<compile_context>
chip_gen: v5e
topology: v5e:2x2
jax: 0.10.0
libtpu: 0.0.40
codegen_flags: <defaults>
</compile_context>

<pallas_src>
import functools

import jax
import jax.numpy as jnp
from jax.experimental import pallas as pl
from jax.experimental.pallas import tpu as pltpu


_VMEM_LIMIT = 32 * 1024 * 1024  # per-call footprint is ~2 MiB; 32 MiB is safe on all gens


def _round_up(x, m):
    return (x + m - 1) // m * m


def _pad_vec(v, n):
    return jnp.pad(v, (0, n - v.shape[0]))


# --------------------------------------------------------------------------
# Pallas kernels (whole layer resident in VMEM, single invocation, no grid)
# --------------------------------------------------------------------------

def _fused_layer_kernel(*refs, count, eps, has_rb, groups):
    """out = relu(BN(a @ w (+ row_bias))); BN batch stats computed in-kernel.

    a: (G, Mp, K) bf16   w: (G, K, N) bf16   row_bias: (G, Mp, N) f32
    gamma/beta: (1, N) f32   out: (G, Mp, N) bf16
    Padded rows are all-zero and are excluded from `count`.
    """
    if has_rb:
        a_ref, w_ref, rb_ref, gam_ref, bet_ref, o_ref = refs
    else:
        a_ref, w_ref, gam_ref, bet_ref, o_ref = refs
        rb_ref = None
    n = o_ref.shape[-1]

    accs = []
    s = jnp.zeros((1, n), jnp.float32)
    ss = jnp.zeros((1, n), jnp.float32)
    for g in range(groups):                       # static unroll (G is 1 or 4)
        acc = jnp.dot(a_ref[g], w_ref[g], preferred_element_type=jnp.float32)
        if rb_ref is not None:
            acc = acc + rb_ref[g]
        accs.append(acc)
        s = s + jnp.sum(acc, axis=0, keepdims=True)
        ss = ss + jnp.sum(acc * acc, axis=0, keepdims=True)

    inv = 1.0 / count
    mean = s * inv
    var = jnp.maximum(ss * inv - mean * mean, 0.0)        # guard fp cancellation
    scale = gam_ref[...] * jax.lax.rsqrt(var + eps)       # (1, N)
    shift = bet_ref[...] - mean * scale                   # (1, N)
    for g in range(groups):
        o_ref[g] = jnp.maximum(accs[g] * scale + shift, 0.0).astype(o_ref.dtype)


def _final_deconv_kernel(a_ref, w_ref, b_ref, o_ref, *, groups):
    """out = a @ w + bias (final layer: no BN, keeps its conv bias)."""
    for g in range(groups):
        acc = jnp.dot(a_ref[g], w_ref[g], preferred_element_type=jnp.float32)
        o_ref[g] = (acc + b_ref[...]).astype(o_ref.dtype)


# --------------------------------------------------------------------------
# Pallas wrappers
# --------------------------------------------------------------------------

def _whole_array_call(kernel, args, out_shape):
    vmem = pl.BlockSpec(memory_space=pltpu.MemorySpace.VMEM)
    return pl.pallas_call(
        kernel,
        out_shape=out_shape,
        in_specs=[vmem] * len(args),
        out_specs=vmem,
        compiler_params=pltpu.CompilerParams(vmem_limit_bytes=_VMEM_LIMIT),
    )(*args)


def fused_conv_bn_relu(cols, w_mat, gamma, beta, row_bias=None, eps=1e-5):
    """cols: (G,M,K) bf16, w_mat: (G,K,N) bf16, gamma/beta: (N,) f32.

    One pallas_call: matmul + BN batch stats + normalize + ReLU, VMEM-resident.
    Returns (G, M, N) bf16.  Padded channels (gamma=beta=0) come out exactly 0.
    """
    G, M, _ = cols.shape
    N = w_mat.shape[2]
    Mp = _round_up(M, 16)                         # bf16 sublane packing
    if Mp != M:
        cols = jnp.pad(cols, ((0, 0), (0, Mp - M), (0, 0)))
        if row_bias is not None:
            row_bias = jnp.pad(row_bias, ((0, 0), (0, Mp - M), (0, 0)))
    args = [cols, w_mat]
    if row_bias is not None:
        args.append(row_bias.astype(jnp.float32))
    args += [gamma.reshape(1, N).astype(jnp.float32),
             beta.reshape(1, N).astype(jnp.float32)]
    kernel = functools.partial(_fused_layer_kernel, count=float(G * M), eps=eps,
                               has_rb=row_bias is not None, groups=G)
    out = _whole_array_call(kernel, args,
                            jax.ShapeDtypeStruct((G, Mp, N), jnp.bfloat16))
    return out[:, :M] if Mp != M else out


def fused_deconv_bias(cols, w_mat, bias):
    """Final transposed conv: (G,M,K) @ (G,K,N) + bias -> (G,M,N) f32."""
    G, M, _ = cols.shape
    N = w_mat.shape[2]
    Mp = _round_up(M, 16)
    if Mp != M:
        cols = jnp.pad(cols, ((0, 0), (0, Mp - M), (0, 0)))
    kernel = functools.partial(_final_deconv_kernel, groups=G)
    out = _whole_array_call(
        kernel, [cols, w_mat, bias.reshape(1, N).astype(jnp.float32)],
        jax.ShapeDtypeStruct((G, Mp, N), jnp.float32))
    return out[:, :M] if Mp != M else out


# --------------------------------------------------------------------------
# Conv / ConvTranspose lowering helpers (cheap XLA glue at these shapes)
# --------------------------------------------------------------------------

def _im2col(x, k, stride, pad, kpad=None):
    """x: (B,H,W,C) -> cols (B*Ho*Wo, kpad or k*k*C); patch order (kh, kw, c)."""
    B, H, W, C = x.shape
    xp = jnp.pad(x, ((0, 0), (pad, pad), (pad, pad), (0, 0)))
    Ho = (H + 2 * pad - k) // stride + 1
    Wo = (W + 2 * pad - k) // stride + 1
    cols = []
    for kh in range(k):
        for kw in range(k):
            cols.append(
                xp[:, kh:kh + stride * Ho:stride, kw:kw + stride * Wo:stride, :])
    K = k * k * C
    if kpad is not None and kpad > K:
        cols.append(jnp.zeros((B, Ho, Wo, kpad - K), x.dtype))
    cols = jnp.concatenate(cols, axis=-1)
    return cols.reshape(B * Ho * Wo, cols.shape[-1]), B, Ho, Wo


def _deconv_subpixel_cols(x):
    """Sub-pixel decomposition of 4x4/s2/p1 ConvTranspose2d.

    x: (B,H,W,C) -> cols (4, B*H*W, 4*C); group g = ey*2+ex (output parity),
    tap order (ty, tx, c).
    """
    B, H, W, C = x.shape
    groups = []
    for ey in range(2):
        for ex in range(2):
            p_t, p_b = (1, 0) if ey == 0 else (0, 1)
            p_l, p_r = (1, 0) if ex == 0 else (0, 1)
            xp = jnp.pad(x, ((0, 0), (p_t, p_b), (p_l, p_r), (0, 0)))
            taps = []
            for ty in range(2):
                for tx in range(2):
                    taps.append(xp[:, ty:ty + H, tx:tx + W, :])
            groups.append(jnp.concatenate(taps, axis=-1).reshape(B * H * W, 4 * C))
    return jnp.stack(groups, axis=0)


def _interleave_subpixel(y, B, H, W):
    """y: (4, B*H*W, C) parity results -> (B, 2H, 2W, C)."""
    C = y.shape[-1]
    y = y.reshape(2, 2, B, H, W, C)                 # (ey, ex, b, m, n, c)
    y = jnp.transpose(y, (2, 3, 0, 4, 1, 5))        # (b, m, ey, n, ex, c)
    return y.reshape(B, 2 * H, 2 * W, C)


def _enc1_embed_bias(e, w_emb_t, H, W, Ho, Wo):
    """Exact conv contribution of the spatially-broadcast time embedding.

    e: (B,E); w_emb_t: (3,3,E,Np).  Handles zero-padding edge taps exactly.
    Returns (B*Ho*Wo, Np) f32.
    """
    contrib = jnp.einsum("be,hwec->bhwc", e, w_emb_t)             # (B,3,3,Np)
    ho = jnp.arange(Ho)[:, None]
    kh = jnp.arange(3)[None, :]
    rmask = ((2 * ho + kh - 1 >= 0) & (2 * ho + kh - 1 < H)).astype(jnp.float32)
    wo = jnp.arange(Wo)[:, None]
    kw = jnp.arange(3)[None, :]
    cmask = ((2 * wo + kw - 1 >= 0) & (2 * wo + kw - 1 < W)).astype(jnp.float32)
    bias = jnp.einsum("bhwc,yh,xw->byxc", contrib, rmask, cmask)  # (B,Ho,Wo,Np)
    return bias.reshape(-1, bias.shape[-1])


# --------------------------------------------------------------------------
# Parameters
# --------------------------------------------------------------------------

def init_params(key, channels, embed_dim):
    keys = jax.random.split(key, 8)

    def kaiming(k, shape, fan_out):
        return jax.random.normal(k, shape, jnp.float32) * jnp.sqrt(2.0 / fan_out)

    def xavier(k, shape):
        fan_out, fan_in = shape
        return (jax.random.normal(k, shape, jnp.float32)
                * jnp.sqrt(2.0 / (fan_in + fan_out)))

    cin1 = channels + embed_dim
    p = {
        "enc1_w": kaiming(keys[0], (64, cin1, 3, 3), 64 * 9),
        "enc1_b": jnp.zeros((64,), jnp.float32),
        "enc2_w": kaiming(keys[1], (128, 64, 3, 3), 128 * 9),
        "enc2_b": jnp.zeros((128,), jnp.float32),
        "enc3_w": kaiming(keys[2], (256, 128, 3, 3), 256 * 9),
        "enc3_b": jnp.zeros((256,), jnp.float32),
        "dec1_w": kaiming(keys[3], (256, 128, 4, 4), 256 * 16),
        "dec1_b": jnp.zeros((128,), jnp.float32),
        "dec2_w": kaiming(keys[4], (128, 64, 4, 4), 128 * 16),
        "dec2_b": jnp.zeros((64,), jnp.float32),
        "dec3_w": kaiming(keys[5], (64, channels, 4, 4), 64 * 16),
        "dec3_b": jnp.zeros((channels,), jnp.float32),
        "lin1_w": xavier(keys[6], (embed_dim, 1)),
        "lin1_b": jnp.zeros((embed_dim,), jnp.float32),
        "lin2_w": xavier(keys[7], (embed_dim, embed_dim)),
        "lin2_b": jnp.zeros((embed_dim,), jnp.float32),
    }
    for name, c in [("bn1", 64), ("bn2", 128), ("bn3", 256),
                    ("bn4", 128), ("bn5", 64)]:
        p[name + "_g"] = jnp.ones((c,), jnp.float32)
        p[name + "_b"] = jnp.zeros((c,), jnp.float32)
    return p


def _conv_w_mat(w, cin_pad=None, kpad=None, npad=None):
    """(Cout,Cin,3,3) -> bf16 (Kp, Np); K order (kh,kw,ci); zero-padded."""
    Cout, Cin, kh, kw = w.shape
    if cin_pad is not None and cin_pad > Cin:
        w = jnp.pad(w, ((0, 0), (0, cin_pad - Cin), (0, 0), (0, 0)))
        Cin = cin_pad
    m = jnp.transpose(w, (2, 3, 1, 0)).reshape(kh * kw * Cin, Cout)
    K = kh * kw * Cin
    if kpad is not None and kpad > K:
        m = jnp.pad(m, ((0, kpad - K), (0, 0)))
    if npad is not None and npad > Cout:
        m = jnp.pad(m, ((0, 0), (0, npad - Cout)))
    return m.astype(jnp.bfloat16)


def _deconv_w_subpixel(w, cin_pad=None, cout_pad=None):
    """(Cin,Cout,4,4) -> bf16 (4, 4*Cin_pad, Cout_pad) sub-pixel weight matrices."""
    Cin, Cout, _, _ = w.shape
    if cin_pad is not None and cin_pad > Cin:
        w = jnp.pad(w, ((0, cin_pad - Cin), (0, 0), (0, 0), (0, 0)))
        Cin = cin_pad
    if cout_pad is not None and cout_pad > Cout:
        w = jnp.pad(w, ((0, 0), (0, cout_pad - Cout), (0, 0), (0, 0)))
        Cout = cout_pad
    KSEL = ((3, 1), (2, 0))  # even-parity outputs use kernel rows 3,1; odd use 2,0
    mats = []
    for ey in range(2):
        for ex in range(2):
            sub = jnp.stack(
                [jnp.stack([w[:, :, KSEL[ey][ty], KSEL[ex][tx]]
                            for tx in range(2)], axis=0)
                 for ty in range(2)], axis=0)          # (ty, tx, Cin, Cout)
            mats.append(sub.reshape(4 * Cin, Cout))
    return jnp.stack(mats, axis=0).astype(jnp.bfloat16)


def prepare_params(p, channels):
    """One-time conversion to matmul layouts / lane-dense padding / bf16."""
    w_img = p["enc1_w"][:, :channels]      # (64, C, 3, 3)
    w_emb = p["enc1_w"][:, channels:]      # (64, E, 3, 3)
    wemb_t = jnp.transpose(w_emb, (2, 3, 1, 0))                   # (3,3,E,64) f32
    wemb_t = jnp.pad(wemb_t, ((0, 0),) * 3 + ((0, 128 - wemb_t.shape[-1]),))
    kpad1 = _round_up(9 * channels, 128)
    np_out = _round_up(channels, 128)

    pp = {
        "enc1_wmat": _conv_w_mat(w_img, kpad=kpad1, npad=128)[None],
        "enc1_wemb_t": wemb_t,
        "enc2_wmat": _conv_w_mat(p["enc2_w"], cin_pad=128)[None],  # (1,1152,128)
        "enc3_wmat": _conv_w_mat(p["enc3_w"])[None],               # (1,1152,256)
        "dec1_wmat": _deconv_w_subpixel(p["dec1_w"]),              # (4,1024,128)
        "dec2_wmat": _deconv_w_subpixel(p["dec2_w"], cout_pad=128),
        "dec3_wmat": _deconv_w_subpixel(p["dec3_w"], cin_pad=128, cout_pad=np_out),
        "dec3_b": _pad_vec(p["dec3_b"], np_out),
        "lin1_w": p["lin1_w"], "lin1_b": p["lin1_b"],
        "lin2_w": p["lin2_w"], "lin2_b": p["lin2_b"],
        "bn1_g": _pad_vec(p["bn1_g"], 128), "bn1_b": _pad_vec(p["bn1_b"], 128),
        "bn2_g": p["bn2_g"], "bn2_b": p["bn2_b"],
        "bn3_g": p["bn3_g"], "bn3_b": p["bn3_b"],
        "bn4_g": p["bn4_g"], "bn4_b": p["bn4_b"],
        "bn5_g": _pad_vec(p["bn5_g"], 128), "bn5_b": _pad_vec(p["bn5_b"], 128),
    }
    return pp
    # conv biases enc1-3 / dec1-2 are dropped: they cancel exactly under
    # training-mode BatchNorm batch statistics; only dec3 keeps its bias.


# --------------------------------------------------------------------------
# Forward pass (matches UNet.forward, training-mode BN)
# --------------------------------------------------------------------------

@jax.jit
def unet_forward(pp, x_nchw, t):
    B, C, H, W = x_nchw.shape
    x = jnp.transpose(x_nchw, (0, 2, 3, 1)).astype(jnp.float32)    # -> NHWC

    # time-embedding MLP: tiny, plain XLA (pallas launch cost would dominate)
    tt = t.astype(jnp.float32).reshape(B, 1)
    e = jax.nn.relu(tt @ pp["lin1_w"].T + pp["lin1_b"])
    e = jax.nn.relu(e @ pp["lin2_w"].T + pp["lin2_b"])             # (B, E)

    # ---- encoder: fused conv + BN-stats + normalize + ReLU, one call each ----
    cols, _, H1, W1 = _im2col(x.astype(jnp.bfloat16), 3, 2, 1,
                              kpad=pp["enc1_wmat"].shape[1])
    rb = _enc1_embed_bias(e, pp["enc1_wemb_t"], H, W, H1, W1)      # (B*H1*W1,128)
    x1 = fused_conv_bn_relu(cols[None], pp["enc1_wmat"],
                            pp["bn1_g"], pp["bn1_b"], row_bias=rb[None])
    x1 = x1.reshape(B, H1, W1, -1)                                 # 128-wide (64 real)

    cols, _, H2, W2 = _im2col(x1, 3, 2, 1)
    x2 = fused_conv_bn_relu(cols[None], pp["enc2_wmat"],
                            pp["bn2_g"], pp["bn2_b"]).reshape(B, H2, W2, -1)

    cols, _, H3, W3 = _im2col(x2, 3, 2, 1)
    x3 = fused_conv_bn_relu(cols[None], pp["enc3_wmat"],
                            pp["bn3_g"], pp["bn3_b"]).reshape(B, H3, W3, -1)
    # TODO(synk): the reference's host-side torch.isnan debug prints are omitted.

    # ---- decoder: sub-pixel transposed convs, fused BN per layer ----
    d = _deconv_subpixel_cols(x3)
    d1 = fused_conv_bn_relu(d, pp["dec1_wmat"], pp["bn4_g"], pp["bn4_b"])
    d1 = _interleave_subpixel(d1, B, H3, W3)                       # (B,2H3,2W3,128)

    d = _deconv_subpixel_cols(d1)
    d2 = fused_conv_bn_relu(d, pp["dec2_wmat"], pp["bn5_g"], pp["bn5_b"])
    d2 = _interleave_subpixel(d2, B, 2 * H3, 2 * W3)               # (B,4H3,4W3,128)

    d = _deconv_subpixel_cols(d2)
    out = fused_deconv_bias(d, pp["dec3_wmat"], pp["dec3_b"])      # (4, M, Np) f32
    out = _interleave_subpixel(out, B, 4 * H3, 4 * W3)[..., :C]    # (B, H, W, C)

    return jnp.transpose(out, (0, 3, 1, 2))                        # -> NCHW


# --------------------------------------------------------------------------
# Pure-JAX f32 reference (lax convs) for a numerical sanity check
# --------------------------------------------------------------------------

def unet_reference(p, x_nchw, t, eps=1e-5):
    B = x_nchw.shape[0]
    tt = t.astype(jnp.float32).reshape(B, 1)
    e = jax.nn.relu(tt @ p["lin1_w"].T + p["lin1_b"])
    e = jax.nn.relu(e @ p["lin2_w"].T + p["lin2_b"])
    emb = jnp.broadcast_to(e[:, :, None, None],
                           (B, e.shape[1], x_nchw.shape[2], x_nchw.shape[3]))
    h = jnp.concatenate([x_nchw.astype(jnp.float32), emb], axis=1)

    def conv(x, w, b):
        y = jax.lax.conv_general_dilated(
            x, w, (2, 2), ((1, 1), (1, 1)),
            dimension_numbers=("NCHW", "OIHW", "NCHW"))
        return y + b[None, :, None, None]

    def deconv(x, w, b):
        w_t = jnp.transpose(w, (1, 0, 2, 3))[:, :, ::-1, ::-1]
        y = jax.lax.conv_general_dilated(
            x, w_t, (1, 1), ((2, 2), (2, 2)), lhs_dilation=(2, 2),
            dimension_numbers=("NCHW", "OIHW", "NCHW"))
        return y + b[None, :, None, None]

    def bn_relu(x, g, b):
        mean = jnp.mean(x, axis=(0, 2, 3), keepdims=True)
        var = jnp.mean((x - mean) ** 2, axis=(0, 2, 3), keepdims=True)
        xn = (x - mean) * jax.lax.rsqrt(var + eps)
        return jax.nn.relu(xn * g[None, :, None, None] + b[None, :, None, None])

    h = bn_relu(conv(h, p["enc1_w"], p["enc1_b"]), p["bn1_g"], p["bn1_b"])
    h = bn_relu(conv(h, p["enc2_w"], p["enc2_b"]), p["bn2_g"], p["bn2_b"])
    h = bn_relu(conv(h, p["enc3_w"], p["enc3_b"]), p["bn3_g"], p["bn3_b"])
    h = bn_relu(deconv(h, p["dec1_w"], p["dec1_b"]), p["bn4_g"], p["bn4_b"])
    h = bn_relu(deconv(h, p["dec2_w"], p["dec2_b"]), p["bn5_g"], p["bn5_b"])
    return deconv(h, p["dec3_w"], p["dec3_b"])


if __name__ == "__main__":
    B, CHANNELS, H, W = 2, 4, 16, 16
    EMBED_DIM = 512  # module default

    root = jax.random.PRNGKey(0)
    k_param, k_x, k_t = jax.random.split(root, 3)

    raw_params = init_params(k_param, CHANNELS, EMBED_DIM)
    params = prepare_params(raw_params, CHANNELS)

    x = jax.random.normal(k_x, (B, CHANNELS, H, W), jnp.float32)
    t = jax.random.randint(k_t, (B,), 0, 1000).astype(jnp.float32)

    out = unet_forward(params, x, t)
    jax.block_until_ready(out)

    assert out.shape == (B, CHANNELS, H, W), out.shape
    assert not bool(jnp.isnan(out).any())

    # numerical sanity check against the pure-JAX f32 reference
    ref = jax.jit(unet_reference)(raw_params, x, t)
    jax.block_until_ready(ref)
    num = jnp.sqrt(jnp.sum((out.astype(jnp.float32) - ref) ** 2))
    den = jnp.sqrt(jnp.sum(ref ** 2)) + 1e-12
    rel = float(num / den)
    assert rel < 0.15, f"mismatch vs f32 reference: rel_err={rel}"

    print("KERNEL_OK")
</pallas_src>

<mosaic_0001>
module attributes {stable_mosaic.version = 11 : i64} {
  func.func @_fused_layer_kernel(%arg0: memref<1x128x128xbf16, #tpu.memory_space<vmem>>, %arg1: memref<1x128x128xbf16, #tpu.memory_space<vmem>>, %arg2: memref<1x128x128xf32, #tpu.memory_space<vmem>>, %arg3: memref<1x128xf32, #tpu.memory_space<vmem>>, %arg4: memref<1x128xf32, #tpu.memory_space<vmem>>, %arg5: memref<1x128x128xbf16, #tpu.memory_space<vmem>>) attributes {dimension_semantics = [], scalar_prefetch = 0 : i64, scratch_operands = 0 : i64, tpu.core_type = #tpu.core_type<tc>} {
    %cst = arith.constant 0.000000e+00 : f32
    %0 = vector.broadcast %cst : f32 to vector<1x128xf32>
    %cst_0 = arith.constant 0.000000e+00 : f32
    %1 = vector.broadcast %cst_0 : f32 to vector<1x128xf32>
    %c0 = arith.constant 0 : index
    %c0_1 = arith.constant 0 : index
    %c0_2 = arith.constant 0 : index
    %2 = vector.load %arg0[%c0, %c0_1, %c0_2] : memref<1x128x128xbf16, #tpu.memory_space<vmem>>, vector<1x128x128xbf16>
    %3 = vector.shape_cast %2 : vector<1x128x128xbf16> to vector<128x128xbf16>
    %c0_3 = arith.constant 0 : index
    %c0_4 = arith.constant 0 : index
    %c0_5 = arith.constant 0 : index
    %4 = vector.load %arg1[%c0_3, %c0_4, %c0_5] : memref<1x128x128xbf16, #tpu.memory_space<vmem>>, vector<1x128x128xbf16>
    %5 = vector.shape_cast %4 : vector<1x128x128xbf16> to vector<128x128xbf16>
    %cst_6 = arith.constant dense<0.000000e+00> : vector<128x128xf32>
    %6 = tpu.matmul %3, %5, %cst_6 {dimension_numbers = #tpu.dot_dimension_numbers<[1], [0], [0], [1], [0, 0, 1, 1], [], []>} : vector<128x128xbf16>, vector<128x128xbf16>, vector<128x128xf32> -> vector<128x128xf32>
    %c0_7 = arith.constant 0 : index
    %c0_8 = arith.constant 0 : index
    %c0_9 = arith.constant 0 : index
    %7 = vector.load %arg2[%c0_7, %c0_8, %c0_9] : memref<1x128x128xf32, #tpu.memory_space<vmem>>, vector<1x128x128xf32>
    %8 = vector.shape_cast %7 : vector<1x128x128xf32> to vector<128x128xf32>
    %9 = arith.addf %6, %8 : vector<128x128xf32>
    %cst_10 = arith.constant dense<0.000000e+00> : vector<128xf32>
    %10 = vector.multi_reduction <add>, %9, %cst_10 [0] : vector<128x128xf32> to vector<128xf32>
    %11 = vector.shape_cast %10 : vector<128xf32> to vector<1x128xf32>
    %12 = arith.addf %0, %11 : vector<1x128xf32>
    %13 = arith.mulf %9, %9 : vector<128x128xf32>
    %cst_11 = arith.constant dense<0.000000e+00> : vector<128xf32>
    %14 = vector.multi_reduction <add>, %13, %cst_11 [0] : vector<128x128xf32> to vector<128xf32>
    %15 = vector.shape_cast %14 : vector<128xf32> to vector<1x128xf32>
    %16 = arith.addf %1, %15 : vector<1x128xf32>
    %cst_12 = arith.constant 7.812500e-03 : f32
    %17 = vector.broadcast %cst_12 : f32 to vector<1x128xf32>
    %18 = arith.mulf %12, %17 : vector<1x128xf32>
    %cst_13 = arith.constant 7.812500e-03 : f32
    %19 = vector.broadcast %cst_13 : f32 to vector<1x128xf32>
    %20 = arith.mulf %16, %19 : vector<1x128xf32>
    %21 = arith.mulf %18, %18 : vector<1x128xf32>
    %22 = arith.subf %20, %21 : vector<1x128xf32>
    %cst_14 = arith.constant 0.000000e+00 : f32
    %23 = vector.broadcast %cst_14 : f32 to vector<1x128xf32>
    %24 = arith.maximumf %22, %23 : vector<1x128xf32>
    %c0_15 = arith.constant 0 : index
    %c0_16 = arith.constant 0 : index
    %25 = vector.load %arg3[%c0_15, %c0_16] : memref<1x128xf32, #tpu.memory_space<vmem>>, vector<1x128xf32>
    %cst_17 = arith.constant 9.99999974E-6 : f32
    %26 = vector.broadcast %cst_17 : f32 to vector<1x128xf32>
    %27 = arith.addf %24, %26 : vector<1x128xf32>
    %28 = math.rsqrt %27 : vector<1x128xf32>
    %29 = arith.mulf %25, %28 : vector<1x128xf32>
    %c0_18 = arith.constant 0 : index
    %c0_19 = arith.constant 0 : index
    %30 = vector.load %arg4[%c0_18, %c0_19] : memref<1x128xf32, #tpu.memory_space<vmem>>, vector<1x128xf32>
    %31 = arith.mulf %18, %29 : vector<1x128xf32>
    %32 = arith.subf %30, %31 : vector<1x128xf32>
    %33 = vector.broadcast %29 : vector<1x128xf32> to vector<128x128xf32>
    %34 = arith.mulf %9, %33 : vector<128x128xf32>
    %35 = vector.broadcast %32 : vector<1x128xf32> to vector<128x128xf32>
    %36 = arith.addf %34, %35 : vector<128x128xf32>
    %cst_20 = arith.constant 0.000000e+00 : f32
    %37 = vector.broadcast %cst_20 : f32 to vector<128x128xf32>
    %38 = arith.maximumf %36, %37 : vector<128x128xf32>
    %39 = arith.truncf %38 : vector<128x128xf32> to vector<128x128xbf16>
    %c0_21 = arith.constant 0 : index
    %c0_22 = arith.constant 0 : index
    %c0_23 = arith.constant 0 : index
    %40 = vector.load %arg5[%c0_21, %c0_22, %c0_23] : memref<1x128x128xbf16, #tpu.memory_space<vmem>>, vector<1x128x128xbf16>
    %41 = vector.shape_cast %40 : vector<1x128x128xbf16> to vector<128x128xbf16>
    %42 = vector.shape_cast %39 : vector<128x128xbf16> to vector<1x128x128xbf16>
    tpu.vector_store %arg5[%c0_21, %c0_22, %c0_23], %42 {strides = array<i32>} : memref<1x128x128xbf16, #tpu.memory_space<vmem>>, vector<1x128x128xbf16>,
    return
  }
}

module attributes {stable_mosaic.version = 11 : i64} {
  func.func @_fused_layer_kernel(%arg0: memref<1x32x1152xbf16, #tpu.memory_space<vmem>>, %arg1: memref<1x1152x128xbf16, #tpu.memory_space<vmem>>, %arg2: memref<1x128xf32, #tpu.memory_space<vmem>>, %arg3: memref<1x128xf32, #tpu.memory_space<vmem>>, %arg4: memref<1x32x128xbf16, #tpu.memory_space<vmem>>) attributes {dimension_semantics = [], scalar_prefetch = 0 : i64, scratch_operands = 0 : i64, tpu.core_type = #tpu.core_type<tc>} {
    %cst = arith.constant 0.000000e+00 : f32
    %0 = vector.broadcast %cst : f32 to vector<1x128xf32>
    %cst_0 = arith.constant 0.000000e+00 : f32
    %1 = vector.broadcast %cst_0 : f32 to vector<1x128xf32>
    %c0 = arith.constant 0 : index
    %c0_1 = arith.constant 0 : index
    %c0_2 = arith.constant 0 : index
    %2 = vector.load %arg0[%c0, %c0_1, %c0_2] : memref<1x32x1152xbf16, #tpu.memory_space<vmem>>, vector<1x32x1152xbf16>
    %3 = vector.shape_cast %2 : vector<1x32x1152xbf16> to vector<32x1152xbf16>
    %c0_3 = arith.constant 0 : index
    %c0_4 = arith.constant 0 : index
    %c0_5 = arith.constant 0 : index
    %4 = vector.load %arg1[%c0_3, %c0_4, %c0_5] : memref<1x1152x128xbf16, #tpu.memory_space<vmem>>, vector<1x1152x128xbf16>
    %5 = vector.shape_cast %4 : vector<1x1152x128xbf16> to vector<1152x128xbf16>
    %cst_6 = arith.constant dense<0.000000e+00> : vector<32x128xf32>
    %6 = tpu.matmul %3, %5, %cst_6 {dimension_numbers = #tpu.dot_dimension_numbers<[1], [0], [0], [1], [0, 0, 1, 1], [], []>} : vector<32x1152xbf16>, vector<1152x128xbf16>, vector<32x128xf32> -> vector<32x128xf32>
    %cst_7 = arith.constant dense<0.000000e+00> : vector<128xf32>
    %7 = vector.multi_reduction <add>, %6, %cst_7 [0] : vector<32x128xf32> to vector<128xf32>
    %8 = vector.shape_cast %7 : vector<128xf32> to vector<1x128xf32>
    %9 = arith.addf %0, %8 : vector<1x128xf32>
    %10 = arith.mulf %6, %6 : vector<32x128xf32>
    %cst_8 = arith.constant dense<0.000000e+00> : vector<128xf32>
    %11 = vector.multi_reduction <add>, %10, %cst_8 [0] : vector<32x128xf32> to vector<128xf32>
    %12 = vector.shape_cast %11 : vector<128xf32> to vector<1x128xf32>
    %13 = arith.addf %1, %12 : vector<1x128xf32>
    %cst_9 = arith.constant 3.125000e-02 : f32
    %14 = vector.broadcast %cst_9 : f32 to vector<1x128xf32>
    %15 = arith.mulf %9, %14 : vector<1x128xf32>
    %cst_10 = arith.constant 3.125000e-02 : f32
    %16 = vector.broadcast %cst_10 : f32 to vector<1x128xf32>
    %17 = arith.mulf %13, %16 : vector<1x128xf32>
    %18 = arith.mulf %15, %15 : vector<1x128xf32>
    %19 = arith.subf %17, %18 : vector<1x128xf32>
    %cst_11 = arith.constant 0.000000e+00 : f32
    %20 = vector.broadcast %cst_11 : f32 to vector<1x128xf32>
    %21 = arith.maximumf %19, %20 : vector<1x128xf32>
    %c0_12 = arith.constant 0 : index
    %c0_13 = arith.constant 0 : index
    %22 = vector.load %arg2[%c0_12, %c0_13] : memref<1x128xf32, #tpu.memory_space<vmem>>, vector<1x128xf32>
    %cst_14 = arith.constant 9.99999974E-6 : f32
    %23 = vector.broadcast %cst_14 : f32 to vector<1x128xf32>
    %24 = arith.addf %21, %23 : vector<1x128xf32>
    %25 = math.rsqrt %24 : vector<1x128xf32>
    %26 = arith.mulf %22, %25 : vector<1x128xf32>
    %c0_15 = arith.constant 0 : index
    %c0_16 = arith.constant 0 : index
    %27 = vector.load %arg3[%c0_15, %c0_16] : memref<1x128xf32, #tpu.memory_space<vmem>>, vector<1x128xf32>
    %28 = arith.mulf %15, %26 : vector<1x128xf32>
    %29 = arith.subf %27, %28 : vector<1x128xf32>
    %30 = vector.broadcast %26 : vector<1x128xf32> to vector<32x128xf32>
    %31 = arith.mulf %6, %30 : vector<32x128xf32>
    %32 = vector.broadcast %29 : vector<1x128xf32> to vector<32x128xf32>
    %33 = arith.addf %31, %32 : vector<32x128xf32>
    %cst_17 = arith.constant 0.000000e+00 : f32
    %34 = vector.broadcast %cst_17 : f32 to vector<32x128xf32>
    %35 = arith.maximumf %33, %34 : vector<32x128xf32>
    %36 = arith.truncf %35 : vector<32x128xf32> to vector<32x128xbf16>
    %c0_18 = arith.constant 0 : index
    %c0_19 = arith.constant 0 : index
    %c0_20 = arith.constant 0 : index
    %37 = vector.load %arg4[%c0_18, %c0_19, %c0_20] : memref<1x32x128xbf16, #tpu.memory_space<vmem>>, vector<1x32x128xbf16>
    %38 = vector.shape_cast %37 : vector<1x32x128xbf16> to vector<32x128xbf16>
    %39 = vector.shape_cast %36 : vector<32x128xbf16> to vector<1x32x128xbf16>
    tpu.vector_store %arg4[%c0_18, %c0_19, %c0_20], %39 {strides = array<i32>} : memref<1x32x128xbf16, #tpu.memory_space<vmem>>, vector<1x32x128xbf16>,
    return
  }
}

module attributes {stable_mosaic.version = 11 : i64} {
  func.func @_fused_layer_kernel(%arg0: memref<1x16x1152xbf16, #tpu.memory_space<vmem>>, %arg1: memref<1x1152x256xbf16, #tpu.memory_space<vmem>>, %arg2: memref<1x256xf32, #tpu.memory_space<vmem>>, %arg3: memref<1x256xf32, #tpu.memory_space<vmem>>, %arg4: memref<1x16x256xbf16, #tpu.memory_space<vmem>>) attributes {dimension_semantics = [], scalar_prefetch = 0 : i64, scratch_operands = 0 : i64, tpu.core_type = #tpu.core_type<tc>} {
    %cst = arith.constant 0.000000e+00 : f32
    %0 = vector.broadcast %cst : f32 to vector<1x256xf32>
    %cst_0 = arith.constant 0.000000e+00 : f32
    %1 = vector.broadcast %cst_0 : f32 to vector<1x256xf32>
    %c0 = arith.constant 0 : index
    %c0_1 = arith.constant 0 : index
    %c0_2 = arith.constant 0 : index
    %2 = vector.load %arg0[%c0, %c0_1, %c0_2] : memref<1x16x1152xbf16, #tpu.memory_space<vmem>>, vector<1x16x1152xbf16>
    %3 = vector.shape_cast %2 : vector<1x16x1152xbf16> to vector<16x1152xbf16>
    %c0_3 = arith.constant 0 : index
    %c0_4 = arith.constant 0 : index
    %c0_5 = arith.constant 0 : index
    %4 = vector.load %arg1[%c0_3, %c0_4, %c0_5] : memref<1x1152x256xbf16, #tpu.memory_space<vmem>>, vector<1x1152x256xbf16>
    %5 = vector.shape_cast %4 : vector<1x1152x256xbf16> to vector<1152x256xbf16>
    %cst_6 = arith.constant dense<0.000000e+00> : vector<16x256xf32>
    %6 = tpu.matmul %3, %5, %cst_6 {dimension_numbers = #tpu.dot_dimension_numbers<[1], [0], [0], [1], [0, 0, 1, 1], [], []>} : vector<16x1152xbf16>, vector<1152x256xbf16>, vector<16x256xf32> -> vector<16x256xf32>
    %cst_7 = arith.constant dense<0.000000e+00> : vector<256xf32>
    %7 = vector.multi_reduction <add>, %6, %cst_7 [0] : vector<16x256xf32> to vector<256xf32>
    %8 = vector.shape_cast %7 : vector<256xf32> to vector<1x256xf32>
    %9 = arith.addf %0, %8 : vector<1x256xf32>
    %10 = arith.mulf %6, %6 : vector<16x256xf32>
    %cst_8 = arith.constant dense<0.000000e+00> : vector<256xf32>
    %11 = vector.multi_reduction <add>, %10, %cst_8 [0] : vector<16x256xf32> to vector<256xf32>
    %12 = vector.shape_cast %11 : vector<256xf32> to vector<1x256xf32>
    %13 = arith.addf %1, %12 : vector<1x256xf32>
    %cst_9 = arith.constant 1.250000e-01 : f32
    %14 = vector.broadcast %cst_9 : f32 to vector<1x256xf32>
    %15 = arith.mulf %9, %14 : vector<1x256xf32>
    %cst_10 = arith.constant 1.250000e-01 : f32
    %16 = vector.broadcast %cst_10 : f32 to vector<1x256xf32>
    %17 = arith.mulf %13, %16 : vector<1x256xf32>
    %18 = arith.mulf %15, %15 : vector<1x256xf32>
    %19 = arith.subf %17, %18 : vector<1x256xf32>
    %cst_11 = arith.constant 0.000000e+00 : f32
    %20 = vector.broadcast %cst_11 : f32 to vector<1x256xf32>
    %21 = arith.maximumf %19, %20 : vector<1x256xf32>
    %c0_12 = arith.constant 0 : index
    %c0_13 = arith.constant 0 : index
    %22 = vector.load %arg2[%c0_12, %c0_13] : memref<1x256xf32, #tpu.memory_space<vmem>>, vector<1x256xf32>
    %cst_14 = arith.constant 9.99999974E-6 : f32
    %23 = vector.broadcast %cst_14 : f32 to vector<1x256xf32>
    %24 = arith.addf %21, %23 : vector<1x256xf32>
    %25 = math.rsqrt %24 : vector<1x256xf32>
    %26 = arith.mulf %22, %25 : vector<1x256xf32>
    %c0_15 = arith.constant 0 : index
    %c0_16 = arith.constant 0 : index
    %27 = vector.load %arg3[%c0_15, %c0_16] : memref<1x256xf32, #tpu.memory_space<vmem>>, vector<1x256xf32>
    %28 = arith.mulf %15, %26 : vector<1x256xf32>
    %29 = arith.subf %27, %28 : vector<1x256xf32>
    %30 = vector.broadcast %26 : vector<1x256xf32> to vector<16x256xf32>
    %31 = arith.mulf %6, %30 : vector<16x256xf32>
    %32 = vector.broadcast %29 : vector<1x256xf32> to vector<16x256xf32>
    %33 = arith.addf %31, %32 : vector<16x256xf32>
    %cst_17 = arith.constant 0.000000e+00 : f32
    %34 = vector.broadcast %cst_17 : f32 to vector<16x256xf32>
    %35 = arith.maximumf %33, %34 : vector<16x256xf32>
    %36 = arith.truncf %35 : vector<16x256xf32> to vector<16x256xbf16>
    %c0_18 = arith.constant 0 : index
    %c0_19 = arith.constant 0 : index
    %c0_20 = arith.constant 0 : index
    %37 = vector.load %arg4[%c0_18, %c0_19, %c0_20] : memref<1x16x256xbf16, #tpu.memory_space<vmem>>, vector<1x16x256xbf16>
    %38 = vector.shape_cast %37 : vector<1x16x256xbf16> to vector<16x256xbf16>
    %39 = vector.shape_cast %36 : vector<16x256xbf16> to vector<1x16x256xbf16>
    tpu.vector_store %arg4[%c0_18, %c0_19, %c0_20], %39 {strides = array<i32>} : memref<1x16x256xbf16, #tpu.memory_space<vmem>>, vector<1x16x256xbf16>,
    return
  }
}

module attributes {stable_mosaic.version = 11 : i64} {
  func.func @_fused_layer_kernel(%arg0: memref<4x16x1024xbf16, #tpu.memory_space<vmem>>, %arg1: memref<4x1024x128xbf16, #tpu.memory_space<vmem>>, %arg2: memref<1x128xf32, #tpu.memory_space<vmem>>, %arg3: memref<1x128xf32, #tpu.memory_space<vmem>>, %arg4: memref<4x16x128xbf16, #tpu.memory_space<vmem>>) attributes {dimension_semantics = [], scalar_prefetch = 0 : i64, scratch_operands = 0 : i64, tpu.core_type = #tpu.core_type<tc>} {
    %cst = arith.constant 0.000000e+00 : f32
    %0 = vector.broadcast %cst : f32 to vector<1x128xf32>
    %cst_0 = arith.constant 0.000000e+00 : f32
    %1 = vector.broadcast %cst_0 : f32 to vector<1x128xf32>
    %c0 = arith.constant 0 : index
    %c0_1 = arith.constant 0 : index
    %c0_2 = arith.constant 0 : index
    %2 = vector.load %arg0[%c0, %c0_1, %c0_2] : memref<4x16x1024xbf16, #tpu.memory_space<vmem>>, vector<1x16x1024xbf16>
    %3 = vector.shape_cast %2 : vector<1x16x1024xbf16> to vector<16x1024xbf16>
    %c0_3 = arith.constant 0 : index
    %c0_4 = arith.constant 0 : index
    %c0_5 = arith.constant 0 : index
    %4 = vector.load %arg1[%c0_3, %c0_4, %c0_5] : memref<4x1024x128xbf16, #tpu.memory_space<vmem>>, vector<1x1024x128xbf16>
    %5 = vector.shape_cast %4 : vector<1x1024x128xbf16> to vector<1024x128xbf16>
    %cst_6 = arith.constant dense<0.000000e+00> : vector<16x128xf32>
    %6 = tpu.matmul %3, %5, %cst_6 {dimension_numbers = #tpu.dot_dimension_numbers<[1], [0], [0], [1], [0, 0, 1, 1], [], []>} : vector<16x1024xbf16>, vector<1024x128xbf16>, vector<16x128xf32> -> vector<16x128xf32>
    %cst_7 = arith.constant dense<0.000000e+00> : vector<128xf32>
    %7 = vector.multi_reduction <add>, %6, %cst_7 [0] : vector<16x128xf32> to vector<128xf32>
    %8 = vector.shape_cast %7 : vector<128xf32> to vector<1x128xf32>
    %9 = arith.addf %0, %8 : vector<1x128xf32>
    %10 = arith.mulf %6, %6 : vector<16x128xf32>
    %cst_8 = arith.constant dense<0.000000e+00> : vector<128xf32>
    %11 = vector.multi_reduction <add>, %10, %cst_8 [0] : vector<16x128xf32> to vector<128xf32>
    %12 = vector.shape_cast %11 : vector<128xf32> to vector<1x128xf32>
    %13 = arith.addf %1, %12 : vector<1x128xf32>
    %c1 = arith.constant 1 : index
    %c0_9 = arith.constant 0 : index
    %c0_10 = arith.constant 0 : index
    %14 = vector.load %arg0[%c1, %c0_9, %c0_10] : memref<4x16x1024xbf16, #tpu.memory_space<vmem>>, vector<1x16x1024xbf16>
    %15 = vector.shape_cast %14 : vector<1x16x1024xbf16> to vector<16x1024xbf16>
    %c1_11 = arith.constant 1 : index
    %c0_12 = arith.constant 0 : index
    %c0_13 = arith.constant 0 : index
    %16 = vector.load %arg1[%c1_11, %c0_12, %c0_13] : memref<4x1024x128xbf16, #tpu.memory_space<vmem>>, vector<1x1024x128xbf16>
    %17 = vector.shape_cast %16 : vector<1x1024x128xbf16> to vector<1024x128xbf16>
    %cst_14 = arith.constant dense<0.000000e+00> : vector<16x128xf32>
    %18 = tpu.matmul %15, %17, %cst_14 {dimension_numbers = #tpu.dot_dimension_numbers<[1], [0], [0], [1], [0, 0, 1, 1], [], []>} : vector<16x1024xbf16>, vector<1024x128xbf16>, vector<16x128xf32> -> vector<16x128xf32>
    %cst_15 = arith.constant dense<0.000000e+00> : vector<128xf32>
    %19 = vector.multi_reduction <add>, %18, %cst_15 [0] : vector<16x128xf32> to vector<128xf32>
    %20 = vector.shape_cast %19 : vector<128xf32> to vector<1x128xf32>
    %21 = arith.addf %9, %20 : vector<1x128xf32>
    %22 = arith.mulf %18, %18 : vector<16x128xf32>
    %cst_16 = arith.constant dense<0.000000e+00> : vector<128xf32>
    %23 = vector.multi_reduction <add>, %22, %cst_16 [0] : vector<16x128xf32> to vector<128xf32>
    %24 = vector.shape_cast %23 : vector<128xf32> to vector<1x128xf32>
    %25 = arith.addf %13, %24 : vector<1x128xf32>
    %c2 = arith.constant 2 : index
    %c0_17 = arith.constant 0 : index
    %c0_18 = arith.constant 0 : index
    %26 = vector.load %arg0[%c2, %c0_17, %c0_18] : memref<4x16x1024xbf16, #tpu.memory_space<vmem>>, vector<1x16x1024xbf16>
    %27 = vector.shape_cast %26 : vector<1x16x1024xbf16> to vector<16x1024xbf16>
    %c2_19 = arith.constant 2 : index
    %c0_20 = arith.constant 0 : index
    %c0_21 = arith.constant 0 : index
    %28 = vector.load %arg1[%c2_19, %c0_20, %c0_21] : memref<4x1024x128xbf16, #tpu.memory_space<vmem>>, vector<1x1024x128xbf16>
    %29 = vector.shape_cast %28 : vector<1x1024x128xbf16> to vector<1024x128xbf16>
    %cst_22 = arith.constant dense<0.000000e+00> : vector<16x128xf32>
    %30 = tpu.matmul %27, %29, %cst_22 {dimension_numbers = #tpu.dot_dimension_numbers<[1], [0], [0], [1], [0, 0, 1, 1], [], []>} : vector<16x1024xbf16>, vector<1024x128xbf16>, vector<16x128xf32> -> vector<16x128xf32>
    %cst_23 = arith.constant dense<0.000000e+00> : vector<128xf32>
    %31 = vector.multi_reduction <add>, %30, %cst_23 [0] : vector<16x128xf32> to vector<128xf32>
    %32 = vector.shape_cast %31 : vector<128xf32> to vector<1x128xf32>
    %33 = arith.addf %21, %32 : vector<1x128xf32>
    %34 = arith.mulf %30, %30 : vector<16x128xf32>
    %cst_24 = arith.constant dense<0.000000e+00> : vector<128xf32>
    %35 = vector.multi_reduction <add>, %34, %cst_24 [0] : vector<16x128xf32> to vector<128xf32>
    %36 = vector.shape_cast %35 : vector<128xf32> to vector<1x128xf32>
    %37 = arith.addf %25, %36 : vector<1x128xf32>
    %c3 = arith.constant 3 : index
    %c0_25 = arith.constant 0 : index
    %c0_26 = arith.constant 0 : index
    %38 = vector.load %arg0[%c3, %c0_25, %c0_26] : memref<4x16x1024xbf16, #tpu.memory_space<vmem>>, vector<1x16x1024xbf16>
    %39 = vector.shape_cast %38 : vector<1x16x1024xbf16> to vector<16x1024xbf16>
    %c3_27 = arith.constant 3 : index
    %c0_28 = arith.constant 0 : index
    %c0_29 = arith.constant 0 : index
    %40 = vector.load %arg1[%c3_27, %c0_28, %c0_29] : memref<4x1024x128xbf16, #tpu.memory_space<vmem>>, vector<1x1024x128xbf16>
    %41 = vector.shape_cast %40 : vector<1x1024x128xbf16> to vector<1024x128xbf16>
    %cst_30 = arith.constant dense<0.000000e+00> : vector<16x128xf32>
    %42 = tpu.matmul %39, %41, %cst_30 {dimension_numbers = #tpu.dot_dimension_numbers<[1], [0], [0], [1], [0, 0, 1, 1], [], []>} : vector<16x1024xbf16>, vector<1024x128xbf16>, vector<16x128xf32> -> vector<16x128xf32>
    %cst_31 = arith.constant dense<0.000000e+00> : vector<128xf32>
    %43 = vector.multi_reduction <add>, %42, %cst_31 [0] : vector<16x128xf32> to vector<128xf32>
    %44 = vector.shape_cast %43 : vector<128xf32> to vector<1x128xf32>
    %45 = arith.addf %33, %44 : vector<1x128xf32>
    %46 = arith.mulf %42, %42 : vector<16x128xf32>
    %cst_32 = arith.constant dense<0.000000e+00> : vector<128xf32>
    %47 = vector.multi_reduction <add>, %46, %cst_32 [0] : vector<16x128xf32> to vector<128xf32>
    %48 = vector.shape_cast %47 : vector<128xf32> to vector<1x128xf32>
    %49 = arith.addf %37, %48 : vector<1x128xf32>
    %cst_33 = arith.constant 3.125000e-02 : f32
    %50 = vector.broadcast %cst_33 : f32 to vector<1x128xf32>
    %51 = arith.mulf %45, %50 : vector<1x128xf32>
    %cst_34 = arith.constant 3.125000e-02 : f32
    %52 = vector.broadcast %cst_34 : f32 to vector<1x128xf32>
    %53 = arith.mulf %49, %52 : vector<1x128xf32>
    %54 = arith.mulf %51, %51 : vector<1x128xf32>
    %55 = arith.subf %53, %54 : vector<1x128xf32>
    %cst_35 = arith.constant 0.000000e+00 : f32
    %56 = vector.broadcast %cst_35 : f32 to vector<1x128xf32>
    %57 = arith.maximumf %55, %56 : vector<1x128xf32>
    %c0_36 = arith.constant 0 : index
    %c0_37 = arith.constant 0 : index
    %58 = vector.load %arg2[%c0_36, %c0_37] : memref<1x128xf32, #tpu.memory_space<vmem>>, vector<1x128xf32>
    %cst_38 = arith.constant 9.99999974E-6 : f32
    %59 = vector.broadcast %cst_38 : f32 to vector<1x128xf32>
    %60 = arith.addf %57, %59 : vector<1x128xf32>
    %61 = math.rsqrt %60 : vector<1x128xf32>
    %62 = arith.mulf %58, %61 : vector<1x128xf32>
    %c0_39 = arith.constant 0 : index
    %c0_40 = arith.constant 0 : index
    %63 = vector.load %arg3[%c0_39, %c0_40] : memref<1x128xf32, #tpu.memory_space<vmem>>, vector<1x128xf32>
    %64 = arith.mulf %51, %62 : vector<1x128xf32>
    %65 = arith.subf %63, %64 : vector<1x128xf32>
    %66 = vector.broadcast %62 : vector<1x128xf32> to vector<16x128xf32>
    %67 = arith.mulf %6, %66 : vector<16x128xf32>
    %68 = vector.broadcast %65 : vector<1x128xf32> to vector<16x128xf32>
    %69 = arith.addf %67, %68 : vector<16x128xf32>
    %cst_41 = arith.constant 0.000000e+00 : f32
    %70 = vector.broadcast %cst_41 : f32 to vector<16x128xf32>
    %71 = arith.maximumf %69, %70 : vector<16x128xf32>
    %72 = arith.truncf %71 : vector<16x128xf32> to vector<16x128xbf16>
    %c0_42 = arith.constant 0 : index
    %c0_43 = arith.constant 0 : index
    %c0_44 = arith.constant 0 : index
    %73 = vector.load %arg4[%c0_42, %c0_43, %c0_44] : memref<4x16x128xbf16, #tpu.memory_space<vmem>>, vector<1x16x128xbf16>
    %74 = vector.shape_cast %73 : vector<1x16x128xbf16> to vector<16x128xbf16>
    %75 = vector.shape_cast %72 : vector<16x128xbf16> to vector<1x16x128xbf16>
    tpu.vector_store %arg4[%c0_42, %c0_43, %c0_44], %75 {strides = array<i32>} : memref<4x16x128xbf16, #tpu.memory_space<vmem>>, vector<1x16x128xbf16>,
    %76 = vector.broadcast %62 : vector<1x128xf32> to vector<16x128xf32>
    %77 = arith.mulf %18, %76 : vector<16x128xf32>
    %78 = vector.broadcast %65 : vector<1x128xf32> to vector<16x128xf32>
    %79 = arith.addf %77, %78 : vector<16x128xf32>
    %cst_45 = arith.constant 0.000000e+00 : f32
    %80 = vector.broadcast %cst_45 : f32 to vector<16x128xf32>
    %81 = arith.maximumf %79, %80 : vector<16x128xf32>
    %82 = arith.truncf %81 : vector<16x128xf32> to vector<16x128xbf16>
    %c1_46 = arith.constant 1 : index
    %c0_47 = arith.constant 0 : index
    %c0_48 = arith.constant 0 : index
    %83 = vector.load %arg4[%c1_46, %c0_47, %c0_48] : memref<4x16x128xbf16, #tpu.memory_space<vmem>>, vector<1x16x128xbf16>
    %84 = vector.shape_cast %83 : vector<1x16x128xbf16> to vector<16x128xbf16>
    %85 = vector.shape_cast %82 : vector<16x128xbf16> to vector<1x16x128xbf16>
    tpu.vector_store %arg4[%c1_46, %c0_47, %c0_48], %85 {strides = array<i32>} : memref<4x16x128xbf16, #tpu.memory_space<vmem>>, vector<1x16x128xbf16>,
    %86 = vector.broadcast %62 : vector<1x128xf32> to vector<16x128xf32>
    %87 = arith.mulf %30, %86 : vector<16x128xf32>
    %88 = vector.broadcast %65 : vector<1x128xf32> to vector<16x128xf32>
    %89 = arith.addf %87, %88 : vector<16x128xf32>
    %cst_49 = arith.constant 0.000000e+00 : f32
    %90 = vector.broadcast %cst_49 : f32 to vector<16x128xf32>
    %91 = arith.maximumf %89, %90 : vector<16x128xf32>
    %92 = arith.truncf %91 : vector<16x128xf32> to vector<16x128xbf16>
    %c2_50 = arith.constant 2 : index
    %c0_51 = arith.constant 0 : index
    %c0_52 = arith.constant 0 : index
    %93 = vector.load %arg4[%c2_50, %c0_51, %c0_52] : memref<4x16x128xbf16, #tpu.memory_space<vmem>>, vector<1x16x128xbf16>
    %94 = vector.shape_cast %93 : vector<1x16x128xbf16> to vector<16x128xbf16>
    %95 = vector.shape_cast %92 : vector<16x128xbf16> to vector<1x16x128xbf16>
    tpu.vector_store %arg4[%c2_50, %c0_51, %c0_52], %95 {strides = array<i32>} : memref<4x16x128xbf16, #tpu.memory_space<vmem>>, vector<1x16x128xbf16>,
    %96 = vector.broadcast %62 : vector<1x128xf32> to vector<16x128xf32>
    %97 = arith.mulf %42, %96 : vector<16x128xf32>
    %98 = vector.broadcast %65 : vector<1x128xf32> to vector<16x128xf32>
    %99 = arith.addf %97, %98 : vector<16x128xf32>
    %cst_53 = arith.constant 0.000000e+00 : f32
    %100 = vector.broadcast %cst_53 : f32 to vector<16x128xf32>
    %101 = arith.maximumf %99, %100 : vector<16x128xf32>
    %102 = arith.truncf %101 : vector<16x128xf32> to vector<16x128xbf16>
    %c3_54 = arith.constant 3 : index
    %c0_55 = arith.constant 0 : index
    %c0_56 = arith.constant 0 : index
    %103 = vector.load %arg4[%c3_54, %c0_55, %c0_56] : memref<4x16x128xbf16, #tpu.memory_space<vmem>>, vector<1x16x128xbf16>
    %104 = vector.shape_cast %103 : vector<1x16x128xbf16> to vector<16x128xbf16>
    %105 = vector.shape_cast %102 : vector<16x128xbf16> to vector<1x16x128xbf16>
    tpu.vector_store %arg4[%c3_54, %c0_55, %c0_56], %105 {strides = array<i32>} : memref<4x16x128xbf16, #tpu.memory_space<vmem>>, vector<1x16x128xbf16>,
    return
  }
}

module attributes {stable_mosaic.version = 11 : i64} {
  func.func @_fused_layer_kernel(%arg0: memref<4x32x512xbf16, #tpu.memory_space<vmem>>, %arg1: memref<4x512x128xbf16, #tpu.memory_space<vmem>>, %arg2: memref<1x128xf32, #tpu.memory_space<vmem>>, %arg3: memref<1x128xf32, #tpu.memory_space<vmem>>, %arg4: memref<4x32x128xbf16, #tpu.memory_space<vmem>>) attributes {dimension_semantics = [], scalar_prefetch = 0 : i64, scratch_operands = 0 : i64, tpu.core_type = #tpu.core_type<tc>} {
    %cst = arith.constant 0.000000e+00 : f32
    %0 = vector.broadcast %cst : f32 to vector<1x128xf32>
    %cst_0 = arith.constant 0.000000e+00 : f32
    %1 = vector.broadcast %cst_0 : f32 to vector<1x128xf32>
    %c0 = arith.constant 0 : index
    %c0_1 = arith.constant 0 : index
    %c0_2 = arith.constant 0 : index
    %2 = vector.load %arg0[%c0, %c0_1, %c0_2] : memref<4x32x512xbf16, #tpu.memory_space<vmem>>, vector<1x32x512xbf16>
    %3 = vector.shape_cast %2 : vector<1x32x512xbf16> to vector<32x512xbf16>
    %c0_3 = arith.constant 0 : index
    %c0_4 = arith.constant 0 : index
    %c0_5 = arith.constant 0 : index
    %4 = vector.load %arg1[%c0_3, %c0_4, %c0_5] : memref<4x512x128xbf16, #tpu.memory_space<vmem>>, vector<1x512x128xbf16>
    %5 = vector.shape_cast %4 : vector<1x512x128xbf16> to vector<512x128xbf16>
    %cst_6 = arith.constant dense<0.000000e+00> : vector<32x128xf32>
    %6 = tpu.matmul %3, %5, %cst_6 {dimension_numbers = #tpu.dot_dimension_numbers<[1], [0], [0], [1], [0, 0, 1, 1], [], []>} : vector<32x512xbf16>, vector<512x128xbf16>, vector<32x128xf32> -> vector<32x128xf32>
    %cst_7 = arith.constant dense<0.000000e+00> : vector<128xf32>
    %7 = vector.multi_reduction <add>, %6, %cst_7 [0] : vector<32x128xf32> to vector<128xf32>
    %8 = vector.shape_cast %7 : vector<128xf32> to vector<1x128xf32>
    %9 = arith.addf %0, %8 : vector<1x128xf32>
    %10 = arith.mulf %6, %6 : vector<32x128xf32>
    %cst_8 = arith.constant dense<0.000000e+00> : vector<128xf32>
    %11 = vector.multi_reduction <add>, %10, %cst_8 [0] : vector<32x128xf32> to vector<128xf32>
    %12 = vector.shape_cast %11 : vector<128xf32> to vector<1x128xf32>
    %13 = arith.addf %1, %12 : vector<1x128xf32>
    %c1 = arith.constant 1 : index
    %c0_9 = arith.constant 0 : index
    %c0_10 = arith.constant 0 : index
    %14 = vector.load %arg0[%c1, %c0_9, %c0_10] : memref<4x32x512xbf16, #tpu.memory_space<vmem>>, vector<1x32x512xbf16>
    %15 = vector.shape_cast %14 : vector<1x32x512xbf16> to vector<32x512xbf16>
    %c1_11 = arith.constant 1 : index
    %c0_12 = arith.constant 0 : index
    %c0_13 = arith.constant 0 : index
    %16 = vector.load %arg1[%c1_11, %c0_12, %c0_13] : memref<4x512x128xbf16, #tpu.memory_space<vmem>>, vector<1x512x128xbf16>
    %17 = vector.shape_cast %16 : vector<1x512x128xbf16> to vector<512x128xbf16>
    %cst_14 = arith.constant dense<0.000000e+00> : vector<32x128xf32>
    %18 = tpu.matmul %15, %17, %cst_14 {dimension_numbers = #tpu.dot_dimension_numbers<[1], [0], [0], [1], [0, 0, 1, 1], [], []>} : vector<32x512xbf16>, vector<512x128xbf16>, vector<32x128xf32> -> vector<32x128xf32>
    %cst_15 = arith.constant dense<0.000000e+00> : vector<128xf32>
    %19 = vector.multi_reduction <add>, %18, %cst_15 [0] : vector<32x128xf32> to vector<128xf32>
    %20 = vector.shape_cast %19 : vector<128xf32> to vector<1x128xf32>
    %21 = arith.addf %9, %20 : vector<1x128xf32>
    %22 = arith.mulf %18, %18 : vector<32x128xf32>
    %cst_16 = arith.constant dense<0.000000e+00> : vector<128xf32>
    %23 = vector.multi_reduction <add>, %22, %cst_16 [0] : vector<32x128xf32> to vector<128xf32>
    %24 = vector.shape_cast %23 : vector<128xf32> to vector<1x128xf32>
    %25 = arith.addf %13, %24 : vector<1x128xf32>
    %c2 = arith.constant 2 : index
    %c0_17 = arith.constant 0 : index
    %c0_18 = arith.constant 0 : index
    %26 = vector.load %arg0[%c2, %c0_17, %c0_18] : memref<4x32x512xbf16, #tpu.memory_space<vmem>>, vector<1x32x512xbf16>
    %27 = vector.shape_cast %26 : vector<1x32x512xbf16> to vector<32x512xbf16>
    %c2_19 = arith.constant 2 : index
    %c0_20 = arith.constant 0 : index
    %c0_21 = arith.constant 0 : index
    %28 = vector.load %arg1[%c2_19, %c0_20, %c0_21] : memref<4x512x128xbf16, #tpu.memory_space<vmem>>, vector<1x512x128xbf16>
    %29 = vector.shape_cast %28 : vector<1x512x128xbf16> to vector<512x128xbf16>
    %cst_22 = arith.constant dense<0.000000e+00> : vector<32x128xf32>
    %30 = tpu.matmul %27, %29, %cst_22 {dimension_numbers = #tpu.dot_dimension_numbers<[1], [0], [0], [1], [0, 0, 1, 1], [], []>} : vector<32x512xbf16>, vector<512x128xbf16>, vector<32x128xf32> -> vector<32x128xf32>
    %cst_23 = arith.constant dense<0.000000e+00> : vector<128xf32>
    %31 = vector.multi_reduction <add>, %30, %cst_23 [0] : vector<32x128xf32> to vector<128xf32>
    %32 = vector.shape_cast %31 : vector<128xf32> to vector<1x128xf32>
    %33 = arith.addf %21, %32 : vector<1x128xf32>
    %34 = arith.mulf %30, %30 : vector<32x128xf32>
    %cst_24 = arith.constant dense<0.000000e+00> : vector<128xf32>
    %35 = vector.multi_reduction <add>, %34, %cst_24 [0] : vector<32x128xf32> to vector<128xf32>
    %36 = vector.shape_cast %35 : vector<128xf32> to vector<1x128xf32>
    %37 = arith.addf %25, %36 : vector<1x128xf32>
    %c3 = arith.constant 3 : index
    %c0_25 = arith.constant 0 : index
    %c0_26 = arith.constant 0 : index
    %38 = vector.load %arg0[%c3, %c0_25, %c0_26] : memref<4x32x512xbf16, #tpu.memory_space<vmem>>, vector<1x32x512xbf16>
    %39 = vector.shape_cast %38 : vector<1x32x512xbf16> to vector<32x512xbf16>
    %c3_27 = arith.constant 3 : index
    %c0_28 = arith.constant 0 : index
    %c0_29 = arith.constant 0 : index
    %40 = vector.load %arg1[%c3_27, %c0_28, %c0_29] : memref<4x512x128xbf16, #tpu.memory_space<vmem>>, vector<1x512x128xbf16>
    %41 = vector.shape_cast %40 : vector<1x512x128xbf16> to vector<512x128xbf16>
    %cst_30 = arith.constant dense<0.000000e+00> : vector<32x128xf32>
    %42 = tpu.matmul %39, %41, %cst_30 {dimension_numbers = #tpu.dot_dimension_numbers<[1], [0], [0], [1], [0, 0, 1, 1], [], []>} : vector<32x512xbf16>, vector<512x128xbf16>, vector<32x128xf32> -> vector<32x128xf32>
    %cst_31 = arith.constant dense<0.000000e+00> : vector<128xf32>
    %43 = vector.multi_reduction <add>, %42, %cst_31 [0] : vector<32x128xf32> to vector<128xf32>
    %44 = vector.shape_cast %43 : vector<128xf32> to vector<1x128xf32>
    %45 = arith.addf %33, %44 : vector<1x128xf32>
    %46 = arith.mulf %42, %42 : vector<32x128xf32>
    %cst_32 = arith.constant dense<0.000000e+00> : vector<128xf32>
    %47 = vector.multi_reduction <add>, %46, %cst_32 [0] : vector<32x128xf32> to vector<128xf32>
    %48 = vector.shape_cast %47 : vector<128xf32> to vector<1x128xf32>
    %49 = arith.addf %37, %48 : vector<1x128xf32>
    %cst_33 = arith.constant 7.812500e-03 : f32
    %50 = vector.broadcast %cst_33 : f32 to vector<1x128xf32>
    %51 = arith.mulf %45, %50 : vector<1x128xf32>
    %cst_34 = arith.constant 7.812500e-03 : f32
    %52 = vector.broadcast %cst_34 : f32 to vector<1x128xf32>
    %53 = arith.mulf %49, %52 : vector<1x128xf32>
    %54 = arith.mulf %51, %51 : vector<1x128xf32>
    %55 = arith.subf %53, %54 : vector<1x128xf32>
    %cst_35 = arith.constant 0.000000e+00 : f32
    %56 = vector.broadcast %cst_35 : f32 to vector<1x128xf32>
    %57 = arith.maximumf %55, %56 : vector<1x128xf32>
    %c0_36 = arith.constant 0 : index
    %c0_37 = arith.constant 0 : index
    %58 = vector.load %arg2[%c0_36, %c0_37] : memref<1x128xf32, #tpu.memory_space<vmem>>, vector<1x128xf32>
    %cst_38 = arith.constant 9.99999974E-6 : f32
    %59 = vector.broadcast %cst_38 : f32 to vector<1x128xf32>
    %60 = arith.addf %57, %59 : vector<1x128xf32>
    %61 = math.rsqrt %60 : vector<1x128xf32>
    %62 = arith.mulf %58, %61 : vector<1x128xf32>
    %c0_39 = arith.constant 0 : index
    %c0_40 = arith.constant 0 : index
    %63 = vector.load %arg3[%c0_39, %c0_40] : memref<1x128xf32, #tpu.memory_space<vmem>>, vector<1x128xf32>
    %64 = arith.mulf %51, %62 : vector<1x128xf32>
    %65 = arith.subf %63, %64 : vector<1x128xf32>
    %66 = vector.broadcast %62 : vector<1x128xf32> to vector<32x128xf32>
    %67 = arith.mulf %6, %66 : vector<32x128xf32>
    %68 = vector.broadcast %65 : vector<1x128xf32> to vector<32x128xf32>
    %69 = arith.addf %67, %68 : vector<32x128xf32>
    %cst_41 = arith.constant 0.000000e+00 : f32
    %70 = vector.broadcast %cst_41 : f32 to vector<32x128xf32>
    %71 = arith.maximumf %69, %70 : vector<32x128xf32>
    %72 = arith.truncf %71 : vector<32x128xf32> to vector<32x128xbf16>
    %c0_42 = arith.constant 0 : index
    %c0_43 = arith.constant 0 : index
    %c0_44 = arith.constant 0 : index
    %73 = vector.load %arg4[%c0_42, %c0_43, %c0_44] : memref<4x32x128xbf16, #tpu.memory_space<vmem>>, vector<1x32x128xbf16>
    %74 = vector.shape_cast %73 : vector<1x32x128xbf16> to vector<32x128xbf16>
    %75 = vector.shape_cast %72 : vector<32x128xbf16> to vector<1x32x128xbf16>
    tpu.vector_store %arg4[%c0_42, %c0_43, %c0_44], %75 {strides = array<i32>} : memref<4x32x128xbf16, #tpu.memory_space<vmem>>, vector<1x32x128xbf16>,
    %76 = vector.broadcast %62 : vector<1x128xf32> to vector<32x128xf32>
    %77 = arith.mulf %18, %76 : vector<32x128xf32>
    %78 = vector.broadcast %65 : vector<1x128xf32> to vector<32x128xf32>
    %79 = arith.addf %77, %78 : vector<32x128xf32>
    %cst_45 = arith.constant 0.000000e+00 : f32
    %80 = vector.broadcast %cst_45 : f32 to vector<32x128xf32>
    %81 = arith.maximumf %79, %80 : vector<32x128xf32>
    %82 = arith.truncf %81 : vector<32x128xf32> to vector<32x128xbf16>
    %c1_46 = arith.constant 1 : index
    %c0_47 = arith.constant 0 : index
    %c0_48 = arith.constant 0 : index
    %83 = vector.load %arg4[%c1_46, %c0_47, %c0_48] : memref<4x32x128xbf16, #tpu.memory_space<vmem>>, vector<1x32x128xbf16>
    %84 = vector.shape_cast %83 : vector<1x32x128xbf16> to vector<32x128xbf16>
    %85 = vector.shape_cast %82 : vector<32x128xbf16> to vector<1x32x128xbf16>
    tpu.vector_store %arg4[%c1_46, %c0_47, %c0_48], %85 {strides = array<i32>} : memref<4x32x128xbf16, #tpu.memory_space<vmem>>, vector<1x32x128xbf16>,
    %86 = vector.broadcast %62 : vector<1x128xf32> to vector<32x128xf32>
    %87 = arith.mulf %30, %86 : vector<32x128xf32>
    %88 = vector.broadcast %65 : vector<1x128xf32> to vector<32x128xf32>
    %89 = arith.addf %87, %88 : vector<32x128xf32>
    %cst_49 = arith.constant 0.000000e+00 : f32
    %90 = vector.broadcast %cst_49 : f32 to vector<32x128xf32>
    %91 = arith.maximumf %89, %90 : vector<32x128xf32>
    %92 = arith.truncf %91 : vector<32x128xf32> to vector<32x128xbf16>
    %c2_50 = arith.constant 2 : index
    %c0_51 = arith.constant 0 : index
    %c0_52 = arith.constant 0 : index
    %93 = vector.load %arg4[%c2_50, %c0_51, %c0_52] : memref<4x32x128xbf16, #tpu.memory_space<vmem>>, vector<1x32x128xbf16>
    %94 = vector.shape_cast %93 : vector<1x32x128xbf16> to vector<32x128xbf16>
    %95 = vector.shape_cast %92 : vector<32x128xbf16> to vector<1x32x128xbf16>
    tpu.vector_store %arg4[%c2_50, %c0_51, %c0_52], %95 {strides = array<i32>} : memref<4x32x128xbf16, #tpu.memory_space<vmem>>, vector<1x32x128xbf16>,
    %96 = vector.broadcast %62 : vector<1x128xf32> to vector<32x128xf32>
    %97 = arith.mulf %42, %96 : vector<32x128xf32>
    %98 = vector.broadcast %65 : vector<1x128xf32> to vector<32x128xf32>
    %99 = arith.addf %97, %98 : vector<32x128xf32>
    %cst_53 = arith.constant 0.000000e+00 : f32
    %100 = vector.broadcast %cst_53 : f32 to vector<32x128xf32>
    %101 = arith.maximumf %99, %100 : vector<32x128xf32>
    %102 = arith.truncf %101 : vector<32x128xf32> to vector<32x128xbf16>
    %c3_54 = arith.constant 3 : index
    %c0_55 = arith.constant 0 : index
    %c0_56 = arith.constant 0 : index
    %103 = vector.load %arg4[%c3_54, %c0_55, %c0_56] : memref<4x32x128xbf16, #tpu.memory_space<vmem>>, vector<1x32x128xbf16>
    %104 = vector.shape_cast %103 : vector<1x32x128xbf16> to vector<32x128xbf16>
    %105 = vector.shape_cast %102 : vector<32x128xbf16> to vector<1x32x128xbf16>
    tpu.vector_store %arg4[%c3_54, %c0_55, %c0_56], %105 {strides = array<i32>} : memref<4x32x128xbf16, #tpu.memory_space<vmem>>, vector<1x32x128xbf16>,
    return
  }
}

module attributes {stable_mosaic.version = 11 : i64} {
  func.func @_final_deconv_kernel(%arg0: memref<4x128x512xbf16, #tpu.memory_space<vmem>>, %arg1: memref<4x512x128xbf16, #tpu.memory_space<vmem>>, %arg2: memref<1x128xf32, #tpu.memory_space<vmem>>, %arg3: memref<4x128x128xf32, #tpu.memory_space<vmem>>) attributes {dimension_semantics = [], scalar_prefetch = 0 : i64, scratch_operands = 0 : i64, tpu.core_type = #tpu.core_type<tc>} {
    %c0 = arith.constant 0 : index
    %c0_0 = arith.constant 0 : index
    %c0_1 = arith.constant 0 : index
    %0 = vector.load %arg0[%c0, %c0_0, %c0_1] : memref<4x128x512xbf16, #tpu.memory_space<vmem>>, vector<1x128x512xbf16>
    %1 = vector.shape_cast %0 : vector<1x128x512xbf16> to vector<128x512xbf16>
    %c0_2 = arith.constant 0 : index
    %c0_3 = arith.constant 0 : index
    %c0_4 = arith.constant 0 : index
    %2 = vector.load %arg1[%c0_2, %c0_3, %c0_4] : memref<4x512x128xbf16, #tpu.memory_space<vmem>>, vector<1x512x128xbf16>
    %3 = vector.shape_cast %2 : vector<1x512x128xbf16> to vector<512x128xbf16>
    %cst = arith.constant dense<0.000000e+00> : vector<128x128xf32>
    %4 = tpu.matmul %1, %3, %cst {dimension_numbers = #tpu.dot_dimension_numbers<[1], [0], [0], [1], [0, 0, 1, 1], [], []>} : vector<128x512xbf16>, vector<512x128xbf16>, vector<128x128xf32> -> vector<128x128xf32>
    %c0_5 = arith.constant 0 : index
    %c0_6 = arith.constant 0 : index
    %5 = vector.load %arg2[%c0_5, %c0_6] : memref<1x128xf32, #tpu.memory_space<vmem>>, vector<1x128xf32>
    %6 = vector.broadcast %5 : vector<1x128xf32> to vector<128x128xf32>
    %7 = arith.addf %4, %6 : vector<128x128xf32>
    %c0_7 = arith.constant 0 : index
    %c0_8 = arith.constant 0 : index
    %c0_9 = arith.constant 0 : index
    %8 = vector.load %arg3[%c0_7, %c0_8, %c0_9] : memref<4x128x128xf32, #tpu.memory_space<vmem>>, vector<1x128x128xf32>
    %9 = vector.shape_cast %8 : vector<1x128x128xf32> to vector<128x128xf32>
    %10 = vector.shape_cast %7 : vector<128x128xf32> to vector<1x128x128xf32>
    tpu.vector_store %arg3[%c0_7, %c0_8, %c0_9], %10 {strides = array<i32>} : memref<4x128x128xf32, #tpu.memory_space<vmem>>, vector<1x128x128xf32>,
    %c1 = arith.constant 1 : index
    %c0_10 = arith.constant 0 : index
    %c0_11 = arith.constant 0 : index
    %11 = vector.load %arg0[%c1, %c0_10, %c0_11] : memref<4x128x512xbf16, #tpu.memory_space<vmem>>, vector<1x128x512xbf16>
    %12 = vector.shape_cast %11 : vector<1x128x512xbf16> to vector<128x512xbf16>
    %c1_12 = arith.constant 1 : index
    %c0_13 = arith.constant 0 : index
    %c0_14 = arith.constant 0 : index
    %13 = vector.load %arg1[%c1_12, %c0_13, %c0_14] : memref<4x512x128xbf16, #tpu.memory_space<vmem>>, vector<1x512x128xbf16>
    %14 = vector.shape_cast %13 : vector<1x512x128xbf16> to vector<512x128xbf16>
    %cst_15 = arith.constant dense<0.000000e+00> : vector<128x128xf32>
    %15 = tpu.matmul %12, %14, %cst_15 {dimension_numbers = #tpu.dot_dimension_numbers<[1], [0], [0], [1], [0, 0, 1, 1], [], []>} : vector<128x512xbf16>, vector<512x128xbf16>, vector<128x128xf32> -> vector<128x128xf32>
    %c0_16 = arith.constant 0 : index
    %c0_17 = arith.constant 0 : index
    %16 = vector.load %arg2[%c0_16, %c0_17] : memref<1x128xf32, #tpu.memory_space<vmem>>, vector<1x128xf32>
    %17 = vector.broadcast %16 : vector<1x128xf32> to vector<128x128xf32>
    %18 = arith.addf %15, %17 : vector<128x128xf32>
    %c1_18 = arith.constant 1 : index
    %c0_19 = arith.constant 0 : index
    %c0_20 = arith.constant 0 : index
    %19 = vector.load %arg3[%c1_18, %c0_19, %c0_20] : memref<4x128x128xf32, #tpu.memory_space<vmem>>, vector<1x128x128xf32>
    %20 = vector.shape_cast %19 : vector<1x128x128xf32> to vector<128x128xf32>
    %21 = vector.shape_cast %18 : vector<128x128xf32> to vector<1x128x128xf32>
    tpu.vector_store %arg3[%c1_18, %c0_19, %c0_20], %21 {strides = array<i32>} : memref<4x128x128xf32, #tpu.memory_space<vmem>>, vector<1x128x128xf32>,
    %c2 = arith.constant 2 : index
    %c0_21 = arith.constant 0 : index
    %c0_22 = arith.constant 0 : index
    %22 = vector.load %arg0[%c2, %c0_21, %c0_22] : memref<4x128x512xbf16, #tpu.memory_space<vmem>>, vector<1x128x512xbf16>
    %23 = vector.shape_cast %22 : vector<1x128x512xbf16> to vector<128x512xbf16>
    %c2_23 = arith.constant 2 : index
    %c0_24 = arith.constant 0 : index
    %c0_25 = arith.constant 0 : index
    %24 = vector.load %arg1[%c2_23, %c0_24, %c0_25] : memref<4x512x128xbf16, #tpu.memory_space<vmem>>, vector<1x512x128xbf16>
    %25 = vector.shape_cast %24 : vector<1x512x128xbf16> to vector<512x128xbf16>
    %cst_26 = arith.constant dense<0.000000e+00> : vector<128x128xf32>
    %26 = tpu.matmul %23, %25, %cst_26 {dimension_numbers = #tpu.dot_dimension_numbers<[1], [0], [0], [1], [0, 0, 1, 1], [], []>} : vector<128x512xbf16>, vector<512x128xbf16>, vector<128x128xf32> -> vector<128x128xf32>
    %c0_27 = arith.constant 0 : index
    %c0_28 = arith.constant 0 : index
    %27 = vector.load %arg2[%c0_27, %c0_28] : memref<1x128xf32, #tpu.memory_space<vmem>>, vector<1x128xf32>
    %28 = vector.broadcast %27 : vector<1x128xf32> to vector<128x128xf32>
    %29 = arith.addf %26, %28 : vector<128x128xf32>
    %c2_29 = arith.constant 2 : index
    %c0_30 = arith.constant 0 : index
    %c0_31 = arith.constant 0 : index
    %30 = vector.load %arg3[%c2_29, %c0_30, %c0_31] : memref<4x128x128xf32, #tpu.memory_space<vmem>>, vector<1x128x128xf32>
    %31 = vector.shape_cast %30 : vector<1x128x128xf32> to vector<128x128xf32>
    %32 = vector.shape_cast %29 : vector<128x128xf32> to vector<1x128x128xf32>
    tpu.vector_store %arg3[%c2_29, %c0_30, %c0_31], %32 {strides = array<i32>} : memref<4x128x128xf32, #tpu.memory_space<vmem>>, vector<1x128x128xf32>,
    %c3 = arith.constant 3 : index
    %c0_32 = arith.constant 0 : index
    %c0_33 = arith.constant 0 : index
    %33 = vector.load %arg0[%c3, %c0_32, %c0_33] : memref<4x128x512xbf16, #tpu.memory_space<vmem>>, vector<1x128x512xbf16>
    %34 = vector.shape_cast %33 : vector<1x128x512xbf16> to vector<128x512xbf16>
    %c3_34 = arith.constant 3 : index
    %c0_35 = arith.constant 0 : index
    %c0_36 = arith.constant 0 : index
    %35 = vector.load %arg1[%c3_34, %c0_35, %c0_36] : memref<4x512x128xbf16, #tpu.memory_space<vmem>>, vector<1x512x128xbf16>
    %36 = vector.shape_cast %35 : vector<1x512x128xbf16> to vector<512x128xbf16>
    %cst_37 = arith.constant dense<0.000000e+00> : vector<128x128xf32>
    %37 = tpu.matmul %34, %36, %cst_37 {dimension_numbers = #tpu.dot_dimension_numbers<[1], [0], [0], [1], [0, 0, 1, 1], [], []>} : vector<128x512xbf16>, vector<512x128xbf16>, vector<128x128xf32> -> vector<128x128xf32>
    %c0_38 = arith.constant 0 : index
    %c0_39 = arith.constant 0 : index
    %38 = vector.load %arg2[%c0_38, %c0_39] : memref<1x128xf32, #tpu.memory_space<vmem>>, vector<1x128xf32>
    %39 = vector.broadcast %38 : vector<1x128xf32> to vector<128x128xf32>
    %40 = arith.addf %37, %39 : vector<128x128xf32>
    %c3_40 = arith.constant 3 : index
    %c0_41 = arith.constant 0 : index
    %c0_42 = arith.constant 0 : index
    %41 = vector.load %arg3[%c3_40, %c0_41, %c0_42] : memref<4x128x128xf32, #tpu.memory_space<vmem>>, vector<1x128x128xf32>
    %42 = vector.shape_cast %41 : vector<1x128x128xf32> to vector<128x128xf32>
    %43 = vector.shape_cast %40 : vector<128x128xf32> to vector<1x128x128xf32>
    tpu.vector_store %arg3[%c3_40, %c0_41, %c0_42], %43 {strides = array<i32>} : memref<4x128x128xf32, #tpu.memory_space<vmem>>, vector<1x128x128xf32>,
    return
  }
}

</mosaic_0001>

<bundles_post_ra>
// kernel: unet_forward.6
= control target key start
LH: loop header
LB: loop body
LE: loop exit
PB: predicated region body
PF: predicated region fallthrough
CT: control target
= control target key end

     0   :  { %s783_s1 = inlined_call_operand.vmem [shape: bf16[1,128,128], index: 1, kind: input, shape index: {}]   ;;  %s784_s0 = inlined_call_operand.vmem [shape: bf16[1,128,128], index: 0, kind: input, shape index: {}]   ;;  %s785_s2 = inlined_call_operand.vmem [shape: f32[1,128,128], index: 2, kind: input, shape index: {}]   ;;  %s786_s3 = inlined_call_operand.vmem [shape: f32[1,128], index: 3, kind: input, shape index: {}]   ;;  %s787_s4 = inlined_call_operand.vmem [shape: f32[1,128], index: 4, kind: input, shape index: {}]   ;;  %s788_s5 = inlined_call_operand.vmem [shape: bf16[1,128,128], index: 5, kind: output, shape index: {}]  }
   0x1   :  { %v463_v0 = vld [vmem:[%s783_s1 + $0x38] sm:$0xff]  ;;  %v462_v1 = vld [vmem:[%s783_s1 + $0x30] sm:$0xff]  ;;  %v461_v2 = vld [vmem:[%s783_s1 + $0x28] sm:$0xff] }
   0x2   :  { %164 = vmatpush.bf16.msra.mxu0 %v463_v0  ;;  %511 = vmatpush.bf16.msra.mxu1 %v463_v0  ;;  %v460_v3 = vld [vmem:[%s783_s1 + $0x20] sm:$0xff]  ;;  %v459_v4 = vld [vmem:[%s783_s1 + $0x18] sm:$0xff]  ;;  %v458_v5 = vld [vmem:[%s783_s1 + $0x10] sm:$0xff] }
   0x3   :  { %512 = vmatpush.bf16.msra.mxu2 %v463_v0  ;;  %513 = vmatpush.bf16.msra.mxu3 %v463_v0  ;;  %v457_v6 = vld [vmem:[%s783_s1 + $0x8] sm:$0xff]  ;;  %v456_v7 = vld [vmem:[%s783_s1] sm:$0xff]  ;;  %v450_v9 = vld [vmem:[%s784_s0 + $0x10] sm:$0xff] }
   0x4   :  { %v448_v8 = vld [vmem:[%s784_s0] sm:$0xff]  ;;  %v454_v11 = vld [vmem:[%s784_s0 + $0x30] sm:$0xff]  ;;  %v449_v12 = vld [vmem:[%s784_s0 + $0x8] sm:$0xff] }
   0x5   :  { %v452_v10 = vld [vmem:[%s784_s0 + $0x20] sm:$0xff]  ;;  %v451_v13 = vld [vmem:[%s784_s0 + $0x18] sm:$0xff]  ;;  %v453_v14 = vld [vmem:[%s784_s0 + $0x28] sm:$0xff] }
   0x6   :  { %165 = vmatpush.bf16.msra.mxu0 %v462_v1  ;;  %514 = vmatpush.bf16.msra.mxu1 %v462_v1  ;;  %v455_v15 = vld [vmem:[%s784_s0 + $0x38] sm:$0xff]  ;;  %v53_v21 = vld [vmem:[%s785_s2 + $0x8] sm:$0xff]  ;;  %v52_v23 = vld [vmem:[%s785_s2] sm:$0xff] }
   0x7   :  { %515 = vmatpush.bf16.msra.mxu2 %v462_v1  ;;  %516 = vmatpush.bf16.msra.mxu3 %v462_v1  ;;  %v54_v24 = vld [vmem:[%s785_s2 + $0x10] sm:$0xff]  ;;  %v56_v32 = vld [vmem:[%s785_s2 + $0x20] sm:$0xff]  ;;  %v55_v33 = vld [vmem:[%s785_s2 + $0x18] sm:$0xff] }
   0x8   :  { %v57_v37 = vld [vmem:[%s785_s2 + $0x28] sm:$0xff]  ;;  %v58_v44 = vld [vmem:[%s785_s2 + $0x30] sm:$0xff]  ;;  %v59_v50 = vld [vmem:[%s785_s2 + $0x38] sm:$0xff] }
   0x9   :  { %v60_v56 = vld [vmem:[%s785_s2 + $0x40] sm:$0xff]  ;;  %v61_v61 = vld [vmem:[%s785_s2 + $0x48] sm:$0xff] }
   0xa   :  { %166 = vmatpush.bf16.msra.mxu0 %v461_v2  ;;  %517 = vmatpush.bf16.msra.mxu1 %v461_v2 }
   0xb   :  { %518 = vmatpush.bf16.msra.mxu2 %v461_v2  ;;  %519 = vmatpush.bf16.msra.mxu3 %v461_v2  ;;  %v62_v2 = vld [vmem:[%s785_s2 + $0x50] sm:$0xff] }
   0xe   :  { %167 = vmatpush.bf16.msra.mxu0 %v460_v3  ;;  %520 = vmatpush.bf16.msra.mxu1 %v460_v3 }
   0xf   :  { %521 = vmatpush.bf16.msra.mxu2 %v460_v3  ;;  %522 = vmatpush.bf16.msra.mxu3 %v460_v3 }
  0x12   :  { %168 = vmatpush.bf16.msra.mxu0 %v459_v4  ;;  %523 = vmatpush.bf16.msra.mxu1 %v459_v4 }
  0x13   :  { %524 = vmatpush.bf16.msra.mxu2 %v459_v4  ;;  %525 = vmatpush.bf16.msra.mxu3 %v459_v4 }
  0x16   :  { %169 = vmatpush.bf16.msra.mxu0 %v458_v5  ;;  %526 = vmatpush.bf16.msra.mxu1 %v458_v5 }
  0x17   :  { %527 = vmatpush.bf16.msra.mxu2 %v458_v5  ;;  %528 = vmatpush.bf16.msra.mxu3 %v458_v5 }
  0x1a   :  { %170 = vmatpush.bf16.msra.mxu0 %v457_v6  ;;  %529 = vmatpush.bf16.msra.mxu1 %v457_v6 }
  0x1b   :  { %530 = vmatpush.bf16.msra.mxu2 %v457_v6  ;;  %531 = vmatpush.bf16.msra.mxu3 %v457_v6 }
  0x1e   :  { %171 = vmatpush.bf16.msra.mxu0 %v456_v7  ;;  %532 = vmatpush.bf16.msra.mxu1 %v456_v7 }
  0x1f   :  { %533 = vmatpush.bf16.msra.mxu2 %v456_v7  ;;  %534 = vmatpush.bf16.msra.mxu3 %v456_v7 }
  0x21   :  { %172 = vmatmul.bf16.vlgmr.msra.gmra.mxu0 %v448_v8  ;;  %182 = vmatmul.bf16.vlgmr.msra.gmra.mxu1 %v450_v9  ;;  %v63_v8 = vld [vmem:[%s785_s2 + $0x58] sm:$0xff] }
  0x22   :  { %192 = vmatmul.bf16.vlgmr.msra.gmra.mxu2 %v452_v10  ;;  %202 = vmatmul.bf16.vlgmr.msra.gmra.mxu3 %v454_v11 }
  0x31   :  { %177 = vmatmul.bf16.gmra.mxu0 %v449_v12  ;;  %187 = vmatmul.bf16.gmra.mxu1 %v451_v13 }
  0x32   :  { %197 = vmatmul.bf16.gmra.mxu2 %v453_v14  ;;  %207 = vmatmul.bf16.gmra.mxu3 %v455_v15  ;;  %v64_v14 = vld [vmem:[%s785_s2 + $0x60] sm:$0xff] }
  0x9e   :  { %v173_v16 = vpop.f32.mrf.mxu0  ;;  %v183_v17 = vpop.f32.mrf.mxu1 }
  0x9f   :  { %v626_v29 = vadd.f32 %v173_v16, %v52_v23  ;;  %v647_v40 = vadd.f32 %v183_v17, %v56_v32 }
  0xa1   :  { %v235_v34 = vmul.f32 %v626_v29, %v626_v29  ;;  %v239_v52 = vmul.f32 %v647_v40, %v647_v40 }
  0xa5   :  { %v193_v18 = vpop.f32.mrf.mxu2  ;;  %v203_v22 = vpop.f32.mrf.mxu3 }
  0xa6   :  { %v175_v19 = vpop.f32.mrf.mxu0  ;;  %v185_v20 = vpop.f32.mrf.mxu1  ;;  %v679_v62 = vadd.f32 %v193_v18, %v60_v56 }
  0xa7   :  { %v624_v27 = vadd.f32 %v175_v19, %v53_v21  ;;  %v655_v46 = vadd.f32 %v185_v20, %v57_v37  ;;  %v65_v19 = vld [vmem:[%s785_s2 + $0x68] sm:$0xff]  ;;  %v711_v20 = vadd.f32 %v203_v22, %v64_v14  ;;  %v67_v22 = vld [vmem:[%s785_s2 + $0x78] sm:$0xff] }
  0xa8   :  { %v243_v10 = vmul.f32 %v679_v62, %v679_v62 }
  0xa9   :  { %v236_v31 = vmul.f32 %v624_v27, %v624_v27  ;;  %v213_v35 = vadd.f32 %v624_v27, %v626_v29  ;;  %v240_v57 = vmul.f32 %v655_v46, %v655_v46 }
  0xab   :  { %v251_v41 = vadd.f32 %v236_v31, %v235_v34  ;;  %v247_v34 = vmul.f32 %v711_v20, %v711_v20 }
  0xad   :  { %v195_v26 = vpop.f32.mrf.mxu2  ;;  %v205_v39 = vpop.f32.mrf.mxu3 }
  0xae   :  { %v178_v25 = vpop.f32.mrf.mxu0  ;;  %v188_v28 = vpop.f32.mrf.mxu1  ;;  %v687_v4 = vadd.f32 %v195_v26, %v61_v61 }
  0xaf   :  { %v628_v30 = vadd.f32 %v178_v25, %v54_v24  ;;  %v665_v53 = vadd.f32 %v188_v28, %v58_v44  ;;  %v66_v25 = vld [vmem:[%s785_s2 + $0x70] sm:$0xff]  ;;  %v719_v28 = vadd.f32 %v205_v39, %v65_v19 }
  0xb0   :  { %v244_v15 = vmul.f32 %v687_v4, %v687_v4 }
  0xb1   :  { %v237_v36 = vmul.f32 %v628_v30, %v628_v30  ;;  %v214_v42 = vadd.f32 %v213_v35, %v628_v30  ;;  %v241_v63 = vmul.f32 %v665_v53, %v665_v53 }
  0xb3   :  { %v252_v47 = vadd.f32 %v251_v41, %v237_v36 }
  0xb5   :  { %v198_v45 = vpop.f32.mrf.mxu2  ;;  %v208_v3 = vpop.f32.mrf.mxu3 }
  0xb6   :  { %v180_v38 = vpop.f32.mrf.mxu0  ;;  %v190_v51 = vpop.f32.mrf.mxu1  ;;  %v698_v13 = vadd.f32 %v198_v45, %v62_v2  ;;  %v730_v37 = vadd.f32 %v208_v3, %v66_v25 }
  0xb7   :  { %v650_v43 = vadd.f32 %v180_v38, %v55_v33  ;;  %v673_v59 = vadd.f32 %v190_v51, %v59_v50  ;;  %v248_v38 = vmul.f32 %v719_v28, %v719_v28 }
  0xb8   :  { %v245_v23 = vmul.f32 %v698_v13, %v698_v13  ;;  %v249_v45 = vmul.f32 %v730_v37, %v730_v37 }
  0xb9   :  { %v215_v48 = vadd.f32 %v214_v42, %v650_v43  ;;  %v238_v49 = vmul.f32 %v650_v43, %v650_v43  ;;  %v242_v6 = vmul.f32 %v673_v59, %v673_v59 }
  0xbb   :  { %v216_v54 = vadd.f32 %v215_v48, %v647_v40  ;;  %v253_v55 = vadd.f32 %v252_v47, %v238_v49 }
  0xbd   :  { %v254_v58 = vadd.f32 %v253_v55, %v239_v52  ;;  %v217_v60 = vadd.f32 %v216_v54, %v655_v46  ;;  %v200_v9 = vpop.f32.mrf.mxu2  ;;  %v210_v33 = vpop.f32.mrf.mxu3 }
  0xbe   :  { %v706_v18 = vadd.f32 %v200_v9, %v63_v8  ;;  %v211_v42 = vadd.f32 %v210_v33, %v67_v22 }
  0xbf   :  { %v218_v0 = vadd.f32 %v217_v60, %v665_v53  ;;  %v255_v1 = vadd.f32 %v254_v58, %v240_v57 }
  0xc0   :  { %v246_v32 = vmul.f32 %v706_v18, %v706_v18  ;;  %v250_v50 = vmul.f32 %v211_v42, %v211_v42 }
  0xc1   :  { %v219_v5 = vadd.f32 %v218_v0, %v673_v59  ;;  %v256_v7 = vadd.f32 %v255_v1, %v241_v63 }
  0xc3   :  { %v220_v11 = vadd.f32 %v219_v5, %v679_v62  ;;  %v257_v12 = vadd.f32 %v256_v7, %v242_v6 }
  0xc5   :  { %v258_v16 = vadd.f32 %v257_v12, %v243_v10  ;;  %v221_v17 = vadd.f32 %v220_v11, %v687_v4 }
  0xc7   :  { %v222_v21 = vadd.f32 %v221_v17, %v698_v13  ;;  %v259_v24 = vadd.f32 %v258_v16, %v244_v15  ;;  %v278_v16 = vld [vmem:[%s786_s3] sm:$0x1] }
  0xc9   :  { %v260_v26 = vadd.f32 %v259_v24, %v245_v23  ;;  %v223_v31 = vadd.f32 %v222_v21, %v706_v18  ;;  %v291_v23 = vld [vmem:[%s787_s4] sm:$0x1] }
  0xcb   :  { %v224_v35 = vadd.f32 %v223_v31, %v711_v20  ;;  %v261_v36 = vadd.f32 %v260_v26, %v246_v32 }
  0xcd   :  { %v262_v39 = vadd.f32 %v261_v36, %v247_v34  ;;  %v225_v41 = vadd.f32 %v224_v35, %v719_v28 }
  0xcf   :  { %v226_v44 = vadd.f32 %v225_v41, %v730_v37  ;;  %v263_v47 = vadd.f32 %v262_v39, %v248_v38 }
  0xd1   :  { %v264_v48 = vadd.f32 %v263_v47, %v249_v45  ;;  %v227_v49 = vadd.f32 %v226_v44, %v211_v42 }
  0xd3   :  { %v228_v51 = vrot.slane %v227_v49, 4  ;;  %v265_v52 = vadd.f32 %v264_v48, %v250_v50 }
  0xd5   :  { %v229_v54 = vadd.f32 %v228_v51, %v227_v49  ;;  %v266_v55 = vrot.slane %v265_v52, 4 }
  0xd7   :  { %v230_v56 = vrot.slane %v229_v54, 2  ;;  %v267_v57 = vadd.f32 %v266_v55, %v265_v52 }
  0xd9   :  { %v231_v58 = vadd.f32 %v230_v56, %v229_v54  ;;  %v268_v60 = vrot.slane %v267_v57, 2 }
  0xdb   :  { %v232_v61 = vrot.slane %v231_v58, 1  ;;  %v269_v63 = vadd.f32 %v268_v60, %v267_v57 }
  0xdd   :  { %v233_v0 = vadd.f32 %v232_v61, %v231_v58  ;;  %v270_v1 = vrot.slane %v269_v63, 1 }
  0xdf   :  { %v271_v2 = vadd.f32 %v270_v1, %v269_v63  ;;  %v273_v3 = vmul.f32 0.0078125, %v233_v0 }
  0xe1   :  { %v274_v5 = vmul.f32 0.0078125, %v271_v2  ;;  %v275_v6 = vmul.f32 %v273_v3, %v273_v3 }
  0xe3   :  { %v276_v7 = vsub.f32 %v274_v5, %v275_v6 }
  0xe5   :  { %v277_v8 = vmax.f32 %v276_v7, 0.0 }
  0xe7   :  { %v279_v9 = vadd.f32 1e-05, %v277_v8 }
  0xe9   :  { %535 = vrsqrt.f32 %v279_v9  ;;  %vm286_vm1 = vweird.f32 %v279_v9 }
  0xef   :  { %v536_v10 = vpop.eup %535 }
  0xf0   :  { %v281_v11 = vmul.f32 %v536_v10, %v279_v9  ;;  %vm287_vm0 = vweird.f32 %v536_v10 }
  0xf1   :  { %vm288_vm2 = vmor %vm286_vm1, %vm287_vm0 }
  0xf2   :  { %v282_v12 = vmul.f32 %v536_v10, %v281_v11 }
  0xf4   :  { %v283_v14 = vmul.f32 0.5, %v282_v12 }
  0xf6   :  { %v284_v15 = vsub.f32 1.5, %v283_v14 }
  0xf8   :  { %v285_v17 = vmul.f32 %v536_v10, %v284_v15 }
  0xfa   :  { %v289_v19 = vsel %vm288_vm2, %v536_v10, %v285_v17 }
  0xfb   :  { %v290_v21 = vmul.f32 %v289_v19, %v278_v16 }
  0xfd   :  { %v292_v24 = vmul.f32 %v290_v21, %v273_v3  ;;  %v295_v25 = vperm.slane %v290_v21, 0 }
  0xff   :  { %v293_v26 = vsub.f32 %v291_v23, %v292_v24  ;;  %v297_v31 = vmul.f32 %v295_v25, %v626_v29  ;;  %v298_v32 = vmul.f32 %v295_v25, %v624_v27  ;;  %v299_v22 = vmul.f32 %v295_v25, %v628_v30 }
 0x100   :  { %v300_v33 = vmul.f32 %v295_v25, %v650_v43  ;;  %v301_v34 = vmul.f32 %v295_v25, %v647_v40  ;;  %v302_v35 = vmul.f32 %v295_v25, %v655_v46  ;;  %v303_v36 = vmul.f32 %v295_v25, %v665_v53 }
 0x101   :  { %v304_v38 = vmul.f32 %v295_v25, %v673_v59  ;;  %v305_v39 = vmul.f32 %v295_v25, %v679_v62  ;;  %v306_v41 = vmul.f32 %v295_v25, %v687_v4  ;;  %v307_v29 = vmul.f32 %v295_v25, %v698_v13 }
 0x102   :  { %v308_v27 = vmul.f32 %v295_v25, %v706_v18  ;;  %v314_v44 = vperm.slane %v293_v26, 0  ;;  %v309_v30 = vmul.f32 %v295_v25, %v711_v20  ;;  %v310_v43 = vmul.f32 %v295_v25, %v719_v28 }
 0x103   :  { %v311_v40 = vmul.f32 %v295_v25, %v730_v37  ;;  %v312_v46 = vmul.f32 %v295_v25, %v211_v42 }
 0x104   :  { %v316_v45 = vadd.f32 %v314_v44, %v297_v31  ;;  %v317_v53 = vadd.f32 %v314_v44, %v298_v32  ;;  %v318_v47 = vadd.f32 %v314_v44, %v299_v22  ;;  %v319_v59 = vadd.f32 %v314_v44, %v300_v33 }
 0x105   :  { %v320_v48 = vadd.f32 %v314_v44, %v301_v34  ;;  %v321_v62 = vadd.f32 %v314_v44, %v302_v35  ;;  %v322_v49 = vadd.f32 %v314_v44, %v303_v36  ;;  %v323_v4 = vadd.f32 %v314_v44, %v304_v38 }
 0x106   :  { %v324_v50 = vadd.f32 %v314_v44, %v305_v39  ;;  %v325_v13 = vadd.f32 %v314_v44, %v306_v41  ;;  %v326_v51 = vadd.f32 %v314_v44, %v307_v29  ;;  %v327_v18 = vadd.f32 %v314_v44, %v308_v27 }
 0x107   :  { %v328_v52 = vadd.f32 %v314_v44, %v309_v30  ;;  %v329_v54 = vadd.f32 %v314_v44, %v310_v43  ;;  %v330_v20 = vadd.f32 %v314_v44, %v311_v40  ;;  %v331_v55 = vadd.f32 %v314_v44, %v312_v46 }
 0x108   :  { %v332_v28 = vmax.f32 %v316_v45, 0.0  ;;  %v333_v56 = vmax.f32 %v317_v53, 0.0  ;;  %v334_v37 = vmax.f32 %v318_v47, 0.0  ;;  %v335_v42 = vmax.f32 %v319_v59, 0.0 }
 0x109   :  { %v336_v57 = vmax.f32 %v320_v48, 0.0  ;;  %v337_v58 = vmax.f32 %v321_v62, 0.0  ;;  %v338_v60 = vmax.f32 %v322_v49, 0.0  ;;  %v339_v61 = vmax.f32 %v323_v4, 0.0 }
 0x10a   :  { %v340_v63 = vmax.f32 %v324_v50, 0.0  ;;  %v341_v0 = vmax.f32 %v325_v13, 0.0  ;;  %v342_v1 = vmax.f32 %v326_v51, 0.0  ;;  %v343_v2 = vmax.f32 %v327_v18, 0.0 }
 0x10b   :  { %v344_v3 = vmax.f32 %v328_v52, 0.0  ;;  %v345_v5 = vmax.f32 %v329_v54, 0.0  ;;  %v467_v6 = vpack.c.bf16 %v333_v56, %v332_v28  ;;  %v472_v7 = vpack.c.bf16 %v335_v42, %v334_v37 }
 0x10c   :  { %v477_v8 = vpack.c.bf16 %v337_v58, %v336_v57  ;;  %v346_v9 = vmax.f32 %v330_v20, 0.0  ;;  %v347_v10 = vmax.f32 %v331_v55, 0.0  ;;  %v482_v11 = vpack.c.bf16 %v339_v61, %v338_v60 }
 0x10d   :  { %468 = vst [vmem:[%s788_s5] sm:$0xff] %v467_v6   ;;  %v487_v12 = vpack.c.bf16 %v341_v0, %v340_v63  ;;  %v492_v14 = vpack.c.bf16 %v343_v2, %v342_v1  ;;  %v497_v15 = vpack.c.bf16 %v345_v5, %v344_v3 }
 0x10e   :  { %504 = vst [vmem:[%s788_s5 + $0x8] sm:$0xff] %v472_v7   ;;  %v502_v16 = vpack.c.bf16 %v347_v10, %v346_v9 }
 0x10f   :  { %505 = vst [vmem:[%s788_s5 + $0x10] sm:$0xff] %v477_v8  }
 0x110   :  { %506 = vst [vmem:[%s788_s5 + $0x18] sm:$0xff] %v482_v11  }
 0x111   :  { %507 = vst [vmem:[%s788_s5 + $0x20] sm:$0xff] %v487_v12  }
 0x112   :  { %508 = vst [vmem:[%s788_s5 + $0x28] sm:$0xff] %v492_v14  }
 0x113   :  { %509 = vst [vmem:[%s788_s5 + $0x30] sm:$0xff] %v497_v15  }
 0x114   :  { %510 = vst [vmem:[%s788_s5 + $0x38] sm:$0xff] %v502_v16  }

// kernel: unet_forward.7
= control target key start
LH: loop header
LB: loop body
LE: loop exit
PB: predicated region body
PF: predicated region fallthrough
CT: control target
= control target key end

     0   :  { %s1783_s1 = inlined_call_operand.vmem [shape: bf16[1,1152,128], index: 1, kind: input, shape index: {}]   ;;  %s1784_s0 = inlined_call_operand.vmem [shape: bf16[1,32,1152], index: 0, kind: input, shape index: {}]   ;;  %s1785_s2 = inlined_call_operand.vmem [shape: f32[1,128], index: 2, kind: input, shape index: {}]   ;;  %s1786_s3 = inlined_call_operand.vmem [shape: f32[1,128], index: 3, kind: input, shape index: {}]   ;;  %s1787_s4 = inlined_call_operand.vmem [shape: bf16[1,32,128], index: 4, kind: output, shape index: {}]  }
   0x1   :  { %v1336_v0 = vld [vmem:[%s1783_s1 + $0x38] sm:$0xff]  ;;  %v1335_v4 = vld [vmem:[%s1783_s1 + $0x30] sm:$0xff]  ;;  %v1334_v8 = vld [vmem:[%s1783_s1 + $0x28] sm:$0xff] }
   0x2   :  { %v1344_v1 = vld [vmem:[%s1783_s1 + $0x78] sm:$0xff]  ;;  %705 = vmatpush.bf16.msra.mxu0 %v1336_v0  ;;  %v1343_v5 = vld [vmem:[%s1783_s1 + $0x70] sm:$0xff]  ;;  %v1342_v9 = vld [vmem:[%s1783_s1 + $0x68] sm:$0xff] }
   0x3   :  { %v1352_v2 = vld [vmem:[%s1783_s1 + $0xb8] sm:$0xff]  ;;  %724 = vmatpush.bf16.msra.mxu1 %v1344_v1  ;;  %v1351_v6 = vld [vmem:[%s1783_s1 + $0xb0] sm:$0xff]  ;;  %v1350_v10 = vld [vmem:[%s1783_s1 + $0xa8] sm:$0xff] }
   0x4   :  { %v1360_v3 = vld [vmem:[%s1783_s1 + $0xf8] sm:$0xff]  ;;  %743 = vmatpush.bf16.msra.mxu2 %v1352_v2  ;;  %v1359_v7 = vld [vmem:[%s1783_s1 + $0xf0] sm:$0xff]  ;;  %v1358_v11 = vld [vmem:[%s1783_s1 + $0xe8] sm:$0xff] }
   0x5   :  { %762 = vmatpush.bf16.msra.mxu3 %v1360_v3  ;;  %v1333_v12 = vld [vmem:[%s1783_s1 + $0x20] sm:$0xff]  ;;  %v1332_v16 = vld [vmem:[%s1783_s1 + $0x18] sm:$0xff]  ;;  %v1331_v20 = vld [vmem:[%s1783_s1 + $0x10] sm:$0xff] }
   0x6   :  { %706 = vmatpush.bf16.msra.mxu0 %v1335_v4  ;;  %v1341_v13 = vld [vmem:[%s1783_s1 + $0x60] sm:$0xff]  ;;  %v1340_v17 = vld [vmem:[%s1783_s1 + $0x58] sm:$0xff]  ;;  %v1339_v21 = vld [vmem:[%s1783_s1 + $0x50] sm:$0xff] }
   0x7   :  { %725 = vmatpush.bf16.msra.mxu1 %v1343_v5  ;;  %v1349_v14 = vld [vmem:[%s1783_s1 + $0xa0] sm:$0xff]  ;;  %v1348_v18 = vld [vmem:[%s1783_s1 + $0x98] sm:$0xff]  ;;  %v1347_v22 = vld [vmem:[%s1783_s1 + $0x90] sm:$0xff] }
   0x8   :  { %744 = vmatpush.bf16.msra.mxu2 %v1351_v6  ;;  %v1357_v15 = vld [vmem:[%s1783_s1 + $0xe0] sm:$0xff]  ;;  %v1356_v19 = vld [vmem:[%s1783_s1 + $0xd8] sm:$0xff]  ;;  %v1355_v23 = vld [vmem:[%s1783_s1 + $0xd0] sm:$0xff] }
   0x9   :  { %763 = vmatpush.bf16.msra.mxu3 %v1359_v7  ;;  %v1330_v24 = vld [vmem:[%s1783_s1 + $0x8] sm:$0xff]  ;;  %v1329_v28 = vld [vmem:[%s1783_s1] sm:$0xff]  ;;  %v963_v39 = vld [vmem:[%s1784_s0 + $0x2c] sm:$0xf0] }
   0xa   :  { %707 = vmatpush.bf16.msra.mxu0 %v1334_v8  ;;  %v1338_v25 = vld [vmem:[%s1783_s1 + $0x48] sm:$0xff]  ;;  %v1337_v29 = vld [vmem:[%s1783_s1 + $0x40] sm:$0xff]  ;;  %v1368_v40 = vld [vmem:[%s1783_s1 + $0x138] sm:$0xff] }
   0xb   :  { %726 = vmatpush.bf16.msra.mxu1 %v1342_v9  ;;  %v1346_v26 = vld [vmem:[%s1783_s1 + $0x88] sm:$0xff]  ;;  %v1345_v30 = vld [vmem:[%s1783_s1 + $0x80] sm:$0xff]  ;;  %v1376_v41 = vld [vmem:[%s1783_s1 + $0x178] sm:$0xff] }
   0xc   :  { %745 = vmatpush.bf16.msra.mxu2 %v1350_v10  ;;  %v1354_v27 = vld [vmem:[%s1783_s1 + $0xc8] sm:$0xff]  ;;  %v1353_v31 = vld [vmem:[%s1783_s1 + $0xc0] sm:$0xff]  ;;  %v1384_v46 = vld [vmem:[%s1783_s1 + $0x1b8] sm:$0xff] }
   0xd   :  { %764 = vmatpush.bf16.msra.mxu3 %v1358_v11  ;;  %v953_v32 = vld [vmem:[%s1784_s0] sm:$0xf]  ;;  %v1315_v33 = vld [vmem:[%s1784_s0 + $0x20] sm:$0xf0]  ;;  %v955_v35 = vld [vmem:[%s1784_s0 + $0x24] sm:$0xf0] }
   0xe   :  { %708 = vmatpush.bf16.msra.mxu0 %v1333_v12  ;;  %v1311_v34 = vld [vmem:[%s1784_s0 + $0x4] sm:$0xf]  ;;  %v961_v36 = vld [vmem:[%s1784_s0 + $0x8] sm:$0xf]  ;;  %v1316_v37 = vld [vmem:[%s1784_s0 + $0x28] sm:$0xf0]  ;;  %v954_v42 = vor.u32 %v1315_v33, %v953_v32 }
   0xf   :  { %727 = vmatpush.bf16.msra.mxu1 %v1341_v13  ;;  %v1312_v38 = vld [vmem:[%s1784_s0 + $0xc] sm:$0xf]  ;;  %v958_v43 = vor.u32 %v1311_v34, %v955_v35  ;;  %v962_v44 = vor.u32 %v1316_v37, %v961_v36  ;;  %v1392_v47 = vld [vmem:[%s1783_s1 + $0x1f8] sm:$0xff]  ;;  %v1367_v48 = vld [vmem:[%s1783_s1 + $0x130] sm:$0xff] }
  0x10   :  { %746 = vmatpush.bf16.msra.mxu2 %v1349_v14  ;;  %v966_v45 = vor.u32 %v1312_v38, %v963_v39  ;;  %v1375_v49 = vld [vmem:[%s1783_s1 + $0x170] sm:$0xff]  ;;  %v1366_v52 = vld [vmem:[%s1783_s1 + $0x128] sm:$0xff]  ;;  %v1365_v56 = vld [vmem:[%s1783_s1 + $0x120] sm:$0xff] }
  0x11   :  { %765 = vmatpush.bf16.msra.mxu3 %v1357_v15  ;;  %v1383_v50 = vld [vmem:[%s1783_s1 + $0x1b0] sm:$0xff]  ;;  %v1374_v53 = vld [vmem:[%s1783_s1 + $0x168] sm:$0xff]  ;;  %v1373_v57 = vld [vmem:[%s1783_s1 + $0x160] sm:$0xff] }
  0x12   :  { %709 = vmatpush.bf16.msra.mxu0 %v1332_v16  ;;  %v1391_v51 = vld [vmem:[%s1783_s1 + $0x1f0] sm:$0xff]  ;;  %v1382_v54 = vld [vmem:[%s1783_s1 + $0x1a8] sm:$0xff]  ;;  %v1381_v58 = vld [vmem:[%s1783_s1 + $0x1a0] sm:$0xff] }
  0x13   :  { %728 = vmatpush.bf16.msra.mxu1 %v1340_v17  ;;  %v1390_v55 = vld [vmem:[%s1783_s1 + $0x1e8] sm:$0xff]  ;;  %v1389_v59 = vld [vmem:[%s1783_s1 + $0x1e0] sm:$0xff]  ;;  %v991_v63 = vld [vmem:[%s1784_s0 + $0x6c] sm:$0xf0] }
  0x14   :  { %747 = vmatpush.bf16.msra.mxu2 %v1348_v18  ;;  %v989_v60 = vld [vmem:[%s1784_s0 + $0x48] sm:$0xf]  ;;  %v1324_v61 = vld [vmem:[%s1784_s0 + $0x68] sm:$0xf0]  ;;  %v997_v0 = vld [vmem:[%s1784_s0 + $0x50] sm:$0xf] }
  0x15   :  { %766 = vmatpush.bf16.msra.mxu3 %v1356_v19  ;;  %v1320_v62 = vld [vmem:[%s1784_s0 + $0x4c] sm:$0xf]  ;;  %v1325_v1 = vld [vmem:[%s1784_s0 + $0x70] sm:$0xf0]  ;;  %v999_v3 = vld [vmem:[%s1784_s0 + $0x74] sm:$0xf0]  ;;  %v990_v6 = vor.u32 %v1324_v61, %v989_v60 }
  0x16   :  { %710 = vmatpush.bf16.msra.mxu0 %v1331_v20  ;;  %v1321_v2 = vld [vmem:[%s1784_s0 + $0x54] sm:$0xf]  ;;  %v1364_v4 = vld [vmem:[%s1783_s1 + $0x118] sm:$0xff]  ;;  %v994_v7 = vor.u32 %v1320_v62, %v991_v63  ;;  %v998_v8 = vor.u32 %v1325_v1, %v997_v0  ;;  %v1362_v16 = vld [vmem:[%s1783_s1 + $0x108] sm:$0xff] }
  0x17   :  { %729 = vmatpush.bf16.msra.mxu1 %v1339_v21  ;;  %v1372_v5 = vld [vmem:[%s1783_s1 + $0x158] sm:$0xff]  ;;  %v1002_v9 = vor.u32 %v1321_v2, %v999_v3  ;;  %v1363_v12 = vld [vmem:[%s1783_s1 + $0x110] sm:$0xff]  ;;  %v1370_v17 = vld [vmem:[%s1783_s1 + $0x148] sm:$0xff] }
  0x18   :  { %748 = vmatpush.bf16.msra.mxu2 %v1347_v22  ;;  %v1380_v10 = vld [vmem:[%s1783_s1 + $0x198] sm:$0xff]  ;;  %v1371_v13 = vld [vmem:[%s1783_s1 + $0x150] sm:$0xff]  ;;  %v1378_v18 = vld [vmem:[%s1783_s1 + $0x188] sm:$0xff] }
  0x19   :  { %767 = vmatpush.bf16.msra.mxu3 %v1355_v23  ;;  %v1388_v11 = vld [vmem:[%s1783_s1 + $0x1d8] sm:$0xff]  ;;  %v1379_v14 = vld [vmem:[%s1783_s1 + $0x190] sm:$0xff]  ;;  %v1386_v19 = vld [vmem:[%s1783_s1 + $0x1c8] sm:$0xff] }
  0x1a   :  { %711 = vmatpush.bf16.msra.mxu0 %v1330_v24  ;;  %v1387_v15 = vld [vmem:[%s1783_s1 + $0x1d0] sm:$0xff]  ;;  %v1361_v20 = vld [vmem:[%s1783_s1 + $0x100] sm:$0xff]  ;;  %v1398_v38 = vld [vmem:[%s1783_s1 + $0x228] sm:$0xff] }
  0x1b   :  { %730 = vmatpush.bf16.msra.mxu1 %v1338_v25  ;;  %v1369_v21 = vld [vmem:[%s1783_s1 + $0x140] sm:$0xff]  ;;  %v969_v24 = vld [vmem:[%s1784_s0 + $0x10] sm:$0xf]  ;;  %v1317_v25 = vld [vmem:[%s1784_s0 + $0x30] sm:$0xf0] }
  0x1c   :  { %749 = vmatpush.bf16.msra.mxu2 %v1346_v26  ;;  %v1377_v22 = vld [vmem:[%s1783_s1 + $0x180] sm:$0xff]  ;;  %v1400_v26 = vld [vmem:[%s1783_s1 + $0x238] sm:$0xff]  ;;  %v970_v33 = vor.u32 %v1317_v25, %v969_v24  ;;  %v1399_v37 = vld [vmem:[%s1783_s1 + $0x230] sm:$0xff] }
  0x1d   :  { %768 = vmatpush.bf16.msra.mxu3 %v1354_v27  ;;  %v1385_v23 = vld [vmem:[%s1783_s1 + $0x1c0] sm:$0xff]  ;;  %v1313_v27 = vld [vmem:[%s1784_s0 + $0x14] sm:$0xf] }
  0x1e   :  { %712 = vmatpush.bf16.msra.mxu0 %v1329_v28  ;;  %v971_v28 = vld [vmem:[%s1784_s0 + $0x34] sm:$0xf0]  ;;  %v979_v32 = vld [vmem:[%s1784_s0 + $0x3c] sm:$0xf0] }
  0x1f   :  { %731 = vmatpush.bf16.msra.mxu1 %v1337_v29  ;;  %v977_v29 = vld [vmem:[%s1784_s0 + $0x18] sm:$0xf]  ;;  %v974_v34 = vor.u32 %v1313_v27, %v971_v28  ;;  %v1397_v39 = vld [vmem:[%s1783_s1 + $0x220] sm:$0xff] }
  0x20   :  { %750 = vmatpush.bf16.msra.mxu2 %v1345_v30  ;;  %v1318_v30 = vld [vmem:[%s1784_s0 + $0x38] sm:$0xf0] }
  0x21   :  { %769 = vmatpush.bf16.msra.mxu3 %v1353_v31  ;;  %713 = vmatmul.bf16.vlgmr.msra.gmra.mxu0 %v954_v42  ;;  %v1314_v31 = vld [vmem:[%s1784_s0 + $0x1c] sm:$0xf]  ;;  %v978_v35 = vor.u32 %v1318_v30, %v977_v29 }
  0x22   :  { %781 = vmatpush.bf16.msrb.mxu0 %v1368_v40  ;;  %732 = vmatmul.bf16.vlgmr.msra.gmra.mxu1 %v958_v43  ;;  %v982_v36 = vor.u32 %v1314_v31, %v979_v32  ;;  %v1005_v40 = vld [vmem:[%s1784_s0 + $0x58] sm:$0xf]  ;;  %v1322_v42 = vld [vmem:[%s1784_s0 + $0x5c] sm:$0xf]  ;;  %v1007_v43 = vld [vmem:[%s1784_s0 + $0x7c] sm:$0xf0] }
  0x23   :  { %800 = vmatpush.bf16.msrb.mxu1 %v1376_v41  ;;  %751 = vmatmul.bf16.vlgmr.msra.gmra.mxu2 %v962_v44  ;;  %v1326_v41 = vld [vmem:[%s1784_s0 + $0x78] sm:$0xf0]  ;;  %v1013_v44 = vld [vmem:[%s1784_s0 + $0x60] sm:$0xf] }
  0x24   :  { %770 = vmatmul.bf16.vlgmr.msra.gmra.mxu3 %v966_v45  ;;  %819 = vmatpush.bf16.msrb.mxu2 %v1384_v46  ;;  %v1327_v45 = vld [vmem:[%s1784_s0 + $0x80] sm:$0xf0]  ;;  %v1396_v46 = vld [vmem:[%s1783_s1 + $0x218] sm:$0xff] }
  0x25   :  { %838 = vmatpush.bf16.msrb.mxu3 %v1392_v47  ;;  %v1323_v47 = vld [vmem:[%s1784_s0 + $0x64] sm:$0xf] }
  0x26   :  { %782 = vmatpush.bf16.msrb.mxu0 %v1367_v48  ;;  %v1015_v48 = vld [vmem:[%s1784_s0 + $0x84] sm:$0xf0] }
  0x27   :  { %801 = vmatpush.bf16.msrb.mxu1 %v1375_v49  ;;  %v1006_v49 = vor.u32 %v1326_v41, %v1005_v40 }
  0x28   :  { %820 = vmatpush.bf16.msrb.mxu2 %v1383_v50  ;;  %v1010_v50 = vor.u32 %v1322_v42, %v1007_v43 }
  0x29   :  { %839 = vmatpush.bf16.msrb.mxu3 %v1391_v51  ;;  %v1014_v51 = vor.u32 %v1327_v45, %v1013_v44 }
  0x2a   :  { %783 = vmatpush.bf16.msrb.mxu0 %v1366_v52  ;;  %v1018_v52 = vor.u32 %v1323_v47, %v1015_v48 }
  0x2b   :  { %802 = vmatpush.bf16.msrb.mxu1 %v1374_v53  ;;  %v1395_v53 = vld [vmem:[%s1783_s1 + $0x210] sm:$0xff] }
  0x2c   :  { %821 = vmatpush.bf16.msrb.mxu2 %v1382_v54  ;;  %v1394_v54 = vld [vmem:[%s1783_s1 + $0x208] sm:$0xff] }
  0x2d   :  { %840 = vmatpush.bf16.msrb.mxu3 %v1390_v55  ;;  %v1393_v55 = vld [vmem:[%s1783_s1 + $0x200] sm:$0xff] }
  0x2e   :  { %784 = vmatpush.bf16.msrb.mxu0 %v1365_v56  ;;  %v985_v56 = vld [vmem:[%s1784_s0 + $0x20] sm:$0xf] }
  0x2f   :  { %803 = vmatpush.bf16.msrb.mxu1 %v1373_v57  ;;  %v1319_v57 = vld [vmem:[%s1784_s0 + $0x40] sm:$0xf0] }
  0x30   :  { %822 = vmatpush.bf16.msrb.mxu2 %v1381_v58  ;;  %v1021_v58 = vld [vmem:[%s1784_s0 + $0x68] sm:$0xf]  ;;  %v986_v60 = vor.u32 %v1319_v57, %v985_v56 }
  0x31   :  { %841 = vmatpush.bf16.msrb.mxu3 %v1389_v59  ;;  %718 = vmatmul.bf16.gmra.mxu0 %v990_v6  ;;  %v1328_v59 = vld [vmem:[%s1784_s0 + $0x88] sm:$0xf0] }
  0x32   :  { %785 = vmatpush.bf16.msrb.mxu0 %v1364_v4  ;;  %737 = vmatmul.bf16.gmra.mxu1 %v994_v7  ;;  %v1022_v61 = vor.u32 %v1328_v59, %v1021_v58 }
  0x33   :  { %804 = vmatpush.bf16.msrb.mxu1 %v1372_v5  ;;  %756 = vmatmul.bf16.gmra.mxu2 %v998_v8 }
  0x34   :  { %775 = vmatmul.bf16.gmra.mxu3 %v1002_v9  ;;  %823 = vmatpush.bf16.msrb.mxu2 %v1380_v10 }
  0x35   :  { %842 = vmatpush.bf16.msrb.mxu3 %v1388_v11 }
  0x36   :  { %786 = vmatpush.bf16.msrb.mxu0 %v1363_v12 }
  0x37   :  { %805 = vmatpush.bf16.msrb.mxu1 %v1371_v13 }
  0x38   :  { %824 = vmatpush.bf16.msrb.mxu2 %v1379_v14 }
  0x39   :  { %843 = vmatpush.bf16.msrb.mxu3 %v1387_v15 }
  0x3a   :  { %787 = vmatpush.bf16.msrb.mxu0 %v1362_v16 }
  0x3b   :  { %806 = vmatpush.bf16.msrb.mxu1 %v1370_v17 }
  0x3c   :  { %825 = vmatpush.bf16.msrb.mxu2 %v1378_v18 }
  0x3d   :  { %844 = vmatpush.bf16.msrb.mxu3 %v1386_v19 }
  0x3e   :  { %788 = vmatpush.bf16.msrb.mxu0 %v1361_v20 }
  0x3f   :  { %807 = vmatpush.bf16.msrb.mxu1 %v1369_v21 }
  0x40   :  { %826 = vmatpush.bf16.msrb.mxu2 %v1377_v22 }
  0x41   :  { %845 = vmatpush.bf16.msrb.mxu3 %v1385_v23  ;;  %789 = vmatmul.bf16.vlgmr.msrb.gmra.mxu0 %v970_v33 }
  0x42   :  { %857 = vmatpush.bf16.msra.mxu0 %v1400_v26  ;;  %808 = vmatmul.bf16.vlgmr.msrb.gmra.mxu1 %v974_v34 }
  0x43   :  { %1412 = vmatpush.bf16.msra.mxu1 %v1400_v26  ;;  %827 = vmatmul.bf16.vlgmr.msrb.gmra.mxu2 %v978_v35 }
  0x44   :  { %846 = vmatmul.bf16.vlgmr.msrb.gmra.mxu3 %v982_v36 }
  0x46   :  { %858 = vmatpush.bf16.msra.mxu0 %v1399_v37 }
  0x47   :  { %1413 = vmatpush.bf16.msra.mxu1 %v1399_v37 }
  0x4a   :  { %859 = vmatpush.bf16.msra.mxu0 %v1398_v38 }
  0x4b   :  { %1414 = vmatpush.bf16.msra.mxu1 %v1398_v38 }
  0x4e   :  { %860 = vmatpush.bf16.msra.mxu0 %v1397_v39 }
  0x4f   :  { %1415 = vmatpush.bf16.msra.mxu1 %v1397_v39 }
  0x51   :  { %794 = vmatmul.bf16.gmra.mxu0 %v1006_v49 }
  0x52   :  { %861 = vmatpush.bf16.msra.mxu0 %v1396_v46  ;;  %813 = vmatmul.bf16.gmra.mxu1 %v1010_v50 }
  0x53   :  { %1416 = vmatpush.bf16.msra.mxu1 %v1396_v46  ;;  %832 = vmatmul.bf16.gmra.mxu2 %v1014_v51 }
  0x54   :  { %851 = vmatmul.bf16.gmra.mxu3 %v1018_v52 }
  0x56   :  { %862 = vmatpush.bf16.msra.mxu0 %v1395_v53 }
  0x57   :  { %1417 = vmatpush.bf16.msra.mxu1 %v1395_v53 }
  0x5a   :  { %863 = vmatpush.bf16.msra.mxu0 %v1394_v54 }
  0x5b   :  { %1418 = vmatpush.bf16.msra.mxu1 %v1394_v54 }
  0x5e   :  { %864 = vmatpush.bf16.msra.mxu0 %v1393_v55 }
  0x5f   :  { %1419 = vmatpush.bf16.msra.mxu1 %v1393_v55 }
  0x61   :  { %865 = vmatmul.bf16.vlgmr.msra.gmra.mxu0 %v986_v60 }
  0x62   :  { %870 = vmatmul.bf16.vlgmr.msra.gmra.mxu1 %v1022_v61 }
  0x9e   :  { %v714_v62 = vpop.f32.mrf.mxu0 }
  0x9f   :  { %v733_v63 = vpop.f32.mrf.mxu1 }
  0xa0   :  { %v734_v24 = vadd.f32 %v733_v63, %v714_v62 }
  0xa6   :  { %v752_v0 = vpop.f32.mrf.mxu2  ;;  %v716_v2 = vpop.f32.mrf.mxu0 }
  0xa7   :  { %v771_v1 = vpop.f32.mrf.mxu3  ;;  %v735_v3 = vpop.f32.mrf.mxu1  ;;  %v753_v25 = vadd.f32 %v752_v0, %v734_v24 }
  0xa8   :  { %v736_v26 = vadd.f32 %v735_v3, %v716_v2 }
  0xa9   :  { %v772_v34 = vadd.f32 %v771_v1, %v753_v25 }
  0xae   :  { %v754_v4 = vpop.f32.mrf.mxu2  ;;  %v719_v6 = vpop.f32.mrf.mxu0 }
  0xaf   :  { %v773_v5 = vpop.f32.mrf.mxu3  ;;  %v738_v7 = vpop.f32.mrf.mxu1  ;;  %v755_v28 = vadd.f32 %v754_v4, %v736_v26 }
  0xb0   :  { %v739_v27 = vadd.f32 %v738_v7, %v719_v6 }
  0xb1   :  { %v774_v36 = vadd.f32 %v773_v5, %v755_v28 }
  0xb6   :  { %v757_v8 = vpop.f32.mrf.mxu2  ;;  %v721_v10 = vpop.f32.mrf.mxu0 }
  0xb7   :  { %v776_v9 = vpop.f32.mrf.mxu3  ;;  %v740_v11 = vpop.f32.mrf.mxu1  ;;  %v758_v29 = vadd.f32 %v757_v8, %v739_v27 }
  0xb8   :  { %v741_v30 = vadd.f32 %v740_v11, %v721_v10 }
  0xb9   :  { %v777_v37 = vadd.f32 %v776_v9, %v758_v29 }
  0xbe   :  { %v759_v12 = vpop.f32.mrf.mxu2  ;;  %v790_v14 = vpop.f32.mrf.mxu0 }
  0xbf   :  { %v778_v13 = vpop.f32.mrf.mxu3  ;;  %v809_v15 = vpop.f32.mrf.mxu1  ;;  %v760_v35 = vadd.f32 %v759_v12, %v741_v30  ;;  %v791_v38 = vadd.f32 %v790_v14, %v772_v34 }
  0xc1   :  { %v779_v40 = vadd.f32 %v778_v13, %v760_v35  ;;  %v810_v43 = vadd.f32 %v809_v15, %v791_v38  ;;  %v905_v35 = vld [vmem:[%s1785_s2] sm:$0x1] }
  0xc6   :  { %v828_v16 = vpop.f32.mrf.mxu2  ;;  %v792_v18 = vpop.f32.mrf.mxu0 }
  0xc7   :  { %v847_v17 = vpop.f32.mrf.mxu3  ;;  %v811_v19 = vpop.f32.mrf.mxu1  ;;  %v793_v41 = vadd.f32 %v792_v18, %v774_v36  ;;  %v829_v47 = vadd.f32 %v828_v16, %v810_v43 }
  0xc9   :  { %v812_v48 = vadd.f32 %v811_v19, %v793_v41  ;;  %v848_v54 = vadd.f32 %v847_v17, %v829_v47 }
  0xce   :  { %v830_v20 = vpop.f32.mrf.mxu2  ;;  %v795_v21 = vpop.f32.mrf.mxu0 }
  0xcf   :  { %v814_v22 = vpop.f32.mrf.mxu1  ;;  %v849_v23 = vpop.f32.mrf.mxu3  ;;  %v796_v42 = vadd.f32 %v795_v21, %v777_v37  ;;  %v831_v51 = vadd.f32 %v830_v20, %v812_v48 }
  0xd1   :  { %v815_v49 = vadd.f32 %v814_v22, %v796_v42  ;;  %v850_v57 = vadd.f32 %v849_v23, %v831_v51 }
  0xd6   :  { %v833_v31 = vpop.f32.mrf.mxu2  ;;  %v797_v32 = vpop.f32.mrf.mxu0 }
  0xd7   :  { %v816_v33 = vpop.f32.mrf.mxu1  ;;  %v852_v39 = vpop.f32.mrf.mxu3  ;;  %v798_v44 = vadd.f32 %v797_v32, %v779_v40  ;;  %v834_v52 = vadd.f32 %v833_v31, %v815_v49 }
  0xd9   :  { %v817_v53 = vadd.f32 %v816_v33, %v798_v44  ;;  %v853_v58 = vadd.f32 %v852_v39, %v834_v52  ;;  %v918_v39 = vld [vmem:[%s1786_s3] sm:$0x1] }
  0xde   :  { %v866_v45 = vpop.f32.mrf.mxu0  ;;  %v835_v50 = vpop.f32.mrf.mxu2 }
  0xdf   :  { %v871_v46 = vpop.f32.mrf.mxu1  ;;  %v836_v55 = vadd.f32 %v835_v50, %v817_v53  ;;  %v854_v56 = vpop.f32.mrf.mxu3  ;;  %v867_v59 = vadd.f32 %v866_v45, %v848_v54 }
  0xe0   :  { %v872_v63 = vadd.f32 %v871_v46, %v853_v58 }
  0xe1   :  { %v855_v62 = vadd.f32 %v854_v56, %v836_v55  ;;  %v886_v1 = vmul.f32 %v867_v59, %v867_v59 }
  0xe2   :  { %v888_v5 = vmul.f32 %v872_v63, %v872_v63 }
  0xe6   :  { %v868_v60 = vpop.f32.mrf.mxu0 }
  0xe7   :  { %v873_v61 = vpop.f32.mrf.mxu1  ;;  %v869_v0 = vadd.f32 %v868_v60, %v850_v57 }
  0xe8   :  { %v874_v4 = vadd.f32 %v873_v61, %v855_v62 }
  0xe9   :  { %v876_v2 = vadd.f32 %v869_v0, %v867_v59  ;;  %v887_v3 = vmul.f32 %v869_v0, %v869_v0 }
  0xea   :  { %v889_v9 = vmul.f32 %v874_v4, %v874_v4 }
  0xeb   :  { %v890_v6 = vadd.f32 %v887_v3, %v886_v1  ;;  %v877_v7 = vadd.f32 %v876_v2, %v872_v63 }
  0xed   :  { %v878_v8 = vadd.f32 %v877_v7, %v874_v4  ;;  %v891_v10 = vadd.f32 %v890_v6, %v888_v5 }
  0xef   :  { %v879_v11 = vrot.slane %v878_v8, 4  ;;  %v892_v12 = vadd.f32 %v891_v10, %v889_v9 }
  0xf1   :  { %v880_v13 = vadd.f32 %v879_v11, %v878_v8  ;;  %v893_v14 = vrot.slane %v892_v12, 4 }
  0xf3   :  { %v881_v15 = vrot.slane %v880_v13, 2  ;;  %v894_v16 = vadd.f32 %v893_v14, %v892_v12 }
  0xf5   :  { %v882_v17 = vadd.f32 %v881_v15, %v880_v13  ;;  %v895_v18 = vrot.slane %v894_v16, 2 }
  0xf7   :  { %v883_v19 = vrot.slane %v882_v17, 1  ;;  %v896_v20 = vadd.f32 %v895_v18, %v894_v16 }
  0xf9   :  { %v884_v21 = vadd.f32 %v883_v19, %v882_v17  ;;  %v897_v22 = vrot.slane %v896_v20, 1 }
  0xfb   :  { %v898_v23 = vadd.f32 %v897_v22, %v896_v20  ;;  %v900_v24 = vmul.f32 0.03125, %v884_v21 }
  0xfd   :  { %v901_v25 = vmul.f32 0.03125, %v898_v23  ;;  %v902_v26 = vmul.f32 %v900_v24, %v900_v24 }
  0xff   :  { %v903_v27 = vsub.f32 %v901_v25, %v902_v26 }
 0x101   :  { %v904_v28 = vmax.f32 %v903_v27, 0.0 }
 0x103   :  { %v906_v29 = vadd.f32 1e-05, %v904_v28 }
 0x105   :  { %1420 = vrsqrt.f32 %v906_v29  ;;  %vm913_vm1 = vweird.f32 %v906_v29 }
 0x10b   :  { %v1421_v30 = vpop.eup %1420 }
 0x10c   :  { %v908_v31 = vmul.f32 %v1421_v30, %v906_v29  ;;  %vm914_vm0 = vweird.f32 %v1421_v30 }
 0x10d   :  { %vm915_vm2 = vmor %vm913_vm1, %vm914_vm0 }
 0x10e   :  { %v909_v32 = vmul.f32 %v1421_v30, %v908_v31 }
 0x110   :  { %v910_v33 = vmul.f32 0.5, %v909_v32 }
 0x112   :  { %v911_v34 = vsub.f32 1.5, %v910_v33 }
 0x114   :  { %v912_v36 = vmul.f32 %v1421_v30, %v911_v34 }
 0x116   :  { %v916_v37 = vsel %vm915_vm2, %v1421_v30, %v912_v36 }
 0x117   :  { %v917_v38 = vmul.f32 %v916_v37, %v905_v35 }
 0x119   :  { %v919_v40 = vmul.f32 %v917_v38, %v900_v24  ;;  %v922_v41 = vperm.slane %v917_v38, 0 }
 0x11b   :  { %v920_v42 = vsub.f32 %v918_v39, %v919_v40  ;;  %v924_v43 = vmul.f32 %v922_v41, %v867_v59  ;;  %v925_v44 = vmul.f32 %v922_v41, %v869_v0  ;;  %v926_v45 = vmul.f32 %v922_v41, %v872_v63 }
 0x11c   :  { %v927_v46 = vmul.f32 %v922_v41, %v874_v4 }
 0x11d   :  { %v929_v47 = vperm.slane %v920_v42, 0 }
 0x11f   :  { %v931_v48 = vadd.f32 %v929_v47, %v924_v43  ;;  %v932_v49 = vadd.f32 %v929_v47, %v925_v44  ;;  %v933_v50 = vadd.f32 %v929_v47, %v926_v45  ;;  %v934_v51 = vadd.f32 %v929_v47, %v927_v46 }
 0x121   :  { %v935_v52 = vmax.f32 %v931_v48, 0.0  ;;  %v936_v53 = vmax.f32 %v932_v49, 0.0  ;;  %v937_v54 = vmax.f32 %v933_v50, 0.0  ;;  %v938_v55 = vmax.f32 %v934_v51, 0.0 }
 0x123   :  { %v1404_v56 = vpack.c.bf16 %v936_v53, %v935_v52  ;;  %v1409_v57 = vpack.c.bf16 %v938_v55, %v937_v54 }
 0x125   :  { %1405 = vst [vmem:[%s1787_s4] sm:$0xff] %v1404_v56  }
 0x126   :  { %1411 = vst [vmem:[%s1787_s4 + $0x8] sm:$0xff] %v1409_v57  }

// kernel: unet_forward.8
= control target key start
LH: loop header
LB: loop body
LE: loop exit
PB: predicated region body
PF: predicated region fallthrough
CT: control target
= control target key end

     0   :  { %vm1261_vm5 = vcmask 1040384   ;;  %s3093_s1 = inlined_call_operand.vmem [shape: bf16[1,1152,256], index: 1, kind: input, shape index: {}]   ;;  %s3094_s0 = inlined_call_operand.vmem [shape: bf16[1,16,1152], index: 0, kind: input, shape index: {}]   ;;  %s3095_s2 = inlined_call_operand.vmem [shape: f32[1,256], index: 2, kind: input, shape index: {}]   ;;  %s3096_s3 = inlined_call_operand.vmem [shape: f32[1,256], index: 3, kind: input, shape index: {}]   ;;  %s3097_s4 = inlined_call_operand.vmem [shape: bf16[1,16,256], index: 4, kind: output, shape index: {}]  }
   0x1   :  { %v1398_v0 = vld [vmem:[%s3093_s1 + $0x70] sm:$0xf]  ;;  %v1940_v1 = vld [vmem:[%s3093_s1 + $0x74] sm:$0xf0]  ;;  %v1390_v11 = vld [vmem:[%s3093_s1 + $0x60] sm:$0xf] }
   0x2   :  { %v1462_v2 = vld [vmem:[%s3093_s1 + $0xf0] sm:$0xf]  ;;  %v1399_v3 = vor.u32 %v1940_v1, %v1398_v0  ;;  %v1956_v4 = vld [vmem:[%s3093_s1 + $0xf4] sm:$0xf0]  ;;  %v1938_v13 = vld [vmem:[%s3093_s1 + $0x64] sm:$0xf0] }
   0x3   :  { %v1526_v5 = vld [vmem:[%s3093_s1 + $0x170] sm:$0xf]  ;;  %v1972_v6 = vld [vmem:[%s3093_s1 + $0x174] sm:$0xf0]  ;;  %v1463_v7 = vor.u32 %v1956_v4, %v1462_v2  ;;  %v1454_v14 = vld [vmem:[%s3093_s1 + $0xe0] sm:$0xf]  ;;  %v1391_v16 = vor.u32 %v1938_v13, %v1390_v11 }
   0x4   :  { %v1527_v8 = vor.u32 %v1972_v6, %v1526_v5  ;;  %v1590_v9 = vld [vmem:[%s3093_s1 + $0x1f0] sm:$0xf]  ;;  %v1988_v10 = vld [vmem:[%s3093_s1 + $0x1f4] sm:$0xf0]  ;;  %937 = vmatpush.bf16.msra.mxu0 %v1399_v3  ;;  %v1954_v15 = vld [vmem:[%s3093_s1 + $0xe4] sm:$0xf0] }
   0x5   :  { %v1591_v12 = vor.u32 %v1988_v10, %v1590_v9  ;;  %951 = vmatpush.bf16.msra.mxu1 %v1463_v7  ;;  %v1455_v17 = vor.u32 %v1954_v15, %v1454_v14  ;;  %v1518_v18 = vld [vmem:[%s3093_s1 + $0x160] sm:$0xf]  ;;  %v1970_v19 = vld [vmem:[%s3093_s1 + $0x164] sm:$0xf0]  ;;  %v1382_v23 = vld [vmem:[%s3093_s1 + $0x50] sm:$0xf] }
   0x6   :  { %965 = vmatpush.bf16.msra.mxu2 %v1527_v8  ;;  %v1582_v20 = vld [vmem:[%s3093_s1 + $0x1e0] sm:$0xf]  ;;  %v1519_v21 = vor.u32 %v1970_v19, %v1518_v18  ;;  %v1986_v22 = vld [vmem:[%s3093_s1 + $0x1e4] sm:$0xf0]  ;;  %v1936_v24 = vld [vmem:[%s3093_s1 + $0x54] sm:$0xf0] }
   0x7   :  { %979 = vmatpush.bf16.msra.mxu3 %v1591_v12  ;;  %v1583_v25 = vor.u32 %v1986_v22, %v1582_v20  ;;  %v1446_v26 = vld [vmem:[%s3093_s1 + $0xd0] sm:$0xf]  ;;  %v1952_v27 = vld [vmem:[%s3093_s1 + $0xd4] sm:$0xf0]  ;;  %v1383_v29 = vor.u32 %v1936_v24, %v1382_v23  ;;  %v1374_v35 = vld [vmem:[%s3093_s1 + $0x40] sm:$0xf] }
   0x8   :  { %v1510_v28 = vld [vmem:[%s3093_s1 + $0x150] sm:$0xf]  ;;  %938 = vmatpush.bf16.msra.mxu0 %v1391_v16  ;;  %v1968_v30 = vld [vmem:[%s3093_s1 + $0x154] sm:$0xf0]  ;;  %v1447_v33 = vor.u32 %v1952_v27, %v1446_v26  ;;  %v1934_v36 = vld [vmem:[%s3093_s1 + $0x44] sm:$0xf0] }
   0x9   :  { %v1574_v31 = vld [vmem:[%s3093_s1 + $0x1d0] sm:$0xf]  ;;  %v1984_v32 = vld [vmem:[%s3093_s1 + $0x1d4] sm:$0xf0]  ;;  %952 = vmatpush.bf16.msra.mxu1 %v1455_v17  ;;  %v1511_v34 = vor.u32 %v1968_v30, %v1510_v28  ;;  %v1438_v37 = vld [vmem:[%s3093_s1 + $0xc0] sm:$0xf]  ;;  %v1375_v44 = vor.u32 %v1934_v36, %v1374_v35 }
   0xa   :  { %966 = vmatpush.bf16.msra.mxu2 %v1519_v21  ;;  %v1575_v38 = vor.u32 %v1984_v32, %v1574_v31  ;;  %v1950_v39 = vld [vmem:[%s3093_s1 + $0xc4] sm:$0xf0]  ;;  %v1502_v40 = vld [vmem:[%s3093_s1 + $0x140] sm:$0xf]  ;;  %v1366_v47 = vld [vmem:[%s3093_s1 + $0x30] sm:$0xf] }
   0xb   :  { %980 = vmatpush.bf16.msra.mxu3 %v1583_v25  ;;  %v1966_v41 = vld [vmem:[%s3093_s1 + $0x144] sm:$0xf0]  ;;  %v1566_v42 = vld [vmem:[%s3093_s1 + $0x1c0] sm:$0xf]  ;;  %v1439_v45 = vor.u32 %v1950_v39, %v1438_v37  ;;  %v1932_v48 = vld [vmem:[%s3093_s1 + $0x34] sm:$0xf0] }
   0xc   :  { %v1982_v43 = vld [vmem:[%s3093_s1 + $0x1c4] sm:$0xf0]  ;;  %939 = vmatpush.bf16.msra.mxu0 %v1383_v29  ;;  %v1503_v46 = vor.u32 %v1966_v41, %v1502_v40  ;;  %v1430_v49 = vld [vmem:[%s3093_s1 + $0xb0] sm:$0xf]  ;;  %v1948_v51 = vld [vmem:[%s3093_s1 + $0xb4] sm:$0xf0]  ;;  %v1367_v56 = vor.u32 %v1932_v48, %v1366_v47 }
   0xd   :  { %953 = vmatpush.bf16.msra.mxu1 %v1447_v33  ;;  %v1567_v50 = vor.u32 %v1982_v43, %v1566_v42  ;;  %v1494_v52 = vld [vmem:[%s3093_s1 + $0x130] sm:$0xf]  ;;  %v1964_v53 = vld [vmem:[%s3093_s1 + $0x134] sm:$0xf0]  ;;  %v1431_v57 = vor.u32 %v1948_v51, %v1430_v49  ;;  %v1358_v59 = vld [vmem:[%s3093_s1 + $0x20] sm:$0xf] }
   0xe   :  { %967 = vmatpush.bf16.msra.mxu2 %v1511_v34  ;;  %v1558_v54 = vld [vmem:[%s3093_s1 + $0x1b0] sm:$0xf]  ;;  %v1980_v55 = vld [vmem:[%s3093_s1 + $0x1b4] sm:$0xf0]  ;;  %v1495_v58 = vor.u32 %v1964_v53, %v1494_v52  ;;  %v1930_v60 = vld [vmem:[%s3093_s1 + $0x24] sm:$0xf0] }
   0xf   :  { %981 = vmatpush.bf16.msra.mxu3 %v1575_v38  ;;  %v1422_v61 = vld [vmem:[%s3093_s1 + $0xa0] sm:$0xf]  ;;  %v1559_v62 = vor.u32 %v1980_v55, %v1558_v54  ;;  %v1946_v63 = vld [vmem:[%s3093_s1 + $0xa4] sm:$0xf0]  ;;  %v1359_v4 = vor.u32 %v1930_v60, %v1358_v59  ;;  %v1350_v7 = vld [vmem:[%s3093_s1 + $0x10] sm:$0xf] }
  0x10   :  { %940 = vmatpush.bf16.msra.mxu0 %v1375_v44  ;;  %v1486_v0 = vld [vmem:[%s3093_s1 + $0x120] sm:$0xf]  ;;  %v1962_v1 = vld [vmem:[%s3093_s1 + $0x124] sm:$0xf0]  ;;  %v1423_v5 = vor.u32 %v1946_v63, %v1422_v61  ;;  %v1928_v8 = vld [vmem:[%s3093_s1 + $0x14] sm:$0xf0] }
  0x11   :  { %954 = vmatpush.bf16.msra.mxu1 %v1439_v45  ;;  %v1550_v2 = vld [vmem:[%s3093_s1 + $0x1a0] sm:$0xf]  ;;  %v1978_v3 = vld [vmem:[%s3093_s1 + $0x1a4] sm:$0xf0]  ;;  %v1487_v6 = vor.u32 %v1962_v1, %v1486_v0  ;;  %v1414_v9 = vld [vmem:[%s3093_s1 + $0x90] sm:$0xf]  ;;  %v1351_v16 = vor.u32 %v1928_v8, %v1350_v7 }
  0x12   :  { %968 = vmatpush.bf16.msra.mxu2 %v1503_v46  ;;  %v1551_v10 = vor.u32 %v1978_v3, %v1550_v2  ;;  %v1944_v11 = vld [vmem:[%s3093_s1 + $0x94] sm:$0xf0]  ;;  %v1478_v12 = vld [vmem:[%s3093_s1 + $0x110] sm:$0xf]  ;;  %v1342_v17 = vld [vmem:[%s3093_s1] sm:$0xf] }
  0x13   :  { %982 = vmatpush.bf16.msra.mxu3 %v1567_v50  ;;  %v1960_v13 = vld [vmem:[%s3093_s1 + $0x114] sm:$0xf0]  ;;  %v1542_v14 = vld [vmem:[%s3093_s1 + $0x190] sm:$0xf]  ;;  %v1926_v18 = vld [vmem:[%s3093_s1 + $0x4] sm:$0xf0]  ;;  %v1415_v19 = vor.u32 %v1944_v11, %v1414_v9 }
  0x14   :  { %941 = vmatpush.bf16.msra.mxu0 %v1367_v56  ;;  %v1976_v15 = vld [vmem:[%s3093_s1 + $0x194] sm:$0xf0]  ;;  %v1479_v20 = vor.u32 %v1960_v13, %v1478_v12  ;;  %v1406_v21 = vld [vmem:[%s3093_s1 + $0x80] sm:$0xf]  ;;  %v1942_v22 = vld [vmem:[%s3093_s1 + $0x84] sm:$0xf0]  ;;  %v1343_v31 = vor.u32 %v1926_v18, %v1342_v17 }
  0x15   :  { %955 = vmatpush.bf16.msra.mxu1 %v1431_v57  ;;  %v1470_v23 = vld [vmem:[%s3093_s1 + $0x100] sm:$0xf]  ;;  %v1543_v24 = vor.u32 %v1976_v15, %v1542_v14  ;;  %v1958_v25 = vld [vmem:[%s3093_s1 + $0x104] sm:$0xf0]  ;;  %v1654_v26 = vld [vmem:[%s3093_s1 + $0x270] sm:$0xf]  ;;  %v1407_v35 = vor.u32 %v1942_v22, %v1406_v21 }
  0x16   :  { %969 = vmatpush.bf16.msra.mxu2 %v1495_v58  ;;  %v2004_v27 = vld [vmem:[%s3093_s1 + $0x274] sm:$0xf0]  ;;  %v1718_v28 = vld [vmem:[%s3093_s1 + $0x2f0] sm:$0xf]  ;;  %v1534_v33 = vld [vmem:[%s3093_s1 + $0x180] sm:$0xf]  ;;  %v1471_v36 = vor.u32 %v1958_v25, %v1470_v23 }
  0x17   :  { %983 = vmatpush.bf16.msra.mxu3 %v1559_v62  ;;  %v2020_v29 = vld [vmem:[%s3093_s1 + $0x2f4] sm:$0xf0]  ;;  %v1782_v30 = vld [vmem:[%s3093_s1 + $0x370] sm:$0xf]  ;;  %v1974_v34 = vld [vmem:[%s3093_s1 + $0x184] sm:$0xf0]  ;;  %v1655_v39 = vor.u32 %v2004_v27, %v1654_v26 }
  0x18   :  { %942 = vmatpush.bf16.msra.mxu0 %v1359_v4  ;;  %v2036_v32 = vld [vmem:[%s3093_s1 + $0x374] sm:$0xf0]  ;;  %v1846_v37 = vld [vmem:[%s3093_s1 + $0x3f0] sm:$0xf]  ;;  %v1719_v40 = vor.u32 %v2020_v29, %v1718_v28  ;;  %v1646_v41 = vld [vmem:[%s3093_s1 + $0x260] sm:$0xf]  ;;  %v1535_v44 = vor.u32 %v1974_v34, %v1534_v33 }
  0x19   :  { %956 = vmatpush.bf16.msra.mxu1 %v1423_v5  ;;  %v2052_v38 = vld [vmem:[%s3093_s1 + $0x3f4] sm:$0xf0]  ;;  %v2002_v42 = vld [vmem:[%s3093_s1 + $0x264] sm:$0xf0]  ;;  %v1783_v43 = vor.u32 %v2036_v32, %v1782_v30  ;;  %v1710_v45 = vld [vmem:[%s3093_s1 + $0x2e0] sm:$0xf] }
  0x1a   :  { %970 = vmatpush.bf16.msra.mxu2 %v1487_v6  ;;  %v2018_v46 = vld [vmem:[%s3093_s1 + $0x2e4] sm:$0xf0]  ;;  %v1774_v47 = vld [vmem:[%s3093_s1 + $0x360] sm:$0xf]  ;;  %v1847_v48 = vor.u32 %v2052_v38, %v1846_v37  ;;  %v1638_v52 = vld [vmem:[%s3093_s1 + $0x250] sm:$0xf]  ;;  %v1647_v56 = vor.u32 %v2002_v42, %v1646_v41 }
  0x1b   :  { %984 = vmatpush.bf16.msra.mxu3 %v1551_v10  ;;  %v2034_v49 = vld [vmem:[%s3093_s1 + $0x364] sm:$0xf0]  ;;  %v1838_v50 = vld [vmem:[%s3093_s1 + $0x3e0] sm:$0xf]  ;;  %v1920_v54 = vld [vmem:[%s3094_s0 + $0x20] sm:$0xf0]  ;;  %v1711_v57 = vor.u32 %v2018_v46, %v1710_v45 }
  0x1c   :  { %943 = vmatpush.bf16.msra.mxu0 %v1351_v16  ;;  %v2050_v51 = vld [vmem:[%s3093_s1 + $0x3e4] sm:$0xf0]  ;;  %v1306_v53 = vld [vmem:[%s3094_s0] sm:$0xf]  ;;  %v2000_v58 = vld [vmem:[%s3093_s1 + $0x254] sm:$0xf0]  ;;  %v1775_v62 = vor.u32 %v2034_v49, %v1774_v47 }
  0x1d   :  { %957 = vmatpush.bf16.msra.mxu1 %v1415_v19  ;;  %v1314_v55 = vld [vmem:[%s3094_s0 + $0x8] sm:$0xf]  ;;  %v1702_v59 = vld [vmem:[%s3093_s1 + $0x2d0] sm:$0xf]  ;;  %v2356_v60 = vor.u32 %v1920_v54, %v1306_v53  ;;  %v1921_v61 = vld [vmem:[%s3094_s0 + $0x28] sm:$0xf0]  ;;  %v1839_v3 = vor.u32 %v2050_v51, %v1838_v50  ;;  %v1639_v11 = vor.u32 %v2000_v58, %v1638_v52 }
  0x1e   :  { %971 = vmatpush.bf16.msra.mxu2 %v1479_v20  ;;  %v2016_v63 = vld [vmem:[%s3093_s1 + $0x2d4] sm:$0xf0]  ;;  %v1766_v0 = vld [vmem:[%s3093_s1 + $0x350] sm:$0xf]  ;;  %v2370_v2 = vor.u32 %v1921_v61, %v1314_v55  ;;  %v1916_v5 = vld [vmem:[%s3094_s0 + $0x4] sm:$0xf] }
  0x1f   :  { %985 = vmatpush.bf16.msra.mxu3 %v1543_v24  ;;  %v2032_v1 = vld [vmem:[%s3093_s1 + $0x354] sm:$0xf0]  ;;  %v1830_v4 = vld [vmem:[%s3093_s1 + $0x3d0] sm:$0xf]  ;;  %v1308_v6 = vld [vmem:[%s3094_s0 + $0x24] sm:$0xf0]  ;;  %v1703_v12 = vor.u32 %v2016_v63, %v1702_v59 }
  0x20   :  { %944 = vmatpush.bf16.msra.mxu0 %v1343_v31  ;;  %v2048_v7 = vld [vmem:[%s3093_s1 + $0x3d4] sm:$0xf0]  ;;  %v2386_v8 = vor.u32 %v1916_v5, %v1308_v6  ;;  %v1917_v9 = vld [vmem:[%s3094_s0 + $0xc] sm:$0xf]  ;;  %v1316_v10 = vld [vmem:[%s3094_s0 + $0x2c] sm:$0xf0]  ;;  %v1767_v15 = vor.u32 %v2032_v1, %v1766_v0 }
  0x21   :  { %958 = vmatpush.bf16.msra.mxu1 %v1407_v35  ;;  %v1630_v13 = vld [vmem:[%s3093_s1 + $0x240] sm:$0xf]  ;;  %v2397_v14 = vor.u32 %v1917_v9, %v1316_v10  ;;  %v1998_v16 = vld [vmem:[%s3093_s1 + $0x244] sm:$0xf0]  ;;  %v1831_v19 = vor.u32 %v2048_v7, %v1830_v4  ;;  %v1622_v26 = vld [vmem:[%s3093_s1 + $0x230] sm:$0xf] }
  0x22   :  { %972 = vmatpush.bf16.msra.mxu2 %v1471_v36  ;;  %v1694_v17 = vld [vmem:[%s3093_s1 + $0x2c0] sm:$0xf]  ;;  %v2014_v18 = vld [vmem:[%s3093_s1 + $0x2c4] sm:$0xf0]  ;;  %v1631_v24 = vor.u32 %v1998_v16, %v1630_v13  ;;  %v1996_v28 = vld [vmem:[%s3093_s1 + $0x234] sm:$0xf0] }
  0x23   :  { %986 = vmatpush.bf16.msra.mxu3 %v1535_v44  ;;  %945 = vmatmul.bf16.vlgmr.msra.gmra.mxu0 %v2356_v60  ;;  %v1758_v20 = vld [vmem:[%s3093_s1 + $0x340] sm:$0xf]  ;;  %v2030_v21 = vld [vmem:[%s3093_s1 + $0x344] sm:$0xf0]  ;;  %v1695_v25 = vor.u32 %v2014_v18, %v1694_v17  ;;  %v1686_v29 = vld [vmem:[%s3093_s1 + $0x2b0] sm:$0xf]  ;;  %v1623_v36 = vor.u32 %v1996_v28, %v1622_v26 }
  0x24   :  { %993 = vmatpush.bf16.msrb.mxu0 %v1655_v39  ;;  %959 = vmatmul.bf16.vlgmr.msra.gmra.mxu1 %v2386_v8  ;;  %v1822_v22 = vld [vmem:[%s3093_s1 + $0x3c0] sm:$0xf]  ;;  %v2046_v23 = vld [vmem:[%s3093_s1 + $0x3c4] sm:$0xf0]  ;;  %v1759_v27 = vor.u32 %v2030_v21, %v1758_v20  ;;  %v2012_v30 = vld [vmem:[%s3093_s1 + $0x2b4] sm:$0xf0] }
  0x25   :  { %1007 = vmatpush.bf16.msrb.mxu1 %v1719_v40  ;;  %973 = vmatmul.bf16.vlgmr.msra.gmra.mxu2 %v2370_v2  ;;  %v1823_v31 = vor.u32 %v2046_v23, %v1822_v22  ;;  %v1750_v32 = vld [vmem:[%s3093_s1 + $0x330] sm:$0xf]  ;;  %v2028_v33 = vld [vmem:[%s3093_s1 + $0x334] sm:$0xf0]  ;;  %v1687_v37 = vor.u32 %v2012_v30, %v1686_v29  ;;  %v1614_v38 = vld [vmem:[%s3093_s1 + $0x220] sm:$0xf] }
  0x26   :  { %1021 = vmatpush.bf16.msrb.mxu2 %v1783_v43  ;;  %987 = vmatmul.bf16.vlgmr.msra.gmra.mxu3 %v2397_v14  ;;  %v1814_v34 = vld [vmem:[%s3093_s1 + $0x3b0] sm:$0xf]  ;;  %v2044_v35 = vld [vmem:[%s3093_s1 + $0x3b4] sm:$0xf0]  ;;  %v1751_v39 = vor.u32 %v2028_v33, %v1750_v32  ;;  %v1994_v40 = vld [vmem:[%s3093_s1 + $0x224] sm:$0xf0] }
  0x27   :  { %1035 = vmatpush.bf16.msrb.mxu3 %v1847_v48  ;;  %v1678_v41 = vld [vmem:[%s3093_s1 + $0x2a0] sm:$0xf]  ;;  %v2010_v42 = vld [vmem:[%s3093_s1 + $0x2a4] sm:$0xf0]  ;;  %v1815_v43 = vor.u32 %v2044_v35, %v1814_v34  ;;  %v1615_v48 = vor.u32 %v1994_v40, %v1614_v38  ;;  %v1606_v50 = vld [vmem:[%s3093_s1 + $0x210] sm:$0xf] }
  0x28   :  { %994 = vmatpush.bf16.msrb.mxu0 %v1647_v56  ;;  %v1742_v44 = vld [vmem:[%s3093_s1 + $0x320] sm:$0xf]  ;;  %v2026_v45 = vld [vmem:[%s3093_s1 + $0x324] sm:$0xf0]  ;;  %v1679_v49 = vor.u32 %v2010_v42, %v1678_v41  ;;  %v1992_v51 = vld [vmem:[%s3093_s1 + $0x214] sm:$0xf0] }
  0x29   :  { %1008 = vmatpush.bf16.msrb.mxu1 %v1711_v57  ;;  %v1806_v46 = vld [vmem:[%s3093_s1 + $0x3a0] sm:$0xf]  ;;  %v2042_v47 = vld [vmem:[%s3093_s1 + $0x3a4] sm:$0xf0]  ;;  %v1743_v52 = vor.u32 %v2026_v45, %v1742_v44  ;;  %v1670_v53 = vld [vmem:[%s3093_s1 + $0x290] sm:$0xf]  ;;  %v1607_v1 = vor.u32 %v1992_v51, %v1606_v50 }
  0x2a   :  { %1022 = vmatpush.bf16.msrb.mxu2 %v1775_v62  ;;  %v2008_v54 = vld [vmem:[%s3093_s1 + $0x294] sm:$0xf0]  ;;  %v1734_v55 = vld [vmem:[%s3093_s1 + $0x310] sm:$0xf]  ;;  %v1807_v56 = vor.u32 %v2042_v47, %v1806_v46  ;;  %v1598_v61 = vld [vmem:[%s3093_s1 + $0x200] sm:$0xf] }
  0x2b   :  { %1036 = vmatpush.bf16.msrb.mxu3 %v1839_v3  ;;  %v2024_v57 = vld [vmem:[%s3093_s1 + $0x314] sm:$0xf0]  ;;  %v1798_v58 = vld [vmem:[%s3093_s1 + $0x390] sm:$0xf]  ;;  %v1990_v62 = vld [vmem:[%s3093_s1 + $0x204] sm:$0xf0]  ;;  %v1671_v3 = vor.u32 %v2008_v54, %v1670_v53 }
  0x2c   :  { %995 = vmatpush.bf16.msrb.mxu0 %v1639_v11  ;;  %v2040_v59 = vld [vmem:[%s3093_s1 + $0x394] sm:$0xf0]  ;;  %v1662_v63 = vld [vmem:[%s3093_s1 + $0x280] sm:$0xf]  ;;  %v2006_v0 = vld [vmem:[%s3093_s1 + $0x284] sm:$0xf0]  ;;  %v1735_v7 = vor.u32 %v2024_v57, %v1734_v55  ;;  %v1599_v20 = vor.u32 %v1990_v62, %v1598_v61 }
  0x2d   :  { %1009 = vmatpush.bf16.msrb.mxu1 %v1703_v12  ;;  %v1726_v4 = vld [vmem:[%s3093_s1 + $0x300] sm:$0xf]  ;;  %v2022_v5 = vld [vmem:[%s3093_s1 + $0x304] sm:$0xf0]  ;;  %v1910_v6 = vld [vmem:[%s3093_s1 + $0x470] sm:$0xf]  ;;  %v1799_v12 = vor.u32 %v2040_v59, %v1798_v58  ;;  %v1663_v21 = vor.u32 %v2006_v0, %v1662_v63 }
  0x2e   :  { %1023 = vmatpush.bf16.msrb.mxu2 %v1767_v15  ;;  %v2068_v9 = vld [vmem:[%s3093_s1 + $0x474] sm:$0xf0]  ;;  %v1939_v10 = vld [vmem:[%s3093_s1 + $0x74] sm:$0xf]  ;;  %v1400_v11 = vld [vmem:[%s3093_s1 + $0x78] sm:$0xf0] }
  0x2f   :  { %1037 = vmatpush.bf16.msrb.mxu3 %v1831_v19  ;;  %v1955_v13 = vld [vmem:[%s3093_s1 + $0xf4] sm:$0xf]  ;;  %v1464_v15 = vld [vmem:[%s3093_s1 + $0xf8] sm:$0xf0]  ;;  %v1790_v16 = vld [vmem:[%s3093_s1 + $0x380] sm:$0xf]  ;;  %v1911_v26 = vor.u32 %v2068_v9, %v1910_v6  ;;  %v1403_v30 = vor.u32 %v1939_v10, %v1400_v11 }
  0x30   :  { %996 = vmatpush.bf16.msrb.mxu0 %v1631_v24  ;;  %v2038_v17 = vld [vmem:[%s3093_s1 + $0x384] sm:$0xf0]  ;;  %v1322_v18 = vld [vmem:[%s3094_s0 + $0x10] sm:$0xf]  ;;  %v1922_v19 = vld [vmem:[%s3094_s0 + $0x30] sm:$0xf0] }
  0x31   :  { %1010 = vmatpush.bf16.msrb.mxu1 %v1695_v25  ;;  %v1330_v22 = vld [vmem:[%s3094_s0 + $0x18] sm:$0xf]  ;;  %v1923_v23 = vld [vmem:[%s3094_s0 + $0x38] sm:$0xf0]  ;;  %v1971_v24 = vld [vmem:[%s3093_s1 + $0x174] sm:$0xf]  ;;  %v1727_v25 = vor.u32 %v2022_v5, %v1726_v4  ;;  %v1791_v35 = vor.u32 %v2038_v17, %v1790_v16 }
  0x32   :  { %1024 = vmatpush.bf16.msrb.mxu2 %v1759_v27  ;;  %v1528_v27 = vld [vmem:[%s3093_s1 + $0x178] sm:$0xf0]  ;;  %v1918_v28 = vld [vmem:[%s3094_s0 + $0x14] sm:$0xf]  ;;  %v1324_v29 = vld [vmem:[%s3094_s0 + $0x34] sm:$0xf0]  ;;  %v2580_v40 = vor.u32 %v1923_v23, %v1330_v22 }
  0x33   :  { %1038 = vmatpush.bf16.msrb.mxu3 %v1823_v31  ;;  %v1467_v31 = vor.u32 %v1955_v13, %v1464_v15  ;;  %v1919_v32 = vld [vmem:[%s3094_s0 + $0x1c] sm:$0xf]  ;;  %v1902_v33 = vld [vmem:[%s3093_s1 + $0x460] sm:$0xf]  ;;  %v2066_v34 = vld [vmem:[%s3093_s1 + $0x464] sm:$0xf0]  ;;  %v1531_v41 = vor.u32 %v1971_v24, %v1528_v27  ;;  %v2588_v44 = vor.u32 %v1918_v28, %v1324_v29 }
  0x34   :  { %997 = vmatpush.bf16.msrb.mxu0 %v1623_v36  ;;  %v2569_v36 = vor.u32 %v1922_v19, %v1322_v18  ;;  %v1937_v38 = vld [vmem:[%s3093_s1 + $0x64] sm:$0xf]  ;;  %v1903_v45 = vor.u32 %v2066_v34, %v1902_v33  ;;  %v1520_v47 = vld [vmem:[%s3093_s1 + $0x168] sm:$0xf0]  ;;  %v1894_v50 = vld [vmem:[%s3093_s1 + $0x450] sm:$0xf] }
  0x35   :  { %1011 = vmatpush.bf16.msrb.mxu1 %v1687_v37  ;;  %v1332_v37 = vld [vmem:[%s3094_s0 + $0x3c] sm:$0xf0]  ;;  %v1953_v42 = vld [vmem:[%s3093_s1 + $0xe4] sm:$0xf]  ;;  %v2064_v51 = vld [vmem:[%s3093_s1 + $0x454] sm:$0xf0] }
  0x36   :  { %1025 = vmatpush.bf16.msrb.mxu2 %v1751_v39  ;;  %v1392_v39 = vld [vmem:[%s3093_s1 + $0x68] sm:$0xf0]  ;;  %v1969_v46 = vld [vmem:[%s3093_s1 + $0x164] sm:$0xf]  ;;  %v1935_v53 = vld [vmem:[%s3093_s1 + $0x54] sm:$0xf]  ;;  %v1895_v58 = vor.u32 %v2064_v51, %v1894_v50 }
  0x37   :  { %1039 = vmatpush.bf16.msrb.mxu3 %v1815_v43  ;;  %v1456_v43 = vld [vmem:[%s3093_s1 + $0xe8] sm:$0xf0]  ;;  %v1384_v54 = vld [vmem:[%s3093_s1 + $0x58] sm:$0xf0]  ;;  %v1523_v55 = vor.u32 %v1969_v46, %v1520_v47  ;;  %v1967_v59 = vld [vmem:[%s3093_s1 + $0x154] sm:$0xf] }
  0x38   :  { %998 = vmatpush.bf16.msrb.mxu0 %v1615_v48  ;;  %v2596_v48 = vor.u32 %v1919_v32, %v1332_v37  ;;  %v1448_v57 = vld [vmem:[%s3093_s1 + $0xd8] sm:$0xf0]  ;;  %v1387_v62 = vor.u32 %v1935_v53, %v1384_v54  ;;  %v1886_v63 = vld [vmem:[%s3093_s1 + $0x440] sm:$0xf]  ;;  %v2062_v0 = vld [vmem:[%s3093_s1 + $0x444] sm:$0xf0] }
  0x39   :  { %1012 = vmatpush.bf16.msrb.mxu1 %v1679_v49  ;;  %v1395_v49 = vor.u32 %v1937_v38, %v1392_v39  ;;  %v1512_v61 = vld [vmem:[%s3093_s1 + $0x158] sm:$0xf0]  ;;  %v1376_v4 = vld [vmem:[%s3093_s1 + $0x48] sm:$0xf0]  ;;  %v1949_v6 = vld [vmem:[%s3093_s1 + $0xc4] sm:$0xf]  ;;  %v1887_v9 = vor.u32 %v2062_v0, %v1886_v63 }
  0x3a   :  { %1026 = vmatpush.bf16.msrb.mxu2 %v1743_v52  ;;  %v1459_v52 = vor.u32 %v1953_v42, %v1456_v43  ;;  %v1515_v5 = vor.u32 %v1967_v59, %v1512_v61  ;;  %v1965_v10 = vld [vmem:[%s3093_s1 + $0x144] sm:$0xf]  ;;  %v1504_v11 = vld [vmem:[%s3093_s1 + $0x148] sm:$0xf0]  ;;  %v1878_v13 = vld [vmem:[%s3093_s1 + $0x430] sm:$0xf] }
  0x3b   :  { %1040 = vmatpush.bf16.msrb.mxu3 %v1807_v56  ;;  %v1951_v56 = vld [vmem:[%s3093_s1 + $0xd4] sm:$0xf]  ;;  %v2060_v15 = vld [vmem:[%s3093_s1 + $0x434] sm:$0xf0]  ;;  %v1368_v18 = vld [vmem:[%s3093_s1 + $0x38] sm:$0xf0]  ;;  %v1507_v19 = vor.u32 %v1965_v10, %v1504_v11 }
  0x3c   :  { %999 = vmatpush.bf16.msrb.mxu0 %v1607_v1  ;;  %v1451_v1 = vor.u32 %v1951_v56, %v1448_v57  ;;  %v1931_v17 = vld [vmem:[%s3093_s1 + $0x34] sm:$0xf]  ;;  %v1879_v22 = vor.u32 %v2060_v15, %v1878_v13  ;;  %v1496_v24 = vld [vmem:[%s3093_s1 + $0x138] sm:$0xf0]  ;;  %v2058_v27 = vld [vmem:[%s3093_s1 + $0x424] sm:$0xf0] }
  0x3d   :  { %1013 = vmatpush.bf16.msrb.mxu1 %v1671_v3  ;;  %v1933_v3 = vld [vmem:[%s3093_s1 + $0x44] sm:$0xf]  ;;  %v1963_v23 = vld [vmem:[%s3093_s1 + $0x134] sm:$0xf]  ;;  %v1424_v33 = vld [vmem:[%s3093_s1 + $0xa8] sm:$0xf0] }
  0x3e   :  { %1027 = vmatpush.bf16.msrb.mxu2 %v1735_v7  ;;  %v1440_v7 = vld [vmem:[%s3093_s1 + $0xc8] sm:$0xf0]  ;;  %v1929_v29 = vld [vmem:[%s3093_s1 + $0x24] sm:$0xf]  ;;  %v1862_v39 = vld [vmem:[%s3093_s1 + $0x410] sm:$0xf] }
  0x3f   :  { %1041 = vmatpush.bf16.msrb.mxu3 %v1799_v12  ;;  %v1379_v12 = vor.u32 %v1933_v3, %v1376_v4  ;;  %v1443_v16 = vor.u32 %v1949_v6, %v1440_v7  ;;  %v1945_v32 = vld [vmem:[%s3093_s1 + $0xa4] sm:$0xf]  ;;  %v1488_v37 = vld [vmem:[%s3093_s1 + $0x128] sm:$0xf0]  ;;  %v1927_v43 = vld [vmem:[%s3093_s1 + $0x14] sm:$0xf] }
  0x40   :  { %1000 = vmatpush.bf16.msrb.mxu0 %v1599_v20  ;;  %v1947_v20 = vld [vmem:[%s3093_s1 + $0xb4] sm:$0xf]  ;;  %v1427_v42 = vor.u32 %v1945_v32, %v1424_v33  ;;  %v1480_v51 = vld [vmem:[%s3093_s1 + $0x118] sm:$0xf0]  ;;  %v1854_v53 = vld [vmem:[%s3093_s1 + $0x400] sm:$0xf] }
  0x41   :  { %1014 = vmatpush.bf16.msrb.mxu1 %v1663_v21  ;;  %v1432_v21 = vld [vmem:[%s3093_s1 + $0xb8] sm:$0xf0]  ;;  %v1943_v46 = vld [vmem:[%s3093_s1 + $0x94] sm:$0xf]  ;;  %v2054_v54 = vld [vmem:[%s3093_s1 + $0x404] sm:$0xf0] }
  0x42   :  { %1028 = vmatpush.bf16.msrb.mxu2 %v1727_v25  ;;  %v1371_v25 = vor.u32 %v1931_v17, %v1368_v18  ;;  %v1435_v28 = vor.u32 %v1947_v20, %v1432_v21  ;;  %v1959_v50 = vld [vmem:[%s3093_s1 + $0x114] sm:$0xf]  ;;  %v1344_v57 = vld [vmem:[%s3093_s1 + $0x8] sm:$0xf0]  ;;  %v1592_v63 = vld [vmem:[%s3093_s1 + $0x1f8] sm:$0xf0]  ;;  %v1855_v6 = vor.u32 %v2054_v54, %v1854_v53 }
  0x43   :  { %1042 = vmatpush.bf16.msrb.mxu3 %v1791_v35  ;;  %1001 = vmatmul.bf16.vlgmr.msrb.gmra.mxu0 %v2569_v36  ;;  %v1961_v35 = vld [vmem:[%s3093_s1 + $0x124] sm:$0xf]  ;;  %v1408_v59 = vld [vmem:[%s3093_s1 + $0x88] sm:$0xf0]  ;;  %v2003_v0 = vld [vmem:[%s3093_s1 + $0x274] sm:$0xf] }
  0x44   :  { %1049 = vmatpush.bf16.msra.mxu0 %v1911_v26  ;;  %1015 = vmatmul.bf16.vlgmr.msrb.gmra.mxu1 %v2588_v44  ;;  %v1870_v26 = vld [vmem:[%s3093_s1 + $0x420] sm:$0xf]  ;;  %v1491_v47 = vor.u32 %v1961_v35, %v1488_v37  ;;  %v1656_v3 = vld [vmem:[%s3093_s1 + $0x278] sm:$0xf0]  ;;  %v2019_v4 = vld [vmem:[%s3093_s1 + $0x2f4] sm:$0xf] }
  0x45   :  { %1063 = vmatpush.bf16.msra.mxu1 %v1403_v30  ;;  %1029 = vmatmul.bf16.vlgmr.msrb.gmra.mxu2 %v2580_v40  ;;  %v1360_v30 = vld [vmem:[%s3093_s1 + $0x28] sm:$0xf0]  ;;  %v1871_v34 = vor.u32 %v2058_v27, %v1870_v26  ;;  %v1957_v7 = vld [vmem:[%s3093_s1 + $0x104] sm:$0xf]  ;;  %v1338_v10 = vld [vmem:[%s3094_s0 + $0x20] sm:$0xf]  ;;  %v1659_v18 = vor.u32 %v2003_v0, %v1656_v3 }
  0x46   :  { %1077 = vmatpush.bf16.msra.mxu2 %v1467_v31  ;;  %1043 = vmatmul.bf16.vlgmr.msrb.gmra.mxu3 %v2596_v48  ;;  %v1499_v31 = vor.u32 %v1963_v23, %v1496_v24  ;;  %v1363_v38 = vor.u32 %v1929_v29, %v1360_v30  ;;  %v1924_v13 = vld [vmem:[%s3094_s0 + $0x40] sm:$0xf0]  ;;  %v2035_v15 = vld [vmem:[%s3093_s1 + $0x374] sm:$0xf]  ;;  %v1584_v20 = vld [vmem:[%s3093_s1 + $0x1e8] sm:$0xf0] }
  0x47   :  { %1091 = vmatpush.bf16.msra.mxu3 %v1531_v41  ;;  %v2056_v41 = vld [vmem:[%s3093_s1 + $0x414] sm:$0xf0]  ;;  %v2001_v23 = vld [vmem:[%s3093_s1 + $0x264] sm:$0xf]  ;;  %v1648_v24 = vld [vmem:[%s3093_s1 + $0x268] sm:$0xf0] }
  0x48   :  { %1050 = vmatpush.bf16.msra.mxu0 %v1903_v45  ;;  %v1352_v45 = vld [vmem:[%s3093_s1 + $0x18] sm:$0xf0]  ;;  %v2017_v27 = vld [vmem:[%s3093_s1 + $0x2e4] sm:$0xf]  ;;  %v1651_v32 = vor.u32 %v2001_v23, %v1648_v24  ;;  %v1983_v33 = vld [vmem:[%s3093_s1 + $0x1d4] sm:$0xf] }
  0x49   :  { %1064 = vmatpush.bf16.msra.mxu1 %v1395_v49  ;;  %v1416_v49 = vld [vmem:[%s3093_s1 + $0x98] sm:$0xf0]  ;;  %v1355_v56 = vor.u32 %v1927_v43, %v1352_v45  ;;  %v2033_v30 = vld [vmem:[%s3093_s1 + $0x364] sm:$0xf]  ;;  %v1999_v37 = vld [vmem:[%s3093_s1 + $0x254] sm:$0xf] }
  0x4a   :  { %1078 = vmatpush.bf16.msra.mxu2 %v1459_v52  ;;  %v1863_v52 = vor.u32 %v2056_v41, %v1862_v39  ;;  %v1419_v61 = vor.u32 %v1943_v46, %v1416_v49  ;;  %v2015_v41 = vld [vmem:[%s3093_s1 + $0x2d4] sm:$0xf]  ;;  %v1768_v46 = vld [vmem:[%s3093_s1 + $0x358] sm:$0xf0]  ;;  %v1981_v49 = vld [vmem:[%s3093_s1 + $0x1c4] sm:$0xf] }
  0x4b   :  { %1092 = vmatpush.bf16.msra.mxu3 %v1523_v55  ;;  %v1925_v55 = vld [vmem:[%s3093_s1 + $0x4] sm:$0xf]  ;;  %v2031_v45 = vld [vmem:[%s3093_s1 + $0x354] sm:$0xf]  ;;  %v1688_v3 = vld [vmem:[%s3093_s1 + $0x2b8] sm:$0xf0] }
  0x4c   :  { %1051 = vmatpush.bf16.msra.mxu0 %v1895_v58  ;;  %v1941_v58 = vld [vmem:[%s3093_s1 + $0x84] sm:$0xf]  ;;  %v1347_v11 = vor.u32 %v1925_v55, %v1344_v57  ;;  %v1771_v53 = vor.u32 %v2031_v45, %v1768_v46  ;;  %v1544_v23 = vld [vmem:[%s3093_s1 + $0x198] sm:$0xf0] }
  0x4d   :  { %1065 = vmatpush.bf16.msra.mxu1 %v1387_v62  ;;  %v1987_v62 = vld [vmem:[%s3093_s1 + $0x1f4] sm:$0xf]  ;;  %v1411_v17 = vor.u32 %v1941_v58, %v1408_v59  ;;  %v2013_v54 = vld [vmem:[%s3093_s1 + $0x2c4] sm:$0xf]  ;;  %v1560_v59 = vld [vmem:[%s3093_s1 + $0x1b8] sm:$0xf0] }
  0x4e   :  { %1079 = vmatpush.bf16.msra.mxu2 %v1451_v1  ;;  %v1483_v1 = vor.u32 %v1959_v50, %v1480_v51  ;;  %v1568_v50 = vld [vmem:[%s3093_s1 + $0x1c8] sm:$0xf0]  ;;  %v1979_v58 = vld [vmem:[%s3093_s1 + $0x1b4] sm:$0xf]  ;;  %v1848_v45 = vld [vmem:[%s3093_s1 + $0x3f8] sm:$0xf0] }
  0x4f   :  { %1093 = vmatpush.bf16.msra.mxu3 %v1515_v5  ;;  %v1720_v5 = vld [vmem:[%s3093_s1 + $0x2f8] sm:$0xf0]  ;;  %v1571_v55 = vor.u32 %v1981_v49, %v1568_v50  ;;  %v2067_v49 = vld [vmem:[%s3093_s1 + $0x474] sm:$0xf] }
  0x50   :  { %1052 = vmatpush.bf16.msra.mxu0 %v1887_v9  ;;  %v1472_v9 = vld [vmem:[%s3093_s1 + $0x108] sm:$0xf0]  ;;  %v1723_v21 = vor.u32 %v2019_v4, %v1720_v5  ;;  %v1563_v4 = vor.u32 %v1979_v58, %v1560_v59  ;;  %v2027_v5 = vld [vmem:[%s3093_s1 + $0x334] sm:$0xf]  ;;  %v1912_v50 = vld [vmem:[%s3093_s1 + $0x478] sm:$0xf0] }
  0x51   :  { %1066 = vmatpush.bf16.msra.mxu1 %v1379_v12  ;;  %v1595_v12 = vor.u32 %v1987_v62, %v1592_v63  ;;  %v1995_v62 = vld [vmem:[%s3093_s1 + $0x234] sm:$0xf]  ;;  %v1624_v63 = vld [vmem:[%s3093_s1 + $0x238] sm:$0xf0]  ;;  %v2065_v58 = vld [vmem:[%s3093_s1 + $0x464] sm:$0xf] }
  0x52   :  { %1080 = vmatpush.bf16.msra.mxu2 %v1443_v16  ;;  %v1784_v16 = vld [vmem:[%s3093_s1 + $0x378] sm:$0xf0]  ;;  %v1904_v59 = vld [vmem:[%s3093_s1 + $0x468] sm:$0xf0] }
  0x53   :  { %1094 = vmatpush.bf16.msra.mxu3 %v1507_v19  ;;  %v1985_v19 = vld [vmem:[%s3093_s1 + $0x1e4] sm:$0xf]  ;;  %v1787_v26 = vor.u32 %v2035_v15, %v1784_v16 }
  0x54   :  { %1053 = vmatpush.bf16.msra.mxu0 %v1879_v22  ;;  %v1475_v22 = vor.u32 %v1957_v7, %v1472_v9  ;;  %v1587_v29 = vor.u32 %v1985_v19, %v1584_v20  ;;  %v1627_v7 = vor.u32 %v1995_v62, %v1624_v63  ;;  %v1977_v9 = vld [vmem:[%s3093_s1 + $0x1a4] sm:$0xf]  ;;  %v1744_v20 = vld [vmem:[%s3093_s1 + $0x328] sm:$0xf0]  ;;  %v1907_v62 = vor.u32 %v2065_v58, %v1904_v59  ;;  %v2047_v63 = vld [vmem:[%s3093_s1 + $0x3d4] sm:$0xf] }
  0x55   :  { %1067 = vmatpush.bf16.msra.mxu1 %v1371_v25  ;;  %v2788_v25 = vor.u32 %v1924_v13, %v1338_v10  ;;  %v1552_v10 = vld [vmem:[%s3093_s1 + $0x1a8] sm:$0xf0]  ;;  %v2009_v16 = vld [vmem:[%s3093_s1 + $0x2a4] sm:$0xf] }
  0x56   :  { %1081 = vmatpush.bf16.msra.mxu2 %v1435_v28  ;;  %v1712_v28 = vld [vmem:[%s3093_s1 + $0x2e8] sm:$0xf0]  ;;  %v2025_v19 = vld [vmem:[%s3093_s1 + $0x324] sm:$0xf] }
  0x57   :  { %1095 = vmatpush.bf16.msra.mxu3 %v1499_v31  ;;  %v1776_v31 = vld [vmem:[%s3093_s1 + $0x368] sm:$0xf0]  ;;  %v1715_v35 = vor.u32 %v2017_v27, %v1712_v28  ;;  %v1608_v27 = vld [vmem:[%s3093_s1 + $0x218] sm:$0xf0]  ;;  %v1747_v28 = vor.u32 %v2025_v19, %v1744_v20 }
  0x58   :  { %1054 = vmatpush.bf16.msra.mxu0 %v1871_v34  ;;  %v1576_v34 = vld [vmem:[%s3093_s1 + $0x1d8] sm:$0xf0]  ;;  %v1779_v39 = vor.u32 %v2033_v30, %v1776_v31  ;;  %v1616_v13 = vld [vmem:[%s3093_s1 + $0x228] sm:$0xf0] }
  0x59   :  { %1068 = vmatpush.bf16.msra.mxu1 %v1363_v38  ;;  %v1640_v38 = vld [vmem:[%s3093_s1 + $0x258] sm:$0xf0]  ;;  %v1579_v43 = vor.u32 %v1983_v33, %v1576_v34  ;;  %v1973_v34 = vld [vmem:[%s3093_s1 + $0x184] sm:$0xf]  ;;  %v1872_v19 = vld [vmem:[%s3093_s1 + $0x428] sm:$0xf0] }
  0x5a   :  { %1082 = vmatpush.bf16.msra.mxu2 %v1427_v42  ;;  %v1704_v42 = vld [vmem:[%s3093_s1 + $0x2d8] sm:$0xf0] }
  0x5b   :  { %1096 = vmatpush.bf16.msra.mxu3 %v1491_v47  ;;  %v1643_v47 = vor.u32 %v1999_v37, %v1640_v38  ;;  %v1707_v51 = vor.u32 %v2015_v41, %v1704_v42  ;;  %v1672_v30 = vld [vmem:[%s3093_s1 + $0x298] sm:$0xf0]  ;;  %v1536_v37 = vld [vmem:[%s3093_s1 + $0x188] sm:$0xf0]  ;;  %v1989_v38 = vld [vmem:[%s3093_s1 + $0x204] sm:$0xf] }
  0x5c   :  { %1055 = vmatpush.bf16.msra.mxu0 %v1863_v52  ;;  %v1997_v52 = vld [vmem:[%s3093_s1 + $0x244] sm:$0xf]  ;;  %v1736_v33 = vld [vmem:[%s3093_s1 + $0x318] sm:$0xf0] }
  0x5d   :  { %1069 = vmatpush.bf16.msra.mxu1 %v1355_v56  ;;  %v2029_v56 = vld [vmem:[%s3093_s1 + $0x344] sm:$0xf] }
  0x5e   :  { %1083 = vmatpush.bf16.msra.mxu2 %v1419_v61  ;;  %v2005_v42 = vld [vmem:[%s3093_s1 + $0x284] sm:$0xf] }
  0x5f   :  { %1097 = vmatpush.bf16.msra.mxu3 %v1483_v1  ;;  %v2011_v1 = vld [vmem:[%s3093_s1 + $0x2b4] sm:$0xf] }
  0x60   :  { %1056 = vmatpush.bf16.msra.mxu0 %v1855_v6  ;;  %v1752_v6 = vld [vmem:[%s3093_s1 + $0x338] sm:$0xf0] }
  0x61   :  { %1070 = vmatpush.bf16.msra.mxu1 %v1347_v11  ;;  %v1691_v11 = vor.u32 %v2011_v1, %v1688_v3  ;;  %v1755_v15 = vor.u32 %v2027_v5, %v1752_v6  ;;  %v2063_v1 = vld [vmem:[%s3093_s1 + $0x454] sm:$0xf]  ;;  %v1896_v3 = vld [vmem:[%s3093_s1 + $0x458] sm:$0xf0]  ;;  %v1824_v6 = vld [vmem:[%s3093_s1 + $0x3c8] sm:$0xf0] }
  0x62   :  { %1084 = vmatpush.bf16.msra.mxu2 %v1411_v17  ;;  %v1680_v17 = vld [vmem:[%s3093_s1 + $0x2a8] sm:$0xf0]  ;;  %v1899_v5 = vor.u32 %v2063_v1, %v1896_v3 }
  0x63   :  { %1098 = vmatpush.bf16.msra.mxu3 %v1475_v22  ;;  %1057 = vmatmul.bf16.vlgmr.msra.gmra.mxu0 %v2788_v25  ;;  %v1975_v22 = vld [vmem:[%s3093_s1 + $0x194] sm:$0xf]  ;;  %v1683_v24 = vor.u32 %v2009_v16, %v1680_v17  ;;  %v2041_v16 = vld [vmem:[%s3093_s1 + $0x3a4] sm:$0xf]  ;;  %v1808_v17 = vld [vmem:[%s3093_s1 + $0x3a8] sm:$0xf0] }
  0x64   :  { %1105 = vmatpush.bf16.msrb.mxu0 %v1595_v12  ;;  %1071 = vmatmul.bf16.vlgmr.msra.gmra.mxu1 %v2356_v60  ;;  %v1760_v60 = vld [vmem:[%s3093_s1 + $0x348] sm:$0xf0]  ;;  %v1993_v12 = vld [vmem:[%s3093_s1 + $0x224] sm:$0xf]  ;;  %v1547_v31 = vor.u32 %v1975_v22, %v1544_v23  ;;  %v1811_v20 = vor.u32 %v2041_v16, %v1808_v17  ;;  %v2039_v22 = vld [vmem:[%s3093_s1 + $0x394] sm:$0xf] }
  0x65   :  { %1119 = vmatpush.bf16.msrb.mxu1 %v1659_v18  ;;  %1085 = vmatmul.bf16.vlgmr.msra.gmra.mxu2 %v2386_v8  ;;  %v1632_v8 = vld [vmem:[%s3093_s1 + $0x248] sm:$0xf0]  ;;  %v1763_v0 = vor.u32 %v2029_v56, %v1760_v60  ;;  %v1555_v18 = vor.u32 %v1977_v9, %v1552_v10  ;;  %v2049_v56 = vld [vmem:[%s3093_s1 + $0x3e4] sm:$0xf]  ;;  %v2043_v9 = vld [vmem:[%s3093_s1 + $0x3b4] sm:$0xf] }
  0x66   :  { %1133 = vmatpush.bf16.msrb.mxu2 %v1723_v21  ;;  %1099 = vmatmul.bf16.vlgmr.msra.gmra.mxu3 %v2370_v2  ;;  %v1696_v2 = vld [vmem:[%s3093_s1 + $0x2c8] sm:$0xf0]  ;;  %v1635_v57 = vor.u32 %v1997_v52, %v1632_v8  ;;  %v1619_v21 = vor.u32 %v1993_v12, %v1616_v13  ;;  %v2021_v52 = vld [vmem:[%s3093_s1 + $0x304] sm:$0xf]  ;;  %v1816_v10 = vld [vmem:[%s3093_s1 + $0x3b8] sm:$0xf0] }
  0x67   :  { %1147 = vmatpush.bf16.msrb.mxu3 %v1787_v26  ;;  %v1699_v61 = vor.u32 %v2013_v54, %v1696_v2  ;;  %v1991_v26 = vld [vmem:[%s3093_s1 + $0x214] sm:$0xf]  ;;  %v1728_v8 = vld [vmem:[%s3093_s1 + $0x308] sm:$0xf0]  ;;  %v1880_v12 = vld [vmem:[%s3093_s1 + $0x438] sm:$0xf0]  ;;  %v1819_v13 = vor.u32 %v2043_v9, %v1816_v10 }
  0x68   :  { %1106 = vmatpush.bf16.msrb.mxu0 %v1587_v29  ;;  %v2007_v29 = vld [vmem:[%s3093_s1 + $0x294] sm:$0xf]  ;;  %v1840_v60 = vld [vmem:[%s3093_s1 + $0x3e8] sm:$0xf0]  ;;  %v1800_v23 = vld [vmem:[%s3093_s1 + $0x398] sm:$0xf0] }
  0x69   :  { %1120 = vmatpush.bf16.msrb.mxu1 %v1651_v32  ;;  %v2023_v32 = vld [vmem:[%s3093_s1 + $0x314] sm:$0xf]  ;;  %v1675_v41 = vor.u32 %v2007_v29, %v1672_v30  ;;  %v2037_v29 = vld [vmem:[%s3093_s1 + $0x384] sm:$0xf]  ;;  %v1792_v30 = vld [vmem:[%s3093_s1 + $0x388] sm:$0xf0] }
  0x6a   :  { %1134 = vmatpush.bf16.msrb.mxu2 %v1715_v35  ;;  %v1611_v35 = vor.u32 %v1991_v26, %v1608_v27  ;;  %v1739_v46 = vor.u32 %v2023_v32, %v1736_v33  ;;  %v1864_v26 = vld [vmem:[%s3093_s1 + $0x418] sm:$0xf0]  ;;  %v1803_v27 = vor.u32 %v2039_v22, %v1800_v23  ;;  %v1856_v32 = vld [vmem:[%s3093_s1 + $0x408] sm:$0xf0]  ;;  %v1795_v33 = vor.u32 %v2037_v29, %v1792_v30 }
  0x6b   :  { %1148 = vmatpush.bf16.msrb.mxu3 %v1779_v39  ;;  %v1600_v39 = vld [vmem:[%s3093_s1 + $0x208] sm:$0xf0] }
  0x6c   :  { %1107 = vmatpush.bf16.msrb.mxu0 %v1579_v43  ;;  %v2051_v43 = vld [vmem:[%s3093_s1 + $0x3f4] sm:$0xf] }
  0x6d   :  { %1121 = vmatpush.bf16.msrb.mxu1 %v1643_v47  ;;  %v1664_v47 = vld [vmem:[%s3093_s1 + $0x288] sm:$0xf0]  ;;  %v1851_v54 = vor.u32 %v2051_v43, %v1848_v45 }
  0x6e   :  { %1135 = vmatpush.bf16.msrb.mxu2 %v1707_v51  ;;  %v1539_v51 = vor.u32 %v1973_v34, %v1536_v37  ;;  %v1667_v2 = vor.u32 %v2005_v42, %v1664_v47 }
  0x6f   :  { %1149 = vmatpush.bf16.msrb.mxu3 %v1771_v53  ;;  %v1603_v53 = vor.u32 %v1989_v38, %v1600_v39 }
  0x70   :  { %1108 = vmatpush.bf16.msrb.mxu0 %v1571_v55  ;;  %v1915_v55 = vor.u32 %v2067_v49, %v1912_v50 }
  0x71   :  { %1122 = vmatpush.bf16.msrb.mxu1 %v1635_v57  ;;  %v1731_v57 = vor.u32 %v2021_v52, %v1728_v8 }
  0x72   :  { %1136 = vmatpush.bf16.msrb.mxu2 %v1699_v61  ;;  %v1843_v61 = vor.u32 %v2049_v56, %v1840_v60 }
  0x73   :  { %1150 = vmatpush.bf16.msrb.mxu3 %v1763_v0  ;;  %v1832_v0 = vld [vmem:[%s3093_s1 + $0x3d8] sm:$0xf0] }
  0x74   :  { %1109 = vmatpush.bf16.msrb.mxu0 %v1563_v4  ;;  %v1835_v4 = vor.u32 %v2047_v63, %v1832_v0 }
  0x75   :  { %1123 = vmatpush.bf16.msrb.mxu1 %v1627_v7 }
  0x76   :  { %1137 = vmatpush.bf16.msrb.mxu2 %v1691_v11  ;;  %v2059_v11 = vld [vmem:[%s3093_s1 + $0x434] sm:$0xf] }
  0x77   :  { %1151 = vmatpush.bf16.msrb.mxu3 %v1755_v15  ;;  %v1883_v15 = vor.u32 %v2059_v11, %v1880_v12 }
  0x78   :  { %1110 = vmatpush.bf16.msrb.mxu0 %v1555_v18  ;;  %v2057_v18 = vld [vmem:[%s3093_s1 + $0x424] sm:$0xf] }
  0x79   :  { %1124 = vmatpush.bf16.msrb.mxu1 %v1619_v21  ;;  %v1875_v21 = vor.u32 %v2057_v18, %v1872_v19 }
  0x7a   :  { %1138 = vmatpush.bf16.msrb.mxu2 %v1683_v24  ;;  %v2055_v24 = vld [vmem:[%s3093_s1 + $0x414] sm:$0xf] }
  0x7b   :  { %1152 = vmatpush.bf16.msrb.mxu3 %v1747_v28  ;;  %v1867_v28 = vor.u32 %v2055_v24, %v1864_v26 }
  0x7c   :  { %1111 = vmatpush.bf16.msrb.mxu0 %v1547_v31  ;;  %v2053_v31 = vld [vmem:[%s3093_s1 + $0x404] sm:$0xf] }
  0x7d   :  { %1125 = vmatpush.bf16.msrb.mxu1 %v1611_v35  ;;  %v1859_v34 = vor.u32 %v2053_v31, %v1856_v32 }
  0x7e   :  { %1139 = vmatpush.bf16.msrb.mxu2 %v1675_v41 }
  0x7f   :  { %1153 = vmatpush.bf16.msrb.mxu3 %v1739_v46 }
  0x80   :  { %1112 = vmatpush.bf16.msrb.mxu0 %v1539_v51 }
  0x81   :  { %1126 = vmatpush.bf16.msrb.mxu1 %v1603_v53 }
  0x82   :  { %1140 = vmatpush.bf16.msrb.mxu2 %v1667_v2 }
  0x83   :  { %1154 = vmatpush.bf16.msrb.mxu3 %v1731_v57  ;;  %1113 = vmatmul.bf16.vlgmr.msrb.gmra.mxu0 %v2397_v14  ;;  %v2045_v14 = vld [vmem:[%s3093_s1 + $0x3c4] sm:$0xf] }
  0x84   :  { %1161 = vmatpush.bf16.msra.mxu0 %v1851_v54  ;;  %1127 = vmatmul.bf16.vlgmr.msrb.gmra.mxu1 %v2569_v36  ;;  %v2061_v36 = vld [vmem:[%s3093_s1 + $0x444] sm:$0xf] }
  0x85   :  { %1175 = vmatpush.bf16.msra.mxu1 %v1915_v55  ;;  %1141 = vmatmul.bf16.vlgmr.msrb.gmra.mxu2 %v2588_v44  ;;  %v1888_v44 = vld [vmem:[%s3093_s1 + $0x448] sm:$0xf0] }
  0x86   :  { %1155 = vmatmul.bf16.vlgmr.msrb.gmra.mxu3 %v2580_v40  ;;  %v1827_v40 = vor.u32 %v2045_v14, %v1824_v6  ;;  %v1891_v7 = vor.u32 %v2061_v36, %v1888_v44 }
  0x88   :  { %1162 = vmatpush.bf16.msra.mxu0 %v1843_v61 }
  0x89   :  { %1176 = vmatpush.bf16.msra.mxu1 %v1907_v62 }
  0x8c   :  { %1163 = vmatpush.bf16.msra.mxu0 %v1835_v4 }
  0x8d   :  { %1177 = vmatpush.bf16.msra.mxu1 %v1899_v5 }
  0x90   :  { %1164 = vmatpush.bf16.msra.mxu0 %v1827_v40 }
  0x91   :  { %1178 = vmatpush.bf16.msra.mxu1 %v1891_v7 }
  0x94   :  { %1165 = vmatpush.bf16.msra.mxu0 %v1819_v13 }
  0x95   :  { %1179 = vmatpush.bf16.msra.mxu1 %v1883_v15 }
  0x98   :  { %1166 = vmatpush.bf16.msra.mxu0 %v1811_v20 }
  0x99   :  { %1180 = vmatpush.bf16.msra.mxu1 %v1875_v21 }
  0x9c   :  { %1167 = vmatpush.bf16.msra.mxu0 %v1803_v27 }
  0x9d   :  { %1181 = vmatpush.bf16.msra.mxu1 %v1867_v28 }
  0xa0   :  { %1168 = vmatpush.bf16.msra.mxu0 %v1795_v33  ;;  %v946_v35 = vpop.f32.mrf.mxu0 }
  0xa1   :  { %1182 = vmatpush.bf16.msra.mxu1 %v1859_v34  ;;  %v960_v37 = vpop.f32.mrf.mxu1 }
  0xa2   :  { %v961_v49 = vadd.f32 %v960_v37, %v946_v35 }
  0xa3   :  { %1169 = vmatmul.bf16.vlgmr.msra.gmra.mxu0 %v2596_v48 }
  0xa4   :  { %1183 = vmatmul.bf16.vlgmr.msra.gmra.mxu1 %v2788_v25 }
  0xa8   :  { %v974_v38 = vpop.f32.mrf.mxu2  ;;  %v948_v39 = vpop.f32.mrf.mxu0 }
  0xa9   :  { %v962_v41 = vpop.f32.mrf.mxu1  ;;  %v988_v42 = vpop.f32.mrf.mxu3  ;;  %v975_v8 = vadd.f32 %v974_v38, %v961_v49 }
  0xaa   :  { %v963_v51 = vadd.f32 %v962_v41, %v948_v39 }
  0xab   :  { %v989_v2 = vadd.f32 %v988_v42, %v975_v8 }
  0xb0   :  { %v976_v43 = vpop.f32.mrf.mxu2 }
  0xb1   :  { %v990_v47 = vpop.f32.mrf.mxu3  ;;  %v977_v48 = vadd.f32 %v976_v43, %v963_v51 }
  0xb3   :  { %v991_v25 = vadd.f32 %v990_v47, %v977_v48 }
  0xc0   :  { %v1002_v45 = vpop.f32.mrf.mxu0 }
  0xc1   :  { %v1016_v46 = vpop.f32.mrf.mxu1  ;;  %v1003_v60 = vadd.f32 %v1002_v45, %v989_v2 }
  0xc3   :  { %v1017_v61 = vadd.f32 %v1016_v46, %v1003_v60 }
  0xc8   :  { %v1030_v50 = vpop.f32.mrf.mxu2  ;;  %v1004_v52 = vpop.f32.mrf.mxu0 }
  0xc9   :  { %v1018_v53 = vpop.f32.mrf.mxu1  ;;  %v1044_v54 = vpop.f32.mrf.mxu3  ;;  %v1005_v57 = vadd.f32 %v1004_v52, %v991_v25  ;;  %v1031_v1 = vadd.f32 %v1030_v50, %v1017_v61 }
  0xcb   :  { %v1019_v62 = vadd.f32 %v1018_v53, %v1005_v57  ;;  %v1045_v6 = vadd.f32 %v1044_v54, %v1031_v1 }
  0xd0   :  { %v1032_v55 = vpop.f32.mrf.mxu2 }
  0xd1   :  { %v1046_v59 = vpop.f32.mrf.mxu3  ;;  %v1033_v63 = vadd.f32 %v1032_v55, %v1019_v62 }
  0xd3   :  { %v1047_v4 = vadd.f32 %v1046_v59, %v1033_v63 }
  0xe0   :  { %v1058_v56 = vpop.f32.mrf.mxu0 }
  0xe1   :  { %v1072_v58 = vpop.f32.mrf.mxu1  ;;  %v3054_v44 = vadd.f32 %v1058_v56, %v1045_v6 }
  0xe3   :  { %v1205_v10 = vmul.f32 %v3054_v44, %v3054_v44 }
  0xe8   :  { %v1086_v0 = vpop.f32.mrf.mxu2  ;;  %v1060_v3 = vpop.f32.mrf.mxu0 }
  0xe9   :  { %v1074_v5 = vpop.f32.mrf.mxu1  ;;  %v1100_v14 = vpop.f32.mrf.mxu3  ;;  %v3052_v36 = vadd.f32 %v1060_v3, %v1047_v4  ;;  %v1087_v15 = vadd.f32 %v1086_v0, %v1072_v58 }
  0xeb   :  { %v1189_v40 = vadd.f32 %v3052_v36, %v3054_v44  ;;  %v1207_v7 = vmul.f32 %v3052_v36, %v3052_v36  ;;  %v1101_v20 = vadd.f32 %v1100_v14, %v1087_v15 }
  0xed   :  { %v1190_v12 = vrot.slane %v1189_v40, 4  ;;  %v1209_v13 = vadd.f32 %v1207_v7, %v1205_v10 }
  0xef   :  { %v1191_v18 = vadd.f32 %v1190_v12, %v1189_v40  ;;  %v1210_v19 = vrot.slane %v1209_v13, 4 }
  0xf0   :  { %v1088_v9 = vpop.f32.mrf.mxu2 }
  0xf1   :  { %v1102_v17 = vpop.f32.mrf.mxu3  ;;  %v1192_v22 = vrot.slane %v1191_v18, 2  ;;  %v1211_v23 = vadd.f32 %v1210_v19, %v1209_v13  ;;  %v1089_v24 = vadd.f32 %v1088_v9, %v1074_v5 }
  0xf3   :  { %v1193_v30 = vadd.f32 %v1192_v22, %v1191_v18  ;;  %v1212_v31 = vrot.slane %v1211_v23, 2  ;;  %v1103_v32 = vadd.f32 %v1102_v17, %v1089_v24 }
  0xf5   :  { %v1194_v35 = vrot.slane %v1193_v30, 1  ;;  %v1213_v37 = vadd.f32 %v1212_v31, %v1211_v23 }
  0xf7   :  { %v1195_v45 = vadd.f32 %v1194_v35, %v1193_v30  ;;  %v1214_v46 = vrot.slane %v1213_v37, 1 }
  0xf9   :  { %v1215_v52 = vadd.f32 %v1214_v46, %v1213_v37  ;;  %v3062_v8 = vmul.f32 0.125, %v1195_v45  ;;  %v1265_v45 = vld [vmem:[%s3096_s3] sm:$0x3] }
  0xfb   :  { %v1227_v55 = vmul.f32 0.125, %v1215_v52  ;;  %v1229_v56 = vmul.f32 %v3062_v8, %v3062_v8 }
  0xfd   :  { %v1231_v61 = vsub.f32 %v1227_v55, %v1229_v56 }
  0xff   :  { %v1233_v3 = vmax.f32 %v1231_v61, 0.0 }
 0x100   :  { %v1114_v11 = vpop.f32.mrf.mxu0 }
 0x101   :  { %v1128_v16 = vpop.f32.mrf.mxu1  ;;  %v1115_v26 = vadd.f32 %v1114_v11, %v1101_v20  ;;  %v1236_v40 = vadd.f32 1e-05, %v1233_v3 }
 0x103   :  { %v1129_v33 = vadd.f32 %v1128_v16, %v1115_v26  ;;  %2069 = vrsqrt.f32 %v1236_v40  ;;  %vm1244_vm4 = vweird.f32 %v1236_v40 }
 0x108   :  { %v1142_v21 = vpop.f32.mrf.mxu2  ;;  %v1116_v27 = vpop.f32.mrf.mxu0 }
 0x109   :  { %v1130_v28 = vpop.f32.mrf.mxu1  ;;  %v1156_v29 = vpop.f32.mrf.mxu3  ;;  %v1117_v34 = vadd.f32 %v1116_v27, %v1103_v32  ;;  %v1143_v38 = vadd.f32 %v1142_v21, %v1129_v33 }
 0x10a   :  { %v2070_v18 = vpop.eup %2069 }
 0x10b   :  { %v1131_v42 = vadd.f32 %v1130_v28, %v1117_v34  ;;  %v1157_v47 = vadd.f32 %v1156_v29, %v1143_v38  ;;  %v1239_v21 = vmul.f32 %v2070_v18, %v1236_v40  ;;  %vm1245_vm1 = vweird.f32 %v2070_v18  ;;  %v1235_v34 = vld [vmem:[%s3095_s2] sm:$0x3] }
 0x10c   :  { %vm1246_vm6 = vmor %vm1244_vm4, %vm1245_vm1 }
 0x10d   :  { %v1240_v22 = vmul.f32 %v2070_v18, %v1239_v21 }
 0x10f   :  { %v1241_v24 = vmul.f32 0.5, %v1240_v22 }
 0x110   :  { %v1144_v39 = vpop.f32.mrf.mxu2 }
 0x111   :  { %v1145_v49 = vadd.f32 %v1144_v39, %v1131_v42  ;;  %v1158_v50 = vpop.f32.mrf.mxu3  ;;  %v1242_v28 = vsub.f32 1.5, %v1241_v24 }
 0x113   :  { %v1159_v53 = vadd.f32 %v1158_v50, %v1145_v49  ;;  %v1243_v31 = vmul.f32 %v2070_v18, %v1242_v28 }
 0x115   :  { %v1247_v37 = vsel %vm1246_vm6, %v2070_v18, %v1243_v31 }
 0x120   :  { %v1170_v41 = vpop.f32.mrf.mxu0 }
 0x121   :  { %v1184_v43 = vpop.f32.mrf.mxu1  ;;  %v1171_v51 = vadd.f32 %v1170_v41, %v1157_v47 }
 0x123   :  { %v3064_v48 = vadd.f32 %v1184_v43, %v1171_v51 }
 0x125   :  { %v1206_v57 = vmul.f32 %v3064_v48, %v3064_v48 }
 0x128   :  { %v1172_v54 = vpop.f32.mrf.mxu0 }
 0x129   :  { %v1173_v2 = vadd.f32 %v1172_v54, %v1159_v53  ;;  %v1186_v25 = vpop.f32.mrf.mxu1 }
 0x12b   :  { %v3068_v60 = vadd.f32 %v1186_v25, %v1173_v2 }
 0x12d   :  { %v1196_v58 = vadd.f32 %v3068_v60, %v3064_v48  ;;  %v1208_v59 = vmul.f32 %v3068_v60, %v3068_v60 }
 0x12f   :  { %v1197_v62 = vrot.slane %v1196_v58, 4  ;;  %v1216_v63 = vadd.f32 %v1208_v59, %v1206_v57 }
 0x131   :  { %v1198_v0 = vadd.f32 %v1197_v62, %v1196_v58  ;;  %v1217_v1 = vrot.slane %v1216_v63, 4 }
 0x133   :  { %v1199_v4 = vrot.slane %v1198_v0, 2  ;;  %v1218_v5 = vadd.f32 %v1217_v1, %v1216_v63 }
 0x135   :  { %v1200_v14 = vadd.f32 %v1199_v4, %v1198_v0  ;;  %v1219_v6 = vrot.slane %v1218_v5, 2 }
 0x137   :  { %v1201_v7 = vrot.slane %v1200_v14, 1  ;;  %v1220_v9 = vadd.f32 %v1219_v6, %v1218_v5 }
 0x139   :  { %v1202_v10 = vadd.f32 %v1201_v7, %v1200_v14  ;;  %v1221_v11 = vrot.slane %v1220_v9, 1 }
 0x13b   :  { %v1222_v12 = vadd.f32 %v1221_v11, %v1220_v9  ;;  %v1226_v13 = vmul.f32 0.125, %v1202_v10 }
 0x13d   :  { %v1228_v15 = vmul.f32 0.125, %v1222_v12  ;;  %v1230_v16 = vmul.f32 %v1226_v13, %v1226_v13 }
 0x13f   :  { %v1232_v17 = vsub.f32 %v1228_v15, %v1230_v16 }
 0x141   :  { %v1234_v19 = vmax.f32 %v1232_v17, 0.0 }
 0x143   :  { %v1237_v20 = vadd.f32 1e-05, %v1234_v19 }
 0x145   :  { %2071 = vrsqrt.f32 %v1237_v20  ;;  %vm1254_vm2 = vweird.f32 %v1237_v20 }
 0x14b   :  { %v2072_v23 = vpop.eup %2071 }
 0x14c   :  { %v1249_v26 = vmul.f32 %v2072_v23, %v1237_v20  ;;  %vm1255_vm0 = vweird.f32 %v2072_v23 }
 0x14d   :  { %vm1256_vm3 = vmor %vm1254_vm2, %vm1255_vm0 }
 0x14e   :  { %v1250_v27 = vmul.f32 %v2072_v23, %v1249_v26 }
 0x150   :  { %v1251_v29 = vmul.f32 0.5, %v1250_v27 }
 0x152   :  { %v1252_v30 = vsub.f32 1.5, %v1251_v29 }
 0x154   :  { %v1253_v32 = vmul.f32 %v2072_v23, %v1252_v30 }
 0x156   :  { %v1257_v33 = vsel %vm1256_vm3, %v2072_v23, %v1253_v32 }
 0x157   :  { %v1260_v35 = vrot.slane %v1257_v33, 7 }
 0x159   :  { %v1262_v38 = vsel %vm1261_vm5, %v1247_v37, %v1260_v35 }
 0x15a   :  { %v1264_v39 = vmul.f32 %v1262_v38, %v1235_v34 }
 0x15c   :  { %v1267_v41 = vperm.slane %v1264_v39, 0  ;;  %v1268_v42 = vperm.slane %v1264_v39, 1 }
 0x15e   :  { %v1272_v43 = vmul.f32 %v1268_v42, %v1226_v13  ;;  %v1271_v46 = vmul.f32 %v1267_v41, %v3062_v8  ;;  %v1279_v51 = vmul.f32 %v1267_v41, %v3054_v44  ;;  %v1280_v52 = vmul.f32 %v1268_v42, %v3064_v48 }
 0x15f   :  { %v1281_v53 = vmul.f32 %v1267_v41, %v3052_v36  ;;  %v1282_v54 = vmul.f32 %v1268_v42, %v3068_v60 }
 0x160   :  { %v1275_v47 = vrot.slane %v1272_v43, 7 }
 0x162   :  { %v1276_v49 = vsel %vm1261_vm5, %v1271_v46, %v1275_v47 }
 0x163   :  { %v1278_v50 = vsub.f32 %v1265_v45, %v1276_v49 }
 0x165   :  { %v1284_v2 = vperm.slane %v1278_v50, 0  ;;  %v1285_v25 = vperm.slane %v1278_v50, 1 }
 0x167   :  { %v1288_v55 = vadd.f32 %v1284_v2, %v1279_v51  ;;  %v1289_v56 = vadd.f32 %v1285_v25, %v1280_v52  ;;  %v1290_v57 = vadd.f32 %v1284_v2, %v1281_v53  ;;  %v1291_v58 = vadd.f32 %v1285_v25, %v1282_v54 }
 0x169   :  { %v1292_v59 = vmax.f32 %v1288_v55, 0.0  ;;  %v1293_v61 = vmax.f32 %v1289_v56, 0.0  ;;  %v1294_v8 = vmax.f32 %v1290_v57, 0.0  ;;  %v1295_v62 = vmax.f32 %v1291_v58, 0.0 }
 0x16b   :  { %v1296_v63 = vpack.c.bf16 %v1293_v61, %v1292_v59  ;;  %v1297_v0 = vpack.c.bf16 %v1295_v62, %v1294_v8 }
 0x16d   :  { %1298 = vst [vmem:[%s3097_s4] sm:$0xff] %v1296_v63 }
 0x16e   :  { %1299 = vst [vmem:[%s3097_s4 + $0x8] sm:$0xff] %v1297_v0 }

// kernel: unet_forward.9
= control target key start
LH: loop header
LB: loop body
LE: loop exit
PB: predicated region body
PF: predicated region fallthrough
CT: control target
= control target key end

     0   :  { %s5801_s1 = inlined_call_operand.vmem [shape: bf16[4,1024,128], index: 1, kind: input, shape index: {}]   ;;  %s5802_s0 = inlined_call_operand.vmem [shape: bf16[4,16,1024], index: 0, kind: input, shape index: {}]   ;;  %s5803_s2 = inlined_call_operand.vmem [shape: f32[1,128], index: 2, kind: input, shape index: {}]   ;;  %s5804_s3 = inlined_call_operand.vmem [shape: f32[1,128], index: 3, kind: input, shape index: {}]   ;;  %s5805_s4 = inlined_call_operand.vmem [shape: bf16[4,16,128], index: 4, kind: output, shape index: {}]  }
   0x1   :  { %v4438_v0 = vld [vmem:[%s5801_s1 + $0x38] sm:$0xff]  ;;  %v4437_v4 = vld [vmem:[%s5801_s1 + $0x30] sm:$0xff]  ;;  %v4436_v8 = vld [vmem:[%s5801_s1 + $0x28] sm:$0xff] }
   0x2   :  { %v4446_v1 = vld [vmem:[%s5801_s1 + $0x78] sm:$0xff]  ;;  %577 = vmatpush.bf16.msra.mxu0 %v4438_v0  ;;  %v4445_v5 = vld [vmem:[%s5801_s1 + $0x70] sm:$0xff]  ;;  %v4444_v9 = vld [vmem:[%s5801_s1 + $0x68] sm:$0xff] }
   0x3   :  { %v4454_v2 = vld [vmem:[%s5801_s1 + $0xb8] sm:$0xff]  ;;  %591 = vmatpush.bf16.msra.mxu1 %v4446_v1  ;;  %v4453_v6 = vld [vmem:[%s5801_s1 + $0xb0] sm:$0xff]  ;;  %v4452_v10 = vld [vmem:[%s5801_s1 + $0xa8] sm:$0xff] }
   0x4   :  { %v4462_v3 = vld [vmem:[%s5801_s1 + $0xf8] sm:$0xff]  ;;  %605 = vmatpush.bf16.msra.mxu2 %v4454_v2  ;;  %v4461_v7 = vld [vmem:[%s5801_s1 + $0xf0] sm:$0xff]  ;;  %v4460_v11 = vld [vmem:[%s5801_s1 + $0xe8] sm:$0xff] }
   0x5   :  { %619 = vmatpush.bf16.msra.mxu3 %v4462_v3  ;;  %v4435_v12 = vld [vmem:[%s5801_s1 + $0x20] sm:$0xff]  ;;  %v4434_v16 = vld [vmem:[%s5801_s1 + $0x18] sm:$0xff]  ;;  %v4433_v20 = vld [vmem:[%s5801_s1 + $0x10] sm:$0xff] }
   0x6   :  { %578 = vmatpush.bf16.msra.mxu0 %v4437_v4  ;;  %v4443_v13 = vld [vmem:[%s5801_s1 + $0x60] sm:$0xff]  ;;  %v4442_v17 = vld [vmem:[%s5801_s1 + $0x58] sm:$0xff]  ;;  %v4441_v21 = vld [vmem:[%s5801_s1 + $0x50] sm:$0xff] }
   0x7   :  { %592 = vmatpush.bf16.msra.mxu1 %v4445_v5  ;;  %v4451_v14 = vld [vmem:[%s5801_s1 + $0xa0] sm:$0xff]  ;;  %v4450_v18 = vld [vmem:[%s5801_s1 + $0x98] sm:$0xff]  ;;  %v4449_v22 = vld [vmem:[%s5801_s1 + $0x90] sm:$0xff] }
   0x8   :  { %606 = vmatpush.bf16.msra.mxu2 %v4453_v6  ;;  %v4459_v15 = vld [vmem:[%s5801_s1 + $0xe0] sm:$0xff]  ;;  %v4458_v19 = vld [vmem:[%s5801_s1 + $0xd8] sm:$0xff]  ;;  %v4457_v23 = vld [vmem:[%s5801_s1 + $0xd0] sm:$0xff] }
   0x9   :  { %620 = vmatpush.bf16.msra.mxu3 %v4461_v7  ;;  %v4432_v24 = vld [vmem:[%s5801_s1 + $0x8] sm:$0xff]  ;;  %v4431_v28 = vld [vmem:[%s5801_s1] sm:$0xff]  ;;  %v4470_v32 = vld [vmem:[%s5801_s1 + $0x138] sm:$0xff] }
   0xa   :  { %579 = vmatpush.bf16.msra.mxu0 %v4436_v8  ;;  %v4440_v25 = vld [vmem:[%s5801_s1 + $0x48] sm:$0xff]  ;;  %v4439_v29 = vld [vmem:[%s5801_s1 + $0x40] sm:$0xff]  ;;  %v4478_v33 = vld [vmem:[%s5801_s1 + $0x178] sm:$0xff] }
   0xb   :  { %593 = vmatpush.bf16.msra.mxu1 %v4444_v9  ;;  %v4448_v26 = vld [vmem:[%s5801_s1 + $0x88] sm:$0xff]  ;;  %v4447_v30 = vld [vmem:[%s5801_s1 + $0x80] sm:$0xff]  ;;  %v4486_v42 = vld [vmem:[%s5801_s1 + $0x1b8] sm:$0xff] }
   0xc   :  { %607 = vmatpush.bf16.msra.mxu2 %v4452_v10  ;;  %v4456_v27 = vld [vmem:[%s5801_s1 + $0xc8] sm:$0xff]  ;;  %v4455_v31 = vld [vmem:[%s5801_s1 + $0xc0] sm:$0xff]  ;;  %v4494_v43 = vld [vmem:[%s5801_s1 + $0x1f8] sm:$0xff] }
   0xd   :  { %621 = vmatpush.bf16.msra.mxu3 %v4460_v11  ;;  %v2859_v34 = vld [vmem:[%s5802_s0] sm:$0xf]  ;;  %v2867_v36 = vld [vmem:[%s5802_s0 + $0x8] sm:$0xf]  ;;  %v4423_v38 = vld [vmem:[%s5802_s0 + $0x4] sm:$0xf] }
   0xe   :  { %580 = vmatpush.bf16.msra.mxu0 %v4435_v12  ;;  %v4427_v35 = vld [vmem:[%s5802_s0 + $0x1c] sm:$0xf0]  ;;  %v4428_v37 = vld [vmem:[%s5802_s0 + $0x24] sm:$0xf0]  ;;  %v2861_v39 = vld [vmem:[%s5802_s0 + $0x20] sm:$0xf0] }
   0xf   :  { %594 = vmatpush.bf16.msra.mxu1 %v4443_v13  ;;  %v4424_v40 = vld [vmem:[%s5802_s0 + $0xc] sm:$0xf]  ;;  %v2860_v44 = vor.u32 %v4427_v35, %v2859_v34  ;;  %v2868_v45 = vor.u32 %v4428_v37, %v2867_v36  ;;  %v2864_v46 = vor.u32 %v4423_v38, %v2861_v39  ;;  %v4469_v48 = vld [vmem:[%s5801_s1 + $0x130] sm:$0xff]  ;;  %v4467_v56 = vld [vmem:[%s5801_s1 + $0x120] sm:$0xff] }
  0x10   :  { %608 = vmatpush.bf16.msra.mxu2 %v4451_v14  ;;  %v2869_v41 = vld [vmem:[%s5802_s0 + $0x28] sm:$0xf0]  ;;  %v4477_v49 = vld [vmem:[%s5801_s1 + $0x170] sm:$0xff]  ;;  %v4475_v57 = vld [vmem:[%s5801_s1 + $0x160] sm:$0xff] }
  0x11   :  { %622 = vmatpush.bf16.msra.mxu3 %v4459_v15  ;;  %v2872_v47 = vor.u32 %v4424_v40, %v2869_v41  ;;  %v4485_v50 = vld [vmem:[%s5801_s1 + $0x1b0] sm:$0xff]  ;;  %v4468_v52 = vld [vmem:[%s5801_s1 + $0x128] sm:$0xff]  ;;  %v4483_v58 = vld [vmem:[%s5801_s1 + $0x1a0] sm:$0xff] }
  0x12   :  { %581 = vmatpush.bf16.msra.mxu0 %v4434_v16  ;;  %v4493_v51 = vld [vmem:[%s5801_s1 + $0x1f0] sm:$0xff]  ;;  %v4476_v53 = vld [vmem:[%s5801_s1 + $0x168] sm:$0xff]  ;;  %v4491_v59 = vld [vmem:[%s5801_s1 + $0x1e0] sm:$0xff] }
  0x13   :  { %595 = vmatpush.bf16.msra.mxu1 %v4442_v17  ;;  %v4484_v54 = vld [vmem:[%s5801_s1 + $0x1a8] sm:$0xff]  ;;  %v4466_v60 = vld [vmem:[%s5801_s1 + $0x118] sm:$0xff]  ;;  %v4465_v0 = vld [vmem:[%s5801_s1 + $0x110] sm:$0xff] }
  0x14   :  { %609 = vmatpush.bf16.msra.mxu2 %v4450_v18  ;;  %v4492_v55 = vld [vmem:[%s5801_s1 + $0x1e8] sm:$0xff]  ;;  %v4474_v61 = vld [vmem:[%s5801_s1 + $0x158] sm:$0xff]  ;;  %v4473_v1 = vld [vmem:[%s5801_s1 + $0x150] sm:$0xff] }
  0x15   :  { %623 = vmatpush.bf16.msra.mxu3 %v4458_v19  ;;  %v4482_v62 = vld [vmem:[%s5801_s1 + $0x198] sm:$0xff]  ;;  %v4481_v2 = vld [vmem:[%s5801_s1 + $0x190] sm:$0xff]  ;;  %v4464_v4 = vld [vmem:[%s5801_s1 + $0x108] sm:$0xff] }
  0x16   :  { %582 = vmatpush.bf16.msra.mxu0 %v4433_v20  ;;  %v4490_v63 = vld [vmem:[%s5801_s1 + $0x1d8] sm:$0xff]  ;;  %v4489_v3 = vld [vmem:[%s5801_s1 + $0x1d0] sm:$0xff]  ;;  %v4472_v5 = vld [vmem:[%s5801_s1 + $0x148] sm:$0xff] }
  0x17   :  { %596 = vmatpush.bf16.msra.mxu1 %v4441_v21  ;;  %v4480_v6 = vld [vmem:[%s5801_s1 + $0x188] sm:$0xff]  ;;  %v4463_v8 = vld [vmem:[%s5801_s1 + $0x100] sm:$0xff]  ;;  %v4510_v12 = vld [vmem:[%s5801_s1 + $0x238] sm:$0xff] }
  0x18   :  { %610 = vmatpush.bf16.msra.mxu2 %v4449_v22  ;;  %v4488_v7 = vld [vmem:[%s5801_s1 + $0x1c8] sm:$0xff]  ;;  %v4471_v9 = vld [vmem:[%s5801_s1 + $0x140] sm:$0xff]  ;;  %v4518_v13 = vld [vmem:[%s5801_s1 + $0x278] sm:$0xff] }
  0x19   :  { %624 = vmatpush.bf16.msra.mxu3 %v4457_v23  ;;  %v4479_v10 = vld [vmem:[%s5801_s1 + $0x180] sm:$0xff]  ;;  %v2875_v14 = vld [vmem:[%s5802_s0 + $0x10] sm:$0xf]  ;;  %v2883_v16 = vld [vmem:[%s5802_s0 + $0x18] sm:$0xf] }
  0x1a   :  { %583 = vmatpush.bf16.msra.mxu0 %v4432_v24  ;;  %v4487_v11 = vld [vmem:[%s5801_s1 + $0x1c0] sm:$0xff]  ;;  %v4429_v15 = vld [vmem:[%s5802_s0 + $0x2c] sm:$0xf0]  ;;  %v4430_v17 = vld [vmem:[%s5802_s0 + $0x34] sm:$0xf0] }
  0x1b   :  { %597 = vmatpush.bf16.msra.mxu1 %v4440_v25  ;;  %v4425_v18 = vld [vmem:[%s5802_s0 + $0x14] sm:$0xf]  ;;  %v4426_v20 = vld [vmem:[%s5802_s0 + $0x1c] sm:$0xf]  ;;  %v2876_v24 = vor.u32 %v4429_v15, %v2875_v14  ;;  %v2884_v25 = vor.u32 %v4430_v17, %v2883_v16  ;;  %v4524_v34 = vld [vmem:[%s5801_s1 + $0x2a8] sm:$0xff] }
  0x1c   :  { %611 = vmatpush.bf16.msra.mxu2 %v4448_v26  ;;  %v2877_v19 = vld [vmem:[%s5802_s0 + $0x30] sm:$0xf0]  ;;  %v2885_v21 = vld [vmem:[%s5802_s0 + $0x38] sm:$0xf0]  ;;  %v4532_v35 = vld [vmem:[%s5801_s1 + $0x2e8] sm:$0xff] }
  0x1d   :  { %625 = vmatpush.bf16.msra.mxu3 %v4456_v27  ;;  %v4526_v22 = vld [vmem:[%s5801_s1 + $0x2b8] sm:$0xff]  ;;  %v2880_v26 = vor.u32 %v4425_v18, %v2877_v19  ;;  %v2888_v27 = vor.u32 %v4426_v20, %v2885_v21  ;;  %v4507_v36 = vld [vmem:[%s5801_s1 + $0x220] sm:$0xff]  ;;  %v4556_v14 = vld [vmem:[%s5801_s1 + $0x3a8] sm:$0xff] }
  0x1e   :  { %584 = vmatpush.bf16.msra.mxu0 %v4431_v28  ;;  %v4534_v23 = vld [vmem:[%s5801_s1 + $0x2f8] sm:$0xff]  ;;  %v4509_v28 = vld [vmem:[%s5801_s1 + $0x230] sm:$0xff]  ;;  %v4515_v37 = vld [vmem:[%s5801_s1 + $0x260] sm:$0xff] }
  0x1f   :  { %598 = vmatpush.bf16.msra.mxu1 %v4439_v29  ;;  %v4517_v29 = vld [vmem:[%s5801_s1 + $0x270] sm:$0xff]  ;;  %v4523_v38 = vld [vmem:[%s5801_s1 + $0x2a0] sm:$0xff]  ;;  %v4506_v40 = vld [vmem:[%s5801_s1 + $0x218] sm:$0xff] }
  0x20   :  { %612 = vmatpush.bf16.msra.mxu2 %v4447_v30  ;;  %v4525_v30 = vld [vmem:[%s5801_s1 + $0x2b0] sm:$0xff]  ;;  %v4531_v39 = vld [vmem:[%s5801_s1 + $0x2e0] sm:$0xff]  ;;  %v4514_v41 = vld [vmem:[%s5801_s1 + $0x258] sm:$0xff] }
  0x21   :  { %626 = vmatpush.bf16.msra.mxu3 %v4455_v31  ;;  %585 = vmatmul.bf16.vlgmr.msra.gmra.mxu0 %v2860_v44  ;;  %v4533_v31 = vld [vmem:[%s5801_s1 + $0x2f0] sm:$0xff]  ;;  %v4564_v15 = vld [vmem:[%s5801_s1 + $0x3e8] sm:$0xff]  ;;  %v4539_v16 = vld [vmem:[%s5801_s1 + $0x320] sm:$0xff] }
  0x22   :  { %633 = vmatpush.bf16.msrb.mxu0 %v4470_v32  ;;  %599 = vmatmul.bf16.vlgmr.msra.gmra.mxu1 %v2864_v46  ;;  %v4508_v32 = vld [vmem:[%s5801_s1 + $0x228] sm:$0xff]  ;;  %v4505_v44 = vld [vmem:[%s5801_s1 + $0x210] sm:$0xff]  ;;  %v4547_v17 = vld [vmem:[%s5801_s1 + $0x360] sm:$0xff] }
  0x23   :  { %647 = vmatpush.bf16.msrb.mxu1 %v4478_v33  ;;  %613 = vmatmul.bf16.vlgmr.msra.gmra.mxu2 %v2868_v45  ;;  %v4516_v33 = vld [vmem:[%s5801_s1 + $0x268] sm:$0xff]  ;;  %v4513_v45 = vld [vmem:[%s5801_s1 + $0x250] sm:$0xff]  ;;  %v4555_v18 = vld [vmem:[%s5801_s1 + $0x3a0] sm:$0xff] }
  0x24   :  { %661 = vmatpush.bf16.msrb.mxu2 %v4486_v42  ;;  %627 = vmatmul.bf16.vlgmr.msra.gmra.mxu3 %v2872_v47  ;;  %v4522_v42 = vld [vmem:[%s5801_s1 + $0x298] sm:$0xff]  ;;  %v4521_v46 = vld [vmem:[%s5801_s1 + $0x290] sm:$0xff]  ;;  %v4563_v19 = vld [vmem:[%s5801_s1 + $0x3e0] sm:$0xff] }
  0x25   :  { %675 = vmatpush.bf16.msrb.mxu3 %v4494_v43  ;;  %v4530_v43 = vld [vmem:[%s5801_s1 + $0x2d8] sm:$0xff]  ;;  %v4529_v47 = vld [vmem:[%s5801_s1 + $0x2d0] sm:$0xff] }
  0x26   :  { %634 = vmatpush.bf16.msrb.mxu0 %v4469_v48  ;;  %v4504_v48 = vld [vmem:[%s5801_s1 + $0x208] sm:$0xff]  ;;  %v4538_v20 = vld [vmem:[%s5801_s1 + $0x318] sm:$0xff] }
  0x27   :  { %648 = vmatpush.bf16.msrb.mxu1 %v4477_v49  ;;  %v4512_v49 = vld [vmem:[%s5801_s1 + $0x248] sm:$0xff]  ;;  %v4546_v21 = vld [vmem:[%s5801_s1 + $0x358] sm:$0xff] }
  0x28   :  { %662 = vmatpush.bf16.msrb.mxu2 %v4485_v50  ;;  %v4520_v50 = vld [vmem:[%s5801_s1 + $0x288] sm:$0xff] }
  0x29   :  { %676 = vmatpush.bf16.msrb.mxu3 %v4493_v51  ;;  %v4528_v51 = vld [vmem:[%s5801_s1 + $0x2c8] sm:$0xff] }
  0x2a   :  { %635 = vmatpush.bf16.msrb.mxu0 %v4468_v52  ;;  %v4503_v52 = vld [vmem:[%s5801_s1 + $0x200] sm:$0xff] }
  0x2b   :  { %649 = vmatpush.bf16.msrb.mxu1 %v4476_v53  ;;  %v4511_v53 = vld [vmem:[%s5801_s1 + $0x240] sm:$0xff] }
  0x2c   :  { %663 = vmatpush.bf16.msrb.mxu2 %v4484_v54  ;;  %v4519_v54 = vld [vmem:[%s5801_s1 + $0x280] sm:$0xff] }
  0x2d   :  { %677 = vmatpush.bf16.msrb.mxu3 %v4492_v55  ;;  %v4527_v55 = vld [vmem:[%s5801_s1 + $0x2c0] sm:$0xff] }
  0x2e   :  { %636 = vmatpush.bf16.msrb.mxu0 %v4467_v56  ;;  %v4542_v56 = vld [vmem:[%s5801_s1 + $0x338] sm:$0xff] }
  0x2f   :  { %650 = vmatpush.bf16.msrb.mxu1 %v4475_v57  ;;  %v4550_v57 = vld [vmem:[%s5801_s1 + $0x378] sm:$0xff] }
  0x30   :  { %664 = vmatpush.bf16.msrb.mxu2 %v4483_v58  ;;  %v3283_v58 = vld [vmem:[%s5802_s0 + $0x40] sm:$0xf] }
  0x31   :  { %678 = vmatpush.bf16.msrb.mxu3 %v4491_v59  ;;  %v4499_v59 = vld [vmem:[%s5802_s0 + $0x5c] sm:$0xf0] }
  0x32   :  { %637 = vmatpush.bf16.msrb.mxu0 %v4466_v60  ;;  %v3291_v60 = vld [vmem:[%s5802_s0 + $0x48] sm:$0xf] }
  0x33   :  { %651 = vmatpush.bf16.msrb.mxu1 %v4474_v61  ;;  %v4500_v61 = vld [vmem:[%s5802_s0 + $0x64] sm:$0xf0] }
  0x34   :  { %665 = vmatpush.bf16.msrb.mxu2 %v4482_v62  ;;  %v4495_v62 = vld [vmem:[%s5802_s0 + $0x44] sm:$0xf] }
  0x35   :  { %679 = vmatpush.bf16.msrb.mxu3 %v4490_v63  ;;  %v3285_v63 = vld [vmem:[%s5802_s0 + $0x60] sm:$0xf0] }
  0x36   :  { %638 = vmatpush.bf16.msrb.mxu0 %v4465_v0  ;;  %v4496_v0 = vld [vmem:[%s5802_s0 + $0x4c] sm:$0xf] }
  0x37   :  { %652 = vmatpush.bf16.msrb.mxu1 %v4473_v1  ;;  %v3293_v1 = vld [vmem:[%s5802_s0 + $0x68] sm:$0xf0] }
  0x38   :  { %666 = vmatpush.bf16.msrb.mxu2 %v4481_v2  ;;  %v4558_v2 = vld [vmem:[%s5801_s1 + $0x3b8] sm:$0xff] }
  0x39   :  { %680 = vmatpush.bf16.msrb.mxu3 %v4489_v3  ;;  %v4566_v3 = vld [vmem:[%s5801_s1 + $0x3f8] sm:$0xff] }
  0x3a   :  { %639 = vmatpush.bf16.msrb.mxu0 %v4464_v4  ;;  %v3284_v4 = vor.u32 %v4499_v59, %v3283_v58  ;;  %v4596_v58 = vld [vmem:[%s5801_s1 + $0x4a8] sm:$0xff] }
  0x3b   :  { %653 = vmatpush.bf16.msrb.mxu1 %v4472_v5  ;;  %v3292_v5 = vor.u32 %v4500_v61, %v3291_v60  ;;  %v4604_v59 = vld [vmem:[%s5801_s1 + $0x4e8] sm:$0xff]  ;;  %v4579_v60 = vld [vmem:[%s5801_s1 + $0x420] sm:$0xff] }
  0x3c   :  { %667 = vmatpush.bf16.msrb.mxu2 %v4480_v6  ;;  %v3288_v6 = vor.u32 %v4495_v62, %v3285_v63  ;;  %v4587_v61 = vld [vmem:[%s5801_s1 + $0x460] sm:$0xff] }
  0x3d   :  { %681 = vmatpush.bf16.msrb.mxu3 %v4488_v7  ;;  %v3296_v7 = vor.u32 %v4496_v0, %v3293_v1  ;;  %v4595_v62 = vld [vmem:[%s5801_s1 + $0x4a0] sm:$0xff]  ;;  %v4578_v0 = vld [vmem:[%s5801_s1 + $0x418] sm:$0xff] }
  0x3e   :  { %640 = vmatpush.bf16.msrb.mxu0 %v4463_v8  ;;  %v4541_v8 = vld [vmem:[%s5801_s1 + $0x330] sm:$0xff]  ;;  %v4603_v63 = vld [vmem:[%s5801_s1 + $0x4e0] sm:$0xff]  ;;  %v4586_v1 = vld [vmem:[%s5801_s1 + $0x458] sm:$0xff] }
  0x3f   :  { %654 = vmatpush.bf16.msrb.mxu1 %v4471_v9  ;;  %v4549_v9 = vld [vmem:[%s5801_s1 + $0x370] sm:$0xff] }
  0x40   :  { %668 = vmatpush.bf16.msrb.mxu2 %v4479_v10  ;;  %v4557_v10 = vld [vmem:[%s5801_s1 + $0x3b0] sm:$0xff] }
  0x41   :  { %682 = vmatpush.bf16.msrb.mxu3 %v4487_v11  ;;  %641 = vmatmul.bf16.vlgmr.msrb.gmra.mxu0 %v2876_v24  ;;  %v4565_v11 = vld [vmem:[%s5801_s1 + $0x3f0] sm:$0xff] }
  0x42   :  { %1269 = vmatpush.bf16.msra.mxu0 %v4510_v12  ;;  %655 = vmatmul.bf16.vlgmr.msrb.gmra.mxu1 %v2880_v26  ;;  %v4540_v12 = vld [vmem:[%s5801_s1 + $0x328] sm:$0xff]  ;;  %v4537_v24 = vld [vmem:[%s5801_s1 + $0x310] sm:$0xff] }
  0x43   :  { %1283 = vmatpush.bf16.msra.mxu1 %v4518_v13  ;;  %669 = vmatmul.bf16.vlgmr.msrb.gmra.mxu2 %v2884_v25  ;;  %v4548_v13 = vld [vmem:[%s5801_s1 + $0x368] sm:$0xff]  ;;  %v4545_v25 = vld [vmem:[%s5801_s1 + $0x350] sm:$0xff] }
  0x44   :  { %1297 = vmatpush.bf16.msra.mxu2 %v4526_v22  ;;  %683 = vmatmul.bf16.vlgmr.msrb.gmra.mxu3 %v2888_v27  ;;  %v4554_v22 = vld [vmem:[%s5801_s1 + $0x398] sm:$0xff]  ;;  %v4553_v26 = vld [vmem:[%s5801_s1 + $0x390] sm:$0xff] }
  0x45   :  { %1311 = vmatpush.bf16.msra.mxu3 %v4534_v23  ;;  %v4562_v23 = vld [vmem:[%s5801_s1 + $0x3d8] sm:$0xff]  ;;  %v4561_v27 = vld [vmem:[%s5801_s1 + $0x3d0] sm:$0xff] }
  0x46   :  { %1270 = vmatpush.bf16.msra.mxu0 %v4509_v28  ;;  %v4536_v28 = vld [vmem:[%s5801_s1 + $0x308] sm:$0xff] }
  0x47   :  { %1284 = vmatpush.bf16.msra.mxu1 %v4517_v29  ;;  %v4544_v29 = vld [vmem:[%s5801_s1 + $0x348] sm:$0xff] }
  0x48   :  { %1298 = vmatpush.bf16.msra.mxu2 %v4525_v30  ;;  %v4552_v30 = vld [vmem:[%s5801_s1 + $0x388] sm:$0xff] }
  0x49   :  { %1312 = vmatpush.bf16.msra.mxu3 %v4533_v31  ;;  %v4560_v31 = vld [vmem:[%s5801_s1 + $0x3c8] sm:$0xff] }
  0x4a   :  { %1271 = vmatpush.bf16.msra.mxu0 %v4508_v32  ;;  %v4535_v32 = vld [vmem:[%s5801_s1 + $0x300] sm:$0xff] }
  0x4b   :  { %1285 = vmatpush.bf16.msra.mxu1 %v4516_v33  ;;  %v4543_v33 = vld [vmem:[%s5801_s1 + $0x340] sm:$0xff] }
  0x4c   :  { %1299 = vmatpush.bf16.msra.mxu2 %v4524_v34  ;;  %v4551_v34 = vld [vmem:[%s5801_s1 + $0x380] sm:$0xff] }
  0x4d   :  { %1313 = vmatpush.bf16.msra.mxu3 %v4532_v35  ;;  %v4559_v35 = vld [vmem:[%s5801_s1 + $0x3c0] sm:$0xff] }
  0x4e   :  { %1272 = vmatpush.bf16.msra.mxu0 %v4507_v36  ;;  %v4582_v36 = vld [vmem:[%s5801_s1 + $0x438] sm:$0xff] }
  0x4f   :  { %1286 = vmatpush.bf16.msra.mxu1 %v4515_v37  ;;  %v4590_v37 = vld [vmem:[%s5801_s1 + $0x478] sm:$0xff] }
  0x50   :  { %1300 = vmatpush.bf16.msra.mxu2 %v4523_v38  ;;  %v3299_v38 = vld [vmem:[%s5802_s0 + $0x50] sm:$0xf] }
  0x51   :  { %1314 = vmatpush.bf16.msra.mxu3 %v4531_v39  ;;  %v4501_v39 = vld [vmem:[%s5802_s0 + $0x6c] sm:$0xf0] }
  0x52   :  { %1273 = vmatpush.bf16.msra.mxu0 %v4506_v40  ;;  %v3307_v40 = vld [vmem:[%s5802_s0 + $0x58] sm:$0xf] }
  0x53   :  { %1287 = vmatpush.bf16.msra.mxu1 %v4514_v41  ;;  %v4502_v41 = vld [vmem:[%s5802_s0 + $0x74] sm:$0xf0] }
  0x54   :  { %1301 = vmatpush.bf16.msra.mxu2 %v4522_v42  ;;  %v4497_v42 = vld [vmem:[%s5802_s0 + $0x54] sm:$0xf] }
  0x55   :  { %1315 = vmatpush.bf16.msra.mxu3 %v4530_v43  ;;  %v3301_v43 = vld [vmem:[%s5802_s0 + $0x70] sm:$0xf0] }
  0x56   :  { %1274 = vmatpush.bf16.msra.mxu0 %v4505_v44  ;;  %v4498_v44 = vld [vmem:[%s5802_s0 + $0x5c] sm:$0xf] }
  0x57   :  { %1288 = vmatpush.bf16.msra.mxu1 %v4513_v45  ;;  %v3309_v45 = vld [vmem:[%s5802_s0 + $0x78] sm:$0xf0] }
  0x58   :  { %1302 = vmatpush.bf16.msra.mxu2 %v4521_v46  ;;  %v4598_v46 = vld [vmem:[%s5801_s1 + $0x4b8] sm:$0xff] }
  0x59   :  { %1316 = vmatpush.bf16.msra.mxu3 %v4529_v47  ;;  %v4606_v47 = vld [vmem:[%s5801_s1 + $0x4f8] sm:$0xff] }
  0x5a   :  { %1275 = vmatpush.bf16.msra.mxu0 %v4504_v48  ;;  %v3300_v48 = vor.u32 %v4501_v39, %v3299_v38  ;;  %v4628_v38 = vld [vmem:[%s5801_s1 + $0x5a8] sm:$0xff] }
  0x5b   :  { %1289 = vmatpush.bf16.msra.mxu1 %v4512_v49  ;;  %v3308_v49 = vor.u32 %v4502_v41, %v3307_v40  ;;  %v4636_v39 = vld [vmem:[%s5801_s1 + $0x5e8] sm:$0xff]  ;;  %v4611_v41 = vld [vmem:[%s5801_s1 + $0x520] sm:$0xff] }
  0x5c   :  { %1303 = vmatpush.bf16.msra.mxu2 %v4520_v50  ;;  %v3304_v50 = vor.u32 %v4497_v42, %v3301_v43  ;;  %v4619_v42 = vld [vmem:[%s5801_s1 + $0x560] sm:$0xff] }
  0x5d   :  { %1317 = vmatpush.bf16.msra.mxu3 %v4528_v51  ;;  %v3312_v51 = vor.u32 %v4498_v44, %v3309_v45  ;;  %v4627_v44 = vld [vmem:[%s5801_s1 + $0x5a0] sm:$0xff] }
  0x5e   :  { %1276 = vmatpush.bf16.msra.mxu0 %v4503_v52  ;;  %v4581_v52 = vld [vmem:[%s5801_s1 + $0x430] sm:$0xff]  ;;  %v4635_v45 = vld [vmem:[%s5801_s1 + $0x5e0] sm:$0xff] }
  0x5f   :  { %1290 = vmatpush.bf16.msra.mxu1 %v4511_v53  ;;  %v4589_v53 = vld [vmem:[%s5801_s1 + $0x470] sm:$0xff] }
  0x60   :  { %1304 = vmatpush.bf16.msra.mxu2 %v4519_v54  ;;  %v4597_v54 = vld [vmem:[%s5801_s1 + $0x4b0] sm:$0xff] }
  0x61   :  { %1318 = vmatpush.bf16.msra.mxu3 %v4527_v55  ;;  %1277 = vmatmul.bf16.vlgmr.msra.gmra.mxu0 %v3284_v4  ;;  %v4605_v55 = vld [vmem:[%s5801_s1 + $0x4f0] sm:$0xff] }
  0x62   :  { %1325 = vmatpush.bf16.msrb.mxu0 %v4542_v56  ;;  %1291 = vmatmul.bf16.vlgmr.msra.gmra.mxu1 %v3288_v6  ;;  %v4580_v56 = vld [vmem:[%s5801_s1 + $0x428] sm:$0xff]  ;;  %v4577_v4 = vld [vmem:[%s5801_s1 + $0x410] sm:$0xff] }
  0x63   :  { %1339 = vmatpush.bf16.msrb.mxu1 %v4550_v57  ;;  %1305 = vmatmul.bf16.vlgmr.msra.gmra.mxu2 %v3292_v5  ;;  %v4588_v57 = vld [vmem:[%s5801_s1 + $0x468] sm:$0xff]  ;;  %v4585_v5 = vld [vmem:[%s5801_s1 + $0x450] sm:$0xff] }
  0x64   :  { %1353 = vmatpush.bf16.msrb.mxu2 %v4558_v2  ;;  %1319 = vmatmul.bf16.vlgmr.msra.gmra.mxu3 %v3296_v7  ;;  %v4594_v2 = vld [vmem:[%s5801_s1 + $0x498] sm:$0xff]  ;;  %v4593_v6 = vld [vmem:[%s5801_s1 + $0x490] sm:$0xff] }
  0x65   :  { %1367 = vmatpush.bf16.msrb.mxu3 %v4566_v3  ;;  %v4602_v3 = vld [vmem:[%s5801_s1 + $0x4d8] sm:$0xff]  ;;  %v4601_v7 = vld [vmem:[%s5801_s1 + $0x4d0] sm:$0xff] }
  0x66   :  { %1326 = vmatpush.bf16.msrb.mxu0 %v4541_v8  ;;  %v4576_v8 = vld [vmem:[%s5801_s1 + $0x408] sm:$0xff] }
  0x67   :  { %1340 = vmatpush.bf16.msrb.mxu1 %v4549_v9  ;;  %v4584_v9 = vld [vmem:[%s5801_s1 + $0x448] sm:$0xff] }
  0x68   :  { %1354 = vmatpush.bf16.msrb.mxu2 %v4557_v10  ;;  %v4592_v10 = vld [vmem:[%s5801_s1 + $0x488] sm:$0xff] }
  0x69   :  { %1368 = vmatpush.bf16.msrb.mxu3 %v4565_v11  ;;  %v4600_v11 = vld [vmem:[%s5801_s1 + $0x4c8] sm:$0xff] }
  0x6a   :  { %1327 = vmatpush.bf16.msrb.mxu0 %v4540_v12  ;;  %v4575_v12 = vld [vmem:[%s5801_s1 + $0x400] sm:$0xff] }
  0x6b   :  { %1341 = vmatpush.bf16.msrb.mxu1 %v4548_v13  ;;  %v4583_v13 = vld [vmem:[%s5801_s1 + $0x440] sm:$0xff] }
  0x6c   :  { %1355 = vmatpush.bf16.msrb.mxu2 %v4556_v14  ;;  %v4591_v14 = vld [vmem:[%s5801_s1 + $0x480] sm:$0xff] }
  0x6d   :  { %1369 = vmatpush.bf16.msrb.mxu3 %v4564_v15  ;;  %v4599_v15 = vld [vmem:[%s5801_s1 + $0x4c0] sm:$0xff] }
  0x6e   :  { %1328 = vmatpush.bf16.msrb.mxu0 %v4539_v16  ;;  %v4614_v16 = vld [vmem:[%s5801_s1 + $0x538] sm:$0xff] }
  0x6f   :  { %1342 = vmatpush.bf16.msrb.mxu1 %v4547_v17  ;;  %v4622_v17 = vld [vmem:[%s5801_s1 + $0x578] sm:$0xff] }
  0x70   :  { %1356 = vmatpush.bf16.msrb.mxu2 %v4555_v18  ;;  %v3707_v18 = vld [vmem:[%s5802_s0 + $0x80] sm:$0xf] }
  0x71   :  { %1370 = vmatpush.bf16.msrb.mxu3 %v4563_v19  ;;  %v4571_v19 = vld [vmem:[%s5802_s0 + $0x9c] sm:$0xf0] }
  0x72   :  { %1329 = vmatpush.bf16.msrb.mxu0 %v4538_v20  ;;  %v3715_v20 = vld [vmem:[%s5802_s0 + $0x88] sm:$0xf] }
  0x73   :  { %1343 = vmatpush.bf16.msrb.mxu1 %v4546_v21  ;;  %v4572_v21 = vld [vmem:[%s5802_s0 + $0xa4] sm:$0xf0] }
  0x74   :  { %1357 = vmatpush.bf16.msrb.mxu2 %v4554_v22  ;;  %v4567_v22 = vld [vmem:[%s5802_s0 + $0x84] sm:$0xf] }
  0x75   :  { %1371 = vmatpush.bf16.msrb.mxu3 %v4562_v23  ;;  %v3709_v23 = vld [vmem:[%s5802_s0 + $0xa0] sm:$0xf0] }
  0x76   :  { %1330 = vmatpush.bf16.msrb.mxu0 %v4537_v24  ;;  %v4568_v24 = vld [vmem:[%s5802_s0 + $0x8c] sm:$0xf] }
  0x77   :  { %1344 = vmatpush.bf16.msrb.mxu1 %v4545_v25  ;;  %v3717_v25 = vld [vmem:[%s5802_s0 + $0xa8] sm:$0xf0] }
  0x78   :  { %1358 = vmatpush.bf16.msrb.mxu2 %v4553_v26  ;;  %v4630_v26 = vld [vmem:[%s5801_s1 + $0x5b8] sm:$0xff] }
  0x79   :  { %1372 = vmatpush.bf16.msrb.mxu3 %v4561_v27  ;;  %v4638_v27 = vld [vmem:[%s5801_s1 + $0x5f8] sm:$0xff] }
  0x7a   :  { %1331 = vmatpush.bf16.msrb.mxu0 %v4536_v28  ;;  %v3708_v28 = vor.u32 %v4571_v19, %v3707_v18  ;;  %v4570_v18 = vld [vmem:[%s5802_s0 + $0x9c] sm:$0xf] }
  0x7b   :  { %1345 = vmatpush.bf16.msrb.mxu1 %v4544_v29  ;;  %v3716_v29 = vor.u32 %v4572_v21, %v3715_v20  ;;  %v3733_v19 = vld [vmem:[%s5802_s0 + $0xb8] sm:$0xf0] }
  0x7c   :  { %1359 = vmatpush.bf16.msrb.mxu2 %v4552_v30  ;;  %v3712_v30 = vor.u32 %v4567_v22, %v3709_v23  ;;  %v4670_v20 = vld [vmem:[%s5801_s1 + $0x6b8] sm:$0xff] }
  0x7d   :  { %1373 = vmatpush.bf16.msrb.mxu3 %v4560_v31  ;;  %v3720_v31 = vor.u32 %v4568_v24, %v3717_v25  ;;  %v4678_v21 = vld [vmem:[%s5801_s1 + $0x6f8] sm:$0xff]  ;;  %v3736_v25 = vor.u32 %v4570_v18, %v3733_v19  ;;  %v4133_v18 = vld [vmem:[%s5802_s0 + $0xe0] sm:$0xf0] }
  0x7e   :  { %1332 = vmatpush.bf16.msrb.mxu0 %v4535_v32  ;;  %v4613_v32 = vld [vmem:[%s5801_s1 + $0x530] sm:$0xff]  ;;  %v4702_v19 = vld [vmem:[%s5801_s1 + $0x7b8] sm:$0xff] }
  0x7f   :  { %1346 = vmatpush.bf16.msrb.mxu1 %v4543_v33  ;;  %v4621_v33 = vld [vmem:[%s5801_s1 + $0x570] sm:$0xff] }
  0x80   :  { %1360 = vmatpush.bf16.msrb.mxu2 %v4551_v34  ;;  %v4629_v34 = vld [vmem:[%s5801_s1 + $0x5b0] sm:$0xff] }
  0x81   :  { %1374 = vmatpush.bf16.msrb.mxu3 %v4559_v35  ;;  %1333 = vmatmul.bf16.vlgmr.msrb.gmra.mxu0 %v3300_v48  ;;  %v4637_v35 = vld [vmem:[%s5801_s1 + $0x5f0] sm:$0xff]  ;;  %v4618_v48 = vld [vmem:[%s5801_s1 + $0x558] sm:$0xff] }
  0x82   :  { %1961 = vmatpush.bf16.msra.mxu0 %v4582_v36  ;;  %1347 = vmatmul.bf16.vlgmr.msrb.gmra.mxu1 %v3304_v50  ;;  %v4612_v36 = vld [vmem:[%s5801_s1 + $0x528] sm:$0xff]  ;;  %v4634_v50 = vld [vmem:[%s5801_s1 + $0x5d8] sm:$0xff] }
  0x83   :  { %1975 = vmatpush.bf16.msra.mxu1 %v4590_v37  ;;  %1361 = vmatmul.bf16.vlgmr.msrb.gmra.mxu2 %v3308_v49  ;;  %v4620_v37 = vld [vmem:[%s5801_s1 + $0x568] sm:$0xff]  ;;  %v4626_v49 = vld [vmem:[%s5801_s1 + $0x598] sm:$0xff] }
  0x84   :  { %1989 = vmatpush.bf16.msra.mxu2 %v4598_v46  ;;  %1375 = vmatmul.bf16.vlgmr.msrb.gmra.mxu3 %v3312_v51 }
  0x85   :  { %2003 = vmatpush.bf16.msra.mxu3 %v4606_v47  ;;  %v4610_v47 = vld [vmem:[%s5801_s1 + $0x518] sm:$0xff] }
  0x86   :  { %1962 = vmatpush.bf16.msra.mxu0 %v4581_v52 }
  0x87   :  { %1976 = vmatpush.bf16.msra.mxu1 %v4589_v53 }
  0x88   :  { %1990 = vmatpush.bf16.msra.mxu2 %v4597_v54  ;;  %v4609_v54 = vld [vmem:[%s5801_s1 + $0x510] sm:$0xff] }
  0x89   :  { %2004 = vmatpush.bf16.msra.mxu3 %v4605_v55  ;;  %v4617_v55 = vld [vmem:[%s5801_s1 + $0x550] sm:$0xff] }
  0x8a   :  { %1963 = vmatpush.bf16.msra.mxu0 %v4580_v56 }
  0x8b   :  { %1977 = vmatpush.bf16.msra.mxu1 %v4588_v57 }
  0x8c   :  { %1991 = vmatpush.bf16.msra.mxu2 %v4596_v58 }
  0x8d   :  { %2005 = vmatpush.bf16.msra.mxu3 %v4604_v59  ;;  %v4625_v59 = vld [vmem:[%s5801_s1 + $0x590] sm:$0xff] }
  0x8e   :  { %1964 = vmatpush.bf16.msra.mxu0 %v4579_v60  ;;  %v4633_v60 = vld [vmem:[%s5801_s1 + $0x5d0] sm:$0xff] }
  0x8f   :  { %1978 = vmatpush.bf16.msra.mxu1 %v4587_v61 }
  0x90   :  { %1992 = vmatpush.bf16.msra.mxu2 %v4595_v62  ;;  %v4608_v62 = vld [vmem:[%s5801_s1 + $0x508] sm:$0xff] }
  0x91   :  { %2006 = vmatpush.bf16.msra.mxu3 %v4603_v63  ;;  %v4616_v63 = vld [vmem:[%s5801_s1 + $0x548] sm:$0xff] }
  0x92   :  { %1965 = vmatpush.bf16.msra.mxu0 %v4578_v0  ;;  %v4624_v0 = vld [vmem:[%s5801_s1 + $0x588] sm:$0xff] }
  0x93   :  { %1979 = vmatpush.bf16.msra.mxu1 %v4586_v1  ;;  %v4632_v1 = vld [vmem:[%s5801_s1 + $0x5c8] sm:$0xff] }
  0x94   :  { %1993 = vmatpush.bf16.msra.mxu2 %v4594_v2 }
  0x95   :  { %2007 = vmatpush.bf16.msra.mxu3 %v4602_v3  ;;  %v4607_v3 = vld [vmem:[%s5801_s1 + $0x500] sm:$0xff] }
  0x96   :  { %1966 = vmatpush.bf16.msra.mxu0 %v4577_v4 }
  0x97   :  { %1980 = vmatpush.bf16.msra.mxu1 %v4585_v5  ;;  %v4615_v5 = vld [vmem:[%s5801_s1 + $0x540] sm:$0xff] }
  0x98   :  { %1994 = vmatpush.bf16.msra.mxu2 %v4593_v6  ;;  %v4623_v6 = vld [vmem:[%s5801_s1 + $0x580] sm:$0xff] }
  0x99   :  { %2008 = vmatpush.bf16.msra.mxu3 %v4601_v7  ;;  %v4631_v7 = vld [vmem:[%s5801_s1 + $0x5c0] sm:$0xff] }
  0x9a   :  { %1967 = vmatpush.bf16.msra.mxu0 %v4576_v8 }
  0x9b   :  { %1981 = vmatpush.bf16.msra.mxu1 %v4584_v9  ;;  %v4654_v9 = vld [vmem:[%s5801_s1 + $0x638] sm:$0xff] }
  0x9c   :  { %1995 = vmatpush.bf16.msra.mxu2 %v4592_v10  ;;  %v4662_v10 = vld [vmem:[%s5801_s1 + $0x678] sm:$0xff] }
  0x9d   :  { %2009 = vmatpush.bf16.msra.mxu3 %v4600_v11  ;;  %v3723_v11 = vld [vmem:[%s5802_s0 + $0x90] sm:$0xf] }
  0x9e   :  { %1968 = vmatpush.bf16.msra.mxu0 %v4575_v12  ;;  %v586_v40 = vpop.f32.mrf.mxu0  ;;  %v4573_v12 = vld [vmem:[%s5802_s0 + $0xac] sm:$0xf0] }
  0x9f   :  { %1982 = vmatpush.bf16.msra.mxu1 %v4583_v13  ;;  %v600_v43 = vpop.f32.mrf.mxu1  ;;  %v3724_v22 = vor.u32 %v4573_v12, %v3723_v11  ;;  %v4141_v11 = vld [vmem:[%s5802_s0 + $0xe8] sm:$0xf0]  ;;  %v4131_v12 = vld [vmem:[%s5802_s0 + $0xc0] sm:$0xf] }
  0xa0   :  { %1996 = vmatpush.bf16.msra.mxu2 %v4591_v14  ;;  %v601_v46 = vadd.f32 %v600_v43, %v586_v40  ;;  %v3731_v14 = vld [vmem:[%s5802_s0 + $0x98] sm:$0xf]  ;;  %v4675_v40 = vld [vmem:[%s5801_s1 + $0x6e0] sm:$0xff] }
  0xa1   :  { %2010 = vmatpush.bf16.msra.mxu3 %v4599_v15  ;;  %1969 = vmatmul.bf16.vlgmr.msra.gmra.mxu0 %v3708_v28  ;;  %v4574_v15 = vld [vmem:[%s5802_s0 + $0xb4] sm:$0xf0]  ;;  %v4669_v28 = vld [vmem:[%s5801_s1 + $0x6b0] sm:$0xff] }
  0xa2   :  { %2017 = vmatpush.bf16.msrb.mxu0 %v4614_v16  ;;  %1983 = vmatmul.bf16.vlgmr.msra.gmra.mxu1 %v3712_v30  ;;  %v4569_v16 = vld [vmem:[%s5802_s0 + $0x94] sm:$0xf]  ;;  %v3732_v23 = vor.u32 %v4574_v15, %v3731_v14  ;;  %v4652_v30 = vld [vmem:[%s5801_s1 + $0x628] sm:$0xff]  ;;  %v4658_v43 = vld [vmem:[%s5801_s1 + $0x658] sm:$0xff] }
  0xa3   :  { %2031 = vmatpush.bf16.msrb.mxu1 %v4622_v17  ;;  %1997 = vmatmul.bf16.vlgmr.msra.gmra.mxu2 %v3716_v29  ;;  %v3725_v17 = vld [vmem:[%s5802_s0 + $0xb0] sm:$0xf0] }
  0xa4   :  { %2045 = vmatpush.bf16.msrb.mxu2 %v4630_v26  ;;  %2011 = vmatmul.bf16.vlgmr.msra.gmra.mxu3 %v3720_v31  ;;  %v3728_v24 = vor.u32 %v4569_v16, %v3725_v17  ;;  %v4653_v26 = vld [vmem:[%s5801_s1 + $0x630] sm:$0xff]  ;;  %v4660_v31 = vld [vmem:[%s5801_s1 + $0x668] sm:$0xff]  ;;  %v4643_v16 = vld [vmem:[%s5802_s0 + $0xdc] sm:$0xf0] }
  0xa5   :  { %2059 = vmatpush.bf16.msrb.mxu3 %v4638_v27  ;;  %v4661_v27 = vld [vmem:[%s5801_s1 + $0x670] sm:$0xff]  ;;  %v4639_v17 = vld [vmem:[%s5802_s0 + $0xc4] sm:$0xf] }
  0xa6   :  { %2018 = vmatpush.bf16.msrb.mxu0 %v4613_v32  ;;  %v614_v51 = vpop.f32.mrf.mxu2  ;;  %v588_v56 = vpop.f32.mrf.mxu0  ;;  %v4677_v29 = vld [vmem:[%s5801_s1 + $0x6f0] sm:$0xff]  ;;  %v4668_v32 = vld [vmem:[%s5801_s1 + $0x6a8] sm:$0xff] }
  0xa7   :  { %2032 = vmatpush.bf16.msrb.mxu1 %v4621_v33  ;;  %v615_v52 = vadd.f32 %v614_v51, %v601_v46  ;;  %v628_v53 = vpop.f32.mrf.mxu3  ;;  %v602_v58 = vpop.f32.mrf.mxu1  ;;  %v4676_v33 = vld [vmem:[%s5801_s1 + $0x6e8] sm:$0xff] }
  0xa8   :  { %2046 = vmatpush.bf16.msrb.mxu2 %v4629_v34  ;;  %v603_v61 = vadd.f32 %v602_v58, %v588_v56  ;;  %v4673_v56 = vld [vmem:[%s5801_s1 + $0x6d0] sm:$0xff]  ;;  %v4648_v58 = vld [vmem:[%s5801_s1 + $0x608] sm:$0xff] }
  0xa9   :  { %2060 = vmatpush.bf16.msrb.mxu3 %v4637_v35  ;;  %v5427_v57 = vadd.f32 %v628_v53, %v615_v52  ;;  %v4649_v52 = vld [vmem:[%s5801_s1 + $0x610] sm:$0xff] }
  0xaa   :  { %2019 = vmatpush.bf16.msrb.mxu0 %v4612_v36  ;;  %v4651_v36 = vld [vmem:[%s5801_s1 + $0x620] sm:$0xff]  ;;  %v4657_v53 = vld [vmem:[%s5801_s1 + $0x650] sm:$0xff] }
  0xab   :  { %2033 = vmatpush.bf16.msrb.mxu1 %v4620_v37  ;;  %v4659_v37 = vld [vmem:[%s5801_s1 + $0x660] sm:$0xff] }
  0xac   :  { %2047 = vmatpush.bf16.msrb.mxu2 %v4628_v38 }
  0xad   :  { %2061 = vmatpush.bf16.msrb.mxu3 %v4636_v39  ;;  %v4667_v39 = vld [vmem:[%s5801_s1 + $0x6a0] sm:$0xff] }
  0xae   :  { %2020 = vmatpush.bf16.msrb.mxu0 %v4611_v41  ;;  %v616_v2 = vpop.f32.mrf.mxu2 }
  0xaf   :  { %2034 = vmatpush.bf16.msrb.mxu1 %v4619_v42  ;;  %v617_v4 = vadd.f32 %v616_v2, %v603_v61  ;;  %v630_v8 = vpop.f32.mrf.mxu3  ;;  %v4650_v42 = vld [vmem:[%s5801_s1 + $0x618] sm:$0xff]  ;;  %v4672_v61 = vld [vmem:[%s5801_s1 + $0x6c8] sm:$0xff]  ;;  %v4655_v2 = vld [vmem:[%s5801_s1 + $0x640] sm:$0xff] }
  0xb0   :  { %2048 = vmatpush.bf16.msrb.mxu2 %v4627_v44  ;;  %v4666_v44 = vld [vmem:[%s5801_s1 + $0x698] sm:$0xff] }
  0xb1   :  { %2062 = vmatpush.bf16.msrb.mxu3 %v4635_v45  ;;  %v5471_v13 = vadd.f32 %v630_v8, %v617_v4  ;;  %v4674_v45 = vld [vmem:[%s5801_s1 + $0x6d8] sm:$0xff]  ;;  %v4671_v4 = vld [vmem:[%s5801_s1 + $0x6c0] sm:$0xff]  ;;  %v4139_v8 = vld [vmem:[%s5802_s0 + $0xc8] sm:$0xf] }
  0xb2   :  { %2021 = vmatpush.bf16.msrb.mxu0 %v4610_v47 }
  0xb3   :  { %2035 = vmatpush.bf16.msrb.mxu1 %v4618_v48 }
  0xb4   :  { %2049 = vmatpush.bf16.msrb.mxu2 %v4626_v49 }
  0xb5   :  { %2063 = vmatpush.bf16.msrb.mxu3 %v4634_v50 }
  0xb6   :  { %2022 = vmatpush.bf16.msrb.mxu0 %v4609_v54 }
  0xb7   :  { %2036 = vmatpush.bf16.msrb.mxu1 %v4617_v55  ;;  %v4665_v55 = vld [vmem:[%s5801_s1 + $0x690] sm:$0xff] }
  0xb8   :  { %2050 = vmatpush.bf16.msrb.mxu2 %v4625_v59  ;;  %v4656_v59 = vld [vmem:[%s5801_s1 + $0x648] sm:$0xff] }
  0xb9   :  { %2064 = vmatpush.bf16.msrb.mxu3 %v4633_v60  ;;  %v4664_v60 = vld [vmem:[%s5801_s1 + $0x688] sm:$0xff] }
  0xba   :  { %2023 = vmatpush.bf16.msrb.mxu0 %v4608_v62 }
  0xbb   :  { %2037 = vmatpush.bf16.msrb.mxu1 %v4616_v63 }
  0xbc   :  { %2051 = vmatpush.bf16.msrb.mxu2 %v4624_v0 }
  0xbd   :  { %2065 = vmatpush.bf16.msrb.mxu3 %v4632_v1  ;;  %v4647_v1 = vld [vmem:[%s5801_s1 + $0x600] sm:$0xff] }
  0xbe   :  { %2024 = vmatpush.bf16.msrb.mxu0 %v4607_v3  ;;  %v642_v34 = vpop.f32.mrf.mxu0  ;;  %v4663_v3 = vld [vmem:[%s5801_s1 + $0x680] sm:$0xff] }
  0xbf   :  { %2038 = vmatpush.bf16.msrb.mxu1 %v4615_v5  ;;  %v643_v35 = vadd.f32 %v642_v34, %v5427_v57  ;;  %v656_v38 = vpop.f32.mrf.mxu1 }
  0xc0   :  { %2052 = vmatpush.bf16.msrb.mxu2 %v4623_v6  ;;  %v4686_v6 = vld [vmem:[%s5801_s1 + $0x738] sm:$0xff] }
  0xc1   :  { %2066 = vmatpush.bf16.msrb.mxu3 %v4631_v7  ;;  %2025 = vmatmul.bf16.vlgmr.msrb.gmra.mxu0 %v3724_v22  ;;  %v657_v41 = vadd.f32 %v656_v38, %v643_v35  ;;  %v4694_v7 = vld [vmem:[%s5801_s1 + $0x778] sm:$0xff]  ;;  %v4683_v35 = vld [vmem:[%s5801_s1 + $0x720] sm:$0xff] }
  0xc2   :  { %2653 = vmatpush.bf16.msra.mxu0 %v4654_v9  ;;  %2039 = vmatmul.bf16.vlgmr.msrb.gmra.mxu1 %v3728_v24  ;;  %v4644_v9 = vld [vmem:[%s5802_s0 + $0xe4] sm:$0xf0]  ;;  %v4132_v24 = vor.u32 %v4643_v16, %v4131_v12  ;;  %v4699_v38 = vld [vmem:[%s5801_s1 + $0x7a0] sm:$0xff]  ;;  %v4642_v12 = vld [vmem:[%s5802_s0 + $0xdc] sm:$0xf] }
  0xc3   :  { %2667 = vmatpush.bf16.msra.mxu1 %v4662_v10  ;;  %2053 = vmatmul.bf16.vlgmr.msrb.gmra.mxu2 %v3732_v23  ;;  %v4640_v10 = vld [vmem:[%s5802_s0 + $0xcc] sm:$0xf]  ;;  %v4140_v22 = vor.u32 %v4644_v9, %v4139_v8  ;;  %v4149_v8 = vld [vmem:[%s5802_s0 + $0xf0] sm:$0xf0]  ;;  %v4155_v9 = vld [vmem:[%s5802_s0 + $0xd8] sm:$0xf] }
  0xc4   :  { %2681 = vmatpush.bf16.msra.mxu2 %v4670_v20  ;;  %2067 = vmatmul.bf16.vlgmr.msrb.gmra.mxu3 %v3736_v25  ;;  %v4710_v20 = vld [vmem:[%s5801_s1 + $0x7f8] sm:$0xff]  ;;  %v4144_v23 = vor.u32 %v4640_v10, %v4141_v11  ;;  %v4136_v25 = vor.u32 %v4639_v17, %v4133_v18 }
  0xc5   :  { %2695 = vmatpush.bf16.msra.mxu3 %v4678_v21  ;;  %v4646_v11 = vld [vmem:[%s5802_s0 + $0xf4] sm:$0xf0] }
  0xc6   :  { %2654 = vmatpush.bf16.msra.mxu0 %v4653_v26  ;;  %v670_v46 = vpop.f32.mrf.mxu2  ;;  %v644_v49 = vpop.f32.mrf.mxu0  ;;  %v4685_v26 = vld [vmem:[%s5801_s1 + $0x730] sm:$0xff]  ;;  %v4156_v17 = vor.u32 %v4646_v11, %v4155_v9 }
  0xc7   :  { %2668 = vmatpush.bf16.msra.mxu1 %v4661_v27  ;;  %v671_v47 = vadd.f32 %v670_v46, %v657_v41  ;;  %v684_v48 = vpop.f32.mrf.mxu3  ;;  %v645_v50 = vadd.f32 %v644_v49, %v5471_v13  ;;  %v658_v54 = vpop.f32.mrf.mxu1  ;;  %v4693_v27 = vld [vmem:[%s5801_s1 + $0x770] sm:$0xff]  ;;  %v4682_v41 = vld [vmem:[%s5801_s1 + $0x718] sm:$0xff] }
  0xc8   :  { %2682 = vmatpush.bf16.msra.mxu2 %v4669_v28  ;;  %v4701_v28 = vld [vmem:[%s5801_s1 + $0x7b0] sm:$0xff] }
  0xc9   :  { %2696 = vmatpush.bf16.msra.mxu3 %v4677_v29  ;;  %v5547_v51 = vadd.f32 %v684_v48, %v671_v47  ;;  %v659_v57 = vadd.f32 %v658_v54, %v645_v50  ;;  %v4709_v29 = vld [vmem:[%s5801_s1 + $0x7f0] sm:$0xff] }
  0xca   :  { %2655 = vmatpush.bf16.msra.mxu0 %v4652_v30  ;;  %v4684_v30 = vld [vmem:[%s5801_s1 + $0x728] sm:$0xff]  ;;  %v4681_v48 = vld [vmem:[%s5801_s1 + $0x710] sm:$0xff] }
  0xcb   :  { %2669 = vmatpush.bf16.msra.mxu1 %v4660_v31  ;;  %v697_v13 = vmul.f32 %v5547_v51, %v5547_v51  ;;  %v4692_v31 = vld [vmem:[%s5801_s1 + $0x768] sm:$0xff]  ;;  %v4689_v49 = vld [vmem:[%s5801_s1 + $0x750] sm:$0xff] }
  0xcc   :  { %2683 = vmatpush.bf16.msra.mxu2 %v4668_v32  ;;  %v4700_v32 = vld [vmem:[%s5801_s1 + $0x7a8] sm:$0xff]  ;;  %v4697_v54 = vld [vmem:[%s5801_s1 + $0x790] sm:$0xff] }
  0xcd   :  { %2697 = vmatpush.bf16.msra.mxu3 %v4676_v33  ;;  %v4708_v33 = vld [vmem:[%s5801_s1 + $0x7e8] sm:$0xff] }
  0xce   :  { %2656 = vmatpush.bf16.msra.mxu0 %v4651_v36  ;;  %v672_v62 = vpop.f32.mrf.mxu2  ;;  %v4691_v36 = vld [vmem:[%s5801_s1 + $0x760] sm:$0xff] }
  0xcf   :  { %2670 = vmatpush.bf16.msra.mxu1 %v4659_v37  ;;  %v673_v63 = vadd.f32 %v672_v62, %v659_v57  ;;  %v686_v0 = vpop.f32.mrf.mxu3  ;;  %v4680_v57 = vld [vmem:[%s5801_s1 + $0x708] sm:$0xff]  ;;  %v4679_v62 = vld [vmem:[%s5801_s1 + $0x700] sm:$0xff] }
  0xd0   :  { %2684 = vmatpush.bf16.msra.mxu2 %v4667_v39  ;;  %v4707_v39 = vld [vmem:[%s5801_s1 + $0x7e0] sm:$0xff] }
  0xd1   :  { %2698 = vmatpush.bf16.msra.mxu3 %v4675_v40  ;;  %v5585_v5 = vadd.f32 %v686_v0, %v673_v63  ;;  %v4687_v63 = vld [vmem:[%s5801_s1 + $0x740] sm:$0xff] }
  0xd2   :  { %2657 = vmatpush.bf16.msra.mxu0 %v4650_v42  ;;  %v4690_v42 = vld [vmem:[%s5801_s1 + $0x758] sm:$0xff] }
  0xd3   :  { %2671 = vmatpush.bf16.msra.mxu1 %v4658_v43  ;;  %v5612_v14 = vadd.f32 %v5585_v5, %v5547_v51  ;;  %v698_v15 = vmul.f32 %v5585_v5, %v5585_v5  ;;  %v4698_v43 = vld [vmem:[%s5801_s1 + $0x798] sm:$0xff] }
  0xd4   :  { %2685 = vmatpush.bf16.msra.mxu2 %v4666_v44  ;;  %v4706_v44 = vld [vmem:[%s5801_s1 + $0x7d8] sm:$0xff] }
  0xd5   :  { %2699 = vmatpush.bf16.msra.mxu3 %v4674_v45  ;;  %v5631_v21 = vadd.f32 %v698_v15, %v697_v13  ;;  %v4157_v13 = vld [vmem:[%s5802_s0 + $0xf8] sm:$0xf0] }
  0xd6   :  { %2658 = vmatpush.bf16.msra.mxu0 %v4649_v52  ;;  %v4160_v18 = vor.u32 %v4642_v12, %v4157_v13 }
  0xd7   :  { %2672 = vmatpush.bf16.msra.mxu1 %v4657_v53 }
  0xd8   :  { %2686 = vmatpush.bf16.msra.mxu2 %v4665_v55  ;;  %v4705_v55 = vld [vmem:[%s5801_s1 + $0x7d0] sm:$0xff] }
  0xd9   :  { %2700 = vmatpush.bf16.msra.mxu3 %v4673_v56 }
  0xda   :  { %2659 = vmatpush.bf16.msra.mxu0 %v4648_v58  ;;  %v4688_v58 = vld [vmem:[%s5801_s1 + $0x748] sm:$0xff] }
  0xdb   :  { %2673 = vmatpush.bf16.msra.mxu1 %v4656_v59  ;;  %v4696_v59 = vld [vmem:[%s5801_s1 + $0x788] sm:$0xff] }
  0xdc   :  { %2687 = vmatpush.bf16.msra.mxu2 %v4664_v60  ;;  %v4704_v60 = vld [vmem:[%s5801_s1 + $0x7c8] sm:$0xff] }
  0xdd   :  { %2701 = vmatpush.bf16.msra.mxu3 %v4672_v61 }
  0xde   :  { %2660 = vmatpush.bf16.msra.mxu0 %v4647_v1  ;;  %v1278_v34 = vpop.f32.mrf.mxu0  ;;  %v4695_v1 = vld [vmem:[%s5801_s1 + $0x780] sm:$0xff] }
  0xdf   :  { %2674 = vmatpush.bf16.msra.mxu1 %v4655_v2  ;;  %v1292_v37 = vpop.f32.mrf.mxu1  ;;  %v4703_v2 = vld [vmem:[%s5801_s1 + $0x7c0] sm:$0xff] }
  0xe0   :  { %2688 = vmatpush.bf16.msra.mxu2 %v4663_v3  ;;  %v1293_v40 = vadd.f32 %v1292_v37, %v1278_v34  ;;  %v4147_v3 = vld [vmem:[%s5802_s0 + $0xd0] sm:$0xf] }
  0xe1   :  { %2702 = vmatpush.bf16.msra.mxu3 %v4671_v4  ;;  %2661 = vmatmul.bf16.vlgmr.msra.gmra.mxu0 %v4132_v24  ;;  %v4645_v4 = vld [vmem:[%s5802_s0 + $0xec] sm:$0xf0] }
  0xe2   :  { %2709 = vmatpush.bf16.msrb.mxu0 %v4686_v6  ;;  %2675 = vmatmul.bf16.vlgmr.msra.gmra.mxu1 %v4136_v25  ;;  %v4148_v15 = vor.u32 %v4645_v4, %v4147_v3 }
  0xe3   :  { %2723 = vmatpush.bf16.msrb.mxu1 %v4694_v7  ;;  %2689 = vmatmul.bf16.vlgmr.msra.gmra.mxu2 %v4140_v22  ;;  %v4641_v7 = vld [vmem:[%s5802_s0 + $0xd4] sm:$0xf] }
  0xe4   :  { %2737 = vmatpush.bf16.msrb.mxu2 %v4702_v19  ;;  %2703 = vmatmul.bf16.vlgmr.msra.gmra.mxu3 %v4144_v23  ;;  %v4152_v16 = vor.u32 %v4641_v7, %v4149_v8 }
  0xe5   :  { %2751 = vmatpush.bf16.msrb.mxu3 %v4710_v20 }
  0xe6   :  { %2710 = vmatpush.bf16.msrb.mxu0 %v4685_v26  ;;  %v1306_v45 = vpop.f32.mrf.mxu2  ;;  %v1280_v50 = vpop.f32.mrf.mxu0 }
  0xe7   :  { %2724 = vmatpush.bf16.msrb.mxu1 %v4693_v27  ;;  %v1307_v46 = vadd.f32 %v1306_v45, %v1293_v40  ;;  %v1320_v47 = vpop.f32.mrf.mxu3  ;;  %v1294_v53 = vpop.f32.mrf.mxu1 }
  0xe8   :  { %2738 = vmatpush.bf16.msrb.mxu2 %v4701_v28  ;;  %v1295_v56 = vadd.f32 %v1294_v53, %v1280_v50 }
  0xe9   :  { %2752 = vmatpush.bf16.msrb.mxu3 %v4709_v29  ;;  %v1321_v52 = vadd.f32 %v1320_v47, %v1307_v46 }
  0xea   :  { %2711 = vmatpush.bf16.msrb.mxu0 %v4684_v30 }
  0xeb   :  { %2725 = vmatpush.bf16.msrb.mxu1 %v4692_v31  ;;  %v690_v31 = vrot.slane %v5612_v14, 4 }
  0xec   :  { %2739 = vmatpush.bf16.msrb.mxu2 %v4700_v32  ;;  %v700_v32 = vrot.slane %v5631_v21, 4 }
  0xed   :  { %2753 = vmatpush.bf16.msrb.mxu3 %v4708_v33 }
  0xee   :  { %2712 = vmatpush.bf16.msrb.mxu0 %v4683_v35  ;;  %v1308_v61 = vpop.f32.mrf.mxu2  ;;  %v691_v35 = vadd.f32 %v690_v31, %v5612_v14 }
  0xef   :  { %2726 = vmatpush.bf16.msrb.mxu1 %v4691_v36  ;;  %v1309_v0 = vadd.f32 %v1308_v61, %v1295_v56  ;;  %v1322_v6 = vpop.f32.mrf.mxu3 }
  0xf0   :  { %2740 = vmatpush.bf16.msrb.mxu2 %v4699_v38  ;;  %v701_v38 = vadd.f32 %v700_v32, %v5631_v21  ;;  %v692_v40 = vrot.slane %v691_v35, 2 }
  0xf1   :  { %2754 = vmatpush.bf16.msrb.mxu3 %v4707_v39  ;;  %v1323_v10 = vadd.f32 %v1322_v6, %v1309_v0 }
  0xf2   :  { %2713 = vmatpush.bf16.msrb.mxu0 %v4682_v41  ;;  %v693_v14 = vadd.f32 %v692_v40, %v691_v35 }
  0xf3   :  { %2727 = vmatpush.bf16.msrb.mxu1 %v4690_v42 }
  0xf4   :  { %2741 = vmatpush.bf16.msrb.mxu2 %v4698_v43 }
  0xf5   :  { %2755 = vmatpush.bf16.msrb.mxu3 %v4706_v44  ;;  %v702_v44 = vrot.slane %v701_v38, 2 }
  0xf6   :  { %2714 = vmatpush.bf16.msrb.mxu0 %v4681_v48 }
  0xf7   :  { %2728 = vmatpush.bf16.msrb.mxu1 %v4689_v49  ;;  %v703_v49 = vadd.f32 %v702_v44, %v701_v38 }
  0xf8   :  { %2742 = vmatpush.bf16.msrb.mxu2 %v4697_v54 }
  0xf9   :  { %2756 = vmatpush.bf16.msrb.mxu3 %v4705_v55  ;;  %v704_v55 = vrot.slane %v703_v49, 1 }
  0xfa   :  { %2715 = vmatpush.bf16.msrb.mxu0 %v4680_v57 }
  0xfb   :  { %2729 = vmatpush.bf16.msrb.mxu1 %v4688_v58  ;;  %v705_v61 = vadd.f32 %v704_v55, %v703_v49 }
  0xfc   :  { %2743 = vmatpush.bf16.msrb.mxu2 %v4696_v59 }
  0xfd   :  { %2757 = vmatpush.bf16.msrb.mxu3 %v4704_v60 }
  0xfe   :  { %2716 = vmatpush.bf16.msrb.mxu0 %v4679_v62  ;;  %v1334_v19 = vpop.f32.mrf.mxu0 }
  0xff   :  { %2730 = vmatpush.bf16.msrb.mxu1 %v4687_v63  ;;  %v1335_v20 = vadd.f32 %v1334_v19, %v1321_v52  ;;  %v1348_v22 = vpop.f32.mrf.mxu1  ;;  %v694_v52 = vrot.slane %v693_v14, 1 }
 0x100   :  { %2744 = vmatpush.bf16.msrb.mxu2 %v4695_v1 }
 0x101   :  { %2758 = vmatpush.bf16.msrb.mxu3 %v4703_v2  ;;  %2717 = vmatmul.bf16.vlgmr.msrb.gmra.mxu0 %v4148_v15  ;;  %v1349_v23 = vadd.f32 %v1348_v22, %v1335_v20  ;;  %v695_v58 = vadd.f32 %v694_v52, %v693_v14 }
 0x102   :  { %2731 = vmatmul.bf16.vlgmr.msrb.gmra.mxu1 %v4152_v16 }
 0x103   :  { %2745 = vmatmul.bf16.vlgmr.msrb.gmra.mxu2 %v4156_v17 }
 0x104   :  { %2759 = vmatmul.bf16.vlgmr.msrb.gmra.mxu3 %v4160_v18 }
 0x106   :  { %v1362_v24 = vpop.f32.mrf.mxu2  ;;  %v1336_v27 = vpop.f32.mrf.mxu0 }
 0x107   :  { %v1363_v25 = vadd.f32 %v1362_v24, %v1349_v23  ;;  %v1376_v26 = vpop.f32.mrf.mxu3  ;;  %v1337_v28 = vadd.f32 %v1336_v27, %v1323_v10  ;;  %v1350_v30 = vpop.f32.mrf.mxu1 }
 0x109   :  { %v5741_v29 = vadd.f32 %v1376_v26, %v1363_v25  ;;  %v1351_v33 = vadd.f32 %v1350_v30, %v1337_v28 }
 0x10b   :  { %v1389_v41 = vmul.f32 %v5741_v29, %v5741_v29 }
 0x10e   :  { %v1364_v34 = vpop.f32.mrf.mxu2 }
 0x10f   :  { %v1365_v36 = vadd.f32 %v1364_v34, %v1351_v33  ;;  %v1378_v37 = vpop.f32.mrf.mxu3 }
 0x111   :  { %v5747_v39 = vadd.f32 %v1378_v37, %v1365_v36 }
 0x113   :  { %v1381_v42 = vadd.f32 %v5747_v39, %v5741_v29  ;;  %v1390_v43 = vmul.f32 %v5747_v39, %v5747_v39 }
 0x115   :  { %v1382_v45 = vrot.slane %v1381_v42, 4  ;;  %v1391_v46 = vadd.f32 %v1390_v43, %v1389_v41 }
 0x117   :  { %v1383_v47 = vadd.f32 %v1382_v45, %v1381_v42  ;;  %v1392_v48 = vrot.slane %v1391_v46, 4 }
 0x119   :  { %v1384_v21 = vrot.slane %v1383_v47, 2  ;;  %v1393_v50 = vadd.f32 %v1392_v48, %v1391_v46 }
 0x11b   :  { %v1385_v53 = vadd.f32 %v1384_v21, %v1383_v47  ;;  %v1394_v54 = vrot.slane %v1393_v50, 2 }
 0x11d   :  { %v1386_v56 = vrot.slane %v1385_v53, 1  ;;  %v1395_v57 = vadd.f32 %v1394_v54, %v1393_v50 }
 0x11e   :  { %v1970_v1 = vpop.f32.mrf.mxu0 }
 0x11f   :  { %v1387_v59 = vadd.f32 %v1386_v56, %v1385_v53  ;;  %v1396_v60 = vrot.slane %v1395_v57, 1  ;;  %v1984_v2 = vpop.f32.mrf.mxu1 }
 0x120   :  { %v1985_v16 = vadd.f32 %v1984_v2, %v1970_v1 }
 0x121   :  { %v5755_v62 = vadd.f32 %v1387_v59, %v695_v58  ;;  %v1397_v63 = vadd.f32 %v1396_v60, %v1395_v57 }
 0x123   :  { %v5757_v0 = vadd.f32 %v1397_v63, %v705_v61 }
 0x126   :  { %v1998_v3 = vpop.f32.mrf.mxu2  ;;  %v1972_v6 = vpop.f32.mrf.mxu0 }
 0x127   :  { %v2012_v4 = vpop.f32.mrf.mxu3  ;;  %v1986_v7 = vpop.f32.mrf.mxu1  ;;  %v1999_v19 = vadd.f32 %v1998_v3, %v1985_v16 }
 0x128   :  { %v1987_v18 = vadd.f32 %v1986_v7, %v1972_v6 }
 0x129   :  { %v2013_v25 = vadd.f32 %v2012_v4, %v1999_v19 }
 0x12e   :  { %v2000_v8 = vpop.f32.mrf.mxu2 }
 0x12f   :  { %v2014_v9 = vpop.f32.mrf.mxu3  ;;  %v2001_v23 = vadd.f32 %v2000_v8, %v1987_v18 }
 0x131   :  { %v2015_v27 = vadd.f32 %v2014_v9, %v2001_v23 }
 0x13e   :  { %v2026_v10 = vpop.f32.mrf.mxu0 }
 0x13f   :  { %v2040_v11 = vpop.f32.mrf.mxu1  ;;  %v2027_v28 = vadd.f32 %v2026_v10, %v2013_v25 }
 0x141   :  { %v2041_v33 = vadd.f32 %v2040_v11, %v2027_v28 }
 0x146   :  { %v2054_v12 = vpop.f32.mrf.mxu2  ;;  %v2028_v15 = vpop.f32.mrf.mxu0 }
 0x147   :  { %v2068_v13 = vpop.f32.mrf.mxu3  ;;  %v2042_v17 = vpop.f32.mrf.mxu1  ;;  %v2029_v30 = vadd.f32 %v2028_v15, %v2015_v27  ;;  %v2055_v38 = vadd.f32 %v2054_v12, %v2041_v33 }
 0x149   :  { %v2043_v34 = vadd.f32 %v2042_v17, %v2029_v30  ;;  %v5761_v44 = vadd.f32 %v2068_v13, %v2055_v38 }
 0x14b   :  { %v2081_v49 = vmul.f32 %v5761_v44, %v5761_v44 }
 0x14e   :  { %v2056_v20 = vpop.f32.mrf.mxu2 }
 0x14f   :  { %v2070_v22 = vpop.f32.mrf.mxu3  ;;  %v2057_v36 = vadd.f32 %v2056_v20, %v2043_v34 }
 0x151   :  { %v5759_v41 = vadd.f32 %v2070_v22, %v2057_v36 }
 0x153   :  { %v2082_v47 = vmul.f32 %v5759_v41, %v5759_v41  ;;  %v2073_v21 = vadd.f32 %v5759_v41, %v5761_v44 }
 0x155   :  { %v2083_v53 = vadd.f32 %v2082_v47, %v2081_v49  ;;  %v2074_v57 = vrot.slane %v2073_v21, 4 }
 0x157   :  { %v2084_v60 = vrot.slane %v2083_v53, 4  ;;  %v2075_v1 = vadd.f32 %v2074_v57, %v2073_v21 }
 0x159   :  { %v2085_v4 = vadd.f32 %v2084_v60, %v2083_v53  ;;  %v2076_v8 = vrot.slane %v2075_v1, 2 }
 0x15b   :  { %v2086_v12 = vrot.slane %v2085_v4, 2  ;;  %v2077_v15 = vadd.f32 %v2076_v8, %v2075_v1 }
 0x15d   :  { %v2087_v19 = vadd.f32 %v2086_v12, %v2085_v4  ;;  %v2078_v23 = vrot.slane %v2077_v15, 1 }
 0x15e   :  { %v2662_v24 = vpop.f32.mrf.mxu0 }
 0x15f   :  { %v2676_v26 = vpop.f32.mrf.mxu1  ;;  %v2079_v30 = vadd.f32 %v2078_v23, %v2077_v15 }
 0x160   :  { %v2677_v40 = vadd.f32 %v2676_v26, %v2662_v24  ;;  %v2088_v26 = vrot.slane %v2087_v19, 1 }
 0x161   :  { %v2080_v36 = vadd.f32 %v2079_v30, %v5755_v62  ;;  %v2788_v62 = vld [vmem:[%s5803_s2] sm:$0x1] }
 0x162   :  { %v2089_v33 = vadd.f32 %v2088_v26, %v2087_v19 }
 0x166   :  { %v2690_v31 = vpop.f32.mrf.mxu2  ;;  %v2664_v35 = vpop.f32.mrf.mxu0 }
 0x167   :  { %v2704_v32 = vpop.f32.mrf.mxu3  ;;  %v2678_v37 = vpop.f32.mrf.mxu1  ;;  %v2691_v45 = vadd.f32 %v2690_v31, %v2677_v40  ;;  %v2090_v40 = vadd.f32 %v2089_v33, %v5757_v0 }
 0x168   :  { %v2679_v46 = vadd.f32 %v2678_v37, %v2664_v35 }
 0x169   :  { %v2705_v50 = vadd.f32 %v2704_v32, %v2691_v45 }
 0x16e   :  { %v2692_v42 = vpop.f32.mrf.mxu2 }
 0x16f   :  { %v2706_v43 = vpop.f32.mrf.mxu3  ;;  %v2693_v52 = vadd.f32 %v2692_v42, %v2679_v46 }
 0x171   :  { %v2707_v58 = vadd.f32 %v2706_v43, %v2693_v52 }
 0x17e   :  { %v2718_v14 = vpop.f32.mrf.mxu0 }
 0x17f   :  { %v2732_v48 = vpop.f32.mrf.mxu1  ;;  %v2719_v54 = vadd.f32 %v2718_v14, %v2705_v50 }
 0x181   :  { %v2733_v61 = vadd.f32 %v2732_v48, %v2719_v54 }
 0x186   :  { %v2746_v55 = vpop.f32.mrf.mxu2  ;;  %v2720_v59 = vpop.f32.mrf.mxu0 }
 0x187   :  { %v2760_v56 = vpop.f32.mrf.mxu3  ;;  %v2721_v63 = vadd.f32 %v2720_v59, %v2707_v58  ;;  %v2747_v2 = vadd.f32 %v2746_v55, %v2733_v61  ;;  %v2734_v3 = vpop.f32.mrf.mxu1  ;;  %v2801_v58 = vld [vmem:[%s5804_s3] sm:$0x1] }
 0x189   :  { %v2735_v6 = vadd.f32 %v2734_v3, %v2721_v63  ;;  %v5769_v9 = vadd.f32 %v2760_v56, %v2747_v2 }
 0x18b   :  { %v2773_v16 = vmul.f32 %v5769_v9, %v5769_v9 }
 0x18e   :  { %v2748_v7 = vpop.f32.mrf.mxu2 }
 0x18f   :  { %v2749_v10 = vadd.f32 %v2748_v7, %v2735_v6  ;;  %v2762_v11 = vpop.f32.mrf.mxu3 }
 0x191   :  { %v2763_v13 = vadd.f32 %v2762_v11, %v2749_v10 }
 0x193   :  { %v2765_v17 = vadd.f32 %v2763_v13, %v5769_v9  ;;  %v2774_v18 = vmul.f32 %v2763_v13, %v2763_v13 }
 0x195   :  { %v2766_v20 = vrot.slane %v2765_v17, 4  ;;  %v2775_v22 = vadd.f32 %v2774_v18, %v2773_v16 }
 0x197   :  { %v2767_v24 = vadd.f32 %v2766_v20, %v2765_v17  ;;  %v2776_v25 = vrot.slane %v2775_v22, 4 }
 0x199   :  { %v2768_v27 = vrot.slane %v2767_v24, 2  ;;  %v2777_v28 = vadd.f32 %v2776_v25, %v2775_v22 }
 0x19b   :  { %v2769_v31 = vadd.f32 %v2768_v27, %v2767_v24  ;;  %v2778_v32 = vrot.slane %v2777_v28, 2 }
 0x19d   :  { %v2770_v34 = vrot.slane %v2769_v31, 1  ;;  %v2779_v35 = vadd.f32 %v2778_v32, %v2777_v28 }
 0x19f   :  { %v2771_v37 = vadd.f32 %v2770_v34, %v2769_v31  ;;  %v2780_v38 = vrot.slane %v2779_v35, 1 }
 0x1a1   :  { %v2772_v42 = vadd.f32 %v2771_v37, %v2080_v36  ;;  %v2781_v43 = vadd.f32 %v2780_v38, %v2779_v35 }
 0x1a3   :  { %v2782_v45 = vadd.f32 %v2781_v43, %v2090_v40  ;;  %v2783_v46 = vmul.f32 0.03125, %v2772_v42 }
 0x1a5   :  { %v2784_v14 = vmul.f32 0.03125, %v2782_v45  ;;  %v2785_v47 = vmul.f32 %v2783_v46, %v2783_v46 }
 0x1a7   :  { %v2786_v48 = vsub.f32 %v2784_v14, %v2785_v47 }
 0x1a9   :  { %v2787_v49 = vmax.f32 %v2786_v48, 0.0 }
 0x1ab   :  { %v2789_v21 = vadd.f32 1e-05, %v2787_v49 }
 0x1ad   :  { %4734 = vrsqrt.f32 %v2789_v21  ;;  %vm2796_vm1 = vweird.f32 %v2789_v21 }
 0x1b3   :  { %v4735_v50 = vpop.eup %4734 }
 0x1b4   :  { %v2791_v52 = vmul.f32 %v4735_v50, %v2789_v21  ;;  %vm2797_vm0 = vweird.f32 %v4735_v50 }
 0x1b5   :  { %vm2798_vm2 = vmor %vm2796_vm1, %vm2797_vm0 }
 0x1b6   :  { %v2792_v53 = vmul.f32 %v4735_v50, %v2791_v52 }
 0x1b8   :  { %v2793_v54 = vmul.f32 0.5, %v2792_v53 }
 0x1ba   :  { %v2794_v55 = vsub.f32 1.5, %v2793_v54 }
 0x1bc   :  { %v2795_v0 = vmul.f32 %v4735_v50, %v2794_v55 }
 0x1be   :  { %v2799_v56 = vsel %vm2798_vm2, %v4735_v50, %v2795_v0 }
 0x1bf   :  { %v2800_v57 = vmul.f32 %v2799_v56, %v2788_v62 }
 0x1c1   :  { %v2802_v59 = vmul.f32 %v2800_v57, %v2783_v46  ;;  %v2805_v60 = vperm.slane %v2800_v57, 0 }
 0x1c3   :  { %v2803_v61 = vsub.f32 %v2801_v58, %v2802_v59  ;;  %v2807_v63 = vmul.f32 %v2805_v60, %v5547_v51  ;;  %v2808_v1 = vmul.f32 %v2805_v60, %v5585_v5  ;;  %v2820_v2 = vmul.f32 %v2805_v60, %v5741_v29 }
 0x1c4   :  { %v2821_v3 = vmul.f32 %v2805_v60, %v5747_v39  ;;  %v2831_v6 = vmul.f32 %v2805_v60, %v5761_v44  ;;  %v2832_v7 = vmul.f32 %v2805_v60, %v5759_v41  ;;  %v2842_v8 = vmul.f32 %v2805_v60, %v5769_v9 }
 0x1c5   :  { %v2810_v4 = vperm.slane %v2803_v61, 0  ;;  %v2843_v10 = vmul.f32 %v2805_v60, %v2763_v13 }
 0x1c7   :  { %v2812_v11 = vadd.f32 %v2810_v4, %v2807_v63  ;;  %v2813_v12 = vadd.f32 %v2810_v4, %v2808_v1  ;;  %v2822_v15 = vadd.f32 %v2820_v2, %v2810_v4  ;;  %v2823_v16 = vadd.f32 %v2821_v3, %v2810_v4 }
 0x1c8   :  { %v2833_v17 = vadd.f32 %v2831_v6, %v2810_v4  ;;  %v2834_v51 = vadd.f32 %v2832_v7, %v2810_v4  ;;  %v2844_v18 = vadd.f32 %v2842_v8, %v2810_v4  ;;  %v2845_v5 = vadd.f32 %v2843_v10, %v2810_v4 }
 0x1c9   :  { %v2814_v19 = vmax.f32 %v2812_v11, 0.0  ;;  %v2815_v29 = vmax.f32 %v2813_v12, 0.0  ;;  %v2824_v20 = vmax.f32 %v2822_v15, 0.0  ;;  %v2825_v39 = vmax.f32 %v2823_v16, 0.0 }
 0x1ca   :  { %v2835_v22 = vmax.f32 %v2833_v17, 0.0  ;;  %v2836_v23 = vmax.f32 %v2834_v51, 0.0  ;;  %v2846_v44 = vmax.f32 %v2844_v18, 0.0  ;;  %v2847_v24 = vmax.f32 %v2845_v5, 0.0 }
 0x1cb   :  { %v4714_v41 = vpack.c.bf16 %v2815_v29, %v2814_v19  ;;  %v4719_v25 = vpack.c.bf16 %v2825_v39, %v2824_v20 }
 0x1cc   :  { %v4724_v9 = vpack.c.bf16 %v2836_v23, %v2835_v22  ;;  %v4729_v13 = vpack.c.bf16 %v2847_v24, %v2846_v44 }
 0x1cd   :  { %4715 = vst [vmem:[%s5805_s4] sm:$0xff] %v4714_v41  }
 0x1ce   :  { %4731 = vst [vmem:[%s5805_s4 + $0x8] sm:$0xff] %v4719_v25  }
 0x1cf   :  { %4732 = vst [vmem:[%s5805_s4 + $0x10] sm:$0xff] %v4724_v9  }
 0x1d0   :  { %4733 = vst [vmem:[%s5805_s4 + $0x18] sm:$0xff] %v4729_v13  }

// kernel: unet_forward.10
= control target key start
LH: loop header
LB: loop body
LE: loop exit
PB: predicated region body
PF: predicated region fallthrough
CT: control target
= control target key end

     0   :  { %s3563_s1 = inlined_call_operand.vmem [shape: bf16[4,512,128], index: 1, kind: input, shape index: {}]   ;;  %s3564_s0 = inlined_call_operand.vmem [shape: bf16[4,32,512], index: 0, kind: input, shape index: {}]   ;;  %s3565_s2 = inlined_call_operand.vmem [shape: f32[1,128], index: 2, kind: input, shape index: {}]   ;;  %s3566_s3 = inlined_call_operand.vmem [shape: f32[1,128], index: 3, kind: input, shape index: {}]   ;;  %s3567_s4 = inlined_call_operand.vmem [shape: bf16[4,32,128], index: 4, kind: output, shape index: {}]  }
   0x1   :  { %v2636_v0 = vld [vmem:[%s3563_s1 + $0x38] sm:$0xff]  ;;  %v2635_v4 = vld [vmem:[%s3563_s1 + $0x30] sm:$0xff]  ;;  %v2634_v8 = vld [vmem:[%s3563_s1 + $0x28] sm:$0xff] }
   0x2   :  { %v2644_v1 = vld [vmem:[%s3563_s1 + $0x78] sm:$0xff]  ;;  %321 = vmatpush.bf16.msra.mxu0 %v2636_v0  ;;  %v2643_v5 = vld [vmem:[%s3563_s1 + $0x70] sm:$0xff]  ;;  %v2642_v9 = vld [vmem:[%s3563_s1 + $0x68] sm:$0xff] }
   0x3   :  { %v2652_v2 = vld [vmem:[%s3563_s1 + $0xb8] sm:$0xff]  ;;  %340 = vmatpush.bf16.msra.mxu1 %v2644_v1  ;;  %v2651_v6 = vld [vmem:[%s3563_s1 + $0xb0] sm:$0xff]  ;;  %v2650_v10 = vld [vmem:[%s3563_s1 + $0xa8] sm:$0xff] }
   0x4   :  { %v2660_v3 = vld [vmem:[%s3563_s1 + $0xf8] sm:$0xff]  ;;  %359 = vmatpush.bf16.msra.mxu2 %v2652_v2  ;;  %v2659_v7 = vld [vmem:[%s3563_s1 + $0xf0] sm:$0xff]  ;;  %v2658_v11 = vld [vmem:[%s3563_s1 + $0xe8] sm:$0xff] }
   0x5   :  { %378 = vmatpush.bf16.msra.mxu3 %v2660_v3  ;;  %v2633_v12 = vld [vmem:[%s3563_s1 + $0x20] sm:$0xff]  ;;  %v2632_v16 = vld [vmem:[%s3563_s1 + $0x18] sm:$0xff]  ;;  %v2631_v20 = vld [vmem:[%s3563_s1 + $0x10] sm:$0xff] }
   0x6   :  { %322 = vmatpush.bf16.msra.mxu0 %v2635_v4  ;;  %v2641_v13 = vld [vmem:[%s3563_s1 + $0x60] sm:$0xff]  ;;  %v2640_v17 = vld [vmem:[%s3563_s1 + $0x58] sm:$0xff]  ;;  %v2639_v21 = vld [vmem:[%s3563_s1 + $0x50] sm:$0xff] }
   0x7   :  { %341 = vmatpush.bf16.msra.mxu1 %v2643_v5  ;;  %v2649_v14 = vld [vmem:[%s3563_s1 + $0xa0] sm:$0xff]  ;;  %v2648_v18 = vld [vmem:[%s3563_s1 + $0x98] sm:$0xff]  ;;  %v2647_v22 = vld [vmem:[%s3563_s1 + $0x90] sm:$0xff] }
   0x8   :  { %360 = vmatpush.bf16.msra.mxu2 %v2651_v6  ;;  %v2657_v15 = vld [vmem:[%s3563_s1 + $0xe0] sm:$0xff]  ;;  %v2656_v19 = vld [vmem:[%s3563_s1 + $0xd8] sm:$0xff]  ;;  %v2655_v23 = vld [vmem:[%s3563_s1 + $0xd0] sm:$0xff] }
   0x9   :  { %379 = vmatpush.bf16.msra.mxu3 %v2659_v7  ;;  %v2630_v24 = vld [vmem:[%s3563_s1 + $0x8] sm:$0xff]  ;;  %v2629_v28 = vld [vmem:[%s3563_s1] sm:$0xff]  ;;  %v2623_v33 = vld [vmem:[%s3564_s0 + $0xc] sm:$0xf0] }
   0xa   :  { %323 = vmatpush.bf16.msra.mxu0 %v2634_v8  ;;  %v2638_v25 = vld [vmem:[%s3563_s1 + $0x48] sm:$0xff]  ;;  %v2637_v29 = vld [vmem:[%s3563_s1 + $0x40] sm:$0xff]  ;;  %v1757_v35 = vld [vmem:[%s3564_s0 + $0x10] sm:$0xf0] }
   0xb   :  { %342 = vmatpush.bf16.msra.mxu1 %v2642_v9  ;;  %v2646_v26 = vld [vmem:[%s3563_s1 + $0x88] sm:$0xff]  ;;  %v2645_v30 = vld [vmem:[%s3563_s1 + $0x80] sm:$0xff]  ;;  %v2624_v37 = vld [vmem:[%s3564_s0 + $0x14] sm:$0xf0] }
   0xc   :  { %361 = vmatpush.bf16.msra.mxu2 %v2650_v10  ;;  %v2654_v27 = vld [vmem:[%s3563_s1 + $0xc8] sm:$0xff]  ;;  %v2653_v31 = vld [vmem:[%s3563_s1 + $0xc0] sm:$0xff]  ;;  %v1765_v39 = vld [vmem:[%s3564_s0 + $0x18] sm:$0xf0] }
   0xd   :  { %380 = vmatpush.bf16.msra.mxu3 %v2658_v11  ;;  %v1755_v32 = vld [vmem:[%s3564_s0] sm:$0xf]  ;;  %v2621_v34 = vld [vmem:[%s3564_s0 + $0x4] sm:$0xf]  ;;  %v1763_v36 = vld [vmem:[%s3564_s0 + $0x8] sm:$0xf] }
   0xe   :  { %324 = vmatpush.bf16.msra.mxu0 %v2633_v12  ;;  %v2622_v38 = vld [vmem:[%s3564_s0 + $0xc] sm:$0xf]  ;;  %v2692_v40 = vld [vmem:[%s3563_s1 + $0x1b8] sm:$0xff]  ;;  %v1756_v42 = vor.u32 %v2623_v33, %v1755_v32  ;;  %v1760_v43 = vor.u32 %v2621_v34, %v1757_v35  ;;  %v1764_v44 = vor.u32 %v2624_v37, %v1763_v36  ;;  %v2691_v48 = vld [vmem:[%s3563_s1 + $0x1b0] sm:$0xff] }
   0xf   :  { %343 = vmatpush.bf16.msra.mxu1 %v2641_v13  ;;  %v2676_v41 = vld [vmem:[%s3563_s1 + $0x138] sm:$0xff]  ;;  %v1768_v45 = vor.u32 %v2622_v38, %v1765_v39  ;;  %v2675_v49 = vld [vmem:[%s3563_s1 + $0x130] sm:$0xff]  ;;  %v2690_v52 = vld [vmem:[%s3563_s1 + $0x1a8] sm:$0xff] }
  0x10   :  { %362 = vmatpush.bf16.msra.mxu2 %v2649_v14  ;;  %v2684_v46 = vld [vmem:[%s3563_s1 + $0x178] sm:$0xff]  ;;  %v2683_v50 = vld [vmem:[%s3563_s1 + $0x170] sm:$0xff]  ;;  %v2674_v53 = vld [vmem:[%s3563_s1 + $0x128] sm:$0xff] }
  0x11   :  { %381 = vmatpush.bf16.msra.mxu3 %v2657_v15  ;;  %v2700_v47 = vld [vmem:[%s3563_s1 + $0x1f8] sm:$0xff]  ;;  %v2699_v51 = vld [vmem:[%s3563_s1 + $0x1f0] sm:$0xff]  ;;  %v2682_v54 = vld [vmem:[%s3563_s1 + $0x168] sm:$0xff] }
  0x12   :  { %325 = vmatpush.bf16.msra.mxu0 %v2632_v16  ;;  %v2698_v55 = vld [vmem:[%s3563_s1 + $0x1e8] sm:$0xff]  ;;  %v2689_v56 = vld [vmem:[%s3563_s1 + $0x1a0] sm:$0xff]  ;;  %v2627_v61 = vld [vmem:[%s3564_s0 + $0x2c] sm:$0xf0] }
  0x13   :  { %344 = vmatpush.bf16.msra.mxu1 %v2640_v17  ;;  %v2673_v57 = vld [vmem:[%s3563_s1 + $0x120] sm:$0xff]  ;;  %v1773_v63 = vld [vmem:[%s3564_s0 + $0x30] sm:$0xf0]  ;;  %v1779_v0 = vld [vmem:[%s3564_s0 + $0x28] sm:$0xf] }
  0x14   :  { %363 = vmatpush.bf16.msra.mxu2 %v2648_v18  ;;  %v2681_v58 = vld [vmem:[%s3563_s1 + $0x160] sm:$0xff]  ;;  %v2628_v1 = vld [vmem:[%s3564_s0 + $0x34] sm:$0xf0]  ;;  %v2626_v2 = vld [vmem:[%s3564_s0 + $0x2c] sm:$0xf] }
  0x15   :  { %382 = vmatpush.bf16.msra.mxu3 %v2656_v19  ;;  %v2697_v59 = vld [vmem:[%s3563_s1 + $0x1e0] sm:$0xff]  ;;  %v1781_v3 = vld [vmem:[%s3564_s0 + $0x38] sm:$0xf0]  ;;  %v1780_v8 = vor.u32 %v2628_v1, %v1779_v0  ;;  %v2687_v12 = vld [vmem:[%s3563_s1 + $0x190] sm:$0xff] }
  0x16   :  { %326 = vmatpush.bf16.msra.mxu0 %v2631_v20  ;;  %v1771_v60 = vld [vmem:[%s3564_s0 + $0x20] sm:$0xf]  ;;  %v2625_v62 = vld [vmem:[%s3564_s0 + $0x24] sm:$0xf]  ;;  %v2688_v4 = vld [vmem:[%s3563_s1 + $0x198] sm:$0xff]  ;;  %v1784_v9 = vor.u32 %v2626_v2, %v1781_v3 }
  0x17   :  { %345 = vmatpush.bf16.msra.mxu1 %v2639_v21  ;;  %v2672_v5 = vld [vmem:[%s3563_s1 + $0x118] sm:$0xff]  ;;  %v1772_v6 = vor.u32 %v2627_v61, %v1771_v60  ;;  %v1776_v7 = vor.u32 %v2625_v62, %v1773_v63  ;;  %v2671_v13 = vld [vmem:[%s3563_s1 + $0x110] sm:$0xff]  ;;  %v2686_v16 = vld [vmem:[%s3563_s1 + $0x188] sm:$0xff] }
  0x18   :  { %364 = vmatpush.bf16.msra.mxu2 %v2647_v22  ;;  %v2680_v10 = vld [vmem:[%s3563_s1 + $0x158] sm:$0xff]  ;;  %v2679_v14 = vld [vmem:[%s3563_s1 + $0x150] sm:$0xff]  ;;  %v2670_v17 = vld [vmem:[%s3563_s1 + $0x108] sm:$0xff] }
  0x19   :  { %383 = vmatpush.bf16.msra.mxu3 %v2655_v23  ;;  %v2696_v11 = vld [vmem:[%s3563_s1 + $0x1d8] sm:$0xff]  ;;  %v2695_v15 = vld [vmem:[%s3563_s1 + $0x1d0] sm:$0xff]  ;;  %v2678_v18 = vld [vmem:[%s3563_s1 + $0x148] sm:$0xff] }
  0x1a   :  { %327 = vmatpush.bf16.msra.mxu0 %v2630_v24  ;;  %v2694_v19 = vld [vmem:[%s3563_s1 + $0x1c8] sm:$0xff]  ;;  %v2685_v20 = vld [vmem:[%s3563_s1 + $0x180] sm:$0xff]  ;;  %v1997_v33 = vld [vmem:[%s3564_s0 + $0x58] sm:$0xf0] }
  0x1b   :  { %346 = vmatpush.bf16.msra.mxu1 %v2638_v25  ;;  %v2669_v21 = vld [vmem:[%s3563_s1 + $0x100] sm:$0xff]  ;;  %v2732_v25 = vld [vmem:[%s3563_s1 + $0x2b8] sm:$0xff]  ;;  %v2662_v32 = vld [vmem:[%s3564_s0 + $0x4c] sm:$0xf] }
  0x1c   :  { %365 = vmatpush.bf16.msra.mxu2 %v2646_v26  ;;  %v2677_v22 = vld [vmem:[%s3563_s1 + $0x140] sm:$0xff]  ;;  %v2716_v26 = vld [vmem:[%s3563_s1 + $0x238] sm:$0xff]  ;;  %v2731_v37 = vld [vmem:[%s3563_s1 + $0x2b0] sm:$0xff] }
  0x1d   :  { %384 = vmatpush.bf16.msra.mxu3 %v2654_v27  ;;  %v2693_v23 = vld [vmem:[%s3563_s1 + $0x1c0] sm:$0xff]  ;;  %v2663_v27 = vld [vmem:[%s3564_s0 + $0x4c] sm:$0xf0]  ;;  %v2724_v34 = vld [vmem:[%s3563_s1 + $0x278] sm:$0xff] }
  0x1e   :  { %328 = vmatpush.bf16.msra.mxu0 %v2629_v28  ;;  %v1987_v24 = vld [vmem:[%s3564_s0 + $0x40] sm:$0xf]  ;;  %v2661_v28 = vld [vmem:[%s3564_s0 + $0x44] sm:$0xf]  ;;  %v2740_v35 = vld [vmem:[%s3563_s1 + $0x2f8] sm:$0xff] }
  0x1f   :  { %347 = vmatpush.bf16.msra.mxu1 %v2637_v29  ;;  %v1989_v29 = vld [vmem:[%s3564_s0 + $0x50] sm:$0xf0]  ;;  %v1988_v36 = vor.u32 %v2663_v27, %v1987_v24  ;;  %v2712_v60 = vld [vmem:[%s3563_s1 + $0x218] sm:$0xff]  ;;  %v2702_v27 = vld [vmem:[%s3564_s0 + $0x8c] sm:$0xf] }
  0x20   :  { %366 = vmatpush.bf16.msra.mxu2 %v2645_v30  ;;  %v1995_v30 = vld [vmem:[%s3564_s0 + $0x48] sm:$0xf]  ;;  %v1992_v38 = vor.u32 %v2661_v28, %v1989_v29  ;;  %v2013_v61 = vld [vmem:[%s3564_s0 + $0x78] sm:$0xf0]  ;;  %v2727_v1 = vld [vmem:[%s3563_s1 + $0x290] sm:$0xff] }
  0x21   :  { %385 = vmatpush.bf16.msra.mxu3 %v2653_v31  ;;  %329 = vmatmul.bf16.vlgmr.msra.gmra.mxu0 %v1756_v42  ;;  %v2664_v31 = vld [vmem:[%s3564_s0 + $0x54] sm:$0xf0]  ;;  %v2723_v42 = vld [vmem:[%s3563_s1 + $0x270] sm:$0xff]  ;;  %v2229_v28 = vld [vmem:[%s3564_s0 + $0x98] sm:$0xf0] }
  0x22   :  { %727 = vmatpush.bf16.msrb.mxu0 %v2676_v41  ;;  %348 = vmatmul.bf16.vlgmr.msra.gmra.mxu1 %v1760_v43  ;;  %v1996_v39 = vor.u32 %v2664_v31, %v1995_v30  ;;  %v2715_v41 = vld [vmem:[%s3563_s1 + $0x230] sm:$0xff]  ;;  %v2720_v62 = vld [vmem:[%s3563_s1 + $0x258] sm:$0xff] }
  0x23   :  { %367 = vmatmul.bf16.vlgmr.msra.gmra.mxu2 %v1764_v44  ;;  %746 = vmatpush.bf16.msrb.mxu1 %v2684_v46  ;;  %v2739_v43 = vld [vmem:[%s3563_s1 + $0x2f0] sm:$0xff]  ;;  %v2730_v44 = vld [vmem:[%s3563_s1 + $0x2a8] sm:$0xff]  ;;  %v2736_v63 = vld [vmem:[%s3563_s1 + $0x2d8] sm:$0xff] }
  0x24   :  { %765 = vmatpush.bf16.msrb.mxu2 %v2692_v40  ;;  %386 = vmatmul.bf16.vlgmr.msra.gmra.mxu3 %v1768_v45  ;;  %v2000_v40 = vor.u32 %v2662_v32, %v1997_v33  ;;  %v2714_v45 = vld [vmem:[%s3563_s1 + $0x228] sm:$0xff]  ;;  %v2221_v24 = vld [vmem:[%s3564_s0 + $0x90] sm:$0xf0]  ;;  %v2232_v33 = vor.u32 %v2702_v27, %v2229_v28  ;;  %v2477_v27 = vld [vmem:[%s3564_s0 + $0xf8] sm:$0xf0] }
  0x25   :  { %784 = vmatpush.bf16.msrb.mxu3 %v2700_v47  ;;  %v2722_v46 = vld [vmem:[%s3563_s1 + $0x268] sm:$0xff]  ;;  %v2763_v30 = vld [vmem:[%s3563_s1 + $0x370] sm:$0xff] }
  0x26   :  { %728 = vmatpush.bf16.msrb.mxu0 %v2675_v49  ;;  %v2738_v47 = vld [vmem:[%s3563_s1 + $0x2e8] sm:$0xff]  ;;  %v2713_v49 = vld [vmem:[%s3563_s1 + $0x220] sm:$0xff] }
  0x27   :  { %747 = vmatpush.bf16.msrb.mxu1 %v2683_v50  ;;  %v2721_v50 = vld [vmem:[%s3563_s1 + $0x260] sm:$0xff] }
  0x28   :  { %766 = vmatpush.bf16.msrb.mxu2 %v2691_v48  ;;  %v2729_v48 = vld [vmem:[%s3563_s1 + $0x2a0] sm:$0xff] }
  0x29   :  { %785 = vmatpush.bf16.msrb.mxu3 %v2699_v51  ;;  %v2737_v51 = vld [vmem:[%s3563_s1 + $0x2e0] sm:$0xff] }
  0x2a   :  { %729 = vmatpush.bf16.msrb.mxu0 %v2674_v53  ;;  %v2667_v53 = vld [vmem:[%s3564_s0 + $0x6c] sm:$0xf0] }
  0x2b   :  { %748 = vmatpush.bf16.msrb.mxu1 %v2682_v54  ;;  %v2728_v54 = vld [vmem:[%s3563_s1 + $0x298] sm:$0xff] }
  0x2c   :  { %767 = vmatpush.bf16.msrb.mxu2 %v2690_v52  ;;  %v2003_v52 = vld [vmem:[%s3564_s0 + $0x60] sm:$0xf] }
  0x2d   :  { %786 = vmatpush.bf16.msrb.mxu3 %v2698_v55  ;;  %v2665_v55 = vld [vmem:[%s3564_s0 + $0x64] sm:$0xf]  ;;  %v2004_v0 = vor.u32 %v2667_v53, %v2003_v52  ;;  %v2706_v52 = vld [vmem:[%s3564_s0 + $0xac] sm:$0xf]  ;;  %v2752_v53 = vld [vmem:[%s3563_s1 + $0x318] sm:$0xff] }
  0x2e   :  { %730 = vmatpush.bf16.msrb.mxu0 %v2673_v57  ;;  %v2011_v57 = vld [vmem:[%s3564_s0 + $0x68] sm:$0xf] }
  0x2f   :  { %749 = vmatpush.bf16.msrb.mxu1 %v2681_v58  ;;  %v2668_v58 = vld [vmem:[%s3564_s0 + $0x74] sm:$0xf0] }
  0x30   :  { %768 = vmatpush.bf16.msrb.mxu2 %v2689_v56  ;;  %v2005_v56 = vld [vmem:[%s3564_s0 + $0x70] sm:$0xf0]  ;;  %v2012_v3 = vor.u32 %v2668_v58, %v2011_v57 }
  0x31   :  { %787 = vmatpush.bf16.msrb.mxu3 %v2697_v59  ;;  %334 = vmatmul.bf16.gmra.mxu0 %v1772_v6  ;;  %v2666_v59 = vld [vmem:[%s3564_s0 + $0x6c] sm:$0xf]  ;;  %v2008_v2 = vor.u32 %v2665_v55, %v2005_v56  ;;  %v2719_v6 = vld [vmem:[%s3563_s1 + $0x250] sm:$0xff]  ;;  %v2776_v55 = vld [vmem:[%s3563_s1 + $0x3d8] sm:$0xff] }
  0x32   :  { %731 = vmatpush.bf16.msrb.mxu0 %v2672_v5  ;;  %353 = vmatmul.bf16.gmra.mxu1 %v1776_v7  ;;  %v2711_v5 = vld [vmem:[%s3563_s1 + $0x210] sm:$0xff] }
  0x33   :  { %372 = vmatmul.bf16.gmra.mxu2 %v1780_v8  ;;  %750 = vmatpush.bf16.msrb.mxu1 %v2680_v10  ;;  %v2735_v7 = vld [vmem:[%s3563_s1 + $0x2d0] sm:$0xff]  ;;  %v2726_v8 = vld [vmem:[%s3563_s1 + $0x288] sm:$0xff] }
  0x34   :  { %769 = vmatpush.bf16.msrb.mxu2 %v2688_v4  ;;  %391 = vmatmul.bf16.gmra.mxu3 %v1784_v9  ;;  %v2016_v4 = vor.u32 %v2666_v59, %v2013_v61  ;;  %v2710_v9 = vld [vmem:[%s3563_s1 + $0x208] sm:$0xff]  ;;  %v2767_v56 = vld [vmem:[%s3563_s1 + $0x390] sm:$0xff] }
  0x35   :  { %788 = vmatpush.bf16.msrb.mxu3 %v2696_v11  ;;  %v2718_v10 = vld [vmem:[%s3563_s1 + $0x248] sm:$0xff]  ;;  %v2759_v58 = vld [vmem:[%s3563_s1 + $0x350] sm:$0xff] }
  0x36   :  { %732 = vmatpush.bf16.msrb.mxu0 %v2671_v13  ;;  %v2734_v11 = vld [vmem:[%s3563_s1 + $0x2c8] sm:$0xff]  ;;  %v2772_v13 = vld [vmem:[%s3563_s1 + $0x3b8] sm:$0xff] }
  0x37   :  { %751 = vmatpush.bf16.msrb.mxu1 %v2679_v14  ;;  %v2709_v14 = vld [vmem:[%s3563_s1 + $0x200] sm:$0xff] }
  0x38   :  { %770 = vmatpush.bf16.msrb.mxu2 %v2687_v12  ;;  %v2725_v12 = vld [vmem:[%s3563_s1 + $0x280] sm:$0xff] }
  0x39   :  { %789 = vmatpush.bf16.msrb.mxu3 %v2695_v15  ;;  %v2717_v15 = vld [vmem:[%s3563_s1 + $0x240] sm:$0xff] }
  0x3a   :  { %733 = vmatpush.bf16.msrb.mxu0 %v2670_v17  ;;  %v2219_v17 = vld [vmem:[%s3564_s0 + $0x80] sm:$0xf] }
  0x3b   :  { %752 = vmatpush.bf16.msrb.mxu1 %v2678_v18  ;;  %v2703_v18 = vld [vmem:[%s3564_s0 + $0x8c] sm:$0xf0] }
  0x3c   :  { %771 = vmatpush.bf16.msrb.mxu2 %v2686_v16  ;;  %v2733_v16 = vld [vmem:[%s3563_s1 + $0x2c0] sm:$0xff]  ;;  %v2220_v29 = vor.u32 %v2703_v18, %v2219_v17 }
  0x3d   :  { %790 = vmatpush.bf16.msrb.mxu3 %v2694_v19  ;;  %v2756_v19 = vld [vmem:[%s3563_s1 + $0x338] sm:$0xff] }
  0x3e   :  { %734 = vmatpush.bf16.msrb.mxu0 %v2669_v21  ;;  %v2701_v21 = vld [vmem:[%s3564_s0 + $0x84] sm:$0xf] }
  0x3f   :  { %753 = vmatpush.bf16.msrb.mxu1 %v2677_v22  ;;  %v2780_v22 = vld [vmem:[%s3563_s1 + $0x3f8] sm:$0xff]  ;;  %v2224_v31 = vor.u32 %v2701_v21, %v2221_v24  ;;  %v2747_v21 = vld [vmem:[%s3564_s0 + $0xec] sm:$0xf0]  ;;  %v2475_v24 = vld [vmem:[%s3564_s0 + $0xe8] sm:$0xf] }
  0x40   :  { %772 = vmatpush.bf16.msrb.mxu2 %v2685_v20  ;;  %v2764_v20 = vld [vmem:[%s3563_s1 + $0x378] sm:$0xff] }
  0x41   :  { %791 = vmatpush.bf16.msrb.mxu3 %v2693_v23  ;;  %735 = vmatmul.bf16.vlgmr.msrb.gmra.mxu0 %v1988_v36  ;;  %v2771_v23 = vld [vmem:[%s3563_s1 + $0x3b0] sm:$0xff]  ;;  %v2770_v36 = vld [vmem:[%s3563_s1 + $0x3a8] sm:$0xff] }
  0x42   :  { %1133 = vmatpush.bf16.msra.mxu0 %v2716_v26  ;;  %754 = vmatmul.bf16.vlgmr.msrb.gmra.mxu1 %v1992_v38  ;;  %v2704_v26 = vld [vmem:[%s3564_s0 + $0x94] sm:$0xf0]  ;;  %v2754_v38 = vld [vmem:[%s3563_s1 + $0x328] sm:$0xff] }
  0x43   :  { %1152 = vmatpush.bf16.msra.mxu1 %v2724_v34  ;;  %773 = vmatmul.bf16.vlgmr.msrb.gmra.mxu2 %v1996_v39  ;;  %v2755_v34 = vld [vmem:[%s3563_s1 + $0x330] sm:$0xff]  ;;  %v2778_v39 = vld [vmem:[%s3563_s1 + $0x3e8] sm:$0xff] }
  0x44   :  { %1171 = vmatpush.bf16.msra.mxu2 %v2732_v25  ;;  %792 = vmatmul.bf16.vlgmr.msrb.gmra.mxu3 %v2000_v40  ;;  %v2227_v25 = vld [vmem:[%s3564_s0 + $0x88] sm:$0xf]  ;;  %v2769_v40 = vld [vmem:[%s3563_s1 + $0x3a0] sm:$0xff] }
  0x45   :  { %1190 = vmatpush.bf16.msra.mxu3 %v2740_v35  ;;  %v2228_v32 = vor.u32 %v2704_v26, %v2227_v25  ;;  %v2779_v35 = vld [vmem:[%s3563_s1 + $0x3f0] sm:$0xff]  ;;  %v2748_v25 = vld [vmem:[%s3564_s0 + $0xf4] sm:$0xf0]  ;;  %v2746_v26 = vld [vmem:[%s3564_s0 + $0xec] sm:$0xf] }
  0x46   :  { %1134 = vmatpush.bf16.msra.mxu0 %v2715_v41  ;;  %v2761_v41 = vld [vmem:[%s3563_s1 + $0x360] sm:$0xff] }
  0x47   :  { %1153 = vmatpush.bf16.msra.mxu1 %v2723_v42  ;;  %v2753_v42 = vld [vmem:[%s3563_s1 + $0x320] sm:$0xff] }
  0x48   :  { %1172 = vmatpush.bf16.msra.mxu2 %v2731_v37  ;;  %v2762_v37 = vld [vmem:[%s3563_s1 + $0x368] sm:$0xff] }
  0x49   :  { %1191 = vmatpush.bf16.msra.mxu3 %v2739_v43  ;;  %v2777_v43 = vld [vmem:[%s3563_s1 + $0x3e0] sm:$0xff] }
  0x4a   :  { %1135 = vmatpush.bf16.msra.mxu0 %v2714_v45  ;;  %v2235_v45 = vld [vmem:[%s3564_s0 + $0xa0] sm:$0xf] }
  0x4b   :  { %1154 = vmatpush.bf16.msra.mxu1 %v2722_v46  ;;  %v2707_v46 = vld [vmem:[%s3564_s0 + $0xac] sm:$0xf0] }
  0x4c   :  { %1173 = vmatpush.bf16.msra.mxu2 %v2730_v44  ;;  %v2768_v44 = vld [vmem:[%s3563_s1 + $0x398] sm:$0xff]  ;;  %v2236_v57 = vor.u32 %v2707_v46, %v2235_v45 }
  0x4d   :  { %1192 = vmatpush.bf16.msra.mxu3 %v2738_v47  ;;  %v2760_v47 = vld [vmem:[%s3563_s1 + $0x358] sm:$0xff] }
  0x4e   :  { %1136 = vmatpush.bf16.msra.mxu0 %v2713_v49  ;;  %v2237_v49 = vld [vmem:[%s3564_s0 + $0xb0] sm:$0xf0] }
  0x4f   :  { %1155 = vmatpush.bf16.msra.mxu1 %v2721_v50  ;;  %v2243_v50 = vld [vmem:[%s3564_s0 + $0xa8] sm:$0xf] }
  0x50   :  { %1174 = vmatpush.bf16.msra.mxu2 %v2729_v48  ;;  %v2705_v48 = vld [vmem:[%s3564_s0 + $0xa4] sm:$0xf] }
  0x51   :  { %1193 = vmatpush.bf16.msra.mxu3 %v2737_v51  ;;  %740 = vmatmul.bf16.gmra.mxu0 %v2004_v0  ;;  %v2708_v51 = vld [vmem:[%s3564_s0 + $0xb4] sm:$0xf0]  ;;  %v2240_v59 = vor.u32 %v2705_v48, %v2237_v49  ;;  %v2766_v0 = vld [vmem:[%s3563_s1 + $0x388] sm:$0xff] }
  0x52   :  { %1137 = vmatpush.bf16.msra.mxu0 %v2712_v60  ;;  %759 = vmatmul.bf16.gmra.mxu1 %v2008_v2  ;;  %v2244_v60 = vor.u32 %v2708_v51, %v2243_v50  ;;  %v2750_v2 = vld [vmem:[%s3563_s1 + $0x308] sm:$0xff] }
  0x53   :  { %1156 = vmatpush.bf16.msra.mxu1 %v2720_v62  ;;  %778 = vmatmul.bf16.gmra.mxu2 %v2012_v3  ;;  %v2751_v62 = vld [vmem:[%s3563_s1 + $0x310] sm:$0xff]  ;;  %v2774_v3 = vld [vmem:[%s3563_s1 + $0x3c8] sm:$0xff] }
  0x54   :  { %1175 = vmatpush.bf16.msra.mxu2 %v2728_v54  ;;  %797 = vmatmul.bf16.gmra.mxu3 %v2016_v4  ;;  %v2245_v54 = vld [vmem:[%s3564_s0 + $0xb8] sm:$0xf0]  ;;  %v2765_v4 = vld [vmem:[%s3563_s1 + $0x380] sm:$0xff] }
  0x55   :  { %1194 = vmatpush.bf16.msra.mxu3 %v2736_v63  ;;  %v2248_v61 = vor.u32 %v2706_v52, %v2245_v54  ;;  %v2775_v63 = vld [vmem:[%s3563_s1 + $0x3d0] sm:$0xff] }
  0x56   :  { %1138 = vmatpush.bf16.msra.mxu0 %v2711_v5  ;;  %v2757_v5 = vld [vmem:[%s3563_s1 + $0x340] sm:$0xff] }
  0x57   :  { %1157 = vmatpush.bf16.msra.mxu1 %v2719_v6  ;;  %v2749_v6 = vld [vmem:[%s3563_s1 + $0x300] sm:$0xff] }
  0x58   :  { %1176 = vmatpush.bf16.msra.mxu2 %v2727_v1  ;;  %v2758_v1 = vld [vmem:[%s3563_s1 + $0x348] sm:$0xff] }
  0x59   :  { %1195 = vmatpush.bf16.msra.mxu3 %v2735_v7  ;;  %v2773_v7 = vld [vmem:[%s3563_s1 + $0x3c0] sm:$0xff] }
  0x5a   :  { %1139 = vmatpush.bf16.msra.mxu0 %v2710_v9  ;;  %v2743_v9 = vld [vmem:[%s3564_s0 + $0xcc] sm:$0xf0] }
  0x5b   :  { %1158 = vmatpush.bf16.msra.mxu1 %v2718_v10  ;;  %v2741_v10 = vld [vmem:[%s3564_s0 + $0xc4] sm:$0xf] }
  0x5c   :  { %1177 = vmatpush.bf16.msra.mxu2 %v2726_v8  ;;  %v2451_v8 = vld [vmem:[%s3564_s0 + $0xc0] sm:$0xf] }
  0x5d   :  { %1196 = vmatpush.bf16.msra.mxu3 %v2734_v11  ;;  %v2453_v11 = vld [vmem:[%s3564_s0 + $0xd0] sm:$0xf0] }
  0x5e   :  { %1140 = vmatpush.bf16.msra.mxu0 %v2709_v14  ;;  %v2742_v14 = vld [vmem:[%s3564_s0 + $0xcc] sm:$0xf]  ;;  %v2456_v17 = vor.u32 %v2741_v10, %v2453_v11 }
  0x5f   :  { %1159 = vmatpush.bf16.msra.mxu1 %v2717_v15  ;;  %v2461_v15 = vld [vmem:[%s3564_s0 + $0xd8] sm:$0xf0] }
  0x60   :  { %1178 = vmatpush.bf16.msra.mxu2 %v2725_v12  ;;  %v2459_v12 = vld [vmem:[%s3564_s0 + $0xc8] sm:$0xf] }
  0x61   :  { %1197 = vmatpush.bf16.msra.mxu3 %v2733_v16  ;;  %1141 = vmatmul.bf16.vlgmr.msra.gmra.mxu0 %v2220_v29  ;;  %v2452_v16 = vor.u32 %v2743_v9, %v2451_v8 }
  0x62   :  { %1539 = vmatpush.bf16.msrb.mxu0 %v2756_v19  ;;  %1160 = vmatmul.bf16.vlgmr.msra.gmra.mxu1 %v2224_v31  ;;  %v2464_v19 = vor.u32 %v2742_v14, %v2461_v15  ;;  %v2480_v31 = vor.u32 %v2746_v26, %v2477_v27 }
  0x63   :  { %1558 = vmatpush.bf16.msrb.mxu1 %v2764_v20  ;;  %1179 = vmatmul.bf16.vlgmr.msra.gmra.mxu2 %v2228_v32  ;;  %v2467_v20 = vld [vmem:[%s3564_s0 + $0xe0] sm:$0xf] }
  0x64   :  { %1577 = vmatpush.bf16.msrb.mxu2 %v2772_v13  ;;  %1198 = vmatmul.bf16.vlgmr.msra.gmra.mxu3 %v2232_v33  ;;  %v2744_v13 = vld [vmem:[%s3564_s0 + $0xd4] sm:$0xf0]  ;;  %v2468_v28 = vor.u32 %v2747_v21, %v2467_v20 }
  0x65   :  { %1596 = vmatpush.bf16.msrb.mxu3 %v2780_v22  ;;  %v2460_v18 = vor.u32 %v2744_v13, %v2459_v12  ;;  %v2745_v22 = vld [vmem:[%s3564_s0 + $0xe4] sm:$0xf] }
  0x66   :  { %1540 = vmatpush.bf16.msrb.mxu0 %v2755_v34 }
  0x67   :  { %1559 = vmatpush.bf16.msrb.mxu1 %v2763_v30  ;;  %v2476_v30 = vor.u32 %v2748_v25, %v2475_v24 }
  0x68   :  { %1578 = vmatpush.bf16.msrb.mxu2 %v2771_v23  ;;  %v2469_v23 = vld [vmem:[%s3564_s0 + $0xf0] sm:$0xf0] }
  0x69   :  { %1597 = vmatpush.bf16.msrb.mxu3 %v2779_v35  ;;  %v2472_v29 = vor.u32 %v2745_v22, %v2469_v23 }
  0x6a   :  { %1541 = vmatpush.bf16.msrb.mxu0 %v2754_v38 }
  0x6b   :  { %1560 = vmatpush.bf16.msrb.mxu1 %v2762_v37 }
  0x6c   :  { %1579 = vmatpush.bf16.msrb.mxu2 %v2770_v36 }
  0x6d   :  { %1598 = vmatpush.bf16.msrb.mxu3 %v2778_v39 }
  0x6e   :  { %1542 = vmatpush.bf16.msrb.mxu0 %v2753_v42 }
  0x6f   :  { %1561 = vmatpush.bf16.msrb.mxu1 %v2761_v41 }
  0x70   :  { %1580 = vmatpush.bf16.msrb.mxu2 %v2769_v40 }
  0x71   :  { %1599 = vmatpush.bf16.msrb.mxu3 %v2777_v43  ;;  %1146 = vmatmul.bf16.gmra.mxu0 %v2236_v57 }
  0x72   :  { %1543 = vmatpush.bf16.msrb.mxu0 %v2752_v53  ;;  %1165 = vmatmul.bf16.gmra.mxu1 %v2240_v59 }
  0x73   :  { %1562 = vmatpush.bf16.msrb.mxu1 %v2760_v47  ;;  %1184 = vmatmul.bf16.gmra.mxu2 %v2244_v60 }
  0x74   :  { %1581 = vmatpush.bf16.msrb.mxu2 %v2768_v44  ;;  %1203 = vmatmul.bf16.gmra.mxu3 %v2248_v61 }
  0x75   :  { %1600 = vmatpush.bf16.msrb.mxu3 %v2776_v55 }
  0x76   :  { %1544 = vmatpush.bf16.msrb.mxu0 %v2751_v62 }
  0x77   :  { %1563 = vmatpush.bf16.msrb.mxu1 %v2759_v58 }
  0x78   :  { %1582 = vmatpush.bf16.msrb.mxu2 %v2767_v56 }
  0x79   :  { %1601 = vmatpush.bf16.msrb.mxu3 %v2775_v63 }
  0x7a   :  { %1545 = vmatpush.bf16.msrb.mxu0 %v2750_v2 }
  0x7b   :  { %1564 = vmatpush.bf16.msrb.mxu1 %v2758_v1 }
  0x7c   :  { %1583 = vmatpush.bf16.msrb.mxu2 %v2766_v0 }
  0x7d   :  { %1602 = vmatpush.bf16.msrb.mxu3 %v2774_v3 }
  0x7e   :  { %1546 = vmatpush.bf16.msrb.mxu0 %v2749_v6 }
  0x7f   :  { %1565 = vmatpush.bf16.msrb.mxu1 %v2757_v5 }
  0x80   :  { %1584 = vmatpush.bf16.msrb.mxu2 %v2765_v4 }
  0x81   :  { %1603 = vmatpush.bf16.msrb.mxu3 %v2773_v7  ;;  %1547 = vmatmul.bf16.vlgmr.msrb.gmra.mxu0 %v2452_v16 }
  0x82   :  { %1566 = vmatmul.bf16.vlgmr.msrb.gmra.mxu1 %v2456_v17 }
  0x83   :  { %1585 = vmatmul.bf16.vlgmr.msrb.gmra.mxu2 %v2460_v18 }
  0x84   :  { %1604 = vmatmul.bf16.vlgmr.msrb.gmra.mxu3 %v2464_v19 }
  0x91   :  { %1552 = vmatmul.bf16.gmra.mxu0 %v2468_v28 }
  0x92   :  { %1571 = vmatmul.bf16.gmra.mxu1 %v2472_v29 }
  0x93   :  { %1590 = vmatmul.bf16.gmra.mxu2 %v2476_v30 }
  0x94   :  { %1609 = vmatmul.bf16.gmra.mxu3 %v2480_v31 }
  0x9e   :  { %v330_v32 = vpop.f32.mrf.mxu0 }
  0x9f   :  { %v349_v33 = vpop.f32.mrf.mxu1 }
  0xa0   :  { %v350_v34 = vadd.f32 %v349_v33, %v330_v32 }
  0xa6   :  { %v368_v35 = vpop.f32.mrf.mxu2  ;;  %v332_v38 = vpop.f32.mrf.mxu0 }
  0xa7   :  { %v387_v36 = vpop.f32.mrf.mxu3  ;;  %v369_v37 = vadd.f32 %v368_v35, %v350_v34  ;;  %v351_v39 = vpop.f32.mrf.mxu1 }
  0xa8   :  { %v352_v40 = vadd.f32 %v351_v39, %v332_v38 }
  0xa9   :  { %v3431_v41 = vadd.f32 %v387_v36, %v369_v37 }
  0xab   :  { %v407_v49 = vmul.f32 %v3431_v41, %v3431_v41 }
  0xae   :  { %v370_v42 = vpop.f32.mrf.mxu2  ;;  %v335_v45 = vpop.f32.mrf.mxu0 }
  0xaf   :  { %v389_v43 = vpop.f32.mrf.mxu3  ;;  %v371_v44 = vadd.f32 %v370_v42, %v352_v40  ;;  %v354_v46 = vpop.f32.mrf.mxu1 }
  0xb0   :  { %v355_v47 = vadd.f32 %v354_v46, %v335_v45 }
  0xb1   :  { %v3433_v48 = vadd.f32 %v389_v43, %v371_v44 }
  0xb3   :  { %v397_v50 = vadd.f32 %v3433_v48, %v3431_v41  ;;  %v408_v51 = vmul.f32 %v3433_v48, %v3433_v48 }
  0xb5   :  { %v411_v52 = vadd.f32 %v408_v51, %v407_v49 }
  0xb6   :  { %v373_v53 = vpop.f32.mrf.mxu2  ;;  %v337_v56 = vpop.f32.mrf.mxu0 }
  0xb7   :  { %v392_v54 = vpop.f32.mrf.mxu3  ;;  %v374_v55 = vadd.f32 %v373_v53, %v355_v47  ;;  %v356_v57 = vpop.f32.mrf.mxu1 }
  0xb8   :  { %v357_v58 = vadd.f32 %v356_v57, %v337_v56 }
  0xb9   :  { %v3441_v59 = vadd.f32 %v392_v54, %v374_v55 }
  0xbb   :  { %v398_v60 = vadd.f32 %v397_v50, %v3441_v59  ;;  %v409_v61 = vmul.f32 %v3441_v59, %v3441_v59 }
  0xbd   :  { %v412_v62 = vadd.f32 %v411_v52, %v409_v61 }
  0xbe   :  { %v375_v63 = vpop.f32.mrf.mxu2  ;;  %v736_v2 = vpop.f32.mrf.mxu0 }
  0xbf   :  { %v394_v0 = vpop.f32.mrf.mxu3  ;;  %v376_v1 = vadd.f32 %v375_v63, %v357_v58  ;;  %v755_v3 = vpop.f32.mrf.mxu1 }
  0xc0   :  { %v756_v5 = vadd.f32 %v755_v3, %v736_v2 }
  0xc1   :  { %v3446_v4 = vadd.f32 %v394_v0, %v376_v1 }
  0xc3   :  { %v399_v6 = vadd.f32 %v398_v60, %v3446_v4  ;;  %v410_v7 = vmul.f32 %v3446_v4, %v3446_v4 }
  0xc5   :  { %v413_v8 = vadd.f32 %v412_v62, %v410_v7  ;;  %v400_v33 = vrot.slane %v399_v6, 4 }
  0xc6   :  { %v774_v9 = vpop.f32.mrf.mxu2  ;;  %v738_v12 = vpop.f32.mrf.mxu0 }
  0xc7   :  { %v775_v10 = vadd.f32 %v774_v9, %v756_v5  ;;  %v793_v11 = vpop.f32.mrf.mxu3  ;;  %v757_v13 = vpop.f32.mrf.mxu1  ;;  %v414_v36 = vrot.slane %v413_v8, 4  ;;  %v401_v40 = vadd.f32 %v400_v33, %v399_v6 }
  0xc8   :  { %v758_v15 = vadd.f32 %v757_v13, %v738_v12 }
  0xc9   :  { %v3451_v14 = vadd.f32 %v793_v11, %v775_v10  ;;  %v415_v46 = vadd.f32 %v414_v36, %v413_v8  ;;  %v402_v49 = vrot.slane %v401_v40, 2 }
  0xcb   :  { %v813_v23 = vmul.f32 %v3451_v14, %v3451_v14  ;;  %v416_v52 = vrot.slane %v415_v46, 2  ;;  %v403_v56 = vadd.f32 %v402_v49, %v401_v40 }
  0xcd   :  { %v417_v63 = vadd.f32 %v416_v52, %v415_v46  ;;  %v404_v2 = vrot.slane %v403_v56, 1 }
  0xce   :  { %v776_v16 = vpop.f32.mrf.mxu2  ;;  %v741_v19 = vpop.f32.mrf.mxu0 }
  0xcf   :  { %v777_v17 = vadd.f32 %v776_v16, %v758_v15  ;;  %v795_v18 = vpop.f32.mrf.mxu3  ;;  %v760_v20 = vpop.f32.mrf.mxu1  ;;  %v418_v6 = vrot.slane %v417_v63, 1  ;;  %v405_v10 = vadd.f32 %v404_v2, %v403_v56 }
  0xd0   :  { %v761_v22 = vadd.f32 %v760_v20, %v741_v19 }
  0xd1   :  { %v3453_v21 = vadd.f32 %v795_v18, %v777_v17  ;;  %v419_v17 = vadd.f32 %v418_v6, %v417_v63 }
  0xd3   :  { %v803_v24 = vadd.f32 %v3453_v21, %v3451_v14  ;;  %v814_v25 = vmul.f32 %v3453_v21, %v3453_v21 }
  0xd5   :  { %v817_v26 = vadd.f32 %v814_v25, %v813_v23 }
  0xd6   :  { %v779_v27 = vpop.f32.mrf.mxu2  ;;  %v743_v30 = vpop.f32.mrf.mxu0 }
  0xd7   :  { %v780_v28 = vadd.f32 %v779_v27, %v761_v22  ;;  %v798_v29 = vpop.f32.mrf.mxu3  ;;  %v762_v31 = vpop.f32.mrf.mxu1 }
  0xd8   :  { %v763_v38 = vadd.f32 %v762_v31, %v743_v30 }
  0xd9   :  { %v3461_v32 = vadd.f32 %v798_v29, %v780_v28 }
  0xdb   :  { %v804_v34 = vadd.f32 %v803_v24, %v3461_v32  ;;  %v815_v35 = vmul.f32 %v3461_v32, %v3461_v32 }
  0xdd   :  { %v818_v37 = vadd.f32 %v817_v26, %v815_v35 }
  0xde   :  { %v781_v39 = vpop.f32.mrf.mxu2  ;;  %v1142_v44 = vpop.f32.mrf.mxu0 }
  0xdf   :  { %v782_v42 = vadd.f32 %v781_v39, %v763_v38  ;;  %v800_v43 = vpop.f32.mrf.mxu3  ;;  %v1161_v45 = vpop.f32.mrf.mxu1 }
  0xe0   :  { %v1162_v30 = vadd.f32 %v1161_v45, %v1142_v44 }
  0xe1   :  { %v3466_v47 = vadd.f32 %v800_v43, %v782_v42 }
  0xe3   :  { %v805_v50 = vadd.f32 %v804_v34, %v3466_v47  ;;  %v816_v51 = vmul.f32 %v3466_v47, %v3466_v47 }
  0xe5   :  { %v806_v53 = vrot.slane %v805_v50, 4  ;;  %v819_v54 = vadd.f32 %v818_v37, %v816_v51 }
  0xe6   :  { %v1180_v55 = vpop.f32.mrf.mxu2  ;;  %v1144_v61 = vpop.f32.mrf.mxu0 }
  0xe7   :  { %v807_v57 = vadd.f32 %v806_v53, %v805_v50  ;;  %v820_v58 = vrot.slane %v819_v54, 4  ;;  %v1199_v60 = vpop.f32.mrf.mxu3  ;;  %v1163_v62 = vpop.f32.mrf.mxu1  ;;  %v1181_v36 = vadd.f32 %v1180_v55, %v1162_v30 }
  0xe8   :  { %v1164_v31 = vadd.f32 %v1163_v62, %v1144_v61 }
  0xe9   :  { %v808_v0 = vrot.slane %v807_v57, 2  ;;  %v821_v1 = vadd.f32 %v820_v58, %v819_v54  ;;  %v3477_v49 = vadd.f32 %v1199_v60, %v1181_v36 }
  0xeb   :  { %v809_v3 = vadd.f32 %v808_v0, %v807_v57  ;;  %v822_v5 = vrot.slane %v821_v1, 2  ;;  %v1219_v53 = vmul.f32 %v3477_v49, %v3477_v49 }
  0xed   :  { %v810_v7 = vrot.slane %v809_v3, 1  ;;  %v823_v8 = vadd.f32 %v822_v5, %v821_v1 }
  0xee   :  { %v1182_v9 = vpop.f32.mrf.mxu2  ;;  %v1147_v15 = vpop.f32.mrf.mxu0 }
  0xef   :  { %v811_v11 = vadd.f32 %v810_v7, %v809_v3  ;;  %v824_v12 = vrot.slane %v823_v8, 1  ;;  %v1201_v13 = vpop.f32.mrf.mxu3  ;;  %v1166_v16 = vpop.f32.mrf.mxu1  ;;  %v1183_v34 = vadd.f32 %v1182_v9, %v1164_v31 }
  0xf0   :  { %v1167_v33 = vadd.f32 %v1166_v16, %v1147_v15 }
  0xf1   :  { %v3471_v18 = vadd.f32 %v811_v11, %v405_v10  ;;  %v825_v19 = vadd.f32 %v824_v12, %v823_v8  ;;  %v3475_v43 = vadd.f32 %v1201_v13, %v1183_v34 }
  0xf3   :  { %v3473_v20 = vadd.f32 %v825_v19, %v419_v17  ;;  %v1220_v44 = vmul.f32 %v3475_v43, %v3475_v43  ;;  %v1209_v51 = vadd.f32 %v3475_v43, %v3477_v49 }
  0xf5   :  { %v1223_v60 = vadd.f32 %v1220_v44, %v1219_v53 }
  0xf6   :  { %v1185_v22 = vpop.f32.mrf.mxu2  ;;  %v1149_v24 = vpop.f32.mrf.mxu0 }
  0xf7   :  { %v1204_v23 = vpop.f32.mrf.mxu3  ;;  %v1168_v25 = vpop.f32.mrf.mxu1  ;;  %v1186_v37 = vadd.f32 %v1185_v22, %v1167_v33 }
  0xf8   :  { %v1169_v38 = vadd.f32 %v1168_v25, %v1149_v24 }
  0xf9   :  { %v3479_v50 = vadd.f32 %v1204_v23, %v1186_v37 }
  0xfb   :  { %v1221_v54 = vmul.f32 %v3479_v50, %v3479_v50  ;;  %v1210_v56 = vadd.f32 %v1209_v51, %v3479_v50 }
  0xfd   :  { %v1224_v63 = vadd.f32 %v1223_v60, %v1221_v54 }
  0xfe   :  { %v1187_v26 = vpop.f32.mrf.mxu2  ;;  %v1548_v28 = vpop.f32.mrf.mxu0 }
  0xff   :  { %v1206_v27 = vpop.f32.mrf.mxu3  ;;  %v1567_v29 = vpop.f32.mrf.mxu1  ;;  %v1188_v46 = vadd.f32 %v1187_v26, %v1169_v38 }
 0x100   :  { %v1568_v0 = vadd.f32 %v1567_v29, %v1548_v28 }
 0x101   :  { %v3483_v45 = vadd.f32 %v1206_v27, %v1188_v46 }
 0x103   :  { %v1222_v61 = vmul.f32 %v3483_v45, %v3483_v45  ;;  %v1211_v62 = vadd.f32 %v1210_v56, %v3483_v45 }
 0x105   :  { %v1225_v3 = vadd.f32 %v1224_v63, %v1222_v61  ;;  %v1212_v6 = vrot.slane %v1211_v62, 4 }
 0x106   :  { %v1586_v35 = vpop.f32.mrf.mxu2  ;;  %v1550_v40 = vpop.f32.mrf.mxu0 }
 0x107   :  { %v1605_v39 = vpop.f32.mrf.mxu3  ;;  %v1569_v42 = vpop.f32.mrf.mxu1  ;;  %v1587_v8 = vadd.f32 %v1586_v35, %v1568_v0  ;;  %v1226_v11 = vrot.slane %v1225_v3, 4  ;;  %v1213_v13 = vadd.f32 %v1212_v6, %v1211_v62 }
 0x108   :  { %v1570_v1 = vadd.f32 %v1569_v42, %v1550_v40 }
 0x109   :  { %v3497_v17 = vadd.f32 %v1605_v39, %v1587_v8  ;;  %v1227_v22 = vadd.f32 %v1226_v11, %v1225_v3  ;;  %v1214_v25 = vrot.slane %v1213_v13, 2 }
 0x10b   :  { %v1625_v27 = vmul.f32 %v3497_v17, %v3497_v17  ;;  %v1228_v33 = vrot.slane %v1227_v22, 2  ;;  %v1215_v37 = vadd.f32 %v1214_v25, %v1213_v13 }
 0x10d   :  { %v1229_v42 = vadd.f32 %v1228_v33, %v1227_v22  ;;  %v1216_v51 = vrot.slane %v1215_v37, 1 }
 0x10e   :  { %v1588_v52 = vpop.f32.mrf.mxu2  ;;  %v1553_v57 = vpop.f32.mrf.mxu0 }
 0x10f   :  { %v1607_v55 = vpop.f32.mrf.mxu3  ;;  %v1572_v58 = vpop.f32.mrf.mxu1  ;;  %v1589_v5 = vadd.f32 %v1588_v52, %v1570_v1  ;;  %v1230_v54 = vrot.slane %v1229_v42, 1 }
 0x110   :  { %v1573_v2 = vadd.f32 %v1572_v58, %v1553_v57  ;;  %v1217_v57 = vadd.f32 %v1216_v51, %v1215_v37 }
 0x111   :  { %v3495_v12 = vadd.f32 %v1607_v55, %v1589_v5  ;;  %v1231_v61 = vadd.f32 %v1230_v54, %v1229_v42 }
 0x112   :  { %v1218_v0 = vadd.f32 %v1217_v57, %v3471_v18  ;;  %v1644_v18 = vld [vmem:[%s3565_s2] sm:$0x1] }
 0x113   :  { %v1626_v23 = vmul.f32 %v3495_v12, %v3495_v12  ;;  %v1615_v28 = vadd.f32 %v3495_v12, %v3497_v17  ;;  %v1232_v3 = vadd.f32 %v1231_v61, %v3473_v20 }
 0x115   :  { %v1629_v34 = vadd.f32 %v1626_v23, %v1625_v27 }
 0x116   :  { %v1591_v7 = vpop.f32.mrf.mxu2  ;;  %v1555_v15 = vpop.f32.mrf.mxu0 }
 0x117   :  { %v1592_v9 = vadd.f32 %v1591_v7, %v1573_v2  ;;  %v1610_v10 = vpop.f32.mrf.mxu3  ;;  %v1574_v16 = vpop.f32.mrf.mxu1 }
 0x118   :  { %v1575_v24 = vadd.f32 %v1574_v16, %v1555_v15 }
 0x119   :  { %v3499_v19 = vadd.f32 %v1610_v10, %v1592_v9 }
 0x11b   :  { %v1627_v29 = vmul.f32 %v3499_v19, %v3499_v19  ;;  %v1616_v35 = vadd.f32 %v1615_v28, %v3499_v19  ;;  %v1657_v28 = vld [vmem:[%s3566_s3] sm:$0x1] }
 0x11d   :  { %v1630_v38 = vadd.f32 %v1629_v34, %v1627_v29 }
 0x11e   :  { %v1593_v26 = vpop.f32.mrf.mxu2 }
 0x11f   :  { %v1594_v30 = vadd.f32 %v1593_v26, %v1575_v24  ;;  %v1612_v31 = vpop.f32.mrf.mxu3 }
 0x121   :  { %v3510_v36 = vadd.f32 %v1612_v31, %v1594_v30 }
 0x123   :  { %v1617_v39 = vadd.f32 %v1616_v35, %v3510_v36  ;;  %v1628_v40 = vmul.f32 %v3510_v36, %v3510_v36 }
 0x125   :  { %v1618_v46 = vrot.slane %v1617_v39, 4  ;;  %v1631_v44 = vadd.f32 %v1630_v38, %v1628_v40 }
 0x127   :  { %v1619_v52 = vadd.f32 %v1618_v46, %v1617_v39  ;;  %v1632_v53 = vrot.slane %v1631_v44, 4 }
 0x129   :  { %v1620_v55 = vrot.slane %v1619_v52, 2  ;;  %v1633_v56 = vadd.f32 %v1632_v53, %v1631_v44 }
 0x12b   :  { %v1621_v58 = vadd.f32 %v1620_v55, %v1619_v52  ;;  %v1634_v60 = vrot.slane %v1633_v56, 2 }
 0x12d   :  { %v1622_v62 = vrot.slane %v1621_v58, 1  ;;  %v1635_v63 = vadd.f32 %v1634_v60, %v1633_v56 }
 0x12f   :  { %v1623_v1 = vadd.f32 %v1622_v62, %v1621_v58  ;;  %v1636_v2 = vrot.slane %v1635_v63, 1 }
 0x131   :  { %v1624_v5 = vadd.f32 %v1623_v1, %v1218_v0  ;;  %v1637_v6 = vadd.f32 %v1636_v2, %v1635_v63 }
 0x133   :  { %v1638_v7 = vadd.f32 %v1637_v6, %v1232_v3  ;;  %v1639_v8 = vmul.f32 0.0078125, %v1624_v5 }
 0x135   :  { %v1640_v9 = vmul.f32 0.0078125, %v1638_v7  ;;  %v1641_v10 = vmul.f32 %v1639_v8, %v1639_v8 }
 0x137   :  { %v1642_v11 = vsub.f32 %v1640_v9, %v1641_v10 }
 0x139   :  { %v1643_v13 = vmax.f32 %v1642_v11, 0.0 }
 0x13b   :  { %v1645_v15 = vadd.f32 1e-05, %v1643_v13 }
 0x13d   :  { %2828 = vrsqrt.f32 %v1645_v15  ;;  %vm1652_vm1 = vweird.f32 %v1645_v15 }
 0x143   :  { %v2829_v16 = vpop.eup %2828 }
 0x144   :  { %v1647_v22 = vmul.f32 %v2829_v16, %v1645_v15  ;;  %vm1653_vm0 = vweird.f32 %v2829_v16 }
 0x145   :  { %vm1654_vm2 = vmor %vm1652_vm1, %vm1653_vm0 }
 0x146   :  { %v1648_v23 = vmul.f32 %v2829_v16, %v1647_v22 }
 0x148   :  { %v1649_v24 = vmul.f32 0.5, %v1648_v23 }
 0x14a   :  { %v1650_v25 = vsub.f32 1.5, %v1649_v24 }
 0x14c   :  { %v1651_v20 = vmul.f32 %v2829_v16, %v1650_v25 }
 0x14e   :  { %v1655_v26 = vsel %vm1654_vm2, %v2829_v16, %v1651_v20 }
 0x14f   :  { %v1656_v27 = vmul.f32 %v1655_v26, %v1644_v18 }
 0x151   :  { %v1658_v29 = vmul.f32 %v1656_v27, %v1639_v8  ;;  %v1661_v30 = vperm.slane %v1656_v27, 0 }
 0x153   :  { %v1659_v31 = vsub.f32 %v1657_v28, %v1658_v29  ;;  %v1663_v33 = vmul.f32 %v1661_v30, %v3431_v41  ;;  %v1664_v34 = vmul.f32 %v1661_v30, %v3433_v48  ;;  %v1665_v35 = vmul.f32 %v1661_v30, %v3441_v59 }
 0x154   :  { %v1666_v37 = vmul.f32 %v1661_v30, %v3446_v4  ;;  %v1686_v38 = vmul.f32 %v1661_v30, %v3451_v14  ;;  %v1687_v39 = vmul.f32 %v1661_v30, %v3453_v21  ;;  %v1688_v40 = vmul.f32 %v1661_v30, %v3461_v32 }
 0x155   :  { %v1668_v42 = vperm.slane %v1659_v31, 0  ;;  %v1689_v46 = vmul.f32 %v1661_v30, %v3466_v47  ;;  %v1707_v44 = vmul.f32 %v1661_v30, %v3477_v49  ;;  %v1708_v51 = vmul.f32 %v1661_v30, %v3475_v43 }
 0x156   :  { %v1709_v41 = vmul.f32 %v1661_v30, %v3479_v50  ;;  %v1710_v48 = vmul.f32 %v1661_v30, %v3483_v45  ;;  %v1728_v59 = vmul.f32 %v1661_v30, %v3497_v17  ;;  %v1729_v4 = vmul.f32 %v1661_v30, %v3495_v12 }
 0x157   :  { %v1670_v14 = vadd.f32 %v1668_v42, %v1663_v33  ;;  %v1671_v52 = vadd.f32 %v1668_v42, %v1664_v34  ;;  %v1672_v21 = vadd.f32 %v1668_v42, %v1665_v35  ;;  %v1673_v53 = vadd.f32 %v1668_v42, %v1666_v37 }
 0x158   :  { %v1690_v32 = vadd.f32 %v1686_v38, %v1668_v42  ;;  %v1691_v54 = vadd.f32 %v1687_v39, %v1668_v42  ;;  %v1692_v55 = vadd.f32 %v1688_v40, %v1668_v42  ;;  %v1693_v47 = vadd.f32 %v1689_v46, %v1668_v42 }
 0x159   :  { %v1674_v56 = vmax.f32 %v1670_v14, 0.0  ;;  %v1675_v49 = vmax.f32 %v1671_v52, 0.0  ;;  %v1676_v57 = vmax.f32 %v1672_v21, 0.0  ;;  %v1677_v43 = vmax.f32 %v1673_v53, 0.0 }
 0x15a   :  { %v1694_v58 = vmax.f32 %v1690_v32, 0.0  ;;  %v1695_v50 = vmax.f32 %v1691_v54, 0.0  ;;  %v1696_v60 = vmax.f32 %v1692_v55, 0.0  ;;  %v1697_v45 = vmax.f32 %v1693_v47, 0.0 }
 0x15b   :  { %v2784_v61 = vpack.c.bf16 %v1675_v49, %v1674_v56  ;;  %v2789_v17 = vpack.c.bf16 %v1677_v43, %v1676_v57  ;;  %v1711_v62 = vadd.f32 %v1707_v44, %v1668_v42  ;;  %v1712_v12 = vadd.f32 %v1708_v51, %v1668_v42 }
 0x15c   :  { %v2794_v63 = vpack.c.bf16 %v1695_v50, %v1694_v58  ;;  %v2799_v0 = vpack.c.bf16 %v1697_v45, %v1696_v60  ;;  %v1713_v1 = vadd.f32 %v1709_v41, %v1668_v42  ;;  %v1714_v2 = vadd.f32 %v1710_v48, %v1668_v42 }
 0x15d   :  { %2785 = vst [vmem:[%s3567_s4] sm:$0xff] %v2784_v61   ;;  %v1715_v3 = vmax.f32 %v1711_v62, 0.0  ;;  %v1716_v5 = vmax.f32 %v1712_v12, 0.0  ;;  %v1730_v6 = vmul.f32 %v1661_v30, %v3499_v19  ;;  %v1731_v7 = vmul.f32 %v1661_v30, %v3510_v36 }
 0x15e   :  { %2821 = vst [vmem:[%s3567_s4 + $0x8] sm:$0xff] %v2789_v17   ;;  %v1717_v8 = vmax.f32 %v1713_v1, 0.0  ;;  %v1718_v9 = vmax.f32 %v1714_v2, 0.0  ;;  %v1732_v10 = vadd.f32 %v1728_v59, %v1668_v42  ;;  %v1733_v11 = vadd.f32 %v1729_v4, %v1668_v42 }
 0x15f   :  { %2822 = vst [vmem:[%s3567_s4 + $0x10] sm:$0xff] %v2794_v63   ;;  %v2804_v13 = vpack.c.bf16 %v1716_v5, %v1715_v3  ;;  %v1734_v15 = vadd.f32 %v1730_v6, %v1668_v42  ;;  %v1735_v16 = vadd.f32 %v1731_v7, %v1668_v42 }
 0x160   :  { %2823 = vst [vmem:[%s3567_s4 + $0x18] sm:$0xff] %v2799_v0   ;;  %v2809_v19 = vpack.c.bf16 %v1718_v9, %v1717_v8  ;;  %v1736_v36 = vmax.f32 %v1732_v10, 0.0  ;;  %v1737_v22 = vmax.f32 %v1733_v11, 0.0 }
 0x161   :  { %2824 = vst [vmem:[%s3567_s4 + $0x20] sm:$0xff] %v2804_v13   ;;  %v1738_v23 = vmax.f32 %v1734_v15, 0.0  ;;  %v1739_v24 = vmax.f32 %v1735_v16, 0.0 }
 0x162   :  { %2825 = vst [vmem:[%s3567_s4 + $0x28] sm:$0xff] %v2809_v19   ;;  %v2814_v25 = vpack.c.bf16 %v1737_v22, %v1736_v36 }
 0x163   :  { %v2819_v18 = vpack.c.bf16 %v1739_v24, %v1738_v23 }
 0x164   :  { %2826 = vst [vmem:[%s3567_s4 + $0x30] sm:$0xff] %v2814_v25  }
 0x165   :  { %2827 = vst [vmem:[%s3567_s4 + $0x38] sm:$0xff] %v2819_v18  }

// kernel: unet_forward.11
= control target key start
LH: loop header
LB: loop body
LE: loop exit
PB: predicated region body
PF: predicated region fallthrough
CT: control target
= control target key end

     0   :  { %s5751_s1 = inlined_call_operand.vmem [shape: bf16[4,512,128], index: 1, kind: input, shape index: {}]   ;;  %s5752_s2 = inlined_call_operand.vmem [shape: f32[1,128], index: 2, kind: input, shape index: {}]   ;;  %s5753_s0 = inlined_call_operand.vmem [shape: bf16[4,128,512], index: 0, kind: input, shape index: {}]   ;;  %s5754_s3 = inlined_call_operand.vmem [shape: f32[4,128,128], index: 3, kind: output, shape index: {}]  }
   0x1   :  { %v4082_v0 = vld [vmem:[%s5751_s1 + $0x38] sm:$0xff]  ;;  %v4081_v4 = vld [vmem:[%s5751_s1 + $0x30] sm:$0xff]  ;;  %v4080_v8 = vld [vmem:[%s5751_s1 + $0x28] sm:$0xff] }
   0x2   :  { %v4090_v1 = vld [vmem:[%s5751_s1 + $0x78] sm:$0xff]  ;;  %466 = vmatpush.bf16.msra.mxu0 %v4082_v0  ;;  %v4089_v5 = vld [vmem:[%s5751_s1 + $0x70] sm:$0xff]  ;;  %v4088_v9 = vld [vmem:[%s5751_s1 + $0x68] sm:$0xff] }
   0x3   :  { %v4098_v2 = vld [vmem:[%s5751_s1 + $0xb8] sm:$0xff]  ;;  %515 = vmatpush.bf16.msra.mxu1 %v4090_v1  ;;  %v4097_v6 = vld [vmem:[%s5751_s1 + $0xb0] sm:$0xff]  ;;  %v4096_v10 = vld [vmem:[%s5751_s1 + $0xa8] sm:$0xff] }
   0x4   :  { %v4106_v3 = vld [vmem:[%s5751_s1 + $0xf8] sm:$0xff]  ;;  %564 = vmatpush.bf16.msra.mxu2 %v4098_v2  ;;  %v4105_v7 = vld [vmem:[%s5751_s1 + $0xf0] sm:$0xff]  ;;  %v4104_v11 = vld [vmem:[%s5751_s1 + $0xe8] sm:$0xff] }
   0x5   :  { %613 = vmatpush.bf16.msra.mxu3 %v4106_v3  ;;  %v4079_v12 = vld [vmem:[%s5751_s1 + $0x20] sm:$0xff]  ;;  %v4078_v16 = vld [vmem:[%s5751_s1 + $0x18] sm:$0xff]  ;;  %v4077_v20 = vld [vmem:[%s5751_s1 + $0x10] sm:$0xff] }
   0x6   :  { %467 = vmatpush.bf16.msra.mxu0 %v4081_v4  ;;  %v4087_v13 = vld [vmem:[%s5751_s1 + $0x60] sm:$0xff]  ;;  %v4086_v17 = vld [vmem:[%s5751_s1 + $0x58] sm:$0xff]  ;;  %v4085_v21 = vld [vmem:[%s5751_s1 + $0x50] sm:$0xff] }
   0x7   :  { %516 = vmatpush.bf16.msra.mxu1 %v4089_v5  ;;  %v4095_v14 = vld [vmem:[%s5751_s1 + $0xa0] sm:$0xff]  ;;  %v4094_v18 = vld [vmem:[%s5751_s1 + $0x98] sm:$0xff]  ;;  %v4093_v22 = vld [vmem:[%s5751_s1 + $0x90] sm:$0xff] }
   0x8   :  { %565 = vmatpush.bf16.msra.mxu2 %v4097_v6  ;;  %v4103_v15 = vld [vmem:[%s5751_s1 + $0xe0] sm:$0xff]  ;;  %v4102_v19 = vld [vmem:[%s5751_s1 + $0xd8] sm:$0xff]  ;;  %v4101_v23 = vld [vmem:[%s5751_s1 + $0xd0] sm:$0xff] }
   0x9   :  { %614 = vmatpush.bf16.msra.mxu3 %v4105_v7  ;;  %v4076_v24 = vld [vmem:[%s5751_s1 + $0x8] sm:$0xff]  ;;  %v4075_v28 = vld [vmem:[%s5751_s1] sm:$0xff]  ;;  %v4045_v33 = vld [vmem:[%s5753_s0 + $0xc] sm:$0xf0] }
   0xa   :  { %468 = vmatpush.bf16.msra.mxu0 %v4080_v8  ;;  %v4084_v25 = vld [vmem:[%s5751_s1 + $0x48] sm:$0xff]  ;;  %v4083_v29 = vld [vmem:[%s5751_s1 + $0x40] sm:$0xff]  ;;  %v2687_v35 = vld [vmem:[%s5753_s0 + $0x10] sm:$0xf0] }
   0xb   :  { %517 = vmatpush.bf16.msra.mxu1 %v4088_v9  ;;  %v4092_v26 = vld [vmem:[%s5751_s1 + $0x88] sm:$0xff]  ;;  %v4091_v30 = vld [vmem:[%s5751_s1 + $0x80] sm:$0xff]  ;;  %v4046_v37 = vld [vmem:[%s5753_s0 + $0x14] sm:$0xf0] }
   0xc   :  { %566 = vmatpush.bf16.msra.mxu2 %v4096_v10  ;;  %v4100_v27 = vld [vmem:[%s5751_s1 + $0xc8] sm:$0xff]  ;;  %v4099_v31 = vld [vmem:[%s5751_s1 + $0xc0] sm:$0xff]  ;;  %v2695_v39 = vld [vmem:[%s5753_s0 + $0x18] sm:$0xf0] }
   0xd   :  { %615 = vmatpush.bf16.msra.mxu3 %v4104_v11  ;;  %v2685_v32 = vld [vmem:[%s5753_s0] sm:$0xf]  ;;  %v4043_v34 = vld [vmem:[%s5753_s0 + $0x4] sm:$0xf]  ;;  %v2693_v36 = vld [vmem:[%s5753_s0 + $0x8] sm:$0xf] }
   0xe   :  { %469 = vmatpush.bf16.msra.mxu0 %v4079_v12  ;;  %v4044_v38 = vld [vmem:[%s5753_s0 + $0xc] sm:$0xf]  ;;  %v4162_v40 = vld [vmem:[%s5751_s1 + $0x1b8] sm:$0xff]  ;;  %v2686_v42 = vor.u32 %v4045_v33, %v2685_v32  ;;  %v2690_v43 = vor.u32 %v4043_v34, %v2687_v35  ;;  %v2694_v44 = vor.u32 %v4046_v37, %v2693_v36  ;;  %v4161_v48 = vld [vmem:[%s5751_s1 + $0x1b0] sm:$0xff] }
   0xf   :  { %518 = vmatpush.bf16.msra.mxu1 %v4087_v13  ;;  %v4146_v41 = vld [vmem:[%s5751_s1 + $0x138] sm:$0xff]  ;;  %v2698_v45 = vor.u32 %v4044_v38, %v2695_v39  ;;  %v4145_v49 = vld [vmem:[%s5751_s1 + $0x130] sm:$0xff]  ;;  %v4160_v52 = vld [vmem:[%s5751_s1 + $0x1a8] sm:$0xff] }
  0x10   :  { %567 = vmatpush.bf16.msra.mxu2 %v4095_v14  ;;  %v4170_v46 = vld [vmem:[%s5751_s1 + $0x1f8] sm:$0xff]  ;;  %v4169_v50 = vld [vmem:[%s5751_s1 + $0x1f0] sm:$0xff]  ;;  %v4144_v53 = vld [vmem:[%s5751_s1 + $0x128] sm:$0xff] }
  0x11   :  { %616 = vmatpush.bf16.msra.mxu3 %v4103_v15  ;;  %v4154_v47 = vld [vmem:[%s5751_s1 + $0x178] sm:$0xff]  ;;  %v4153_v51 = vld [vmem:[%s5751_s1 + $0x170] sm:$0xff]  ;;  %v4168_v54 = vld [vmem:[%s5751_s1 + $0x1e8] sm:$0xff] }
  0x12   :  { %470 = vmatpush.bf16.msra.mxu0 %v4078_v16  ;;  %v4152_v55 = vld [vmem:[%s5751_s1 + $0x168] sm:$0xff]  ;;  %v2701_v56 = vld [vmem:[%s5753_s0 + $0x20] sm:$0xf]  ;;  %v4049_v57 = vld [vmem:[%s5753_s0 + $0x2c] sm:$0xf0] }
  0x13   :  { %519 = vmatpush.bf16.msra.mxu1 %v4086_v17  ;;  %v4047_v58 = vld [vmem:[%s5753_s0 + $0x24] sm:$0xf]  ;;  %v2703_v59 = vld [vmem:[%s5753_s0 + $0x30] sm:$0xf0]  ;;  %v2709_v60 = vld [vmem:[%s5753_s0 + $0x28] sm:$0xf]  ;;  %v2702_v0 = vor.u32 %v4049_v57, %v2701_v56 }
  0x14   :  { %568 = vmatpush.bf16.msra.mxu2 %v4094_v18  ;;  %v4050_v61 = vld [vmem:[%s5753_s0 + $0x34] sm:$0xf0]  ;;  %v4048_v62 = vld [vmem:[%s5753_s0 + $0x2c] sm:$0xf]  ;;  %v2711_v63 = vld [vmem:[%s5753_s0 + $0x38] sm:$0xf0]  ;;  %v2706_v1 = vor.u32 %v4047_v58, %v2703_v59 }
  0x15   :  { %617 = vmatpush.bf16.msra.mxu3 %v4102_v19  ;;  %v2710_v2 = vor.u32 %v4050_v61, %v2709_v60  ;;  %v2714_v3 = vor.u32 %v4048_v62, %v2711_v63  ;;  %v4159_v4 = vld [vmem:[%s5751_s1 + $0x1a0] sm:$0xff]  ;;  %v4053_v9 = vld [vmem:[%s5753_s0 + $0x4c] sm:$0xf0]  ;;  %v2719_v11 = vld [vmem:[%s5753_s0 + $0x50] sm:$0xf0] }
  0x16   :  { %471 = vmatpush.bf16.msra.mxu0 %v4077_v20  ;;  %v4143_v5 = vld [vmem:[%s5751_s1 + $0x120] sm:$0xff]  ;;  %v2725_v12 = vld [vmem:[%s5753_s0 + $0x48] sm:$0xf]  ;;  %v4054_v13 = vld [vmem:[%s5753_s0 + $0x54] sm:$0xf0] }
  0x17   :  { %520 = vmatpush.bf16.msra.mxu1 %v4085_v21  ;;  %v4167_v6 = vld [vmem:[%s5751_s1 + $0x1e0] sm:$0xff]  ;;  %v4052_v14 = vld [vmem:[%s5753_s0 + $0x4c] sm:$0xf]  ;;  %v2727_v15 = vld [vmem:[%s5753_s0 + $0x58] sm:$0xf0]  ;;  %v2726_v18 = vor.u32 %v4054_v13, %v2725_v12 }
  0x18   :  { %569 = vmatpush.bf16.msra.mxu2 %v4093_v22  ;;  %v4151_v7 = vld [vmem:[%s5751_s1 + $0x160] sm:$0xff]  ;;  %v2730_v19 = vor.u32 %v4052_v14, %v2727_v15  ;;  %v4158_v20 = vld [vmem:[%s5751_s1 + $0x198] sm:$0xff]  ;;  %v4157_v36 = vld [vmem:[%s5751_s1 + $0x190] sm:$0xff] }
  0x19   :  { %618 = vmatpush.bf16.msra.mxu3 %v4101_v23  ;;  %v2717_v8 = vld [vmem:[%s5753_s0 + $0x40] sm:$0xf]  ;;  %v4051_v10 = vld [vmem:[%s5753_s0 + $0x44] sm:$0xf]  ;;  %v4142_v21 = vld [vmem:[%s5751_s1 + $0x118] sm:$0xff] }
  0x1a   :  { %472 = vmatpush.bf16.msra.mxu0 %v4076_v24  ;;  %v2718_v16 = vor.u32 %v4053_v9, %v2717_v8  ;;  %v2722_v17 = vor.u32 %v4051_v10, %v2719_v11  ;;  %v4166_v22 = vld [vmem:[%s5751_s1 + $0x1d8] sm:$0xff]  ;;  %v2733_v24 = vld [vmem:[%s5753_s0 + $0x60] sm:$0xf]  ;;  %v4141_v37 = vld [vmem:[%s5751_s1 + $0x110] sm:$0xff] }
  0x1b   :  { %521 = vmatpush.bf16.msra.mxu1 %v4084_v25  ;;  %v4150_v23 = vld [vmem:[%s5751_s1 + $0x158] sm:$0xff]  ;;  %v4057_v25 = vld [vmem:[%s5753_s0 + $0x6c] sm:$0xf0]  ;;  %v2765_v56 = vld [vmem:[%s5753_s0 + $0xa0] sm:$0xf] }
  0x1c   :  { %570 = vmatpush.bf16.msra.mxu2 %v4092_v26  ;;  %v4055_v26 = vld [vmem:[%s5753_s0 + $0x64] sm:$0xf]  ;;  %v2734_v32 = vor.u32 %v4057_v25, %v2733_v24  ;;  %v4165_v38 = vld [vmem:[%s5751_s1 + $0x1d0] sm:$0xff]  ;;  %v2773_v60 = vld [vmem:[%s5753_s0 + $0xa8] sm:$0xf] }
  0x1d   :  { %619 = vmatpush.bf16.msra.mxu3 %v4100_v27  ;;  %v2735_v27 = vld [vmem:[%s5753_s0 + $0x70] sm:$0xf0]  ;;  %v4065_v57 = vld [vmem:[%s5753_s0 + $0xac] sm:$0xf0]  ;;  %v4063_v58 = vld [vmem:[%s5753_s0 + $0xa4] sm:$0xf] }
  0x1e   :  { %473 = vmatpush.bf16.msra.mxu0 %v4075_v28  ;;  %v2741_v28 = vld [vmem:[%s5753_s0 + $0x68] sm:$0xf]  ;;  %v2738_v33 = vor.u32 %v4055_v26, %v2735_v27  ;;  %v4149_v39 = vld [vmem:[%s5751_s1 + $0x150] sm:$0xff]  ;;  %v4066_v61 = vld [vmem:[%s5753_s0 + $0xb4] sm:$0xf0] }
  0x1f   :  { %522 = vmatpush.bf16.msra.mxu1 %v4083_v29  ;;  %v4058_v29 = vld [vmem:[%s5753_s0 + $0x74] sm:$0xf0]  ;;  %v2767_v59 = vld [vmem:[%s5753_s0 + $0xb0] sm:$0xf0]  ;;  %v4064_v62 = vld [vmem:[%s5753_s0 + $0xac] sm:$0xf] }
  0x20   :  { %571 = vmatpush.bf16.msra.mxu2 %v4091_v30  ;;  %v4056_v30 = vld [vmem:[%s5753_s0 + $0x6c] sm:$0xf]  ;;  %v2742_v34 = vor.u32 %v4058_v29, %v2741_v28  ;;  %v2775_v63 = vld [vmem:[%s5753_s0 + $0xb8] sm:$0xf0]  ;;  %v2781_v8 = vld [vmem:[%s5753_s0 + $0xc0] sm:$0xf] }
  0x21   :  { %620 = vmatpush.bf16.msra.mxu3 %v4099_v31  ;;  %474 = vmatmul.bf16.vlgmr.msra.gmra.mxu0 %v2686_v42  ;;  %v2743_v31 = vld [vmem:[%s5753_s0 + $0x78] sm:$0xf0]  ;;  %v4059_v42 = vld [vmem:[%s5753_s0 + $0x84] sm:$0xf]  ;;  %v4069_v9 = vld [vmem:[%s5753_s0 + $0xcc] sm:$0xf0] }
  0x22   :  { %1132 = vmatpush.bf16.msrb.mxu0 %v4146_v41  ;;  %523 = vmatmul.bf16.vlgmr.msra.gmra.mxu1 %v2690_v43  ;;  %v2746_v35 = vor.u32 %v4056_v30, %v2743_v31  ;;  %v4061_v41 = vld [vmem:[%s5753_s0 + $0x8c] sm:$0xf0]  ;;  %v2751_v43 = vld [vmem:[%s5753_s0 + $0x90] sm:$0xf0]  ;;  %v4067_v10 = vld [vmem:[%s5753_s0 + $0xc4] sm:$0xf] }
  0x23   :  { %572 = vmatmul.bf16.vlgmr.msra.gmra.mxu2 %v2694_v44  ;;  %1181 = vmatpush.bf16.msrb.mxu1 %v4154_v47  ;;  %v2757_v44 = vld [vmem:[%s5753_s0 + $0x88] sm:$0xf]  ;;  %v2759_v47 = vld [vmem:[%s5753_s0 + $0x98] sm:$0xf0]  ;;  %v2783_v11 = vld [vmem:[%s5753_s0 + $0xd0] sm:$0xf0] }
  0x24   :  { %1230 = vmatpush.bf16.msrb.mxu2 %v4162_v40  ;;  %621 = vmatmul.bf16.vlgmr.msra.gmra.mxu3 %v2698_v45  ;;  %v2749_v40 = vld [vmem:[%s5753_s0 + $0x80] sm:$0xf]  ;;  %v4062_v45 = vld [vmem:[%s5753_s0 + $0x94] sm:$0xf0]  ;;  %v2789_v12 = vld [vmem:[%s5753_s0 + $0xc8] sm:$0xf] }
  0x25   :  { %1279 = vmatpush.bf16.msrb.mxu3 %v4170_v46  ;;  %v4060_v46 = vld [vmem:[%s5753_s0 + $0x8c] sm:$0xf]  ;;  %v4070_v13 = vld [vmem:[%s5753_s0 + $0xd4] sm:$0xf0]  ;;  %v2791_v15 = vld [vmem:[%s5753_s0 + $0xd8] sm:$0xf0] }
  0x26   :  { %1133 = vmatpush.bf16.msrb.mxu0 %v4145_v49  ;;  %v2754_v49 = vor.u32 %v4059_v42, %v2751_v43  ;;  %v4068_v14 = vld [vmem:[%s5753_s0 + $0xcc] sm:$0xf]  ;;  %v4073_v24 = vld [vmem:[%s5753_s0 + $0xec] sm:$0xf0]  ;;  %v4071_v25 = vld [vmem:[%s5753_s0 + $0xe4] sm:$0xf] }
  0x27   :  { %1182 = vmatpush.bf16.msrb.mxu1 %v4153_v51  ;;  %v2762_v51 = vor.u32 %v4060_v46, %v2759_v47  ;;  %v2799_v26 = vld [vmem:[%s5753_s0 + $0xf0] sm:$0xf0]  ;;  %v2805_v27 = vld [vmem:[%s5753_s0 + $0xe8] sm:$0xf]  ;;  %v4218_v28 = vld [vmem:[%s5751_s1 + $0x278] sm:$0xff] }
  0x28   :  { %1231 = vmatpush.bf16.msrb.mxu2 %v4161_v48  ;;  %v2750_v48 = vor.u32 %v4061_v41, %v2749_v40  ;;  %v4074_v29 = vld [vmem:[%s5753_s0 + $0xf4] sm:$0xf0]  ;;  %v4072_v30 = vld [vmem:[%s5753_s0 + $0xec] sm:$0xf]  ;;  %v2807_v31 = vld [vmem:[%s5753_s0 + $0xf8] sm:$0xf0] }
  0x29   :  { %1280 = vmatpush.bf16.msrb.mxu3 %v4169_v50  ;;  %v2758_v50 = vor.u32 %v4062_v45, %v2757_v44  ;;  %v3037_v40 = vld [vmem:[%s5753_s0 + $0x100] sm:$0xf]  ;;  %v4109_v41 = vld [vmem:[%s5753_s0 + $0x10c] sm:$0xf0]  ;;  %v4107_v42 = vld [vmem:[%s5753_s0 + $0x104] sm:$0xf] }
  0x2a   :  { %1134 = vmatpush.bf16.msrb.mxu0 %v4144_v53  ;;  %v4140_v53 = vld [vmem:[%s5751_s1 + $0x108] sm:$0xff]  ;;  %v3039_v43 = vld [vmem:[%s5753_s0 + $0x110] sm:$0xf0]  ;;  %v4110_v46 = vld [vmem:[%s5753_s0 + $0x114] sm:$0xf0] }
  0x2b   :  { %1183 = vmatpush.bf16.msrb.mxu1 %v4152_v55  ;;  %v4148_v55 = vld [vmem:[%s5751_s1 + $0x148] sm:$0xff]  ;;  %v4217_v45 = vld [vmem:[%s5751_s1 + $0x270] sm:$0xff] }
  0x2c   :  { %1232 = vmatpush.bf16.msrb.mxu2 %v4160_v52  ;;  %v4156_v52 = vld [vmem:[%s5751_s1 + $0x188] sm:$0xff] }
  0x2d   :  { %1281 = vmatpush.bf16.msrb.mxu3 %v4168_v54  ;;  %v4164_v54 = vld [vmem:[%s5751_s1 + $0x1c8] sm:$0xff] }
  0x2e   :  { %1135 = vmatpush.bf16.msrb.mxu0 %v4143_v5  ;;  %v4139_v5 = vld [vmem:[%s5751_s1 + $0x100] sm:$0xff]  ;;  %v3045_v44 = vld [vmem:[%s5753_s0 + $0x108] sm:$0xf]  ;;  %v4108_v47 = vld [vmem:[%s5753_s0 + $0x10c] sm:$0xf] }
  0x2f   :  { %1184 = vmatpush.bf16.msrb.mxu1 %v4151_v7  ;;  %v4147_v7 = vld [vmem:[%s5751_s1 + $0x140] sm:$0xff] }
  0x30   :  { %1233 = vmatpush.bf16.msrb.mxu2 %v4159_v4  ;;  %v4155_v4 = vld [vmem:[%s5751_s1 + $0x180] sm:$0xff] }
  0x31   :  { %479 = vmatmul.bf16.gmra.mxu0 %v2702_v0  ;;  %1282 = vmatpush.bf16.msrb.mxu3 %v4167_v6  ;;  %v2766_v0 = vor.u32 %v4065_v57, %v2765_v56  ;;  %v4163_v6 = vld [vmem:[%s5751_s1 + $0x1c0] sm:$0xff]  ;;  %v4224_v57 = vld [vmem:[%s5751_s1 + $0x2a8] sm:$0xff] }
  0x32   :  { %528 = vmatmul.bf16.gmra.mxu1 %v2706_v1  ;;  %1136 = vmatpush.bf16.msrb.mxu0 %v4142_v21  ;;  %v2770_v1 = vor.u32 %v4063_v58, %v2767_v59  ;;  %v4210_v21 = vld [vmem:[%s5751_s1 + $0x238] sm:$0xff]  ;;  %v4208_v58 = vld [vmem:[%s5751_s1 + $0x228] sm:$0xff] }
  0x33   :  { %577 = vmatmul.bf16.gmra.mxu2 %v2710_v2  ;;  %1185 = vmatpush.bf16.msrb.mxu1 %v4150_v23  ;;  %v2774_v2 = vor.u32 %v4066_v61, %v2773_v60  ;;  %v2797_v23 = vld [vmem:[%s5753_s0 + $0xe0] sm:$0xf]  ;;  %v4232_v59 = vld [vmem:[%s5751_s1 + $0x2e8] sm:$0xff] }
  0x34   :  { %626 = vmatmul.bf16.gmra.mxu3 %v2714_v3  ;;  %1234 = vmatpush.bf16.msrb.mxu2 %v4158_v20  ;;  %v2778_v3 = vor.u32 %v4064_v62, %v2775_v63  ;;  %v4226_v20 = vld [vmem:[%s5751_s1 + $0x2b8] sm:$0xff] }
  0x35   :  { %1283 = vmatpush.bf16.msrb.mxu3 %v4166_v22  ;;  %v4234_v22 = vld [vmem:[%s5751_s1 + $0x2f8] sm:$0xff] }
  0x36   :  { %1137 = vmatpush.bf16.msrb.mxu0 %v4141_v37  ;;  %v4209_v37 = vld [vmem:[%s5751_s1 + $0x230] sm:$0xff] }
  0x37   :  { %1186 = vmatpush.bf16.msrb.mxu1 %v4149_v39  ;;  %v4731_v39 = vld [vmem:[%s5752_s2] ss:$0 sm:$0xff] }
  0x38   :  { %1235 = vmatpush.bf16.msrb.mxu2 %v4157_v36  ;;  %v4225_v36 = vld [vmem:[%s5751_s1 + $0x2b0] sm:$0xff] }
  0x39   :  { %1284 = vmatpush.bf16.msrb.mxu3 %v4165_v38  ;;  %v4233_v38 = vld [vmem:[%s5751_s1 + $0x2f0] sm:$0xff] }
  0x3a   :  { %1138 = vmatpush.bf16.msrb.mxu0 %v4140_v53  ;;  %v3046_v53 = vor.u32 %v4110_v46, %v3045_v44  ;;  %v3079_v44 = vld [vmem:[%s5753_s0 + $0x158] sm:$0xf0] }
  0x3b   :  { %1187 = vmatpush.bf16.msrb.mxu1 %v4148_v55 }
  0x3c   :  { %1236 = vmatpush.bf16.msrb.mxu2 %v4156_v52 }
  0x3d   :  { %1285 = vmatpush.bf16.msrb.mxu3 %v4164_v54 }
  0x3e   :  { %1139 = vmatpush.bf16.msrb.mxu0 %v4139_v5  ;;  %v4111_v5 = vld [vmem:[%s5753_s0 + $0x124] sm:$0xf] }
  0x3f   :  { %1188 = vmatpush.bf16.msrb.mxu1 %v4147_v7  ;;  %v3061_v7 = vld [vmem:[%s5753_s0 + $0x128] sm:$0xf] }
  0x40   :  { %1237 = vmatpush.bf16.msrb.mxu2 %v4155_v4  ;;  %v4113_v4 = vld [vmem:[%s5753_s0 + $0x12c] sm:$0xf0] }
  0x41   :  { %484 = vmatmul.bf16.gmra.mxu0 %v2718_v16  ;;  %1286 = vmatpush.bf16.msrb.mxu3 %v4163_v6  ;;  %v2782_v16 = vor.u32 %v4069_v9, %v2781_v8  ;;  %v3055_v6 = vld [vmem:[%s5753_s0 + $0x130] sm:$0xf0]  ;;  %v4216_v8 = vld [vmem:[%s5751_s1 + $0x268] sm:$0xff]  ;;  %v4114_v9 = vld [vmem:[%s5753_s0 + $0x134] sm:$0xf0] }
  0x42   :  { %533 = vmatmul.bf16.gmra.mxu1 %v2722_v17  ;;  %v2786_v17 = vor.u32 %v4067_v10, %v2783_v11  ;;  %1799 = vmatpush.bf16.msra.mxu0 %v4210_v21  ;;  %v4112_v10 = vld [vmem:[%s5753_s0 + $0x12c] sm:$0xf]  ;;  %v3063_v11 = vld [vmem:[%s5753_s0 + $0x138] sm:$0xf0] }
  0x43   :  { %582 = vmatmul.bf16.gmra.mxu2 %v2726_v18  ;;  %v2790_v18 = vor.u32 %v4070_v13, %v2789_v12  ;;  %1848 = vmatpush.bf16.msra.mxu1 %v4218_v28  ;;  %v3066_v21 = vor.u32 %v4112_v10, %v3063_v11  ;;  %v4122_v10 = vld [vmem:[%s5753_s0 + $0x174] sm:$0xf0]  ;;  %v4120_v11 = vld [vmem:[%s5753_s0 + $0x16c] sm:$0xf] }
  0x44   :  { %631 = vmatmul.bf16.gmra.mxu3 %v2730_v19  ;;  %v2794_v19 = vor.u32 %v4068_v14, %v2791_v15  ;;  %1897 = vmatpush.bf16.msra.mxu2 %v4226_v20  ;;  %v3062_v20 = vor.u32 %v4114_v9, %v3061_v7  ;;  %v3087_v7 = vld [vmem:[%s5753_s0 + $0x170] sm:$0xf0]  ;;  %v4214_v9 = vld [vmem:[%s5751_s1 + $0x258] sm:$0xff] }
  0x45   :  { %1946 = vmatpush.bf16.msra.mxu3 %v4234_v22 }
  0x46   :  { %1800 = vmatpush.bf16.msra.mxu0 %v4209_v37  ;;  %v4115_v37 = vld [vmem:[%s5753_s0 + $0x144] sm:$0xf] }
  0x47   :  { %1849 = vmatpush.bf16.msra.mxu1 %v4217_v45 }
  0x48   :  { %1898 = vmatpush.bf16.msra.mxu2 %v4225_v36  ;;  %v4117_v36 = vld [vmem:[%s5753_s0 + $0x14c] sm:$0xf0] }
  0x49   :  { %1947 = vmatpush.bf16.msra.mxu3 %v4233_v38  ;;  %v3071_v38 = vld [vmem:[%s5753_s0 + $0x150] sm:$0xf0] }
  0x4a   :  { %1801 = vmatpush.bf16.msra.mxu0 %v4208_v58  ;;  %v4222_v58 = vld [vmem:[%s5751_s1 + $0x298] sm:$0xff] }
  0x4b   :  { %1850 = vmatpush.bf16.msra.mxu1 %v4216_v8  ;;  %v3093_v8 = vld [vmem:[%s5753_s0 + $0x168] sm:$0xf] }
  0x4c   :  { %1899 = vmatpush.bf16.msra.mxu2 %v4224_v57 }
  0x4d   :  { %1948 = vmatpush.bf16.msra.mxu3 %v4232_v59  ;;  %v4206_v59 = vld [vmem:[%s5751_s1 + $0x218] sm:$0xff] }
  0x51   :  { %489 = vmatmul.bf16.gmra.mxu0 %v2734_v32  ;;  %v2798_v32 = vor.u32 %v4073_v24, %v2797_v23 }
  0x52   :  { %538 = vmatmul.bf16.gmra.mxu1 %v2738_v33  ;;  %v2802_v33 = vor.u32 %v4071_v25, %v2799_v26  ;;  %v4223_v25 = vld [vmem:[%s5751_s1 + $0x2a0] sm:$0xff] }
  0x53   :  { %587 = vmatmul.bf16.gmra.mxu2 %v2742_v34  ;;  %v2806_v34 = vor.u32 %v4074_v29, %v2805_v27  ;;  %v4207_v26 = vld [vmem:[%s5751_s1 + $0x220] sm:$0xff] }
  0x54   :  { %636 = vmatmul.bf16.gmra.mxu3 %v2746_v35  ;;  %v2810_v35 = vor.u32 %v4072_v30, %v2807_v31  ;;  %v4231_v27 = vld [vmem:[%s5751_s1 + $0x2e0] sm:$0xff]  ;;  %1900 = vmatpush.bf16.msra.mxu2 %v4223_v25 }
  0x55   :  { %1802 = vmatpush.bf16.msra.mxu0 %v4207_v26  ;;  %1949 = vmatpush.bf16.msra.mxu3 %v4231_v27  ;;  %v4221_v26 = vld [vmem:[%s5751_s1 + $0x290] sm:$0xff] }
  0x56   :  { %v4205_v27 = vld [vmem:[%s5751_s1 + $0x210] sm:$0xff] }
  0x58   :  { %1901 = vmatpush.bf16.msra.mxu2 %v4222_v58 }
  0x59   :  { %1803 = vmatpush.bf16.msra.mxu0 %v4206_v59  ;;  %v4220_v59 = vld [vmem:[%s5751_s1 + $0x288] sm:$0xff] }
  0x5c   :  { %1902 = vmatpush.bf16.msra.mxu2 %v4221_v26 }
  0x5d   :  { %1804 = vmatpush.bf16.msra.mxu0 %v4205_v27  ;;  %v4219_v27 = vld [vmem:[%s5751_s1 + $0x280] sm:$0xff] }
  0x60   :  { %1903 = vmatpush.bf16.msra.mxu2 %v4220_v59 }
  0x61   :  { %494 = vmatmul.bf16.gmra.mxu0 %v2750_v48  ;;  %v3047_v48 = vld [vmem:[%s5753_s0 + $0x118] sm:$0xf0] }
  0x62   :  { %543 = vmatmul.bf16.gmra.mxu1 %v2754_v49  ;;  %v3038_v49 = vor.u32 %v4109_v41, %v3037_v40  ;;  %v3050_v54 = vor.u32 %v4108_v47, %v3047_v48  ;;  %v3077_v40 = vld [vmem:[%s5753_s0 + $0x148] sm:$0xf]  ;;  %v4215_v41 = vld [vmem:[%s5751_s1 + $0x260] sm:$0xff] }
  0x63   :  { %592 = vmatmul.bf16.gmra.mxu2 %v2758_v50  ;;  %v3042_v50 = vor.u32 %v4107_v42, %v3039_v43  ;;  %v4118_v42 = vld [vmem:[%s5753_s0 + $0x154] sm:$0xf0]  ;;  %v4116_v43 = vld [vmem:[%s5753_s0 + $0x14c] sm:$0xf]  ;;  %1851 = vmatpush.bf16.msra.mxu1 %v4215_v41  ;;  %v3109_v41 = vld [vmem:[%s5753_s0 + $0x188] sm:$0xf] }
  0x64   :  { %641 = vmatmul.bf16.gmra.mxu3 %v2762_v51  ;;  %1904 = vmatpush.bf16.msra.mxu2 %v4219_v27 }
  0x67   :  { %1852 = vmatpush.bf16.msra.mxu1 %v4214_v9  ;;  %v3125_v9 = vld [vmem:[%s5753_s0 + $0x1a8] sm:$0xf] }
  0x71   :  { %499 = vmatmul.bf16.gmra.mxu0 %v2766_v0 }
  0x72   :  { %548 = vmatmul.bf16.gmra.mxu1 %v2770_v1 }
  0x73   :  { %597 = vmatmul.bf16.gmra.mxu2 %v2774_v2 }
  0x74   :  { %646 = vmatmul.bf16.gmra.mxu3 %v2778_v3  ;;  %v3053_v3 = vld [vmem:[%s5753_s0 + $0x120] sm:$0xf] }
  0x75   :  { %v3054_v15 = vor.u32 %v4113_v4, %v3053_v3  ;;  %v3085_v4 = vld [vmem:[%s5753_s0 + $0x160] sm:$0xf] }
  0x81   :  { %504 = vmatmul.bf16.gmra.mxu0 %v2782_v16  ;;  %v3058_v16 = vor.u32 %v4111_v5, %v3055_v6  ;;  %v4121_v5 = vld [vmem:[%s5753_s0 + $0x16c] sm:$0xf0]  ;;  %v4119_v6 = vld [vmem:[%s5753_s0 + $0x164] sm:$0xf] }
  0x82   :  { %553 = vmatmul.bf16.gmra.mxu1 %v2786_v17 }
  0x83   :  { %602 = vmatmul.bf16.gmra.mxu2 %v2790_v18 }
  0x84   :  { %651 = vmatmul.bf16.gmra.mxu3 %v2794_v19 }
  0x91   :  { %509 = vmatmul.bf16.gmra.mxu0 %v2798_v32 }
  0x92   :  { %558 = vmatmul.bf16.gmra.mxu1 %v2802_v33 }
  0x93   :  { %607 = vmatmul.bf16.gmra.mxu2 %v2806_v34 }
  0x94   :  { %656 = vmatmul.bf16.gmra.mxu3 %v2810_v35  ;;  %v3069_v35 = vld [vmem:[%s5753_s0 + $0x140] sm:$0xf] }
  0x95   :  { %v3070_v48 = vor.u32 %v4117_v36, %v3069_v35  ;;  %v3101_v36 = vld [vmem:[%s5753_s0 + $0x180] sm:$0xf] }
  0x9e   :  { %v475_v51 = vpop.f32.mrf.mxu0 }
  0x9f   :  { %v524_v52 = vpop.f32.mrf.mxu1  ;;  %v476_v55 = vadd.f32 %v4731_v39, %v475_v51 }
  0xa1   :  { %1140 = vmatmul.bf16.vlgmr.msrb.gmra.mxu0 %v3038_v49  ;;  %v525_v56 = vadd.f32 %v524_v52, %v476_v55  ;;  %v3074_v49 = vor.u32 %v4115_v37, %v3071_v38  ;;  %v4125_v37 = vld [vmem:[%s5753_s0 + $0x18c] sm:$0xf0]  ;;  %v4123_v38 = vld [vmem:[%s5753_s0 + $0x184] sm:$0xf] }
  0xa2   :  { %1189 = vmatmul.bf16.vlgmr.msrb.gmra.mxu1 %v3042_v50 }
  0xa3   :  { %1238 = vmatmul.bf16.vlgmr.msrb.gmra.mxu2 %v3046_v53  ;;  %v3078_v53 = vor.u32 %v4118_v42, %v3077_v40  ;;  %v3103_v40 = vld [vmem:[%s5753_s0 + $0x190] sm:$0xf0] }
  0xa4   :  { %1287 = vmatmul.bf16.vlgmr.msrb.gmra.mxu3 %v3050_v54  ;;  %v3082_v54 = vor.u32 %v4116_v43, %v3079_v44  ;;  %v4213_v42 = vld [vmem:[%s5751_s1 + $0x250] sm:$0xff]  ;;  %v4126_v43 = vld [vmem:[%s5753_s0 + $0x194] sm:$0xf0]  ;;  %v4124_v44 = vld [vmem:[%s5753_s0 + $0x18c] sm:$0xf] }
  0xa5   :  { %1853 = vmatpush.bf16.msra.mxu1 %v4213_v42  ;;  %v3141_v42 = vld [vmem:[%s5753_s0 + $0x1c8] sm:$0xf] }
  0xa6   :  { %v573_v60 = vpop.f32.mrf.mxu2  ;;  %v477_v63 = vpop.f32.mrf.mxu0 }
  0xa7   :  { %v622_v61 = vpop.f32.mrf.mxu3  ;;  %v574_v62 = vadd.f32 %v573_v60, %v525_v56  ;;  %v526_v0 = vpop.f32.mrf.mxu1  ;;  %v478_v2 = vadd.f32 %v4731_v39, %v477_v63  ;;  %v4230_v60 = vld [vmem:[%s5751_s1 + $0x2d8] sm:$0xff] }
  0xa8   :  { %1950 = vmatpush.bf16.msra.mxu3 %v4230_v60  ;;  %v4204_v60 = vld [vmem:[%s5751_s1 + $0x208] sm:$0xff] }
  0xa9   :  { %v623_v1 = vadd.f32 %v622_v61, %v574_v62  ;;  %v527_v12 = vadd.f32 %v526_v0, %v478_v2  ;;  %1805 = vmatpush.bf16.msra.mxu0 %v4204_v60  ;;  %v4290_v60 = vld [vmem:[%s5751_s1 + $0x3b8] sm:$0xff] }
  0xaa   :  { %2564 = vmatpush.bf16.msrb.mxu2 %v4290_v60 }
  0xab   :  { %662 = vst [vmem:[%s5754_s3] sm:$0xff] %v623_v1 }
  0xae   :  { %v575_v13 = vpop.f32.mrf.mxu2  ;;  %v480_v18 = vpop.f32.mrf.mxu0 }
  0xaf   :  { %v624_v14 = vpop.f32.mrf.mxu3  ;;  %v576_v17 = vadd.f32 %v575_v13, %v527_v12  ;;  %v529_v19 = vpop.f32.mrf.mxu1  ;;  %v481_v22 = vadd.f32 %v4731_v39, %v480_v18  ;;  %v3095_v12 = vld [vmem:[%s5753_s0 + $0x178] sm:$0xf0] }
  0xb1   :  { %v625_v23 = vadd.f32 %v624_v14, %v576_v17  ;;  %1145 = vmatmul.bf16.gmra.mxu0 %v3054_v15  ;;  %v530_v24 = vadd.f32 %v529_v19, %v481_v22  ;;  %v3090_v17 = vor.u32 %v4119_v6, %v3087_v7  ;;  %v3098_v22 = vor.u32 %v4120_v11, %v3095_v12  ;;  %v4129_v6 = vld [vmem:[%s5753_s0 + $0x1ac] sm:$0xf0]  ;;  %v4127_v7 = vld [vmem:[%s5753_s0 + $0x1a4] sm:$0xf]  ;;  %v4130_v11 = vld [vmem:[%s5753_s0 + $0x1b4] sm:$0xf0] }
  0xb2   :  { %1194 = vmatmul.bf16.gmra.mxu1 %v3058_v16  ;;  %v3086_v16 = vor.u32 %v4121_v5, %v3085_v4  ;;  %v3117_v5 = vld [vmem:[%s5753_s0 + $0x1a0] sm:$0xf]  ;;  %v4128_v12 = vld [vmem:[%s5753_s0 + $0x1ac] sm:$0xf] }
  0xb3   :  { %663 = vst [vmem:[%s5754_s3 + $0x8] sm:$0xff] %v625_v23  ;;  %1243 = vmatmul.bf16.gmra.mxu2 %v3062_v20 }
  0xb4   :  { %1292 = vmatmul.bf16.gmra.mxu3 %v3066_v21  ;;  %v3094_v21 = vor.u32 %v4122_v10, %v3093_v8  ;;  %v3119_v8 = vld [vmem:[%s5753_s0 + $0x1b0] sm:$0xf0]  ;;  %v4212_v10 = vld [vmem:[%s5751_s1 + $0x248] sm:$0xff] }
  0xb5   :  { %1854 = vmatpush.bf16.msra.mxu1 %v4212_v10  ;;  %v3157_v10 = vld [vmem:[%s5753_s0 + $0x1e8] sm:$0xf] }
  0xb6   :  { %v578_v28 = vpop.f32.mrf.mxu2  ;;  %v482_v31 = vpop.f32.mrf.mxu0 }
  0xb7   :  { %v627_v29 = vpop.f32.mrf.mxu3  ;;  %v579_v30 = vadd.f32 %v578_v28, %v530_v24  ;;  %v531_v32 = vpop.f32.mrf.mxu1  ;;  %v483_v34 = vadd.f32 %v4731_v39, %v482_v31  ;;  %v4229_v28 = vld [vmem:[%s5751_s1 + $0x2d0] sm:$0xff] }
  0xb8   :  { %1951 = vmatpush.bf16.msra.mxu3 %v4229_v28  ;;  %v4203_v28 = vld [vmem:[%s5751_s1 + $0x200] sm:$0xff] }
  0xb9   :  { %v628_v33 = vadd.f32 %v627_v29, %v579_v30  ;;  %v532_v45 = vadd.f32 %v531_v32, %v483_v34  ;;  %1806 = vmatpush.bf16.msra.mxu0 %v4203_v28  ;;  %v4289_v28 = vld [vmem:[%s5751_s1 + $0x3b0] sm:$0xff] }
  0xba   :  { %2565 = vmatpush.bf16.msrb.mxu2 %v4289_v28 }
  0xbb   :  { %664 = vst [vmem:[%s5754_s3 + $0x10] sm:$0xff] %v628_v33 }
  0xbe   :  { %v580_v46 = vpop.f32.mrf.mxu2  ;;  %v485_v51 = vpop.f32.mrf.mxu0 }
  0xbf   :  { %v629_v47 = vpop.f32.mrf.mxu3  ;;  %v581_v50 = vadd.f32 %v580_v46, %v532_v45  ;;  %v534_v52 = vpop.f32.mrf.mxu1  ;;  %v486_v55 = vadd.f32 %v4731_v39, %v485_v51  ;;  %v3111_v45 = vld [vmem:[%s5753_s0 + $0x198] sm:$0xf0] }
  0xc1   :  { %v630_v56 = vadd.f32 %v629_v47, %v581_v50  ;;  %1150 = vmatmul.bf16.gmra.mxu0 %v3070_v48  ;;  %v535_v57 = vadd.f32 %v534_v52, %v486_v55  ;;  %v3106_v50 = vor.u32 %v4123_v38, %v3103_v40  ;;  %v3114_v55 = vor.u32 %v4124_v44, %v3111_v45  ;;  %v4133_v38 = vld [vmem:[%s5753_s0 + $0x1cc] sm:$0xf0]  ;;  %v4131_v40 = vld [vmem:[%s5753_s0 + $0x1c4] sm:$0xf]  ;;  %v4134_v44 = vld [vmem:[%s5753_s0 + $0x1d4] sm:$0xf0] }
  0xc2   :  { %1199 = vmatmul.bf16.gmra.mxu1 %v3074_v49  ;;  %v3102_v49 = vor.u32 %v4125_v37, %v3101_v36  ;;  %v3133_v37 = vld [vmem:[%s5753_s0 + $0x1c0] sm:$0xf]  ;;  %v4132_v45 = vld [vmem:[%s5753_s0 + $0x1cc] sm:$0xf] }
  0xc3   :  { %665 = vst [vmem:[%s5754_s3 + $0x18] sm:$0xff] %v630_v56  ;;  %1248 = vmatmul.bf16.gmra.mxu2 %v3078_v53 }
  0xc4   :  { %1297 = vmatmul.bf16.gmra.mxu3 %v3082_v54  ;;  %v3110_v54 = vor.u32 %v4126_v43, %v3109_v41  ;;  %v3135_v41 = vld [vmem:[%s5753_s0 + $0x1d0] sm:$0xf0]  ;;  %v4211_v43 = vld [vmem:[%s5751_s1 + $0x240] sm:$0xff] }
  0xc5   :  { %1855 = vmatpush.bf16.msra.mxu1 %v4211_v43  ;;  %v3413_v43 = vld [vmem:[%s5753_s0 + $0x208] sm:$0xf] }
  0xc6   :  { %v583_v61 = vpop.f32.mrf.mxu2  ;;  %v487_v0 = vpop.f32.mrf.mxu0 }
  0xc7   :  { %v632_v62 = vpop.f32.mrf.mxu3  ;;  %v584_v63 = vadd.f32 %v583_v61, %v535_v57  ;;  %v536_v1 = vpop.f32.mrf.mxu1  ;;  %v488_v3 = vadd.f32 %v4731_v39, %v487_v0  ;;  %v4228_v61 = vld [vmem:[%s5751_s1 + $0x2c8] sm:$0xff] }
  0xc8   :  { %1952 = vmatpush.bf16.msra.mxu3 %v4228_v61  ;;  %v4274_v61 = vld [vmem:[%s5751_s1 + $0x338] sm:$0xff] }
  0xc9   :  { %v633_v2 = vadd.f32 %v632_v62, %v584_v63  ;;  %v537_v13 = vadd.f32 %v536_v1, %v488_v3  ;;  %2466 = vmatpush.bf16.msrb.mxu0 %v4274_v61  ;;  %v4288_v61 = vld [vmem:[%s5751_s1 + $0x3a8] sm:$0xff] }
  0xca   :  { %2566 = vmatpush.bf16.msrb.mxu2 %v4288_v61 }
  0xcb   :  { %666 = vst [vmem:[%s5754_s3 + $0x20] sm:$0xff] %v633_v2 }
  0xce   :  { %v585_v14 = vpop.f32.mrf.mxu2  ;;  %v490_v19 = vpop.f32.mrf.mxu0 }
  0xcf   :  { %v634_v15 = vpop.f32.mrf.mxu3  ;;  %v586_v18 = vadd.f32 %v585_v14, %v537_v13  ;;  %v539_v20 = vpop.f32.mrf.mxu1  ;;  %v491_v23 = vadd.f32 %v4731_v39, %v490_v19  ;;  %v3127_v13 = vld [vmem:[%s5753_s0 + $0x1b8] sm:$0xf0] }
  0xd1   :  { %v635_v24 = vadd.f32 %v634_v15, %v586_v18  ;;  %1155 = vmatmul.bf16.gmra.mxu0 %v3086_v16  ;;  %v540_v25 = vadd.f32 %v539_v20, %v491_v23  ;;  %v3122_v18 = vor.u32 %v4127_v7, %v3119_v8  ;;  %v3130_v23 = vor.u32 %v4128_v12, %v3127_v13  ;;  %v4137_v7 = vld [vmem:[%s5753_s0 + $0x1ec] sm:$0xf0]  ;;  %v4135_v8 = vld [vmem:[%s5753_s0 + $0x1e4] sm:$0xf]  ;;  %v4138_v12 = vld [vmem:[%s5753_s0 + $0x1f4] sm:$0xf0] }
  0xd2   :  { %1204 = vmatmul.bf16.gmra.mxu1 %v3090_v17  ;;  %v3118_v17 = vor.u32 %v4129_v6, %v3117_v5  ;;  %v3149_v6 = vld [vmem:[%s5753_s0 + $0x1e0] sm:$0xf]  ;;  %v4136_v13 = vld [vmem:[%s5753_s0 + $0x1ec] sm:$0xf] }
  0xd3   :  { %667 = vst [vmem:[%s5754_s3 + $0x28] sm:$0xff] %v635_v24  ;;  %1253 = vmatmul.bf16.gmra.mxu2 %v3094_v21 }
  0xd4   :  { %1302 = vmatmul.bf16.gmra.mxu3 %v3098_v22  ;;  %v3126_v22 = vor.u32 %v4130_v11, %v3125_v9  ;;  %v3151_v9 = vld [vmem:[%s5753_s0 + $0x1f0] sm:$0xf0]  ;;  %v4282_v11 = vld [vmem:[%s5751_s1 + $0x378] sm:$0xff] }
  0xd5   :  { %2515 = vmatpush.bf16.msrb.mxu1 %v4282_v11  ;;  %v3429_v11 = vld [vmem:[%s5753_s0 + $0x228] sm:$0xf] }
  0xd6   :  { %v588_v29 = vpop.f32.mrf.mxu2  ;;  %v492_v32 = vpop.f32.mrf.mxu0 }
  0xd7   :  { %v637_v30 = vpop.f32.mrf.mxu3  ;;  %v589_v31 = vadd.f32 %v588_v29, %v540_v25  ;;  %v541_v33 = vpop.f32.mrf.mxu1  ;;  %v493_v35 = vadd.f32 %v4731_v39, %v492_v32  ;;  %v4227_v29 = vld [vmem:[%s5751_s1 + $0x2c0] sm:$0xff] }
  0xd8   :  { %1953 = vmatpush.bf16.msra.mxu3 %v4227_v29  ;;  %v4273_v29 = vld [vmem:[%s5751_s1 + $0x330] sm:$0xff] }
  0xd9   :  { %v638_v34 = vadd.f32 %v637_v30, %v589_v31  ;;  %v542_v46 = vadd.f32 %v541_v33, %v493_v35  ;;  %2467 = vmatpush.bf16.msrb.mxu0 %v4273_v29  ;;  %v4287_v29 = vld [vmem:[%s5751_s1 + $0x3a0] sm:$0xff] }
  0xda   :  { %2567 = vmatpush.bf16.msrb.mxu2 %v4287_v29 }
  0xdb   :  { %668 = vst [vmem:[%s5754_s3 + $0x30] sm:$0xff] %v638_v34 }
  0xde   :  { %v590_v47 = vpop.f32.mrf.mxu2  ;;  %v495_v52 = vpop.f32.mrf.mxu0 }
  0xdf   :  { %v639_v48 = vpop.f32.mrf.mxu3  ;;  %v591_v51 = vadd.f32 %v590_v47, %v542_v46  ;;  %v544_v53 = vpop.f32.mrf.mxu1  ;;  %v496_v56 = vadd.f32 %v4731_v39, %v495_v52  ;;  %v3143_v46 = vld [vmem:[%s5753_s0 + $0x1d8] sm:$0xf0] }
  0xe1   :  { %v640_v57 = vadd.f32 %v639_v48, %v591_v51  ;;  %1160 = vmatmul.bf16.gmra.mxu0 %v3102_v49  ;;  %v545_v58 = vadd.f32 %v544_v53, %v496_v56  ;;  %v3138_v51 = vor.u32 %v4131_v40, %v3135_v41  ;;  %v3146_v56 = vor.u32 %v4132_v45, %v3143_v46  ;;  %v5085_v40 = vld [vmem:[%s5752_s2] ss:$0 sm:$0xff]  ;;  %v4173_v41 = vld [vmem:[%s5753_s0 + $0x20c] sm:$0xf0]  ;;  %v4174_v45 = vld [vmem:[%s5753_s0 + $0x214] sm:$0xf0] }
  0xe2   :  { %1209 = vmatmul.bf16.gmra.mxu1 %v3106_v50  ;;  %v3134_v50 = vor.u32 %v4133_v38, %v3133_v37  ;;  %v3405_v38 = vld [vmem:[%s5753_s0 + $0x200] sm:$0xf]  ;;  %v4172_v46 = vld [vmem:[%s5753_s0 + $0x20c] sm:$0xf] }
  0xe3   :  { %669 = vst [vmem:[%s5754_s3 + $0x38] sm:$0xff] %v640_v57  ;;  %1258 = vmatmul.bf16.gmra.mxu2 %v3110_v54 }
  0xe4   :  { %1307 = vmatmul.bf16.gmra.mxu3 %v3114_v55  ;;  %v3142_v55 = vor.u32 %v4134_v44, %v3141_v42  ;;  %v4171_v42 = vld [vmem:[%s5753_s0 + $0x204] sm:$0xf]  ;;  %v4281_v44 = vld [vmem:[%s5751_s1 + $0x370] sm:$0xff] }
  0xe5   :  { %2516 = vmatpush.bf16.msrb.mxu1 %v4281_v44  ;;  %v3445_v44 = vld [vmem:[%s5753_s0 + $0x248] sm:$0xf] }
  0xe6   :  { %v593_v62 = vpop.f32.mrf.mxu2  ;;  %v497_v1 = vpop.f32.mrf.mxu0 }
  0xe7   :  { %v642_v63 = vpop.f32.mrf.mxu3  ;;  %v594_v0 = vadd.f32 %v593_v62, %v545_v58  ;;  %v546_v2 = vpop.f32.mrf.mxu1  ;;  %v498_v4 = vadd.f32 %v4731_v39, %v497_v1  ;;  %v4298_v62 = vld [vmem:[%s5751_s1 + $0x3f8] sm:$0xff] }
  0xe8   :  { %2613 = vmatpush.bf16.msrb.mxu3 %v4298_v62  ;;  %v4272_v62 = vld [vmem:[%s5751_s1 + $0x328] sm:$0xff] }
  0xe9   :  { %v643_v3 = vadd.f32 %v642_v63, %v594_v0  ;;  %v547_v14 = vadd.f32 %v546_v2, %v498_v4  ;;  %2468 = vmatpush.bf16.msrb.mxu0 %v4272_v62  ;;  %v4286_v62 = vld [vmem:[%s5751_s1 + $0x398] sm:$0xff] }
  0xea   :  { %2568 = vmatpush.bf16.msrb.mxu2 %v4286_v62 }
  0xeb   :  { %670 = vst [vmem:[%s5754_s3 + $0x40] sm:$0xff] %v643_v3 }
  0xee   :  { %v595_v15 = vpop.f32.mrf.mxu2  ;;  %v500_v20 = vpop.f32.mrf.mxu0 }
  0xef   :  { %v644_v16 = vpop.f32.mrf.mxu3  ;;  %v596_v19 = vadd.f32 %v595_v15, %v547_v14  ;;  %v549_v21 = vpop.f32.mrf.mxu1  ;;  %v501_v24 = vadd.f32 %v4731_v39, %v500_v20  ;;  %v3159_v14 = vld [vmem:[%s5753_s0 + $0x1f8] sm:$0xf0] }
  0xf1   :  { %v645_v25 = vadd.f32 %v644_v16, %v596_v19  ;;  %1165 = vmatmul.bf16.gmra.mxu0 %v3118_v17  ;;  %v550_v26 = vadd.f32 %v549_v21, %v501_v24  ;;  %v3154_v19 = vor.u32 %v4135_v8, %v3151_v9  ;;  %v3162_v24 = vor.u32 %v4136_v13, %v3159_v14  ;;  %v4177_v8 = vld [vmem:[%s5753_s0 + $0x22c] sm:$0xf0]  ;;  %v4175_v9 = vld [vmem:[%s5753_s0 + $0x224] sm:$0xf]  ;;  %v4178_v13 = vld [vmem:[%s5753_s0 + $0x234] sm:$0xf0] }
  0xf2   :  { %1214 = vmatmul.bf16.gmra.mxu1 %v3122_v18  ;;  %v3150_v18 = vor.u32 %v4137_v7, %v3149_v6  ;;  %v3421_v7 = vld [vmem:[%s5753_s0 + $0x220] sm:$0xf]  ;;  %v4176_v14 = vld [vmem:[%s5753_s0 + $0x22c] sm:$0xf] }
  0xf3   :  { %671 = vst [vmem:[%s5754_s3 + $0x48] sm:$0xff] %v645_v25  ;;  %1263 = vmatmul.bf16.gmra.mxu2 %v3126_v22 }
  0xf4   :  { %1312 = vmatmul.bf16.gmra.mxu3 %v3130_v23  ;;  %v3158_v23 = vor.u32 %v4138_v12, %v3157_v10  ;;  %v3423_v10 = vld [vmem:[%s5753_s0 + $0x230] sm:$0xf0]  ;;  %v4280_v12 = vld [vmem:[%s5751_s1 + $0x368] sm:$0xff] }
  0xf5   :  { %2517 = vmatpush.bf16.msrb.mxu1 %v4280_v12  ;;  %v3461_v12 = vld [vmem:[%s5753_s0 + $0x268] sm:$0xf] }
  0xf6   :  { %v598_v30 = vpop.f32.mrf.mxu2  ;;  %v502_v33 = vpop.f32.mrf.mxu0 }
  0xf7   :  { %v647_v31 = vpop.f32.mrf.mxu3  ;;  %v599_v32 = vadd.f32 %v598_v30, %v550_v26  ;;  %v551_v34 = vpop.f32.mrf.mxu1  ;;  %v503_v36 = vadd.f32 %v4731_v39, %v502_v33  ;;  %v4297_v30 = vld [vmem:[%s5751_s1 + $0x3f0] sm:$0xff] }
  0xf8   :  { %2614 = vmatpush.bf16.msrb.mxu3 %v4297_v30  ;;  %v4271_v30 = vld [vmem:[%s5751_s1 + $0x320] sm:$0xff] }
  0xf9   :  { %v648_v35 = vadd.f32 %v647_v31, %v599_v32  ;;  %v552_v47 = vadd.f32 %v551_v34, %v503_v36  ;;  %2469 = vmatpush.bf16.msrb.mxu0 %v4271_v30  ;;  %v4285_v30 = vld [vmem:[%s5751_s1 + $0x390] sm:$0xff] }
  0xfa   :  { %2569 = vmatpush.bf16.msrb.mxu2 %v4285_v30 }
  0xfb   :  { %672 = vst [vmem:[%s5754_s3 + $0x50] sm:$0xff] %v648_v35 }
  0xfe   :  { %v600_v48 = vpop.f32.mrf.mxu2  ;;  %v505_v53 = vpop.f32.mrf.mxu0 }
  0xff   :  { %v649_v49 = vpop.f32.mrf.mxu3  ;;  %v601_v52 = vadd.f32 %v600_v48, %v552_v47  ;;  %v554_v54 = vpop.f32.mrf.mxu1  ;;  %v506_v57 = vadd.f32 %v4731_v39, %v505_v53  ;;  %v3415_v47 = vld [vmem:[%s5753_s0 + $0x218] sm:$0xf0] }
 0x101   :  { %v650_v58 = vadd.f32 %v649_v49, %v601_v52  ;;  %1170 = vmatmul.bf16.gmra.mxu0 %v3134_v50  ;;  %v555_v59 = vadd.f32 %v554_v54, %v506_v57  ;;  %v3418_v57 = vor.u32 %v4172_v46, %v3415_v47  ;;  %v4182_v46 = vld [vmem:[%s5753_s0 + $0x254] sm:$0xf0]  ;;  %v4180_v47 = vld [vmem:[%s5753_s0 + $0x24c] sm:$0xf] }
 0x102   :  { %1219 = vmatmul.bf16.gmra.mxu1 %v3138_v51  ;;  %v3406_v51 = vor.u32 %v4173_v41, %v3405_v38  ;;  %v3437_v41 = vld [vmem:[%s5753_s0 + $0x240] sm:$0xf] }
 0x103   :  { %673 = vst [vmem:[%s5754_s3 + $0x58] sm:$0xff] %v650_v58  ;;  %1268 = vmatmul.bf16.gmra.mxu2 %v3142_v55 }
 0x104   :  { %1317 = vmatmul.bf16.gmra.mxu3 %v3146_v56  ;;  %v3414_v56 = vor.u32 %v4174_v45, %v3413_v43  ;;  %v3439_v43 = vld [vmem:[%s5753_s0 + $0x250] sm:$0xf0]  ;;  %v4279_v45 = vld [vmem:[%s5751_s1 + $0x360] sm:$0xff] }
 0x105   :  { %2518 = vmatpush.bf16.msrb.mxu1 %v4279_v45  ;;  %v3477_v45 = vld [vmem:[%s5753_s0 + $0x288] sm:$0xf] }
 0x106   :  { %v603_v63 = vpop.f32.mrf.mxu2  ;;  %v507_v2 = vpop.f32.mrf.mxu0 }
 0x107   :  { %v652_v0 = vpop.f32.mrf.mxu3  ;;  %v604_v1 = vadd.f32 %v603_v63, %v555_v59  ;;  %v556_v3 = vpop.f32.mrf.mxu1  ;;  %v508_v5 = vadd.f32 %v4731_v39, %v507_v2  ;;  %v4296_v63 = vld [vmem:[%s5751_s1 + $0x3e8] sm:$0xff] }
 0x108   :  { %2615 = vmatpush.bf16.msrb.mxu3 %v4296_v63  ;;  %v4270_v63 = vld [vmem:[%s5751_s1 + $0x318] sm:$0xff] }
 0x109   :  { %v653_v4 = vadd.f32 %v652_v0, %v604_v1  ;;  %v557_v15 = vadd.f32 %v556_v3, %v508_v5  ;;  %2470 = vmatpush.bf16.msrb.mxu0 %v4270_v63  ;;  %v4284_v63 = vld [vmem:[%s5751_s1 + $0x388] sm:$0xff] }
 0x10a   :  { %2570 = vmatpush.bf16.msrb.mxu2 %v4284_v63 }
 0x10b   :  { %674 = vst [vmem:[%s5754_s3 + $0x60] sm:$0xff] %v653_v4 }
 0x10e   :  { %v605_v16 = vpop.f32.mrf.mxu2  ;;  %v510_v21 = vpop.f32.mrf.mxu0 }
 0x10f   :  { %v654_v17 = vpop.f32.mrf.mxu3  ;;  %v606_v20 = vadd.f32 %v605_v16, %v557_v15  ;;  %v559_v22 = vpop.f32.mrf.mxu1  ;;  %v511_v25 = vadd.f32 %v4731_v39, %v510_v21  ;;  %v3431_v15 = vld [vmem:[%s5753_s0 + $0x238] sm:$0xf0] }
 0x111   :  { %v655_v26 = vadd.f32 %v654_v17, %v606_v20  ;;  %1175 = vmatmul.bf16.gmra.mxu0 %v3150_v18  ;;  %v560_v27 = vadd.f32 %v559_v22, %v511_v25  ;;  %v3426_v20 = vor.u32 %v4175_v9, %v3423_v10  ;;  %v3434_v25 = vor.u32 %v4176_v14, %v3431_v15  ;;  %v4185_v9 = vld [vmem:[%s5753_s0 + $0x26c] sm:$0xf0]  ;;  %v4183_v10 = vld [vmem:[%s5753_s0 + $0x264] sm:$0xf]  ;;  %v4186_v14 = vld [vmem:[%s5753_s0 + $0x274] sm:$0xf0] }
 0x112   :  { %1224 = vmatmul.bf16.gmra.mxu1 %v3154_v19  ;;  %v3422_v19 = vor.u32 %v4177_v8, %v3421_v7  ;;  %v3453_v8 = vld [vmem:[%s5753_s0 + $0x260] sm:$0xf]  ;;  %v4184_v15 = vld [vmem:[%s5753_s0 + $0x26c] sm:$0xf] }
 0x113   :  { %675 = vst [vmem:[%s5754_s3 + $0x68] sm:$0xff] %v655_v26  ;;  %1273 = vmatmul.bf16.gmra.mxu2 %v3158_v23 }
 0x114   :  { %1322 = vmatmul.bf16.gmra.mxu3 %v3162_v24  ;;  %v3430_v24 = vor.u32 %v4178_v13, %v3429_v11  ;;  %v3455_v11 = vld [vmem:[%s5753_s0 + $0x270] sm:$0xf0]  ;;  %v4278_v13 = vld [vmem:[%s5751_s1 + $0x358] sm:$0xff] }
 0x115   :  { %2519 = vmatpush.bf16.msrb.mxu1 %v4278_v13  ;;  %v3493_v13 = vld [vmem:[%s5753_s0 + $0x2a8] sm:$0xf] }
 0x116   :  { %v608_v31 = vpop.f32.mrf.mxu2  ;;  %v512_v34 = vpop.f32.mrf.mxu0 }
 0x117   :  { %v657_v32 = vpop.f32.mrf.mxu3  ;;  %v609_v33 = vadd.f32 %v608_v31, %v560_v27  ;;  %v561_v35 = vpop.f32.mrf.mxu1  ;;  %v513_v37 = vadd.f32 %v4731_v39, %v512_v34  ;;  %v3407_v39 = vld [vmem:[%s5753_s0 + $0x210] sm:$0xf0]  ;;  %v4295_v31 = vld [vmem:[%s5751_s1 + $0x3e0] sm:$0xff] }
 0x118   :  { %v3410_v52 = vor.u32 %v4171_v42, %v3407_v39  ;;  %2616 = vmatpush.bf16.msrb.mxu3 %v4295_v31  ;;  %v4181_v42 = vld [vmem:[%s5753_s0 + $0x24c] sm:$0xf0]  ;;  %v4179_v39 = vld [vmem:[%s5753_s0 + $0x244] sm:$0xf] }
 0x119   :  { %v658_v36 = vadd.f32 %v657_v32, %v609_v33  ;;  %v562_v48 = vadd.f32 %v561_v35, %v513_v37  ;;  %v4269_v31 = vld [vmem:[%s5751_s1 + $0x310] sm:$0xff] }
 0x11a   :  { %2471 = vmatpush.bf16.msrb.mxu0 %v4269_v31  ;;  %v4283_v31 = vld [vmem:[%s5751_s1 + $0x380] sm:$0xff] }
 0x11b   :  { %676 = vst [vmem:[%s5754_s3 + $0x70] sm:$0xff] %v658_v36  ;;  %2571 = vmatpush.bf16.msrb.mxu2 %v4283_v31 }
 0x11e   :  { %v610_v49 = vpop.f32.mrf.mxu2  ;;  %v1141_v54 = vpop.f32.mrf.mxu0 }
 0x11f   :  { %v659_v50 = vpop.f32.mrf.mxu3  ;;  %v611_v53 = vadd.f32 %v610_v49, %v562_v48  ;;  %v1190_v55 = vpop.f32.mrf.mxu1  ;;  %v1142_v58 = vadd.f32 %v5085_v40, %v1141_v54  ;;  %v3447_v48 = vld [vmem:[%s5753_s0 + $0x258] sm:$0xf0] }
 0x121   :  { %v660_v59 = vadd.f32 %v659_v50, %v611_v53  ;;  %1807 = vmatmul.bf16.vlgmr.msra.gmra.mxu0 %v3406_v51  ;;  %v1191_v60 = vadd.f32 %v1190_v55, %v1142_v58  ;;  %v3442_v53 = vor.u32 %v4179_v39, %v3439_v43  ;;  %v3450_v58 = vor.u32 %v4180_v47, %v3447_v48  ;;  %v4189_v39 = vld [vmem:[%s5753_s0 + $0x28c] sm:$0xf0]  ;;  %v4187_v43 = vld [vmem:[%s5753_s0 + $0x284] sm:$0xf]  ;;  %v4190_v47 = vld [vmem:[%s5753_s0 + $0x294] sm:$0xf0] }
 0x122   :  { %1856 = vmatmul.bf16.vlgmr.msra.gmra.mxu1 %v3410_v52  ;;  %v3438_v52 = vor.u32 %v4181_v42, %v3437_v41  ;;  %v3469_v42 = vld [vmem:[%s5753_s0 + $0x280] sm:$0xf]  ;;  %v4188_v48 = vld [vmem:[%s5753_s0 + $0x28c] sm:$0xf] }
 0x123   :  { %677 = vst [vmem:[%s5754_s3 + $0x78] sm:$0xff] %v660_v59  ;;  %1905 = vmatmul.bf16.vlgmr.msra.gmra.mxu2 %v3414_v56 }
 0x124   :  { %1954 = vmatmul.bf16.vlgmr.msra.gmra.mxu3 %v3418_v57  ;;  %v3446_v57 = vor.u32 %v4182_v46, %v3445_v44  ;;  %v3471_v44 = vld [vmem:[%s5753_s0 + $0x290] sm:$0xf0] }
 0x125   :  { %v4277_v46 = vld [vmem:[%s5751_s1 + $0x350] sm:$0xff] }
 0x126   :  { %v1239_v0 = vpop.f32.mrf.mxu2  ;;  %v1143_v3 = vpop.f32.mrf.mxu0  ;;  %2520 = vmatpush.bf16.msrb.mxu1 %v4277_v46  ;;  %v3509_v46 = vld [vmem:[%s5753_s0 + $0x2c8] sm:$0xf] }
 0x127   :  { %v1288_v1 = vpop.f32.mrf.mxu3  ;;  %v1240_v2 = vadd.f32 %v1239_v0, %v1191_v60  ;;  %v1192_v4 = vpop.f32.mrf.mxu1  ;;  %v1144_v6 = vadd.f32 %v5085_v40, %v1143_v3  ;;  %v4294_v0 = vld [vmem:[%s5751_s1 + $0x3d8] sm:$0xff] }
 0x128   :  { %2617 = vmatpush.bf16.msrb.mxu3 %v4294_v0  ;;  %v4268_v0 = vld [vmem:[%s5751_s1 + $0x308] sm:$0xff] }
 0x129   :  { %v1289_v5 = vadd.f32 %v1288_v1, %v1240_v2  ;;  %v1193_v16 = vadd.f32 %v1192_v4, %v1144_v6  ;;  %2472 = vmatpush.bf16.msrb.mxu0 %v4268_v0 }
 0x12b   :  { %3291 = vst [vmem:[%s5754_s3 + $0x80] sm:$0xff] %v1289_v5 }
 0x12e   :  { %v1241_v17 = vpop.f32.mrf.mxu2  ;;  %v1146_v22 = vpop.f32.mrf.mxu0 }
 0x12f   :  { %v1290_v18 = vpop.f32.mrf.mxu3  ;;  %v1242_v21 = vadd.f32 %v1241_v17, %v1193_v16  ;;  %v1195_v23 = vpop.f32.mrf.mxu1  ;;  %v1147_v26 = vadd.f32 %v5085_v40, %v1146_v22  ;;  %v3463_v16 = vld [vmem:[%s5753_s0 + $0x278] sm:$0xf0] }
 0x131   :  { %v1291_v27 = vadd.f32 %v1290_v18, %v1242_v21  ;;  %1812 = vmatmul.bf16.gmra.mxu0 %v3422_v19  ;;  %v1196_v28 = vadd.f32 %v1195_v23, %v1147_v26  ;;  %v3458_v21 = vor.u32 %v4183_v10, %v3455_v11  ;;  %v3466_v26 = vor.u32 %v4184_v15, %v3463_v16  ;;  %v4193_v10 = vld [vmem:[%s5753_s0 + $0x2ac] sm:$0xf0]  ;;  %v4191_v11 = vld [vmem:[%s5753_s0 + $0x2a4] sm:$0xf]  ;;  %v4194_v15 = vld [vmem:[%s5753_s0 + $0x2b4] sm:$0xf0] }
 0x132   :  { %1861 = vmatmul.bf16.gmra.mxu1 %v3426_v20  ;;  %v3454_v20 = vor.u32 %v4185_v9, %v3453_v8  ;;  %v3485_v9 = vld [vmem:[%s5753_s0 + $0x2a0] sm:$0xf]  ;;  %v4192_v16 = vld [vmem:[%s5753_s0 + $0x2ac] sm:$0xf] }
 0x133   :  { %3292 = vst [vmem:[%s5754_s3 + $0x88] sm:$0xff] %v1291_v27  ;;  %1910 = vmatmul.bf16.gmra.mxu2 %v3430_v24 }
 0x134   :  { %1959 = vmatmul.bf16.gmra.mxu3 %v3434_v25  ;;  %v3462_v25 = vor.u32 %v4186_v14, %v3461_v12  ;;  %v3487_v12 = vld [vmem:[%s5753_s0 + $0x2b0] sm:$0xf0]  ;;  %v4276_v14 = vld [vmem:[%s5751_s1 + $0x348] sm:$0xff] }
 0x135   :  { %2521 = vmatpush.bf16.msrb.mxu1 %v4276_v14  ;;  %v3527_v14 = vld [vmem:[%s5753_s0 + $0x2f8] sm:$0xf0] }
 0x136   :  { %v1244_v32 = vpop.f32.mrf.mxu2  ;;  %v1148_v35 = vpop.f32.mrf.mxu0 }
 0x137   :  { %v1293_v33 = vpop.f32.mrf.mxu3  ;;  %v1245_v34 = vadd.f32 %v1244_v32, %v1196_v28  ;;  %v1197_v36 = vpop.f32.mrf.mxu1  ;;  %v1149_v38 = vadd.f32 %v5085_v40, %v1148_v35  ;;  %v4293_v32 = vld [vmem:[%s5751_s1 + $0x3d0] sm:$0xff] }
 0x138   :  { %2618 = vmatpush.bf16.msrb.mxu3 %v4293_v32  ;;  %v4267_v32 = vld [vmem:[%s5751_s1 + $0x300] sm:$0xff] }
 0x139   :  { %v1294_v37 = vadd.f32 %v1293_v33, %v1245_v34  ;;  %v1198_v49 = vadd.f32 %v1197_v36, %v1149_v38  ;;  %2473 = vmatpush.bf16.msrb.mxu0 %v4267_v32 }
 0x13b   :  { %3293 = vst [vmem:[%s5754_s3 + $0x90] sm:$0xff] %v1294_v37 }
 0x13e   :  { %v1246_v50 = vpop.f32.mrf.mxu2  ;;  %v1151_v55 = vpop.f32.mrf.mxu0 }
 0x13f   :  { %v1295_v51 = vpop.f32.mrf.mxu3  ;;  %v1247_v54 = vadd.f32 %v1246_v50, %v1198_v49  ;;  %v1200_v56 = vpop.f32.mrf.mxu1  ;;  %v1152_v59 = vadd.f32 %v5085_v40, %v1151_v55  ;;  %v3479_v49 = vld [vmem:[%s5753_s0 + $0x298] sm:$0xf0] }
 0x141   :  { %v1296_v60 = vadd.f32 %v1295_v51, %v1247_v54  ;;  %1817 = vmatmul.bf16.gmra.mxu0 %v3438_v52  ;;  %v1201_v61 = vadd.f32 %v1200_v56, %v1152_v59  ;;  %v3474_v54 = vor.u32 %v4187_v43, %v3471_v44  ;;  %v3482_v59 = vor.u32 %v4188_v48, %v3479_v49  ;;  %v4197_v43 = vld [vmem:[%s5753_s0 + $0x2cc] sm:$0xf0]  ;;  %v4195_v44 = vld [vmem:[%s5753_s0 + $0x2c4] sm:$0xf]  ;;  %v4198_v48 = vld [vmem:[%s5753_s0 + $0x2d4] sm:$0xf0] }
 0x142   :  { %1866 = vmatmul.bf16.gmra.mxu1 %v3442_v53  ;;  %v3470_v53 = vor.u32 %v4189_v39, %v3469_v42  ;;  %v3501_v39 = vld [vmem:[%s5753_s0 + $0x2c0] sm:$0xf]  ;;  %v4196_v49 = vld [vmem:[%s5753_s0 + $0x2cc] sm:$0xf] }
 0x143   :  { %3294 = vst [vmem:[%s5754_s3 + $0x98] sm:$0xff] %v1296_v60  ;;  %1915 = vmatmul.bf16.gmra.mxu2 %v3446_v57 }
 0x144   :  { %1964 = vmatmul.bf16.gmra.mxu3 %v3450_v58  ;;  %v3478_v58 = vor.u32 %v4190_v47, %v3477_v45  ;;  %v3503_v45 = vld [vmem:[%s5753_s0 + $0x2d0] sm:$0xf0]  ;;  %v4275_v47 = vld [vmem:[%s5751_s1 + $0x340] sm:$0xff] }
 0x145   :  { %2522 = vmatpush.bf16.msrb.mxu1 %v4275_v47 }
 0x146   :  { %v1249_v1 = vpop.f32.mrf.mxu2  ;;  %v1153_v4 = vpop.f32.mrf.mxu0 }
 0x147   :  { %v1298_v2 = vpop.f32.mrf.mxu3  ;;  %v1250_v3 = vadd.f32 %v1249_v1, %v1201_v61  ;;  %v1202_v5 = vpop.f32.mrf.mxu1  ;;  %v1154_v7 = vadd.f32 %v5085_v40, %v1153_v4  ;;  %v4292_v1 = vld [vmem:[%s5751_s1 + $0x3c8] sm:$0xff] }
 0x148   :  { %2619 = vmatpush.bf16.msrb.mxu3 %v4292_v1 }
 0x149   :  { %v1299_v6 = vadd.f32 %v1298_v2, %v1250_v3  ;;  %v1203_v17 = vadd.f32 %v1202_v5, %v1154_v7 }
 0x14b   :  { %3295 = vst [vmem:[%s5754_s3 + $0xa0] sm:$0xff] %v1299_v6 }
 0x14e   :  { %v1251_v18 = vpop.f32.mrf.mxu2  ;;  %v1156_v23 = vpop.f32.mrf.mxu0 }
 0x14f   :  { %v1300_v19 = vpop.f32.mrf.mxu3  ;;  %v1252_v22 = vadd.f32 %v1251_v18, %v1203_v17  ;;  %v1205_v24 = vpop.f32.mrf.mxu1  ;;  %v1157_v27 = vadd.f32 %v5085_v40, %v1156_v23  ;;  %v3495_v17 = vld [vmem:[%s5753_s0 + $0x2b8] sm:$0xf0] }
 0x151   :  { %v1301_v28 = vadd.f32 %v1300_v19, %v1252_v22  ;;  %1822 = vmatmul.bf16.gmra.mxu0 %v3454_v20  ;;  %v1206_v29 = vadd.f32 %v1205_v24, %v1157_v27  ;;  %v3490_v22 = vor.u32 %v4191_v11, %v3487_v12  ;;  %v3498_v27 = vor.u32 %v4192_v16, %v3495_v17  ;;  %v3525_v11 = vld [vmem:[%s5753_s0 + $0x2e8] sm:$0xf]  ;;  %v4202_v12 = vld [vmem:[%s5753_s0 + $0x2f4] sm:$0xf0] }
 0x152   :  { %1871 = vmatmul.bf16.gmra.mxu1 %v3458_v21  ;;  %v3486_v21 = vor.u32 %v4193_v10, %v3485_v9  ;;  %v4199_v9 = vld [vmem:[%s5753_s0 + $0x2e4] sm:$0xf]  ;;  %v3519_v10 = vld [vmem:[%s5753_s0 + $0x2f0] sm:$0xf0] }
 0x153   :  { %3296 = vst [vmem:[%s5754_s3 + $0xa8] sm:$0xff] %v1301_v28  ;;  %1920 = vmatmul.bf16.gmra.mxu2 %v3462_v25 }
 0x154   :  { %1969 = vmatmul.bf16.gmra.mxu3 %v3466_v26  ;;  %v3494_v26 = vor.u32 %v4194_v15, %v3493_v13  ;;  %v4200_v13 = vld [vmem:[%s5753_s0 + $0x2ec] sm:$0xf] }
 0x156   :  { %v1254_v33 = vpop.f32.mrf.mxu2  ;;  %v1158_v36 = vpop.f32.mrf.mxu0 }
 0x157   :  { %v1303_v34 = vpop.f32.mrf.mxu3  ;;  %v1255_v35 = vadd.f32 %v1254_v33, %v1206_v29  ;;  %v1207_v37 = vpop.f32.mrf.mxu1  ;;  %v1159_v41 = vadd.f32 %v5085_v40, %v1158_v36  ;;  %v4291_v33 = vld [vmem:[%s5751_s1 + $0x3c0] sm:$0xff] }
 0x158   :  { %2620 = vmatpush.bf16.msrb.mxu3 %v4291_v33 }
 0x159   :  { %v1304_v38 = vadd.f32 %v1303_v34, %v1255_v35  ;;  %v1208_v50 = vadd.f32 %v1207_v37, %v1159_v41 }
 0x15b   :  { %3297 = vst [vmem:[%s5754_s3 + $0xb0] sm:$0xff] %v1304_v38 }
 0x15e   :  { %v1256_v51 = vpop.f32.mrf.mxu2  ;;  %v1161_v56 = vpop.f32.mrf.mxu0 }
 0x15f   :  { %v1305_v52 = vpop.f32.mrf.mxu3  ;;  %v1257_v55 = vadd.f32 %v1256_v51, %v1208_v50  ;;  %v1210_v57 = vpop.f32.mrf.mxu1  ;;  %v1162_v60 = vadd.f32 %v5085_v40, %v1161_v56  ;;  %v3511_v50 = vld [vmem:[%s5753_s0 + $0x2d8] sm:$0xf0] }
 0x161   :  { %v1306_v61 = vadd.f32 %v1305_v52, %v1257_v55  ;;  %1827 = vmatmul.bf16.gmra.mxu0 %v3470_v53  ;;  %v1211_v62 = vadd.f32 %v1210_v57, %v1162_v60  ;;  %v3506_v55 = vor.u32 %v4195_v44, %v3503_v45  ;;  %v3514_v60 = vor.u32 %v4196_v49, %v3511_v50 }
 0x162   :  { %1876 = vmatmul.bf16.gmra.mxu1 %v3474_v54  ;;  %v3502_v54 = vor.u32 %v4197_v43, %v3501_v39  ;;  %v4236_v39 = vld [vmem:[%s5753_s0 + $0x30c] sm:$0xf]  ;;  %v3783_v43 = vld [vmem:[%s5753_s0 + $0x318] sm:$0xf0] }
 0x163   :  { %3298 = vst [vmem:[%s5754_s3 + $0xb8] sm:$0xff] %v1306_v61  ;;  %1925 = vmatmul.bf16.gmra.mxu2 %v3478_v58 }
 0x164   :  { %1974 = vmatmul.bf16.gmra.mxu3 %v3482_v59  ;;  %v3510_v59 = vor.u32 %v4198_v48, %v3509_v46 }
 0x166   :  { %v1259_v2 = vpop.f32.mrf.mxu2  ;;  %v1163_v5 = vpop.f32.mrf.mxu0 }
 0x167   :  { %v1308_v3 = vpop.f32.mrf.mxu3  ;;  %v1260_v4 = vadd.f32 %v1259_v2, %v1211_v62  ;;  %v1212_v6 = vpop.f32.mrf.mxu1  ;;  %v1164_v8 = vadd.f32 %v5085_v40, %v1163_v5 }
 0x169   :  { %v1309_v7 = vadd.f32 %v1308_v3, %v1260_v4  ;;  %v1213_v18 = vadd.f32 %v1212_v6, %v1164_v8  ;;  %v4201_v8 = vld [vmem:[%s5753_s0 + $0x2ec] sm:$0xf0] }
 0x16b   :  { %3299 = vst [vmem:[%s5754_s3 + $0xc0] sm:$0xff] %v1309_v7  ;;  %v3517_v7 = vld [vmem:[%s5753_s0 + $0x2e0] sm:$0xf] }
 0x16e   :  { %v1261_v19 = vpop.f32.mrf.mxu2  ;;  %v1166_v24 = vpop.f32.mrf.mxu0 }
 0x16f   :  { %v1310_v20 = vpop.f32.mrf.mxu3  ;;  %v1262_v23 = vadd.f32 %v1261_v19, %v1213_v18  ;;  %v1215_v25 = vpop.f32.mrf.mxu1  ;;  %v1167_v28 = vadd.f32 %v5085_v40, %v1166_v24  ;;  %v3518_v18 = vor.u32 %v4201_v8, %v3517_v7  ;;  %v3522_v19 = vor.u32 %v4199_v9, %v3519_v10  ;;  %v3799_v7 = vld [vmem:[%s5753_s0 + $0x338] sm:$0xf0] }
 0x170   :  { %v3530_v24 = vor.u32 %v4200_v13, %v3527_v14 }
 0x171   :  { %v1311_v29 = vadd.f32 %v1310_v20, %v1262_v23  ;;  %1832 = vmatmul.bf16.gmra.mxu0 %v3486_v21  ;;  %v1216_v30 = vadd.f32 %v1215_v25, %v1167_v28  ;;  %v3526_v23 = vor.u32 %v4202_v12, %v3525_v11 }
 0x172   :  { %1881 = vmatmul.bf16.gmra.mxu1 %v3490_v22 }
 0x173   :  { %3300 = vst [vmem:[%s5754_s3 + $0xc8] sm:$0xff] %v1311_v29  ;;  %1930 = vmatmul.bf16.gmra.mxu2 %v3494_v26 }
 0x174   :  { %1979 = vmatmul.bf16.gmra.mxu3 %v3498_v27 }
 0x176   :  { %v1264_v34 = vpop.f32.mrf.mxu2  ;;  %v1168_v37 = vpop.f32.mrf.mxu0 }
 0x177   :  { %v1313_v35 = vpop.f32.mrf.mxu3  ;;  %v1265_v36 = vadd.f32 %v1264_v34, %v1216_v30  ;;  %v1217_v38 = vpop.f32.mrf.mxu1  ;;  %v1169_v42 = vadd.f32 %v5085_v40, %v1168_v37  ;;  %v4237_v37 = vld [vmem:[%s5753_s0 + $0x30c] sm:$0xf0] }
 0x179   :  { %v1314_v41 = vadd.f32 %v1313_v35, %v1265_v36  ;;  %v1218_v51 = vadd.f32 %v1217_v38, %v1169_v42  ;;  %v3773_v35 = vld [vmem:[%s5753_s0 + $0x300] sm:$0xf]  ;;  %v4235_v38 = vld [vmem:[%s5753_s0 + $0x304] sm:$0xf]  ;;  %v4238_v42 = vld [vmem:[%s5753_s0 + $0x314] sm:$0xf0] }
 0x17a   :  { %v5421_v36 = vld [vmem:[%s5752_s2] ss:$0 sm:$0xff]  ;;  %v3774_v47 = vor.u32 %v4237_v37, %v3773_v35  ;;  %v3815_v35 = vld [vmem:[%s5753_s0 + $0x358] sm:$0xf0] }
 0x17b   :  { %3301 = vst [vmem:[%s5754_s3 + $0xd0] sm:$0xff] %v1314_v41  ;;  %v3781_v41 = vld [vmem:[%s5753_s0 + $0x308] sm:$0xf] }
 0x17e   :  { %v1266_v52 = vpop.f32.mrf.mxu2  ;;  %v1171_v57 = vpop.f32.mrf.mxu0 }
 0x17f   :  { %v1315_v53 = vpop.f32.mrf.mxu3  ;;  %v1267_v56 = vadd.f32 %v1266_v52, %v1218_v51  ;;  %v1220_v58 = vpop.f32.mrf.mxu1  ;;  %v1172_v61 = vadd.f32 %v5085_v40, %v1171_v57  ;;  %v3782_v52 = vor.u32 %v4238_v42, %v3781_v41 }
 0x181   :  { %v1316_v62 = vadd.f32 %v1315_v53, %v1267_v56  ;;  %1837 = vmatmul.bf16.gmra.mxu0 %v3502_v54  ;;  %v1221_v63 = vadd.f32 %v1220_v58, %v1172_v61  ;;  %v3786_v53 = vor.u32 %v4236_v39, %v3783_v43 }
 0x182   :  { %1886 = vmatmul.bf16.gmra.mxu1 %v3506_v55 }
 0x183   :  { %3302 = vst [vmem:[%s5754_s3 + $0xd8] sm:$0xff] %v1316_v62  ;;  %1935 = vmatmul.bf16.gmra.mxu2 %v3510_v59 }
 0x184   :  { %1984 = vmatmul.bf16.gmra.mxu3 %v3514_v60 }
 0x186   :  { %v1269_v0 = vpop.f32.mrf.mxu2  ;;  %v1173_v3 = vpop.f32.mrf.mxu0 }
 0x187   :  { %v1318_v1 = vpop.f32.mrf.mxu3  ;;  %v1270_v2 = vadd.f32 %v1269_v0, %v1221_v63  ;;  %v1222_v4 = vpop.f32.mrf.mxu1  ;;  %v1174_v6 = vadd.f32 %v5085_v40, %v1173_v3  ;;  %v3789_v0 = vld [vmem:[%s5753_s0 + $0x320] sm:$0xf]  ;;  %v3791_v3 = vld [vmem:[%s5753_s0 + $0x330] sm:$0xf0] }
 0x189   :  { %v1319_v5 = vadd.f32 %v1318_v1, %v1270_v2  ;;  %v1223_v15 = vadd.f32 %v1222_v4, %v1174_v6  ;;  %v4241_v1 = vld [vmem:[%s5753_s0 + $0x32c] sm:$0xf0]  ;;  %v4239_v2 = vld [vmem:[%s5753_s0 + $0x324] sm:$0xf]  ;;  %v3797_v4 = vld [vmem:[%s5753_s0 + $0x328] sm:$0xf] }
 0x18a   :  { %v4240_v6 = vld [vmem:[%s5753_s0 + $0x32c] sm:$0xf]  ;;  %v3790_v11 = vor.u32 %v4241_v1, %v3789_v0  ;;  %v3794_v12 = vor.u32 %v4239_v2, %v3791_v3  ;;  %v3831_v0 = vld [vmem:[%s5753_s0 + $0x378] sm:$0xf0] }
 0x18b   :  { %3303 = vst [vmem:[%s5754_s3 + $0xe0] sm:$0xff] %v1319_v5  ;;  %v4242_v5 = vld [vmem:[%s5753_s0 + $0x334] sm:$0xf0] }
 0x18e   :  { %v1271_v16 = vpop.f32.mrf.mxu2  ;;  %v1176_v21 = vpop.f32.mrf.mxu0 }
 0x18f   :  { %v1320_v17 = vpop.f32.mrf.mxu3  ;;  %v1272_v20 = vadd.f32 %v1271_v16, %v1223_v15  ;;  %v1225_v22 = vpop.f32.mrf.mxu1  ;;  %v1177_v25 = vadd.f32 %v5085_v40, %v1176_v21  ;;  %v3798_v16 = vor.u32 %v4242_v5, %v3797_v4 }
 0x191   :  { %v1321_v26 = vadd.f32 %v1320_v17, %v1272_v20  ;;  %1842 = vmatmul.bf16.gmra.mxu0 %v3518_v18  ;;  %v1226_v27 = vadd.f32 %v1225_v22, %v1177_v25  ;;  %v3802_v17 = vor.u32 %v4240_v6, %v3799_v7 }
 0x192   :  { %1891 = vmatmul.bf16.gmra.mxu1 %v3522_v19 }
 0x193   :  { %3304 = vst [vmem:[%s5754_s3 + $0xe8] sm:$0xff] %v1321_v26  ;;  %1940 = vmatmul.bf16.gmra.mxu2 %v3526_v23 }
 0x194   :  { %1989 = vmatmul.bf16.gmra.mxu3 %v3530_v24 }
 0x196   :  { %v1274_v28 = vpop.f32.mrf.mxu2  ;;  %v1178_v31 = vpop.f32.mrf.mxu0 }
 0x197   :  { %v1323_v29 = vpop.f32.mrf.mxu3  ;;  %v1275_v30 = vadd.f32 %v1274_v28, %v1226_v27  ;;  %v1227_v32 = vpop.f32.mrf.mxu1  ;;  %v1179_v34 = vadd.f32 %v5085_v40, %v1178_v31  ;;  %v3775_v40 = vld [vmem:[%s5753_s0 + $0x310] sm:$0xf0]  ;;  %v3805_v28 = vld [vmem:[%s5753_s0 + $0x340] sm:$0xf] }
 0x198   :  { %v3778_v48 = vor.u32 %v4235_v38, %v3775_v40  ;;  %v3807_v31 = vld [vmem:[%s5753_s0 + $0x350] sm:$0xf0] }
 0x199   :  { %v1324_v33 = vadd.f32 %v1323_v29, %v1275_v30  ;;  %v1228_v44 = vadd.f32 %v1227_v32, %v1179_v34  ;;  %v4245_v29 = vld [vmem:[%s5753_s0 + $0x34c] sm:$0xf0]  ;;  %v4243_v30 = vld [vmem:[%s5753_s0 + $0x344] sm:$0xf]  ;;  %v3813_v32 = vld [vmem:[%s5753_s0 + $0x348] sm:$0xf] }
 0x19a   :  { %v4244_v34 = vld [vmem:[%s5753_s0 + $0x34c] sm:$0xf]  ;;  %v3806_v41 = vor.u32 %v4245_v29, %v3805_v28  ;;  %v3810_v42 = vor.u32 %v4243_v30, %v3807_v31  ;;  %v3847_v28 = vld [vmem:[%s5753_s0 + $0x398] sm:$0xf0] }
 0x19b   :  { %3305 = vst [vmem:[%s5754_s3 + $0xf0] sm:$0xff] %v1324_v33  ;;  %v4246_v33 = vld [vmem:[%s5753_s0 + $0x354] sm:$0xf0] }
 0x19e   :  { %v1276_v45 = vpop.f32.mrf.mxu2  ;;  %v1808_v50 = vpop.f32.mrf.mxu0 }
 0x19f   :  { %v1325_v46 = vpop.f32.mrf.mxu3  ;;  %v1277_v49 = vadd.f32 %v1276_v45, %v1228_v44  ;;  %v1857_v51 = vpop.f32.mrf.mxu1  ;;  %v1809_v54 = vadd.f32 %v5421_v36, %v1808_v50  ;;  %v3814_v45 = vor.u32 %v4246_v33, %v3813_v32 }
 0x1a1   :  { %v1326_v55 = vadd.f32 %v1325_v46, %v1277_v49  ;;  %2474 = vmatmul.bf16.vlgmr.msrb.gmra.mxu0 %v3774_v47  ;;  %v1858_v56 = vadd.f32 %v1857_v51, %v1809_v54  ;;  %v3818_v46 = vor.u32 %v4244_v34, %v3815_v35 }
 0x1a2   :  { %2523 = vmatmul.bf16.vlgmr.msrb.gmra.mxu1 %v3778_v48 }
 0x1a3   :  { %3306 = vst [vmem:[%s5754_s3 + $0xf8] sm:$0xff] %v1326_v55  ;;  %2572 = vmatmul.bf16.vlgmr.msrb.gmra.mxu2 %v3782_v52 }
 0x1a4   :  { %2621 = vmatmul.bf16.vlgmr.msrb.gmra.mxu3 %v3786_v53 }
 0x1a6   :  { %v1906_v57 = vpop.f32.mrf.mxu2  ;;  %v1810_v60 = vpop.f32.mrf.mxu0 }
 0x1a7   :  { %v1955_v58 = vpop.f32.mrf.mxu3  ;;  %v1907_v59 = vadd.f32 %v1906_v57, %v1858_v56  ;;  %v1859_v61 = vpop.f32.mrf.mxu1  ;;  %v1811_v63 = vadd.f32 %v5421_v36, %v1810_v60  ;;  %v3821_v57 = vld [vmem:[%s5753_s0 + $0x360] sm:$0xf]  ;;  %v3823_v60 = vld [vmem:[%s5753_s0 + $0x370] sm:$0xf0] }
 0x1a9   :  { %v1956_v62 = vadd.f32 %v1955_v58, %v1907_v59  ;;  %v1860_v8 = vadd.f32 %v1859_v61, %v1811_v63  ;;  %v4249_v58 = vld [vmem:[%s5753_s0 + $0x36c] sm:$0xf0]  ;;  %v4247_v59 = vld [vmem:[%s5753_s0 + $0x364] sm:$0xf]  ;;  %v3829_v61 = vld [vmem:[%s5753_s0 + $0x368] sm:$0xf] }
 0x1aa   :  { %v4248_v63 = vld [vmem:[%s5753_s0 + $0x36c] sm:$0xf]  ;;  %v3822_v4 = vor.u32 %v4249_v58, %v3821_v57  ;;  %v3826_v5 = vor.u32 %v4247_v59, %v3823_v60  ;;  %v3863_v57 = vld [vmem:[%s5753_s0 + $0x3b8] sm:$0xf0] }
 0x1ab   :  { %3659 = vst [vmem:[%s5754_s3 + $0x100] sm:$0xff] %v1956_v62  ;;  %v4250_v62 = vld [vmem:[%s5753_s0 + $0x374] sm:$0xf0] }
 0x1ae   :  { %v1908_v9 = vpop.f32.mrf.mxu2  ;;  %v1813_v14 = vpop.f32.mrf.mxu0 }
 0x1af   :  { %v1957_v10 = vpop.f32.mrf.mxu3  ;;  %v1909_v13 = vadd.f32 %v1908_v9, %v1860_v8  ;;  %v1862_v15 = vpop.f32.mrf.mxu1  ;;  %v1814_v18 = vadd.f32 %v5421_v36, %v1813_v14  ;;  %v3830_v9 = vor.u32 %v4250_v62, %v3829_v61 }
 0x1b1   :  { %v1958_v19 = vadd.f32 %v1957_v10, %v1909_v13  ;;  %2479 = vmatmul.bf16.gmra.mxu0 %v3790_v11  ;;  %v1863_v20 = vadd.f32 %v1862_v15, %v1814_v18  ;;  %v3834_v10 = vor.u32 %v4248_v63, %v3831_v0 }
 0x1b2   :  { %2528 = vmatmul.bf16.gmra.mxu1 %v3794_v12 }
 0x1b3   :  { %3660 = vst [vmem:[%s5754_s3 + $0x108] sm:$0xff] %v1958_v19  ;;  %2577 = vmatmul.bf16.gmra.mxu2 %v3798_v16 }
 0x1b4   :  { %2626 = vmatmul.bf16.gmra.mxu3 %v3802_v17 }
 0x1b6   :  { %v1911_v21 = vpop.f32.mrf.mxu2  ;;  %v1815_v24 = vpop.f32.mrf.mxu0 }
 0x1b7   :  { %v1960_v22 = vpop.f32.mrf.mxu3  ;;  %v1912_v23 = vadd.f32 %v1911_v21, %v1863_v20  ;;  %v1864_v25 = vpop.f32.mrf.mxu1  ;;  %v1816_v27 = vadd.f32 %v5421_v36, %v1815_v24  ;;  %v3837_v21 = vld [vmem:[%s5753_s0 + $0x380] sm:$0xf]  ;;  %v3839_v24 = vld [vmem:[%s5753_s0 + $0x390] sm:$0xf0] }
 0x1b9   :  { %v1961_v26 = vadd.f32 %v1960_v22, %v1912_v23  ;;  %v1865_v37 = vadd.f32 %v1864_v25, %v1816_v27  ;;  %v4253_v22 = vld [vmem:[%s5753_s0 + $0x38c] sm:$0xf0]  ;;  %v4251_v23 = vld [vmem:[%s5753_s0 + $0x384] sm:$0xf]  ;;  %v3845_v25 = vld [vmem:[%s5753_s0 + $0x388] sm:$0xf] }
 0x1ba   :  { %v4252_v27 = vld [vmem:[%s5753_s0 + $0x38c] sm:$0xf]  ;;  %v3838_v32 = vor.u32 %v4253_v22, %v3837_v21  ;;  %v3842_v33 = vor.u32 %v4251_v23, %v3839_v24  ;;  %v3879_v21 = vld [vmem:[%s5753_s0 + $0x3d8] sm:$0xf0] }
 0x1bb   :  { %3661 = vst [vmem:[%s5754_s3 + $0x110] sm:$0xff] %v1961_v26  ;;  %v4254_v26 = vld [vmem:[%s5753_s0 + $0x394] sm:$0xf0] }
 0x1be   :  { %v1913_v38 = vpop.f32.mrf.mxu2  ;;  %v1818_v43 = vpop.f32.mrf.mxu0 }
 0x1bf   :  { %v1962_v40 = vpop.f32.mrf.mxu3  ;;  %v1914_v39 = vadd.f32 %v1913_v38, %v1865_v37  ;;  %v1867_v44 = vpop.f32.mrf.mxu1  ;;  %v1819_v47 = vadd.f32 %v5421_v36, %v1818_v43  ;;  %v3846_v38 = vor.u32 %v4254_v26, %v3845_v25 }
 0x1c1   :  { %v1963_v48 = vadd.f32 %v1962_v40, %v1914_v39  ;;  %2484 = vmatmul.bf16.gmra.mxu0 %v3806_v41  ;;  %v1868_v49 = vadd.f32 %v1867_v44, %v1819_v47  ;;  %v3850_v40 = vor.u32 %v4252_v27, %v3847_v28 }
 0x1c2   :  { %2533 = vmatmul.bf16.gmra.mxu1 %v3810_v42 }
 0x1c3   :  { %3662 = vst [vmem:[%s5754_s3 + $0x118] sm:$0xff] %v1963_v48  ;;  %2582 = vmatmul.bf16.gmra.mxu2 %v3814_v45 }
 0x1c4   :  { %2631 = vmatmul.bf16.gmra.mxu3 %v3818_v46 }
 0x1c6   :  { %v1916_v50 = vpop.f32.mrf.mxu2  ;;  %v1820_v53 = vpop.f32.mrf.mxu0 }
 0x1c7   :  { %v1965_v51 = vpop.f32.mrf.mxu3  ;;  %v1917_v52 = vadd.f32 %v1916_v50, %v1868_v49  ;;  %v1869_v54 = vpop.f32.mrf.mxu1  ;;  %v1821_v56 = vadd.f32 %v5421_v36, %v1820_v53  ;;  %v3853_v50 = vld [vmem:[%s5753_s0 + $0x3a0] sm:$0xf]  ;;  %v3855_v53 = vld [vmem:[%s5753_s0 + $0x3b0] sm:$0xf0] }
 0x1c9   :  { %v1966_v55 = vadd.f32 %v1965_v51, %v1917_v52  ;;  %v1870_v1 = vadd.f32 %v1869_v54, %v1821_v56  ;;  %v4257_v51 = vld [vmem:[%s5753_s0 + $0x3ac] sm:$0xf0]  ;;  %v4255_v52 = vld [vmem:[%s5753_s0 + $0x3a4] sm:$0xf]  ;;  %v3861_v54 = vld [vmem:[%s5753_s0 + $0x3a8] sm:$0xf] }
 0x1ca   :  { %v4256_v56 = vld [vmem:[%s5753_s0 + $0x3ac] sm:$0xf]  ;;  %v3854_v61 = vor.u32 %v4257_v51, %v3853_v50  ;;  %v3858_v62 = vor.u32 %v4255_v52, %v3855_v53  ;;  %v3895_v50 = vld [vmem:[%s5753_s0 + $0x3f8] sm:$0xf0] }
 0x1cb   :  { %3663 = vst [vmem:[%s5754_s3 + $0x120] sm:$0xff] %v1966_v55  ;;  %v4258_v55 = vld [vmem:[%s5753_s0 + $0x3b4] sm:$0xf0] }
 0x1ce   :  { %v1918_v2 = vpop.f32.mrf.mxu2  ;;  %v1823_v7 = vpop.f32.mrf.mxu0 }
 0x1cf   :  { %v1967_v3 = vpop.f32.mrf.mxu3  ;;  %v1919_v6 = vadd.f32 %v1918_v2, %v1870_v1  ;;  %v1872_v8 = vpop.f32.mrf.mxu1  ;;  %v1824_v11 = vadd.f32 %v5421_v36, %v1823_v7  ;;  %v3862_v2 = vor.u32 %v4258_v55, %v3861_v54 }
 0x1d1   :  { %v1968_v12 = vadd.f32 %v1967_v3, %v1919_v6  ;;  %2489 = vmatmul.bf16.gmra.mxu0 %v3822_v4  ;;  %v1873_v13 = vadd.f32 %v1872_v8, %v1824_v11  ;;  %v3866_v3 = vor.u32 %v4256_v56, %v3863_v57 }
 0x1d2   :  { %2538 = vmatmul.bf16.gmra.mxu1 %v3826_v5 }
 0x1d3   :  { %3664 = vst [vmem:[%s5754_s3 + $0x128] sm:$0xff] %v1968_v12  ;;  %2587 = vmatmul.bf16.gmra.mxu2 %v3830_v9 }
 0x1d4   :  { %2636 = vmatmul.bf16.gmra.mxu3 %v3834_v10 }
 0x1d6   :  { %v1921_v14 = vpop.f32.mrf.mxu2  ;;  %v1825_v17 = vpop.f32.mrf.mxu0 }
 0x1d7   :  { %v1970_v15 = vpop.f32.mrf.mxu3  ;;  %v1922_v16 = vadd.f32 %v1921_v14, %v1873_v13  ;;  %v1874_v18 = vpop.f32.mrf.mxu1  ;;  %v1826_v20 = vadd.f32 %v5421_v36, %v1825_v17  ;;  %v3869_v14 = vld [vmem:[%s5753_s0 + $0x3c0] sm:$0xf]  ;;  %v3871_v17 = vld [vmem:[%s5753_s0 + $0x3d0] sm:$0xf0] }
 0x1d9   :  { %v1971_v19 = vadd.f32 %v1970_v15, %v1922_v16  ;;  %v1875_v29 = vadd.f32 %v1874_v18, %v1826_v20  ;;  %v4261_v15 = vld [vmem:[%s5753_s0 + $0x3cc] sm:$0xf0]  ;;  %v4259_v16 = vld [vmem:[%s5753_s0 + $0x3c4] sm:$0xf]  ;;  %v3877_v18 = vld [vmem:[%s5753_s0 + $0x3c8] sm:$0xf] }
 0x1da   :  { %v4260_v20 = vld [vmem:[%s5753_s0 + $0x3cc] sm:$0xf]  ;;  %v3870_v25 = vor.u32 %v4261_v15, %v3869_v14  ;;  %v3874_v26 = vor.u32 %v4259_v16, %v3871_v17 }
 0x1db   :  { %3665 = vst [vmem:[%s5754_s3 + $0x130] sm:$0xff] %v1971_v19  ;;  %v4262_v19 = vld [vmem:[%s5753_s0 + $0x3d4] sm:$0xf0] }
 0x1de   :  { %v1923_v30 = vpop.f32.mrf.mxu2  ;;  %v1828_v35 = vpop.f32.mrf.mxu0 }
 0x1df   :  { %v1972_v31 = vpop.f32.mrf.mxu3  ;;  %v1924_v34 = vadd.f32 %v1923_v30, %v1875_v29  ;;  %v1877_v37 = vpop.f32.mrf.mxu1  ;;  %v1829_v41 = vadd.f32 %v5421_v36, %v1828_v35  ;;  %v3878_v30 = vor.u32 %v4262_v19, %v3877_v18 }
 0x1e1   :  { %v1973_v42 = vadd.f32 %v1972_v31, %v1924_v34  ;;  %2494 = vmatmul.bf16.gmra.mxu0 %v3838_v32  ;;  %v1878_v39 = vadd.f32 %v1877_v37, %v1829_v41  ;;  %v3882_v31 = vor.u32 %v4260_v20, %v3879_v21 }
 0x1e2   :  { %2543 = vmatmul.bf16.gmra.mxu1 %v3842_v33 }
 0x1e3   :  { %3666 = vst [vmem:[%s5754_s3 + $0x138] sm:$0xff] %v1973_v42  ;;  %2592 = vmatmul.bf16.gmra.mxu2 %v3846_v38 }
 0x1e4   :  { %2641 = vmatmul.bf16.gmra.mxu3 %v3850_v40 }
 0x1e6   :  { %v1926_v43 = vpop.f32.mrf.mxu2  ;;  %v1830_v46 = vpop.f32.mrf.mxu0 }
 0x1e7   :  { %v1975_v44 = vpop.f32.mrf.mxu3  ;;  %v1927_v45 = vadd.f32 %v1926_v43, %v1878_v39  ;;  %v1879_v47 = vpop.f32.mrf.mxu1  ;;  %v1831_v49 = vadd.f32 %v5421_v36, %v1830_v46  ;;  %v3885_v43 = vld [vmem:[%s5753_s0 + $0x3e0] sm:$0xf]  ;;  %v3887_v46 = vld [vmem:[%s5753_s0 + $0x3f0] sm:$0xf0] }
 0x1e9   :  { %v1976_v48 = vadd.f32 %v1975_v44, %v1927_v45  ;;  %v1880_v58 = vadd.f32 %v1879_v47, %v1831_v49  ;;  %v4265_v44 = vld [vmem:[%s5753_s0 + $0x3ec] sm:$0xf0]  ;;  %v4263_v45 = vld [vmem:[%s5753_s0 + $0x3e4] sm:$0xf]  ;;  %v3893_v47 = vld [vmem:[%s5753_s0 + $0x3e8] sm:$0xf] }
 0x1ea   :  { %v4264_v49 = vld [vmem:[%s5753_s0 + $0x3ec] sm:$0xf]  ;;  %v3886_v54 = vor.u32 %v4265_v44, %v3885_v43  ;;  %v3890_v55 = vor.u32 %v4263_v45, %v3887_v46 }
 0x1eb   :  { %3667 = vst [vmem:[%s5754_s3 + $0x140] sm:$0xff] %v1976_v48  ;;  %v4266_v48 = vld [vmem:[%s5753_s0 + $0x3f4] sm:$0xf0] }
 0x1ee   :  { %v1928_v59 = vpop.f32.mrf.mxu2  ;;  %v1833_v0 = vpop.f32.mrf.mxu0 }
 0x1ef   :  { %v1977_v60 = vpop.f32.mrf.mxu3  ;;  %v1929_v63 = vadd.f32 %v1928_v59, %v1880_v58  ;;  %v1882_v1 = vpop.f32.mrf.mxu1  ;;  %v1834_v4 = vadd.f32 %v5421_v36, %v1833_v0  ;;  %v3894_v59 = vor.u32 %v4266_v48, %v3893_v47 }
 0x1f1   :  { %v1978_v5 = vadd.f32 %v1977_v60, %v1929_v63  ;;  %2499 = vmatmul.bf16.gmra.mxu0 %v3854_v61  ;;  %v1883_v6 = vadd.f32 %v1882_v1, %v1834_v4  ;;  %v3898_v60 = vor.u32 %v4264_v49, %v3895_v50 }
 0x1f2   :  { %2548 = vmatmul.bf16.gmra.mxu1 %v3858_v62 }
 0x1f3   :  { %3668 = vst [vmem:[%s5754_s3 + $0x148] sm:$0xff] %v1978_v5  ;;  %2597 = vmatmul.bf16.gmra.mxu2 %v3862_v2 }
 0x1f4   :  { %2646 = vmatmul.bf16.gmra.mxu3 %v3866_v3 }
 0x1f6   :  { %v1931_v7 = vpop.f32.mrf.mxu2  ;;  %v1835_v10 = vpop.f32.mrf.mxu0 }
 0x1f7   :  { %v1980_v8 = vpop.f32.mrf.mxu3  ;;  %v1932_v9 = vadd.f32 %v1931_v7, %v1883_v6  ;;  %v1884_v11 = vpop.f32.mrf.mxu1  ;;  %v1836_v13 = vadd.f32 %v5421_v36, %v1835_v10  ;;  %v5682_v7 = vld [vmem:[%s5752_s2] ss:$0 sm:$0xff] }
 0x1f9   :  { %v1981_v12 = vadd.f32 %v1980_v8, %v1932_v9  ;;  %v1885_v22 = vadd.f32 %v1884_v11, %v1836_v13 }
 0x1fb   :  { %3669 = vst [vmem:[%s5754_s3 + $0x150] sm:$0xff] %v1981_v12 }
 0x1fe   :  { %v1933_v23 = vpop.f32.mrf.mxu2  ;;  %v1838_v28 = vpop.f32.mrf.mxu0 }
 0x1ff   :  { %v1982_v24 = vpop.f32.mrf.mxu3  ;;  %v1934_v27 = vadd.f32 %v1933_v23, %v1885_v22  ;;  %v1887_v29 = vpop.f32.mrf.mxu1  ;;  %v1839_v32 = vadd.f32 %v5421_v36, %v1838_v28 }
 0x201   :  { %v1983_v33 = vadd.f32 %v1982_v24, %v1934_v27  ;;  %2504 = vmatmul.bf16.gmra.mxu0 %v3870_v25  ;;  %v1888_v34 = vadd.f32 %v1887_v29, %v1839_v32 }
 0x202   :  { %2553 = vmatmul.bf16.gmra.mxu1 %v3874_v26 }
 0x203   :  { %3670 = vst [vmem:[%s5754_s3 + $0x158] sm:$0xff] %v1983_v33  ;;  %2602 = vmatmul.bf16.gmra.mxu2 %v3878_v30 }
 0x204   :  { %2651 = vmatmul.bf16.gmra.mxu3 %v3882_v31 }
 0x206   :  { %v1936_v35 = vpop.f32.mrf.mxu2  ;;  %v1840_v40 = vpop.f32.mrf.mxu0 }
 0x207   :  { %v1985_v37 = vpop.f32.mrf.mxu3  ;;  %v1937_v38 = vadd.f32 %v1936_v35, %v1888_v34  ;;  %v1889_v41 = vpop.f32.mrf.mxu1  ;;  %v1841_v39 = vadd.f32 %v5421_v36, %v1840_v40 }
 0x209   :  { %v1986_v42 = vadd.f32 %v1985_v37, %v1937_v38  ;;  %v1890_v51 = vadd.f32 %v1889_v41, %v1841_v39 }
 0x20b   :  { %3671 = vst [vmem:[%s5754_s3 + $0x160] sm:$0xff] %v1986_v42 }
 0x20e   :  { %v1938_v52 = vpop.f32.mrf.mxu2  ;;  %v1843_v57 = vpop.f32.mrf.mxu0 }
 0x20f   :  { %v1987_v53 = vpop.f32.mrf.mxu3  ;;  %v1939_v56 = vadd.f32 %v1938_v52, %v1890_v51  ;;  %v1892_v58 = vpop.f32.mrf.mxu1  ;;  %v1844_v61 = vadd.f32 %v5421_v36, %v1843_v57 }
 0x211   :  { %v1988_v62 = vadd.f32 %v1987_v53, %v1939_v56  ;;  %2509 = vmatmul.bf16.gmra.mxu0 %v3886_v54  ;;  %v1893_v63 = vadd.f32 %v1892_v58, %v1844_v61 }
 0x212   :  { %2558 = vmatmul.bf16.gmra.mxu1 %v3890_v55 }
 0x213   :  { %3672 = vst [vmem:[%s5754_s3 + $0x168] sm:$0xff] %v1988_v62  ;;  %2607 = vmatmul.bf16.gmra.mxu2 %v3894_v59 }
 0x214   :  { %2656 = vmatmul.bf16.gmra.mxu3 %v3898_v60 }
 0x216   :  { %v1941_v0 = vpop.f32.mrf.mxu2  ;;  %v1845_v3 = vpop.f32.mrf.mxu0 }
 0x217   :  { %v1990_v1 = vpop.f32.mrf.mxu3  ;;  %v1942_v2 = vadd.f32 %v1941_v0, %v1893_v63  ;;  %v1894_v4 = vpop.f32.mrf.mxu1  ;;  %v1846_v6 = vadd.f32 %v5421_v36, %v1845_v3 }
 0x219   :  { %v1991_v5 = vadd.f32 %v1990_v1, %v1942_v2  ;;  %v1895_v8 = vadd.f32 %v1894_v4, %v1846_v6 }
 0x21b   :  { %3673 = vst [vmem:[%s5754_s3 + $0x170] sm:$0xff] %v1991_v5 }
 0x21e   :  { %v1943_v9 = vpop.f32.mrf.mxu2  ;;  %v2475_v12 = vpop.f32.mrf.mxu0 }
 0x21f   :  { %v1992_v10 = vpop.f32.mrf.mxu3  ;;  %v1944_v11 = vadd.f32 %v1943_v9, %v1895_v8  ;;  %v2524_v13 = vpop.f32.mrf.mxu1  ;;  %v2476_v14 = vadd.f32 %v5682_v7, %v2475_v12 }
 0x221   :  { %v1993_v15 = vadd.f32 %v1992_v10, %v1944_v11  ;;  %v2525_v36 = vadd.f32 %v2524_v13, %v2476_v14 }
 0x223   :  { %3674 = vst [vmem:[%s5754_s3 + $0x178] sm:$0xff] %v1993_v15 }
 0x226   :  { %v2573_v16 = vpop.f32.mrf.mxu2  ;;  %v2477_v19 = vpop.f32.mrf.mxu0 }
 0x227   :  { %v2622_v17 = vpop.f32.mrf.mxu3  ;;  %v2574_v18 = vadd.f32 %v2573_v16, %v2525_v36  ;;  %v2526_v20 = vpop.f32.mrf.mxu1  ;;  %v2478_v22 = vadd.f32 %v5682_v7, %v2477_v19 }
 0x229   :  { %v2623_v21 = vadd.f32 %v2622_v17, %v2574_v18  ;;  %v2527_v23 = vadd.f32 %v2526_v20, %v2478_v22 }
 0x22b   :  { %4027 = vst [vmem:[%s5754_s3 + $0x180] sm:$0xff] %v2623_v21 }
 0x22e   :  { %v2575_v24 = vpop.f32.mrf.mxu2  ;;  %v2480_v27 = vpop.f32.mrf.mxu0 }
 0x22f   :  { %v2624_v25 = vpop.f32.mrf.mxu3  ;;  %v2576_v26 = vadd.f32 %v2575_v24, %v2527_v23  ;;  %v2529_v28 = vpop.f32.mrf.mxu1  ;;  %v2481_v29 = vadd.f32 %v5682_v7, %v2480_v27 }
 0x231   :  { %v2625_v30 = vadd.f32 %v2624_v25, %v2576_v26  ;;  %v2530_v31 = vadd.f32 %v2529_v28, %v2481_v29 }
 0x233   :  { %4028 = vst [vmem:[%s5754_s3 + $0x188] sm:$0xff] %v2625_v30 }
 0x236   :  { %v2578_v32 = vpop.f32.mrf.mxu2  ;;  %v2482_v35 = vpop.f32.mrf.mxu0 }
 0x237   :  { %v2627_v33 = vpop.f32.mrf.mxu3  ;;  %v2579_v34 = vadd.f32 %v2578_v32, %v2530_v31  ;;  %v2531_v37 = vpop.f32.mrf.mxu1  ;;  %v2483_v40 = vadd.f32 %v5682_v7, %v2482_v35 }
 0x239   :  { %v2628_v38 = vadd.f32 %v2627_v33, %v2579_v34  ;;  %v2532_v41 = vadd.f32 %v2531_v37, %v2483_v40 }
 0x23b   :  { %4029 = vst [vmem:[%s5754_s3 + $0x190] sm:$0xff] %v2628_v38 }
 0x23e   :  { %v2580_v42 = vpop.f32.mrf.mxu2  ;;  %v2485_v44 = vpop.f32.mrf.mxu0 }
 0x23f   :  { %v2629_v39 = vpop.f32.mrf.mxu3  ;;  %v2581_v43 = vadd.f32 %v2580_v42, %v2532_v41  ;;  %v2534_v45 = vpop.f32.mrf.mxu1  ;;  %v2486_v46 = vadd.f32 %v5682_v7, %v2485_v44 }
 0x241   :  { %v2630_v47 = vadd.f32 %v2629_v39, %v2581_v43  ;;  %v2535_v48 = vadd.f32 %v2534_v45, %v2486_v46 }
 0x243   :  { %4030 = vst [vmem:[%s5754_s3 + $0x198] sm:$0xff] %v2630_v47 }
 0x246   :  { %v2583_v49 = vpop.f32.mrf.mxu2  ;;  %v2487_v52 = vpop.f32.mrf.mxu0 }
 0x247   :  { %v2632_v50 = vpop.f32.mrf.mxu3  ;;  %v2584_v51 = vadd.f32 %v2583_v49, %v2535_v48  ;;  %v2536_v53 = vpop.f32.mrf.mxu1  ;;  %v2488_v55 = vadd.f32 %v5682_v7, %v2487_v52 }
 0x249   :  { %v2633_v54 = vadd.f32 %v2632_v50, %v2584_v51  ;;  %v2537_v56 = vadd.f32 %v2536_v53, %v2488_v55 }
 0x24b   :  { %4031 = vst [vmem:[%s5754_s3 + $0x1a0] sm:$0xff] %v2633_v54 }
 0x24e   :  { %v2585_v57 = vpop.f32.mrf.mxu2  ;;  %v2490_v60 = vpop.f32.mrf.mxu0 }
 0x24f   :  { %v2634_v58 = vpop.f32.mrf.mxu3  ;;  %v2586_v59 = vadd.f32 %v2585_v57, %v2537_v56  ;;  %v2539_v61 = vpop.f32.mrf.mxu1  ;;  %v2491_v62 = vadd.f32 %v5682_v7, %v2490_v60 }
 0x251   :  { %v2635_v63 = vadd.f32 %v2634_v58, %v2586_v59  ;;  %v2540_v0 = vadd.f32 %v2539_v61, %v2491_v62 }
 0x253   :  { %4032 = vst [vmem:[%s5754_s3 + $0x1a8] sm:$0xff] %v2635_v63 }
 0x256   :  { %v2588_v1 = vpop.f32.mrf.mxu2  ;;  %v2492_v4 = vpop.f32.mrf.mxu0 }
 0x257   :  { %v2637_v2 = vpop.f32.mrf.mxu3  ;;  %v2589_v3 = vadd.f32 %v2588_v1, %v2540_v0  ;;  %v2541_v5 = vpop.f32.mrf.mxu1  ;;  %v2493_v8 = vadd.f32 %v5682_v7, %v2492_v4 }
 0x259   :  { %v2638_v6 = vadd.f32 %v2637_v2, %v2589_v3  ;;  %v2542_v9 = vadd.f32 %v2541_v5, %v2493_v8 }
 0x25b   :  { %4033 = vst [vmem:[%s5754_s3 + $0x1b0] sm:$0xff] %v2638_v6 }
 0x25e   :  { %v2590_v10 = vpop.f32.mrf.mxu2  ;;  %v2495_v13 = vpop.f32.mrf.mxu0 }
 0x25f   :  { %v2639_v11 = vpop.f32.mrf.mxu3  ;;  %v2591_v12 = vadd.f32 %v2590_v10, %v2542_v9  ;;  %v2544_v14 = vpop.f32.mrf.mxu1  ;;  %v2496_v15 = vadd.f32 %v5682_v7, %v2495_v13 }
 0x261   :  { %v2640_v36 = vadd.f32 %v2639_v11, %v2591_v12  ;;  %v2545_v16 = vadd.f32 %v2544_v14, %v2496_v15 }
 0x263   :  { %4034 = vst [vmem:[%s5754_s3 + $0x1b8] sm:$0xff] %v2640_v36 }
 0x266   :  { %v2593_v17 = vpop.f32.mrf.mxu2  ;;  %v2497_v20 = vpop.f32.mrf.mxu0 }
 0x267   :  { %v2642_v18 = vpop.f32.mrf.mxu3  ;;  %v2594_v19 = vadd.f32 %v2593_v17, %v2545_v16  ;;  %v2546_v21 = vpop.f32.mrf.mxu1  ;;  %v2498_v23 = vadd.f32 %v5682_v7, %v2497_v20 }
 0x269   :  { %v2643_v22 = vadd.f32 %v2642_v18, %v2594_v19  ;;  %v2547_v24 = vadd.f32 %v2546_v21, %v2498_v23 }
 0x26b   :  { %4035 = vst [vmem:[%s5754_s3 + $0x1c0] sm:$0xff] %v2643_v22 }
 0x26e   :  { %v2595_v25 = vpop.f32.mrf.mxu2  ;;  %v2500_v28 = vpop.f32.mrf.mxu0 }
 0x26f   :  { %v2644_v26 = vpop.f32.mrf.mxu3  ;;  %v2596_v27 = vadd.f32 %v2595_v25, %v2547_v24  ;;  %v2549_v29 = vpop.f32.mrf.mxu1  ;;  %v2501_v30 = vadd.f32 %v5682_v7, %v2500_v28 }
 0x271   :  { %v2645_v31 = vadd.f32 %v2644_v26, %v2596_v27  ;;  %v2550_v32 = vadd.f32 %v2549_v29, %v2501_v30 }
 0x273   :  { %4036 = vst [vmem:[%s5754_s3 + $0x1c8] sm:$0xff] %v2645_v31 }
 0x276   :  { %v2598_v33 = vpop.f32.mrf.mxu2  ;;  %v2502_v37 = vpop.f32.mrf.mxu0 }
 0x277   :  { %v2647_v34 = vpop.f32.mrf.mxu3  ;;  %v2599_v35 = vadd.f32 %v2598_v33, %v2550_v32  ;;  %v2551_v38 = vpop.f32.mrf.mxu1  ;;  %v2503_v41 = vadd.f32 %v5682_v7, %v2502_v37 }
 0x279   :  { %v2648_v40 = vadd.f32 %v2647_v34, %v2599_v35  ;;  %v2552_v42 = vadd.f32 %v2551_v38, %v2503_v41 }
 0x27b   :  { %4037 = vst [vmem:[%s5754_s3 + $0x1d0] sm:$0xff] %v2648_v40 }
 0x27e   :  { %v2600_v39 = vpop.f32.mrf.mxu2  ;;  %v2505_v45 = vpop.f32.mrf.mxu0 }
 0x27f   :  { %v2649_v43 = vpop.f32.mrf.mxu3  ;;  %v2601_v44 = vadd.f32 %v2600_v39, %v2552_v42  ;;  %v2554_v46 = vpop.f32.mrf.mxu1  ;;  %v2506_v47 = vadd.f32 %v5682_v7, %v2505_v45 }
 0x281   :  { %v2650_v48 = vadd.f32 %v2649_v43, %v2601_v44  ;;  %v2555_v49 = vadd.f32 %v2554_v46, %v2506_v47 }
 0x283   :  { %4038 = vst [vmem:[%s5754_s3 + $0x1d8] sm:$0xff] %v2650_v48 }
 0x286   :  { %v2603_v50 = vpop.f32.mrf.mxu2  ;;  %v2507_v53 = vpop.f32.mrf.mxu0 }
 0x287   :  { %v2652_v51 = vpop.f32.mrf.mxu3  ;;  %v2604_v52 = vadd.f32 %v2603_v50, %v2555_v49  ;;  %v2556_v54 = vpop.f32.mrf.mxu1  ;;  %v2508_v56 = vadd.f32 %v5682_v7, %v2507_v53 }
 0x289   :  { %v2653_v55 = vadd.f32 %v2652_v51, %v2604_v52  ;;  %v2557_v57 = vadd.f32 %v2556_v54, %v2508_v56 }
 0x28b   :  { %4039 = vst [vmem:[%s5754_s3 + $0x1e0] sm:$0xff] %v2653_v55 }
 0x28e   :  { %v2605_v58 = vpop.f32.mrf.mxu2  ;;  %v2510_v61 = vpop.f32.mrf.mxu0 }
 0x28f   :  { %v2654_v59 = vpop.f32.mrf.mxu3  ;;  %v2606_v60 = vadd.f32 %v2605_v58, %v2557_v57  ;;  %v2511_v62 = vadd.f32 %v5682_v7, %v2510_v61  ;;  %v2559_v0 = vpop.f32.mrf.mxu1 }
 0x291   :  { %v2655_v63 = vadd.f32 %v2654_v59, %v2606_v60  ;;  %v2560_v1 = vadd.f32 %v2559_v0, %v2511_v62 }
 0x293   :  { %4040 = vst [vmem:[%s5754_s3 + $0x1e8] sm:$0xff] %v2655_v63 }
 0x296   :  { %v2608_v2 = vpop.f32.mrf.mxu2  ;;  %v2512_v5 = vpop.f32.mrf.mxu0 }
 0x297   :  { %v2657_v3 = vpop.f32.mrf.mxu3  ;;  %v2609_v4 = vadd.f32 %v2608_v2, %v2560_v1  ;;  %v2513_v8 = vadd.f32 %v5682_v7, %v2512_v5  ;;  %v2561_v9 = vpop.f32.mrf.mxu1 }
 0x299   :  { %v2658_v6 = vadd.f32 %v2657_v3, %v2609_v4  ;;  %v2562_v10 = vadd.f32 %v2561_v9, %v2513_v8 }
 0x29b   :  { %4041 = vst [vmem:[%s5754_s3 + $0x1f0] sm:$0xff] %v2658_v6 }
 0x29e   :  { %v2610_v11 = vpop.f32.mrf.mxu2 }
 0x29f   :  { %v2611_v12 = vadd.f32 %v2610_v11, %v2562_v10  ;;  %v2659_v13 = vpop.f32.mrf.mxu3 }
 0x2a1   :  { %v2660_v14 = vadd.f32 %v2659_v13, %v2611_v12 }
 0x2a3   :  { %4042 = vst [vmem:[%s5754_s3 + $0x1f8] sm:$0xff] %v2660_v14 }

</bundles_post_ra>
